<compile_context>
chip_gen: v6e
topology: v6e:2x2x1
jax: 0.10.0
libtpu: 0.0.40
codegen_flags: <defaults>
</compile_context>

<pallas_src>
import functools

import numpy as np
import jax
import jax.numpy as jnp
from jax.experimental import pallas as pl
from jax.experimental.pallas import tpu as pltpu

_BN_EPS = 1e-5
_NUM_AZIMUTH = 360  # torch.linspace(0, deg2rad(359), 360).numel()


def _tpu_vmem_capacity():
    try:
        return int(pltpu.get_tpu_info().vmem_capacity_bytes)
    except Exception:
        return 64 * 1024 * 1024


_VMEM_CAP = _tpu_vmem_capacity()
# v7x has only 64 MiB per TensorCore; cap at 96 MiB on v5e/v6e (128 MiB).
_VMEM_LIMIT = min((_VMEM_CAP * 3) // 4, 96 * 1024 * 1024)


def _round_up(x, m):
    return (x + m - 1) // m * m


def _pick_tile(dim, candidates):
    for c in candidates:
        if dim % c == 0:
            return c
    return candidates[-1]


def _row_tiling(m):
    """Choose (tm, Mp): row tile up to 512, Mp = smallest multiple covering m."""
    nb = max(1, -(-m // 512))
    tm = _round_up(-(-m // nb), 16)        # multiple of 16 (bf16 sublane pack)
    return tm, tm * nb


def _epi_row_tile(mp):
    """Largest row tile (<=512, multiple of 8) that divides mp."""
    cap = min(mp, 512)
    cap -= cap % 8
    for c in range(cap, 7, -8):
        if mp % c == 0:
            return c
    return 8


def _pad2d(x, rows, cols):
    return jnp.pad(x, ((0, rows - x.shape[0]), (0, cols - x.shape[1])))


def _out_hw(size, k, s, p):
    return (size + 2 * p - k) // s + 1


# ---------------------------------------------------------------------------
# Kernel 1: tiled matmul (bf16 x bf16 -> f32 acc) with fused bias / BN-stats
# epilogue.  Outputs: Y (bf16 or f32) and optionally per-row-block column
# [sum; sum of squares] computed from the f32 accumulator.
# ---------------------------------------------------------------------------
def _matmul_kernel(*refs, has_bias, with_stats):
    idx = 0
    a_ref = refs[idx]; idx += 1
    w_ref = refs[idx]; idx += 1
    b_ref = None
    if has_bias:
        b_ref = refs[idx]; idx += 1
    o_ref = refs[idx]; idx += 1
    s_ref = None
    if with_stats:
        s_ref = refs[idx]; idx += 1
    acc_ref = refs[idx]

    k = pl.program_id(2)

    @pl.when(k == 0)
    def _():
        acc_ref[...] = jnp.zeros_like(acc_ref)

    acc_ref[...] += jnp.dot(a_ref[...], w_ref[...],
                            preferred_element_type=jnp.float32)

    @pl.when(k == pl.num_programs(2) - 1)
    def _():
        acc = acc_ref[...]
        if has_bias:
            acc = acc + b_ref[...]
        o_ref[...] = acc.astype(o_ref.dtype)
        if with_stats:
            s0 = jnp.sum(acc, axis=0, keepdims=True)          # (1, tn)
            s1 = jnp.sum(acc * acc, axis=0, keepdims=True)    # (1, tn)
            s_ref[...] = jnp.concatenate([s0, s1], axis=0)[None]   # (1, 2, tn)


def _weight_spec(tk, tn, buffer_count):
    index_map = lambda i, j, k: (k, j)
    if buffer_count > 2 and hasattr(pl, "Buffered"):
        try:
            return pl.BlockSpec((tk, tn), index_map,
                                pipeline_mode=pl.Buffered(buffer_count))
        except TypeError:
            pass
    return pl.BlockSpec((tk, tn), index_map)


def _matmul(a, w, bias=None, *, with_stats=False, out_dtype=jnp.bfloat16):
    """a:(M,K), w:(K,N) [+ bias:(1,N) f32] -> padded (Mp,Np) Y
    [+ reduced stats (2,Np) f32] ; MXU runs in bf16, accumulation in f32."""
    M, K = a.shape
    K2, N = w.shape
    assert K == K2
    assert not (with_stats and bias is not None)

    tm, Mp = _row_tiling(M)
    Np = 128 if N <= 128 else _round_up(N, 256)
    Kp = 128 if K <= 128 else _round_up(K, 256)
    tn = _pick_tile(Np, (512, 256, 128))
    tk = _pick_tile(Kp, (512, 256, 128))

    a_p = _pad2d(a.astype(jnp.bfloat16), Mp, Kp)   # zero rows/cols -> exact
    w_p = _pad2d(w.astype(jnp.bfloat16), Kp, Np)

    has_bias = bias is not None
    # Deep weight buffering only for huge-K (fc6-style) matmuls on chips with
    # >=128MiB VMEM (v5e/v6e); v7x (64MiB) keeps Buffered(2).
    w_buf = 3 if (Kp >= 4096 and _VMEM_CAP >= 100 * 1024 * 1024) else 2

    args = [a_p, w_p]
    in_specs = [pl.BlockSpec((tm, tk), lambda i, j, k: (i, k)),
                _weight_spec(tk, tn, w_buf)]
    if has_bias:
        args.append(_pad2d(bias.astype(jnp.float32), 1, Np))
        in_specs.append(pl.BlockSpec((1, tn), lambda i, j, k: (0, j)))

    grid = (Mp // tm, Np // tn, Kp // tk)
    nI = Mp // tm

    out_shape = [jax.ShapeDtypeStruct((Mp, Np), out_dtype)]
    out_specs = [pl.BlockSpec((tm, tn), lambda i, j, k: (i, j))]
    if with_stats:
        out_shape.append(jax.ShapeDtypeStruct((nI, 2, Np), jnp.float32))
        out_specs.append(pl.BlockSpec((1, 2, tn), lambda i, j, k: (i, 0, j)))

    flops = 2 * Mp * Np * Kp
    bytes_accessed = (a_p.size * 2 + w_p.size * 2
                      + Mp * Np * jnp.dtype(out_dtype).itemsize
                      + (Np * 4 if has_bias else 0)
                      + (nI * 2 * Np * 4 if with_stats else 0))

    res = pl.pallas_call(
        functools.partial(_matmul_kernel, has_bias=has_bias,
                          with_stats=with_stats),
        out_shape=out_shape,
        grid=grid,
        in_specs=in_specs,
        out_specs=out_specs,
        scratch_shapes=[pltpu.VMEM((tm, tn), jnp.float32)],
        compiler_params=pltpu.CompilerParams(
            dimension_semantics=("parallel", "parallel", "arbitrary"),
            vmem_limit_bytes=_VMEM_LIMIT),
        cost_estimate=pl.CostEstimate(flops=flops, transcendentals=0,
                                      bytes_accessed=bytes_accessed),
    )(*args)

    if with_stats:
        y, partial_stats = res[0], res[1]
        return y, jnp.sum(partial_stats, axis=0)   # (2, Np), tiny JAX reduce
    return res[0]


# ---------------------------------------------------------------------------
# BN scale/shift precompute (tiny (1, Np) JAX op on the fused statistics).
# NOTE: single-pass E[x^2]-E[x]^2 variance in f32 (clamped at 0); stats come
# from the f32 matmul accumulator, matching the biased variance BN uses for
# normalization in training mode.
# ---------------------------------------------------------------------------
def _bn_scale_shift(stats, gamma, beta, *, count, eps=_BN_EPS):
    Np = stats.shape[1]
    n_true = gamma.shape[1]
    gamma_p = jnp.pad(gamma.astype(jnp.float32), ((0, 0), (0, Np - n_true)))
    beta_p = jnp.pad(beta.astype(jnp.float32), ((0, 0), (0, Np - n_true)))
    inv_count = 1.0 / float(count)
    mean = stats[0:1, :] * inv_count
    var = jnp.maximum(stats[1:2, :] * inv_count - mean * mean, 0.0)
    scale = gamma_p * jax.lax.rsqrt(var + eps)
    shift = beta_p - mean * scale
    return scale, shift


# ---------------------------------------------------------------------------
# Kernel 2: BN apply = y*scale + shift (+ fused residual add) (+ ReLU)
# ---------------------------------------------------------------------------
def _bn_norm_kernel(*refs, relu, has_residual):
    if has_residual:
        y_ref, sc_ref, sh_ref, r_ref, o_ref = refs
    else:
        y_ref, sc_ref, sh_ref, o_ref = refs
        r_ref = None
    out = y_ref[...].astype(jnp.float32) * sc_ref[...] + sh_ref[...]
    if has_residual:
        out = out + r_ref[...].astype(jnp.float32)
    if relu:
        out = jnp.maximum(out, 0.0)
    o_ref[...] = out.astype(o_ref.dtype)


def _bn_norm(y_p, scale, shift, *, residual=None, relu=True,
             out_dtype=jnp.bfloat16):
    """y_p:(Mp,Np) bf16, scale/shift:(1,Np) f32, residual:(Mp,Np) optional."""
    Mp, Np = y_p.shape
    tm = _epi_row_tile(Mp)
    has_res = residual is not None

    args = [y_p, scale, shift]
    in_specs = [pl.BlockSpec((tm, Np), lambda m: (m, 0)),
                pl.BlockSpec((1, Np), lambda m: (0, 0)),
                pl.BlockSpec((1, Np), lambda m: (0, 0))]
    if has_res:
        args.append(residual)
        in_specs.append(pl.BlockSpec((tm, Np), lambda m: (m, 0)))

    return pl.pallas_call(
        functools.partial(_bn_norm_kernel, relu=relu, has_residual=has_res),
        out_shape=jax.ShapeDtypeStruct((Mp, Np), out_dtype),
        grid=(Mp // tm,),
        in_specs=in_specs,
        out_specs=pl.BlockSpec((tm, Np), lambda m: (m, 0)),
        compiler_params=pltpu.CompilerParams(
            dimension_semantics=("parallel",),
            vmem_limit_bytes=_VMEM_LIMIT),
    )(*args)


# ---------------------------------------------------------------------------
# Kernel 3: 3x3 / stride 2 / pad 1 max-pool from parity planes (bf16)
# ---------------------------------------------------------------------------
def _maxpool_kernel(ee_ref, eo_ref, oe_ref, oo_ref, o_ref, *, Ho, Wo):
    # planes hold (even/odd row, even/odd col) samples of the padded input
    ee = ee_ref[0]
    eo = eo_ref[0]
    oe = oe_ref[0]
    oo = oo_ref[0]
    m = ee[:Ho, :Wo, :]
    m = jnp.maximum(m, ee[:Ho, 1:Wo + 1, :])
    m = jnp.maximum(m, ee[1:Ho + 1, :Wo, :])
    m = jnp.maximum(m, ee[1:Ho + 1, 1:Wo + 1, :])
    m = jnp.maximum(m, eo[:Ho, :Wo, :])
    m = jnp.maximum(m, eo[1:Ho + 1, :Wo, :])
    m = jnp.maximum(m, oe[:Ho, :Wo, :])
    m = jnp.maximum(m, oe[:Ho, 1:Wo + 1, :])
    m = jnp.maximum(m, oo[:Ho, :Wo, :])
    o_ref[0] = m.astype(o_ref.dtype)


def _maxpool3x3s2(x):
    """MaxPool2d(kernel=3, stride=2, padding=1), NHWC in/out (bf16)."""
    B, H, W, C = x.shape
    Ho = _out_hw(H, 3, 2, 1)
    Wo = _out_hw(W, 3, 2, 1)
    pad_val = float(jnp.finfo(x.dtype).min)
    xp = jnp.pad(x, ((0, 0), (1, 1), (1, 1), (0, 0)), constant_values=pad_val)
    planes = (xp[:, 0::2, 0::2, :], xp[:, 0::2, 1::2, :],
              xp[:, 1::2, 0::2, :], xp[:, 1::2, 1::2, :])
    in_specs = [pl.BlockSpec((1,) + p.shape[1:], lambda b: (b, 0, 0, 0))
                for p in planes]
    return pl.pallas_call(
        functools.partial(_maxpool_kernel, Ho=Ho, Wo=Wo),
        out_shape=jax.ShapeDtypeStruct((B, Ho, Wo, C), x.dtype),
        grid=(B,),
        in_specs=in_specs,
        out_specs=pl.BlockSpec((1, Ho, Wo, C), lambda b: (b, 0, 0, 0)),
        compiler_params=pltpu.CompilerParams(
            dimension_semantics=("parallel",),
            vmem_limit_bytes=_VMEM_LIMIT),
    )(*planes)


# ---------------------------------------------------------------------------
# Conv + BatchNorm (+ fused residual add) (+ ReLU); NHWC in/out, bf16 activ.
# Activations between layers carry channel dims padded to multiples of 128
# (padded lanes are exactly zero), so all BN-epilogue stores are lane-dense.
# ---------------------------------------------------------------------------
def _im2col(x, kh, kw, stride, pad):
    """Glue: extract conv patches (B*Ho*Wo, kh*kw*Cin) from NHWC input.
    TODO(synk): replace with implicit im2col (tap-indexed grid axis / DMA)."""
    B, H, W, C = x.shape
    Ho = _out_hw(H, kh, stride, pad)
    Wo = _out_hw(W, kw, stride, pad)
    xp = jnp.pad(x, ((0, 0), (pad, pad), (pad, pad), (0, 0)))
    cols = []
    for i in range(kh):
        for j in range(kw):
            cols.append(xp[:,
                           i:i + (Ho - 1) * stride + 1:stride,
                           j:j + (Wo - 1) * stride + 1:stride,
                           :])
    patches = jnp.concatenate(cols, axis=-1)  # (B, Ho, Wo, kh*kw*C)
    return patches.reshape(B * Ho * Wo, kh * kw * C), (B, Ho, Wo)


def _conv_bn(x, w, gamma, beta, *, stride, pad, relu, residual=None):
    kh, kw, cin_true, cout = w.shape
    cin_eff = x.shape[-1]                         # may be channel-padded
    cout_p = _round_up(cout, 128)
    # pad weights in Cin (to match padded activation lanes) and Cout (to 128x)
    w_p = jnp.pad(w, ((0, 0), (0, 0),
                      (0, cin_eff - cin_true), (0, cout_p - cout)))

    patches, (B, Ho, Wo) = _im2col(x, kh, kw, stride, pad)
    M = B * Ho * Wo

    y_p, stats = _matmul(patches, w_p.reshape(kh * kw * cin_eff, cout_p),
                         with_stats=True, out_dtype=jnp.bfloat16)
    scale, shift = _bn_scale_shift(stats, gamma, beta, count=M)

    res_p = None
    if residual is not None:
        assert residual.shape[-1] == y_p.shape[1]
        res2d = residual.reshape(M, residual.shape[-1])
        res_p = jnp.pad(res2d, ((0, y_p.shape[0] - M), (0, 0)))

    out = _bn_norm(y_p, scale, shift, residual=res_p, relu=relu,
                   out_dtype=jnp.bfloat16)
    return out[:M].reshape(B, Ho, Wo, cout_p)


# ---------------------------------------------------------------------------
# ResnetUnit (2 basic blocks; projection shortcut when stride!=1 or cin!=cout)
# ---------------------------------------------------------------------------
def _resnet_unit(x, p, stride):
    # block 1
    if "b1_proj_w" in p:
        identity = _conv_bn(x, p["b1_proj_w"], p["b1_projbn_g"],
                            p["b1_projbn_b"], stride=stride, pad=0, relu=False)
    else:
        identity = x
    out = _conv_bn(x, p["b1_conv1_w"], p["b1_bn1_g"], p["b1_bn1_b"],
                   stride=stride, pad=1, relu=True)
    x = _conv_bn(out, p["b1_conv2_w"], p["b1_bn2_g"], p["b1_bn2_b"],
                 stride=1, pad=1, relu=True, residual=identity)  # relu(bn+id)
    # block 2 (identity shortcut)
    identity = x
    out = _conv_bn(x, p["b2_conv1_w"], p["b2_bn1_g"], p["b2_bn1_b"],
                   stride=1, pad=1, relu=True)
    x = _conv_bn(out, p["b2_conv2_w"], p["b2_bn2_g"], p["b2_bn2_b"],
                 stride=1, pad=1, relu=True, residual=identity)
    return x


# ---------------------------------------------------------------------------
# Parameter construction (deterministic, synthetic)
# ---------------------------------------------------------------------------
def _conv_w(key, kh, kw, cin, cout):
    return (jax.random.normal(key, (kh, kw, cin, cout), jnp.float32)
            * (1.0 / np.sqrt(kh * kw * cin)))


def _bn_params(c):
    return jnp.ones((1, c), jnp.float32), jnp.zeros((1, c), jnp.float32)


def _init_unit_params(next_key, cin, cout, stride):
    p = {}
    p["b1_conv1_w"] = _conv_w(next_key(), 3, 3, cin, cout)
    p["b1_bn1_g"], p["b1_bn1_b"] = _bn_params(cout)
    p["b1_conv2_w"] = _conv_w(next_key(), 3, 3, cout, cout)
    p["b1_bn2_g"], p["b1_bn2_b"] = _bn_params(cout)
    if stride != 1 or cin != cout:
        p["b1_proj_w"] = _conv_w(next_key(), 1, 1, cin, cout)
        p["b1_projbn_g"], p["b1_projbn_b"] = _bn_params(cout)
    p["b2_conv1_w"] = _conv_w(next_key(), 3, 3, cout, cout)
    p["b2_bn1_g"], p["b2_bn1_b"] = _bn_params(cout)
    p["b2_conv2_w"] = _conv_w(next_key(), 3, 3, cout, cout)
    p["b2_bn2_g"], p["b2_bn2_b"] = _bn_params(cout)
    return p


def init_viewpoint_params(base_key, num_input_channels, input_height, input_width):
    counter = [0]

    def next_key():
        counter[0] += 1
        return jax.random.fold_in(base_key, counter[0])

    p = {}
    p["conv1_w"] = _conv_w(next_key(), 7, 7, num_input_channels, 64)
    p["bn1_g"], p["bn1_b"] = _bn_params(64)
    p["unit2"] = _init_unit_params(next_key, 64, 64, 1)
    p["unit3"] = _init_unit_params(next_key, 64, 128, 2)
    p["unit4"] = _init_unit_params(next_key, 128, 256, 2)
    p["unit5"] = _init_unit_params(next_key, 256, 512, 2)

    # replicate the dummy-forward shape inference from __init__
    h = _out_hw(input_height, 7, 2, 3)
    w = _out_hw(input_width, 7, 2, 3)
    h, w = _out_hw(h, 3, 2, 1), _out_hw(w, 3, 2, 1)          # pool1
    for s in (1, 2, 2, 2):                                   # unit2..unit5
        h, w = _out_hw(h, 3, s, 1), _out_hw(w, 3, s, 1)
    num_fc6_in = 512 * h * w

    p["fc6_w"] = (jax.random.normal(next_key(), (num_fc6_in, 1024), jnp.float32)
                  * (1.0 / np.sqrt(num_fc6_in)))
    p["bn6_g"], p["bn6_b"] = _bn_params(1024)
    p["fc7_w"] = (jax.random.normal(next_key(), (1024, _NUM_AZIMUTH), jnp.float32)
                  * (1.0 / np.sqrt(1024)))
    p["fc7_b"] = (jax.random.normal(next_key(), (1, _NUM_AZIMUTH), jnp.float32)
                  * 0.01)
    return p


# ---------------------------------------------------------------------------
# Full forward pass
# ---------------------------------------------------------------------------
def viewpoint_forward(x_nchw, params):
    B = x_nchw.shape[0]
    x = jnp.transpose(x_nchw, (0, 2, 3, 1)).astype(jnp.bfloat16)  # NCHW->NHWC
    x = _conv_bn(x, params["conv1_w"], params["bn1_g"], params["bn1_b"],
                 stride=2, pad=3, relu=True)
    x = _maxpool3x3s2(x)
    x = _resnet_unit(x, params["unit2"], stride=1)
    x = _resnet_unit(x, params["unit3"], stride=2)
    x = _resnet_unit(x, params["unit4"], stride=2)
    x = _resnet_unit(x, params["unit5"], stride=2)

    _, H, W, Cp = x.shape
    C = 512                                   # true channels at unit5 (== Cp)
    x = x[..., :C]
    # torch flattens the NCHW tensor: order = (C, H, W)
    flat = jnp.transpose(x, (0, 3, 1, 2)).reshape(B, C * H * W)

    # fc6 (no bias) with fused BN batch stats, then bn6 + relu6
    y6, stats6 = _matmul(flat, params["fc6_w"], with_stats=True,
                         out_dtype=jnp.bfloat16)
    scale6, shift6 = _bn_scale_shift(stats6, params["bn6_g"], params["bn6_b"],
                                     count=B)
    h6 = _bn_norm(y6, scale6, shift6, relu=True, out_dtype=jnp.bfloat16)

    # fc7: bias epilogue fused in the matmul; row/col padding sliced off once.
    out = _matmul(h6, params["fc7_w"], bias=params["fc7_b"],
                  out_dtype=jnp.float32)
    return out[:B, :_NUM_AZIMUTH]


if __name__ == "__main__":
    key = jax.random.PRNGKey(0)
    batch, channels, height, width = 2, 4, 16, 16
    x = jax.random.normal(jax.random.fold_in(key, 1000),
                          (batch, channels, height, width), jnp.float32)
    params = init_viewpoint_params(key, channels, height, width)

    fwd = jax.jit(viewpoint_forward)
    out = fwd(x, params)
    out = jax.block_until_ready(out)
    assert out.shape == (batch, _NUM_AZIMUTH), out.shape
    assert bool(jnp.all(jnp.isfinite(out)))
    print("KERNEL_OK")
</pallas_src>

<mosaic_0001>
module attributes {stable_mosaic.version = 11 : i64} {
  func.func @_matmul_kernel(%arg0: i32, %arg1: i32, %arg2: i32, %arg3: memref<128x256xbf16, #tpu.memory_space<vmem>>, %arg4: memref<256x128xbf16, #tpu.memory_space<vmem>>, %arg5: memref<128x128xbf16, #tpu.memory_space<vmem>>, %arg6: memref<1x2x128xf32, #tpu.memory_space<vmem>>, %arg7: memref<128x128xf32, #tpu.memory_space<vmem>>) attributes {dimension_semantics = [#tpu.dimension_semantics<parallel>, #tpu.dimension_semantics<parallel>, #tpu.dimension_semantics<arbitrary>], iteration_bounds = array<i64: 1, 1, 1>, scalar_prefetch = 0 : i64, scratch_operands = 1 : i64, tpu.core_type = #tpu.core_type<tc>, window_params = [{transform_indices = @transform_0, window_bounds = array<i64: 128, 256>}, {transform_indices = @transform_1, window_bounds = array<i64: 256, 128>}, {transform_indices = @transform_2, window_bounds = array<i64: 128, 128>}, {transform_indices = @transform_3, window_bounds = array<i64: 1, 2, 128>}]} {
    %c0_i32 = arith.constant 0 : i32
    %0 = arith.cmpi eq, %arg2, %c0_i32 : i32
    %1 = arith.extui %0 : i1 to i32
    %c0_i32_0 = arith.constant 0 : i32
    %2 = arith.cmpi ne, %1, %c0_i32_0 : i32
    scf.if %2 {
      %cst_10 = arith.constant 0.000000e+00 : f32
      %12 = vector.broadcast %cst_10 : f32 to vector<128x128xf32>
      %c0_11 = arith.constant 0 : index
      %c0_12 = arith.constant 0 : index
      %13 = vector.load %arg7[%c0_11, %c0_12] : memref<128x128xf32, #tpu.memory_space<vmem>>, vector<128x128xf32>
      tpu.vector_store %arg7[%c0_11, %c0_12], %12 {strides = array<i32>} : memref<128x128xf32, #tpu.memory_space<vmem>>, vector<128x128xf32>,
    } else {
    }
    %c0 = arith.constant 0 : index
    %c0_1 = arith.constant 0 : index
    %3 = vector.load %arg7[%c0, %c0_1] : memref<128x128xf32, #tpu.memory_space<vmem>>, vector<128x128xf32>
    %c0_2 = arith.constant 0 : index
    %c0_3 = arith.constant 0 : index
    %4 = vector.load %arg3[%c0_2, %c0_3] : memref<128x256xbf16, #tpu.memory_space<vmem>>, vector<128x256xbf16>
    %c0_4 = arith.constant 0 : index
    %c0_5 = arith.constant 0 : index
    %5 = vector.load %arg4[%c0_4, %c0_5] : memref<256x128xbf16, #tpu.memory_space<vmem>>, vector<256x128xbf16>
    %cst = arith.constant dense<0.000000e+00> : vector<128x128xf32>
    %6 = tpu.matmul %4, %5, %cst {dimension_numbers = #tpu.dot_dimension_numbers<[1], [0], [0], [1], [0, 0, 1, 1], [], []>} : vector<128x256xbf16>, vector<256x128xbf16>, vector<128x128xf32> -> vector<128x128xf32>
    %7 = arith.addf %3, %6 : vector<128x128xf32>
    %c0_6 = arith.constant 0 : index
    %c0_7 = arith.constant 0 : index
    %8 = vector.load %arg7[%c0_6, %c0_7] : memref<128x128xf32, #tpu.memory_space<vmem>>, vector<128x128xf32>
    tpu.vector_store %arg7[%c0_6, %c0_7], %7 {strides = array<i32>} : memref<128x128xf32, #tpu.memory_space<vmem>>, vector<128x128xf32>,
    %c0_i32_8 = arith.constant 0 : i32
    %9 = arith.cmpi eq, %arg2, %c0_i32_8 : i32
    %10 = arith.extui %9 : i1 to i32
    %c0_i32_9 = arith.constant 0 : i32
    %11 = arith.cmpi ne, %10, %c0_i32_9 : i32
    scf.if %11 {
      %c0_10 = arith.constant 0 : index
      %c0_11 = arith.constant 0 : index
      %12 = vector.load %arg7[%c0_10, %c0_11] : memref<128x128xf32, #tpu.memory_space<vmem>>, vector<128x128xf32>
      %13 = arith.truncf %12 : vector<128x128xf32> to vector<128x128xbf16>
      %c0_12 = arith.constant 0 : index
      %c0_13 = arith.constant 0 : index
      %14 = vector.load %arg5[%c0_12, %c0_13] : memref<128x128xbf16, #tpu.memory_space<vmem>>, vector<128x128xbf16>
      tpu.vector_store %arg5[%c0_12, %c0_13], %13 {strides = array<i32>} : memref<128x128xbf16, #tpu.memory_space<vmem>>, vector<128x128xbf16>,
      %cst_14 = arith.constant dense<0.000000e+00> : vector<128xf32>
      %15 = vector.multi_reduction <add>, %12, %cst_14 [0] : vector<128x128xf32> to vector<128xf32>
      %16 = vector.shape_cast %15 : vector<128xf32> to vector<1x128xf32>
      %17 = arith.mulf %12, %12 : vector<128x128xf32>
      %cst_15 = arith.constant dense<0.000000e+00> : vector<128xf32>
      %18 = vector.multi_reduction <add>, %17, %cst_15 [0] : vector<128x128xf32> to vector<128xf32>
      %19 = vector.shape_cast %18 : vector<128xf32> to vector<1x128xf32>
      %20 = tpu.concatenate %16, %19 in 0 : vector<1x128xf32>, vector<1x128xf32> -> vector<2x128xf32>
      %21 = vector.shape_cast %20 : vector<2x128xf32> to vector<1x2x128xf32>
      %c0_16 = arith.constant 0 : index
      %c0_17 = arith.constant 0 : index
      %c0_18 = arith.constant 0 : index
      %22 = vector.load %arg6[%c0_16, %c0_17, %c0_18] : memref<1x2x128xf32, #tpu.memory_space<vmem>>, vector<1x2x128xf32>
      tpu.vector_store %arg6[%c0_16, %c0_17, %c0_18], %21 {strides = array<i32>} : memref<1x2x128xf32, #tpu.memory_space<vmem>>, vector<1x2x128xf32>,
    } else {
    }
    return
  }
  func.func @transform_0(%arg0: i32, %arg1: i32, %arg2: i32) -> (i32, i32) {
    %c0_i32 = arith.constant 0 : i32
    return %arg0, %arg2 : i32, i32
  }
  func.func @transform_1(%arg0: i32, %arg1: i32, %arg2: i32) -> (i32, i32) {
    %c0_i32 = arith.constant 0 : i32
    return %arg2, %arg1 : i32, i32
  }
  func.func @transform_2(%arg0: i32, %arg1: i32, %arg2: i32) -> (i32, i32) {
    %c0_i32 = arith.constant 0 : i32
    return %arg0, %arg1 : i32, i32
  }
  func.func @transform_3(%arg0: i32, %arg1: i32, %arg2: i32) -> (i32, i32, i32) {
    %c0_i32 = arith.constant 0 : i32
    %c0_i32_0 = arith.constant 0 : i32
    return %arg0, %c0_i32, %arg1 : i32, i32, i32
  }
}

module attributes {stable_mosaic.version = 11 : i64} {
  func.func @_bn_norm_kernel(%arg0: i32, %arg1: memref<128x128xbf16, #tpu.memory_space<vmem>>, %arg2: memref<1x128xf32, #tpu.memory_space<vmem>>, %arg3: memref<1x128xf32, #tpu.memory_space<vmem>>, %arg4: memref<128x128xbf16, #tpu.memory_space<vmem>>) attributes {dimension_semantics = [#tpu.dimension_semantics<parallel>], iteration_bounds = array<i64: 1>, scalar_prefetch = 0 : i64, scratch_operands = 0 : i64, tpu.core_type = #tpu.core_type<tc>, window_params = [{transform_indices = @transform_0, window_bounds = array<i64: 128, 128>}, {pipeline_mode = #tpu.pipeline_mode<synchronous>, transform_indices = @transform_1, window_bounds = array<i64: 1, 128>}, {pipeline_mode = #tpu.pipeline_mode<synchronous>, transform_indices = @transform_2, window_bounds = array<i64: 1, 128>}, {transform_indices = @transform_3, window_bounds = array<i64: 128, 128>}]} {
    %c0 = arith.constant 0 : index
    %c0_0 = arith.constant 0 : index
    %0 = vector.load %arg1[%c0, %c0_0] : memref<128x128xbf16, #tpu.memory_space<vmem>>, vector<128x128xbf16>
    %1 = arith.extf %0 : vector<128x128xbf16> to vector<128x128xf32>
    %c0_1 = arith.constant 0 : index
    %c0_2 = arith.constant 0 : index
    %2 = vector.load %arg2[%c0_1, %c0_2] : memref<1x128xf32, #tpu.memory_space<vmem>>, vector<1x128xf32>
    %3 = vector.broadcast %2 : vector<1x128xf32> to vector<128x128xf32>
    %4 = arith.mulf %1, %3 : vector<128x128xf32>
    %c0_3 = arith.constant 0 : index
    %c0_4 = arith.constant 0 : index
    %5 = vector.load %arg3[%c0_3, %c0_4] : memref<1x128xf32, #tpu.memory_space<vmem>>, vector<1x128xf32>
    %6 = vector.broadcast %5 : vector<1x128xf32> to vector<128x128xf32>
    %7 = arith.addf %4, %6 : vector<128x128xf32>
    %cst = arith.constant 0.000000e+00 : f32
    %8 = vector.broadcast %cst : f32 to vector<128x128xf32>
    %9 = arith.maximumf %7, %8 : vector<128x128xf32>
    %10 = arith.truncf %9 : vector<128x128xf32> to vector<128x128xbf16>
    %c0_5 = arith.constant 0 : index
    %c0_6 = arith.constant 0 : index
    %11 = vector.load %arg4[%c0_5, %c0_6] : memref<128x128xbf16, #tpu.memory_space<vmem>>, vector<128x128xbf16>
    tpu.vector_store %arg4[%c0_5, %c0_6], %10 {strides = array<i32>} : memref<128x128xbf16, #tpu.memory_space<vmem>>, vector<128x128xbf16>,
    return
  }
  func.func @transform_0(%arg0: i32) -> (i32, i32) {
    %c0_i32 = arith.constant 0 : i32
    %c0_i32_0 = arith.constant 0 : i32
    return %arg0, %c0_i32 : i32, i32
  }
  func.func @transform_1(%arg0: i32) -> (i32, i32) {
    %c0_i32 = arith.constant 0 : i32
    %c0_i32_0 = arith.constant 0 : i32
    %c0_i32_1 = arith.constant 0 : i32
    return %c0_i32, %c0_i32_0 : i32, i32
  }
  func.func @transform_2(%arg0: i32) -> (i32, i32) {
    %c0_i32 = arith.constant 0 : i32
    %c0_i32_0 = arith.constant 0 : i32
    %c0_i32_1 = arith.constant 0 : i32
    return %c0_i32, %c0_i32_0 : i32, i32
  }
  func.func @transform_3(%arg0: i32) -> (i32, i32) {
    %c0_i32 = arith.constant 0 : i32
    %c0_i32_0 = arith.constant 0 : i32
    return %arg0, %c0_i32 : i32, i32
  }
}

module attributes {stable_mosaic.version = 11 : i64} {
  func.func @_maxpool_kernel(%arg0: i32, %arg1: memref<1x5x5x128xbf16, #tpu.memory_space<vmem>>, %arg2: memref<1x5x5x128xbf16, #tpu.memory_space<vmem>>, %arg3: memref<1x5x5x128xbf16, #tpu.memory_space<vmem>>, %arg4: memref<1x5x5x128xbf16, #tpu.memory_space<vmem>>, %arg5: memref<1x4x4x128xbf16, #tpu.memory_space<vmem>>) attributes {dimension_semantics = [#tpu.dimension_semantics<parallel>], iteration_bounds = array<i64: 2>, scalar_prefetch = 0 : i64, scratch_operands = 0 : i64, tpu.core_type = #tpu.core_type<tc>, window_params = [{transform_indices = @transform_0, window_bounds = array<i64: 1, 5, 5, 128>}, {transform_indices = @transform_1, window_bounds = array<i64: 1, 5, 5, 128>}, {transform_indices = @transform_2, window_bounds = array<i64: 1, 5, 5, 128>}, {transform_indices = @transform_3, window_bounds = array<i64: 1, 5, 5, 128>}, {transform_indices = @transform_4, window_bounds = array<i64: 1, 4, 4, 128>}]} {
    %c0 = arith.constant 0 : index
    %c0_0 = arith.constant 0 : index
    %c0_1 = arith.constant 0 : index
    %c0_2 = arith.constant 0 : index
    %0 = vector.load %arg1[%c0, %c0_0, %c0_1, %c0_2] : memref<1x5x5x128xbf16, #tpu.memory_space<vmem>>, vector<1x5x5x128xbf16>
    %1 = vector.shape_cast %0 : vector<1x5x5x128xbf16> to vector<5x5x128xbf16>
    %c0_3 = arith.constant 0 : index
    %c0_4 = arith.constant 0 : index
    %c0_5 = arith.constant 0 : index
    %c0_6 = arith.constant 0 : index
    %2 = vector.load %arg2[%c0_3, %c0_4, %c0_5, %c0_6] : memref<1x5x5x128xbf16, #tpu.memory_space<vmem>>, vector<1x5x5x128xbf16>
    %3 = vector.shape_cast %2 : vector<1x5x5x128xbf16> to vector<5x5x128xbf16>
    %c0_7 = arith.constant 0 : index
    %c0_8 = arith.constant 0 : index
    %c0_9 = arith.constant 0 : index
    %c0_10 = arith.constant 0 : index
    %4 = vector.load %arg3[%c0_7, %c0_8, %c0_9, %c0_10] : memref<1x5x5x128xbf16, #tpu.memory_space<vmem>>, vector<1x5x5x128xbf16>
    %5 = vector.shape_cast %4 : vector<1x5x5x128xbf16> to vector<5x5x128xbf16>
    %c0_11 = arith.constant 0 : index
    %c0_12 = arith.constant 0 : index
    %c0_13 = arith.constant 0 : index
    %c0_14 = arith.constant 0 : index
    %6 = vector.load %arg4[%c0_11, %c0_12, %c0_13, %c0_14] : memref<1x5x5x128xbf16, #tpu.memory_space<vmem>>, vector<1x5x5x128xbf16>
    %7 = vector.shape_cast %6 : vector<1x5x5x128xbf16> to vector<5x5x128xbf16>
    %8 = vector.extract_strided_slice %1 {offsets = [0, 0, 0], sizes = [4, 4, 128], strides = [1, 1, 1]} : vector<5x5x128xbf16> to vector<4x4x128xbf16>
    %9 = vector.extract_strided_slice %1 {offsets = [0, 1, 0], sizes = [4, 4, 128], strides = [1, 1, 1]} : vector<5x5x128xbf16> to vector<4x4x128xbf16>
    %10 = arith.maximumf %8, %9 : vector<4x4x128xbf16>
    %11 = vector.extract_strided_slice %1 {offsets = [1, 0, 0], sizes = [4, 4, 128], strides = [1, 1, 1]} : vector<5x5x128xbf16> to vector<4x4x128xbf16>
    %12 = arith.maximumf %10, %11 : vector<4x4x128xbf16>
    %13 = vector.extract_strided_slice %1 {offsets = [1, 1, 0], sizes = [4, 4, 128], strides = [1, 1, 1]} : vector<5x5x128xbf16> to vector<4x4x128xbf16>
    %14 = arith.maximumf %12, %13 : vector<4x4x128xbf16>
    %15 = vector.extract_strided_slice %3 {offsets = [0, 0, 0], sizes = [4, 4, 128], strides = [1, 1, 1]} : vector<5x5x128xbf16> to vector<4x4x128xbf16>
    %16 = arith.maximumf %14, %15 : vector<4x4x128xbf16>
    %17 = vector.extract_strided_slice %3 {offsets = [1, 0, 0], sizes = [4, 4, 128], strides = [1, 1, 1]} : vector<5x5x128xbf16> to vector<4x4x128xbf16>
    %18 = arith.maximumf %16, %17 : vector<4x4x128xbf16>
    %19 = vector.extract_strided_slice %5 {offsets = [0, 0, 0], sizes = [4, 4, 128], strides = [1, 1, 1]} : vector<5x5x128xbf16> to vector<4x4x128xbf16>
    %20 = arith.maximumf %18, %19 : vector<4x4x128xbf16>
    %21 = vector.extract_strided_slice %5 {offsets = [0, 1, 0], sizes = [4, 4, 128], strides = [1, 1, 1]} : vector<5x5x128xbf16> to vector<4x4x128xbf16>
    %22 = arith.maximumf %20, %21 : vector<4x4x128xbf16>
    %23 = vector.extract_strided_slice %7 {offsets = [0, 0, 0], sizes = [4, 4, 128], strides = [1, 1, 1]} : vector<5x5x128xbf16> to vector<4x4x128xbf16>
    %24 = arith.maximumf %22, %23 : vector<4x4x128xbf16>
    %c0_15 = arith.constant 0 : index
    %c0_16 = arith.constant 0 : index
    %c0_17 = arith.constant 0 : index
    %c0_18 = arith.constant 0 : index
    %25 = vector.load %arg5[%c0_15, %c0_16, %c0_17, %c0_18] : memref<1x4x4x128xbf16, #tpu.memory_space<vmem>>, vector<1x4x4x128xbf16>
    %26 = vector.shape_cast %25 : vector<1x4x4x128xbf16> to vector<4x4x128xbf16>
    %27 = vector.shape_cast %24 : vector<4x4x128xbf16> to vector<1x4x4x128xbf16>
    tpu.vector_store %arg5[%c0_15, %c0_16, %c0_17, %c0_18], %27 {strides = array<i32>} : memref<1x4x4x128xbf16, #tpu.memory_space<vmem>>, vector<1x4x4x128xbf16>,
    return
  }
  func.func @transform_0(%arg0: i32) -> (i32, i32, i32, i32) {
    %c0_i32 = arith.constant 0 : i32
    %c0_i32_0 = arith.constant 0 : i32
    %c0_i32_1 = arith.constant 0 : i32
    %c0_i32_2 = arith.constant 0 : i32
    return %arg0, %c0_i32, %c0_i32_0, %c0_i32_1 : i32, i32, i32, i32
  }
  func.func @transform_1(%arg0: i32) -> (i32, i32, i32, i32) {
    %c0_i32 = arith.constant 0 : i32
    %c0_i32_0 = arith.constant 0 : i32
    %c0_i32_1 = arith.constant 0 : i32
    %c0_i32_2 = arith.constant 0 : i32
    return %arg0, %c0_i32, %c0_i32_0, %c0_i32_1 : i32, i32, i32, i32
  }
  func.func @transform_2(%arg0: i32) -> (i32, i32, i32, i32) {
    %c0_i32 = arith.constant 0 : i32
    %c0_i32_0 = arith.constant 0 : i32
    %c0_i32_1 = arith.constant 0 : i32
    %c0_i32_2 = arith.constant 0 : i32
    return %arg0, %c0_i32, %c0_i32_0, %c0_i32_1 : i32, i32, i32, i32
  }
  func.func @transform_3(%arg0: i32) -> (i32, i32, i32, i32) {
    %c0_i32 = arith.constant 0 : i32
    %c0_i32_0 = arith.constant 0 : i32
    %c0_i32_1 = arith.constant 0 : i32
    %c0_i32_2 = arith.constant 0 : i32
    return %arg0, %c0_i32, %c0_i32_0, %c0_i32_1 : i32, i32, i32, i32
  }
  func.func @transform_4(%arg0: i32) -> (i32, i32, i32, i32) {
    %c0_i32 = arith.constant 0 : i32
    %c0_i32_0 = arith.constant 0 : i32
    %c0_i32_1 = arith.constant 0 : i32
    %c0_i32_2 = arith.constant 0 : i32
    return %arg0, %c0_i32, %c0_i32_0, %c0_i32_1 : i32, i32, i32, i32
  }
}

module attributes {stable_mosaic.version = 11 : i64} {
  func.func @_matmul_kernel(%arg0: i32, %arg1: i32, %arg2: i32, %arg3: memref<32x256xbf16, #tpu.memory_space<vmem>>, %arg4: memref<256x128xbf16, #tpu.memory_space<vmem>>, %arg5: memref<32x128xbf16, #tpu.memory_space<vmem>>, %arg6: memref<1x2x128xf32, #tpu.memory_space<vmem>>, %arg7: memref<32x128xf32, #tpu.memory_space<vmem>>) attributes {dimension_semantics = [#tpu.dimension_semantics<parallel>, #tpu.dimension_semantics<parallel>, #tpu.dimension_semantics<arbitrary>], iteration_bounds = array<i64: 1, 1, 5>, scalar_prefetch = 0 : i64, scratch_operands = 1 : i64, tpu.core_type = #tpu.core_type<tc>, window_params = [{transform_indices = @transform_0, window_bounds = array<i64: 32, 256>}, {transform_indices = @transform_1, window_bounds = array<i64: 256, 128>}, {transform_indices = @transform_2, window_bounds = array<i64: 32, 128>}, {transform_indices = @transform_3, window_bounds = array<i64: 1, 2, 128>}]} {
    %c0_i32 = arith.constant 0 : i32
    %0 = arith.cmpi eq, %arg2, %c0_i32 : i32
    %1 = arith.extui %0 : i1 to i32
    %c0_i32_0 = arith.constant 0 : i32
    %2 = arith.cmpi ne, %1, %c0_i32_0 : i32
    scf.if %2 {
      %cst_9 = arith.constant 0.000000e+00 : f32
      %12 = vector.broadcast %cst_9 : f32 to vector<32x128xf32>
      %c0_10 = arith.constant 0 : index
      %c0_11 = arith.constant 0 : index
      %13 = vector.load %arg7[%c0_10, %c0_11] : memref<32x128xf32, #tpu.memory_space<vmem>>, vector<32x128xf32>
      tpu.vector_store %arg7[%c0_10, %c0_11], %12 {strides = array<i32>} : memref<32x128xf32, #tpu.memory_space<vmem>>, vector<32x128xf32>,
    } else {
    }
    %c0 = arith.constant 0 : index
    %c0_1 = arith.constant 0 : index
    %3 = vector.load %arg7[%c0, %c0_1] : memref<32x128xf32, #tpu.memory_space<vmem>>, vector<32x128xf32>
    %c0_2 = arith.constant 0 : index
    %c0_3 = arith.constant 0 : index
    %4 = vector.load %arg3[%c0_2, %c0_3] : memref<32x256xbf16, #tpu.memory_space<vmem>>, vector<32x256xbf16>
    %c0_4 = arith.constant 0 : index
    %c0_5 = arith.constant 0 : index
    %5 = vector.load %arg4[%c0_4, %c0_5] : memref<256x128xbf16, #tpu.memory_space<vmem>>, vector<256x128xbf16>
    %cst = arith.constant dense<0.000000e+00> : vector<32x128xf32>
    %6 = tpu.matmul %4, %5, %cst {dimension_numbers = #tpu.dot_dimension_numbers<[1], [0], [0], [1], [0, 0, 1, 1], [], []>} : vector<32x256xbf16>, vector<256x128xbf16>, vector<32x128xf32> -> vector<32x128xf32>
    %7 = arith.addf %3, %6 : vector<32x128xf32>
    %c0_6 = arith.constant 0 : index
    %c0_7 = arith.constant 0 : index
    %8 = vector.load %arg7[%c0_6, %c0_7] : memref<32x128xf32, #tpu.memory_space<vmem>>, vector<32x128xf32>
    tpu.vector_store %arg7[%c0_6, %c0_7], %7 {strides = array<i32>} : memref<32x128xf32, #tpu.memory_space<vmem>>, vector<32x128xf32>,
    %c4_i32 = arith.constant 4 : i32
    %9 = arith.cmpi eq, %arg2, %c4_i32 : i32
    %10 = arith.extui %9 : i1 to i32
    %c0_i32_8 = arith.constant 0 : i32
    %11 = arith.cmpi ne, %10, %c0_i32_8 : i32
    scf.if %11 {
      %c0_9 = arith.constant 0 : index
      %c0_10 = arith.constant 0 : index
      %12 = vector.load %arg7[%c0_9, %c0_10] : memref<32x128xf32, #tpu.memory_space<vmem>>, vector<32x128xf32>
      %13 = arith.truncf %12 : vector<32x128xf32> to vector<32x128xbf16>
      %c0_11 = arith.constant 0 : index
      %c0_12 = arith.constant 0 : index
      %14 = vector.load %arg5[%c0_11, %c0_12] : memref<32x128xbf16, #tpu.memory_space<vmem>>, vector<32x128xbf16>
      tpu.vector_store %arg5[%c0_11, %c0_12], %13 {strides = array<i32>} : memref<32x128xbf16, #tpu.memory_space<vmem>>, vector<32x128xbf16>,
      %cst_13 = arith.constant dense<0.000000e+00> : vector<128xf32>
      %15 = vector.multi_reduction <add>, %12, %cst_13 [0] : vector<32x128xf32> to vector<128xf32>
      %16 = vector.shape_cast %15 : vector<128xf32> to vector<1x128xf32>
      %17 = arith.mulf %12, %12 : vector<32x128xf32>
      %cst_14 = arith.constant dense<0.000000e+00> : vector<128xf32>
      %18 = vector.multi_reduction <add>, %17, %cst_14 [0] : vector<32x128xf32> to vector<128xf32>
      %19 = vector.shape_cast %18 : vector<128xf32> to vector<1x128xf32>
      %20 = tpu.concatenate %16, %19 in 0 : vector<1x128xf32>, vector<1x128xf32> -> vector<2x128xf32>
      %21 = vector.shape_cast %20 : vector<2x128xf32> to vector<1x2x128xf32>
      %c0_15 = arith.constant 0 : index
      %c0_16 = arith.constant 0 : index
      %c0_17 = arith.constant 0 : index
      %22 = vector.load %arg6[%c0_15, %c0_16, %c0_17] : memref<1x2x128xf32, #tpu.memory_space<vmem>>, vector<1x2x128xf32>
      tpu.vector_store %arg6[%c0_15, %c0_16, %c0_17], %21 {strides = array<i32>} : memref<1x2x128xf32, #tpu.memory_space<vmem>>, vector<1x2x128xf32>,
    } else {
    }
    return
  }
  func.func @transform_0(%arg0: i32, %arg1: i32, %arg2: i32) -> (i32, i32) {
    %c0_i32 = arith.constant 0 : i32
    return %arg0, %arg2 : i32, i32
  }
  func.func @transform_1(%arg0: i32, %arg1: i32, %arg2: i32) -> (i32, i32) {
    %c0_i32 = arith.constant 0 : i32
    return %arg2, %arg1 : i32, i32
  }
  func.func @transform_2(%arg0: i32, %arg1: i32, %arg2: i32) -> (i32, i32) {
    %c0_i32 = arith.constant 0 : i32
    return %arg0, %arg1 : i32, i32
  }
  func.func @transform_3(%arg0: i32, %arg1: i32, %arg2: i32) -> (i32, i32, i32) {
    %c0_i32 = arith.constant 0 : i32
    %c0_i32_0 = arith.constant 0 : i32
    return %arg0, %c0_i32, %arg1 : i32, i32, i32
  }
}

module attributes {stable_mosaic.version = 11 : i64} {
  func.func @_bn_norm_kernel(%arg0: i32, %arg1: memref<32x128xbf16, #tpu.memory_space<vmem>>, %arg2: memref<1x128xf32, #tpu.memory_space<vmem>>, %arg3: memref<1x128xf32, #tpu.memory_space<vmem>>, %arg4: memref<32x128xbf16, #tpu.memory_space<vmem>>) attributes {dimension_semantics = [#tpu.dimension_semantics<parallel>], iteration_bounds = array<i64: 1>, scalar_prefetch = 0 : i64, scratch_operands = 0 : i64, tpu.core_type = #tpu.core_type<tc>, window_params = [{transform_indices = @transform_0, window_bounds = array<i64: 32, 128>}, {pipeline_mode = #tpu.pipeline_mode<synchronous>, transform_indices = @transform_1, window_bounds = array<i64: 1, 128>}, {pipeline_mode = #tpu.pipeline_mode<synchronous>, transform_indices = @transform_2, window_bounds = array<i64: 1, 128>}, {transform_indices = @transform_3, window_bounds = array<i64: 32, 128>}]} {
    %c0 = arith.constant 0 : index
    %c0_0 = arith.constant 0 : index
    %0 = vector.load %arg1[%c0, %c0_0] : memref<32x128xbf16, #tpu.memory_space<vmem>>, vector<32x128xbf16>
    %1 = arith.extf %0 : vector<32x128xbf16> to vector<32x128xf32>
    %c0_1 = arith.constant 0 : index
    %c0_2 = arith.constant 0 : index
    %2 = vector.load %arg2[%c0_1, %c0_2] : memref<1x128xf32, #tpu.memory_space<vmem>>, vector<1x128xf32>
    %3 = vector.broadcast %2 : vector<1x128xf32> to vector<32x128xf32>
    %4 = arith.mulf %1, %3 : vector<32x128xf32>
    %c0_3 = arith.constant 0 : index
    %c0_4 = arith.constant 0 : index
    %5 = vector.load %arg3[%c0_3, %c0_4] : memref<1x128xf32, #tpu.memory_space<vmem>>, vector<1x128xf32>
    %6 = vector.broadcast %5 : vector<1x128xf32> to vector<32x128xf32>
    %7 = arith.addf %4, %6 : vector<32x128xf32>
    %cst = arith.constant 0.000000e+00 : f32
    %8 = vector.broadcast %cst : f32 to vector<32x128xf32>
    %9 = arith.maximumf %7, %8 : vector<32x128xf32>
    %10 = arith.truncf %9 : vector<32x128xf32> to vector<32x128xbf16>
    %c0_5 = arith.constant 0 : index
    %c0_6 = arith.constant 0 : index
    %11 = vector.load %arg4[%c0_5, %c0_6] : memref<32x128xbf16, #tpu.memory_space<vmem>>, vector<32x128xbf16>
    tpu.vector_store %arg4[%c0_5, %c0_6], %10 {strides = array<i32>} : memref<32x128xbf16, #tpu.memory_space<vmem>>, vector<32x128xbf16>,
    return
  }
  func.func @transform_0(%arg0: i32) -> (i32, i32) {
    %c0_i32 = arith.constant 0 : i32
    %c0_i32_0 = arith.constant 0 : i32
    return %arg0, %c0_i32 : i32, i32
  }
  func.func @transform_1(%arg0: i32) -> (i32, i32) {
    %c0_i32 = arith.constant 0 : i32
    %c0_i32_0 = arith.constant 0 : i32
    %c0_i32_1 = arith.constant 0 : i32
    return %c0_i32, %c0_i32_0 : i32, i32
  }
  func.func @transform_2(%arg0: i32) -> (i32, i32) {
    %c0_i32 = arith.constant 0 : i32
    %c0_i32_0 = arith.constant 0 : i32
    %c0_i32_1 = arith.constant 0 : i32
    return %c0_i32, %c0_i32_0 : i32, i32
  }
  func.func @transform_3(%arg0: i32) -> (i32, i32) {
    %c0_i32 = arith.constant 0 : i32
    %c0_i32_0 = arith.constant 0 : i32
    return %arg0, %c0_i32 : i32, i32
  }
}

module attributes {stable_mosaic.version = 11 : i64} {
  func.func @_bn_norm_kernel(%arg0: i32, %arg1: memref<32x128xbf16, #tpu.memory_space<vmem>>, %arg2: memref<1x128xf32, #tpu.memory_space<vmem>>, %arg3: memref<1x128xf32, #tpu.memory_space<vmem>>, %arg4: memref<32x128xbf16, #tpu.memory_space<vmem>>, %arg5: memref<32x128xbf16, #tpu.memory_space<vmem>>) attributes {dimension_semantics = [#tpu.dimension_semantics<parallel>], iteration_bounds = array<i64: 1>, scalar_prefetch = 0 : i64, scratch_operands = 0 : i64, tpu.core_type = #tpu.core_type<tc>, window_params = [{transform_indices = @transform_0, window_bounds = array<i64: 32, 128>}, {pipeline_mode = #tpu.pipeline_mode<synchronous>, transform_indices = @transform_1, window_bounds = array<i64: 1, 128>}, {pipeline_mode = #tpu.pipeline_mode<synchronous>, transform_indices = @transform_2, window_bounds = array<i64: 1, 128>}, {transform_indices = @transform_3, window_bounds = array<i64: 32, 128>}, {transform_indices = @transform_4, window_bounds = array<i64: 32, 128>}]} {
    %c0 = arith.constant 0 : index
    %c0_0 = arith.constant 0 : index
    %0 = vector.load %arg1[%c0, %c0_0] : memref<32x128xbf16, #tpu.memory_space<vmem>>, vector<32x128xbf16>
    %1 = arith.extf %0 : vector<32x128xbf16> to vector<32x128xf32>
    %c0_1 = arith.constant 0 : index
    %c0_2 = arith.constant 0 : index
    %2 = vector.load %arg2[%c0_1, %c0_2] : memref<1x128xf32, #tpu.memory_space<vmem>>, vector<1x128xf32>
    %3 = vector.broadcast %2 : vector<1x128xf32> to vector<32x128xf32>
    %4 = arith.mulf %1, %3 : vector<32x128xf32>
    %c0_3 = arith.constant 0 : index
    %c0_4 = arith.constant 0 : index
    %5 = vector.load %arg3[%c0_3, %c0_4] : memref<1x128xf32, #tpu.memory_space<vmem>>, vector<1x128xf32>
    %6 = vector.broadcast %5 : vector<1x128xf32> to vector<32x128xf32>
    %7 = arith.addf %4, %6 : vector<32x128xf32>
    %c0_5 = arith.constant 0 : index
    %c0_6 = arith.constant 0 : index
    %8 = vector.load %arg4[%c0_5, %c0_6] : memref<32x128xbf16, #tpu.memory_space<vmem>>, vector<32x128xbf16>
    %9 = arith.extf %8 : vector<32x128xbf16> to vector<32x128xf32>
    %10 = arith.addf %7, %9 : vector<32x128xf32>
    %cst = arith.constant 0.000000e+00 : f32
    %11 = vector.broadcast %cst : f32 to vector<32x128xf32>
    %12 = arith.maximumf %10, %11 : vector<32x128xf32>
    %13 = arith.truncf %12 : vector<32x128xf32> to vector<32x128xbf16>
    %c0_7 = arith.constant 0 : index
    %c0_8 = arith.constant 0 : index
    %14 = vector.load %arg5[%c0_7, %c0_8] : memref<32x128xbf16, #tpu.memory_space<vmem>>, vector<32x128xbf16>
    tpu.vector_store %arg5[%c0_7, %c0_8], %13 {strides = array<i32>} : memref<32x128xbf16, #tpu.memory_space<vmem>>, vector<32x128xbf16>,
    return
  }
  func.func @transform_0(%arg0: i32) -> (i32, i32) {
    %c0_i32 = arith.constant 0 : i32
    %c0_i32_0 = arith.constant 0 : i32
    return %arg0, %c0_i32 : i32, i32
  }
  func.func @transform_1(%arg0: i32) -> (i32, i32) {
    %c0_i32 = arith.constant 0 : i32
    %c0_i32_0 = arith.constant 0 : i32
    %c0_i32_1 = arith.constant 0 : i32
    return %c0_i32, %c0_i32_0 : i32, i32
  }
  func.func @transform_2(%arg0: i32) -> (i32, i32) {
    %c0_i32 = arith.constant 0 : i32
    %c0_i32_0 = arith.constant 0 : i32
    %c0_i32_1 = arith.constant 0 : i32
    return %c0_i32, %c0_i32_0 : i32, i32
  }
  func.func @transform_3(%arg0: i32) -> (i32, i32) {
    %c0_i32 = arith.constant 0 : i32
    %c0_i32_0 = arith.constant 0 : i32
    return %arg0, %c0_i32 : i32, i32
  }
  func.func @transform_4(%arg0: i32) -> (i32, i32) {
    %c0_i32 = arith.constant 0 : i32
    %c0_i32_0 = arith.constant 0 : i32
    return %arg0, %c0_i32 : i32, i32
  }
}

module attributes {stable_mosaic.version = 11 : i64} {
  func.func @_bn_norm_kernel(%arg0: i32, %arg1: memref<16x128xbf16, #tpu.memory_space<vmem>>, %arg2: memref<1x128xf32, #tpu.memory_space<vmem>>, %arg3: memref<1x128xf32, #tpu.memory_space<vmem>>, %arg4: memref<16x128xbf16, #tpu.memory_space<vmem>>) attributes {dimension_semantics = [#tpu.dimension_semantics<parallel>], iteration_bounds = array<i64: 1>, scalar_prefetch = 0 : i64, scratch_operands = 0 : i64, tpu.core_type = #tpu.core_type<tc>, window_params = [{transform_indices = @transform_0, window_bounds = array<i64: 16, 128>}, {pipeline_mode = #tpu.pipeline_mode<synchronous>, transform_indices = @transform_1, window_bounds = array<i64: 1, 128>}, {pipeline_mode = #tpu.pipeline_mode<synchronous>, transform_indices = @transform_2, window_bounds = array<i64: 1, 128>}, {transform_indices = @transform_3, window_bounds = array<i64: 16, 128>}]} {
    %c0 = arith.constant 0 : index
    %c0_0 = arith.constant 0 : index
    %0 = vector.load %arg1[%c0, %c0_0] : memref<16x128xbf16, #tpu.memory_space<vmem>>, vector<16x128xbf16>
    %1 = arith.extf %0 : vector<16x128xbf16> to vector<16x128xf32>
    %c0_1 = arith.constant 0 : index
    %c0_2 = arith.constant 0 : index
    %2 = vector.load %arg2[%c0_1, %c0_2] : memref<1x128xf32, #tpu.memory_space<vmem>>, vector<1x128xf32>
    %3 = vector.broadcast %2 : vector<1x128xf32> to vector<16x128xf32>
    %4 = arith.mulf %1, %3 : vector<16x128xf32>
    %c0_3 = arith.constant 0 : index
    %c0_4 = arith.constant 0 : index
    %5 = vector.load %arg3[%c0_3, %c0_4] : memref<1x128xf32, #tpu.memory_space<vmem>>, vector<1x128xf32>
    %6 = vector.broadcast %5 : vector<1x128xf32> to vector<16x128xf32>
    %7 = arith.addf %4, %6 : vector<16x128xf32>
    %8 = arith.truncf %7 : vector<16x128xf32> to vector<16x128xbf16>
    %c0_5 = arith.constant 0 : index
    %c0_6 = arith.constant 0 : index
    %9 = vector.load %arg4[%c0_5, %c0_6] : memref<16x128xbf16, #tpu.memory_space<vmem>>, vector<16x128xbf16>
    tpu.vector_store %arg4[%c0_5, %c0_6], %8 {strides = array<i32>} : memref<16x128xbf16, #tpu.memory_space<vmem>>, vector<16x128xbf16>,
    return
  }
  func.func @transform_0(%arg0: i32) -> (i32, i32) {
    %c0_i32 = arith.constant 0 : i32
    %c0_i32_0 = arith.constant 0 : i32
    return %arg0, %c0_i32 : i32, i32
  }
  func.func @transform_1(%arg0: i32) -> (i32, i32) {
    %c0_i32 = arith.constant 0 : i32
    %c0_i32_0 = arith.constant 0 : i32
    %c0_i32_1 = arith.constant 0 : i32
    return %c0_i32, %c0_i32_0 : i32, i32
  }
  func.func @transform_2(%arg0: i32) -> (i32, i32) {
    %c0_i32 = arith.constant 0 : i32
    %c0_i32_0 = arith.constant 0 : i32
    %c0_i32_1 = arith.constant 0 : i32
    return %c0_i32, %c0_i32_0 : i32, i32
  }
  func.func @transform_3(%arg0: i32) -> (i32, i32) {
    %c0_i32 = arith.constant 0 : i32
    %c0_i32_0 = arith.constant 0 : i32
    return %arg0, %c0_i32 : i32, i32
  }
}

module attributes {stable_mosaic.version = 11 : i64} {
  func.func @_matmul_kernel(%arg0: i32, %arg1: i32, %arg2: i32, %arg3: memref<16x128xbf16, #tpu.memory_space<vmem>>, %arg4: memref<128x128xbf16, #tpu.memory_space<vmem>>, %arg5: memref<16x128xbf16, #tpu.memory_space<vmem>>, %arg6: memref<1x2x128xf32, #tpu.memory_space<vmem>>, %arg7: memref<16x128xf32, #tpu.memory_space<vmem>>) attributes {dimension_semantics = [#tpu.dimension_semantics<parallel>, #tpu.dimension_semantics<parallel>, #tpu.dimension_semantics<arbitrary>], iteration_bounds = array<i64: 1, 1, 1>, scalar_prefetch = 0 : i64, scratch_operands = 1 : i64, tpu.core_type = #tpu.core_type<tc>, window_params = [{transform_indices = @transform_0, window_bounds = array<i64: 16, 128>}, {transform_indices = @transform_1, window_bounds = array<i64: 128, 128>}, {transform_indices = @transform_2, window_bounds = array<i64: 16, 128>}, {transform_indices = @transform_3, window_bounds = array<i64: 1, 2, 128>}]} {
    %c0_i32 = arith.constant 0 : i32
    %0 = arith.cmpi eq, %arg2, %c0_i32 : i32
    %1 = arith.extui %0 : i1 to i32
    %c0_i32_0 = arith.constant 0 : i32
    %2 = arith.cmpi ne, %1, %c0_i32_0 : i32
    scf.if %2 {
      %cst_10 = arith.constant 0.000000e+00 : f32
      %12 = vector.broadcast %cst_10 : f32 to vector<16x128xf32>
      %c0_11 = arith.constant 0 : index
      %c0_12 = arith.constant 0 : index
      %13 = vector.load %arg7[%c0_11, %c0_12] : memref<16x128xf32, #tpu.memory_space<vmem>>, vector<16x128xf32>
      tpu.vector_store %arg7[%c0_11, %c0_12], %12 {strides = array<i32>} : memref<16x128xf32, #tpu.memory_space<vmem>>, vector<16x128xf32>,
    } else {
    }
    %c0 = arith.constant 0 : index
    %c0_1 = arith.constant 0 : index
    %3 = vector.load %arg7[%c0, %c0_1] : memref<16x128xf32, #tpu.memory_space<vmem>>, vector<16x128xf32>
    %c0_2 = arith.constant 0 : index
    %c0_3 = arith.constant 0 : index
    %4 = vector.load %arg3[%c0_2, %c0_3] : memref<16x128xbf16, #tpu.memory_space<vmem>>, vector<16x128xbf16>
    %c0_4 = arith.constant 0 : index
    %c0_5 = arith.constant 0 : index
    %5 = vector.load %arg4[%c0_4, %c0_5] : memref<128x128xbf16, #tpu.memory_space<vmem>>, vector<128x128xbf16>
    %cst = arith.constant dense<0.000000e+00> : vector<16x128xf32>
    %6 = tpu.matmul %4, %5, %cst {dimension_numbers = #tpu.dot_dimension_numbers<[1], [0], [0], [1], [0, 0, 1, 1], [], []>} : vector<16x128xbf16>, vector<128x128xbf16>, vector<16x128xf32> -> vector<16x128xf32>
    %7 = arith.addf %3, %6 : vector<16x128xf32>
    %c0_6 = arith.constant 0 : index
    %c0_7 = arith.constant 0 : index
    %8 = vector.load %arg7[%c0_6, %c0_7] : memref<16x128xf32, #tpu.memory_space<vmem>>, vector<16x128xf32>
    tpu.vector_store %arg7[%c0_6, %c0_7], %7 {strides = array<i32>} : memref<16x128xf32, #tpu.memory_space<vmem>>, vector<16x128xf32>,
    %c0_i32_8 = arith.constant 0 : i32
    %9 = arith.cmpi eq, %arg2, %c0_i32_8 : i32
    %10 = arith.extui %9 : i1 to i32
    %c0_i32_9 = arith.constant 0 : i32
    %11 = arith.cmpi ne, %10, %c0_i32_9 : i32
    scf.if %11 {
      %c0_10 = arith.constant 0 : index
      %c0_11 = arith.constant 0 : index
      %12 = vector.load %arg7[%c0_10, %c0_11] : memref<16x128xf32, #tpu.memory_space<vmem>>, vector<16x128xf32>
      %13 = arith.truncf %12 : vector<16x128xf32> to vector<16x128xbf16>
      %c0_12 = arith.constant 0 : index
      %c0_13 = arith.constant 0 : index
      %14 = vector.load %arg5[%c0_12, %c0_13] : memref<16x128xbf16, #tpu.memory_space<vmem>>, vector<16x128xbf16>
      tpu.vector_store %arg5[%c0_12, %c0_13], %13 {strides = array<i32>} : memref<16x128xbf16, #tpu.memory_space<vmem>>, vector<16x128xbf16>,
      %cst_14 = arith.constant dense<0.000000e+00> : vector<128xf32>
      %15 = vector.multi_reduction <add>, %12, %cst_14 [0] : vector<16x128xf32> to vector<128xf32>
      %16 = vector.shape_cast %15 : vector<128xf32> to vector<1x128xf32>
      %17 = arith.mulf %12, %12 : vector<16x128xf32>
      %cst_15 = arith.constant dense<0.000000e+00> : vector<128xf32>
      %18 = vector.multi_reduction <add>, %17, %cst_15 [0] : vector<16x128xf32> to vector<128xf32>
      %19 = vector.shape_cast %18 : vector<128xf32> to vector<1x128xf32>
      %20 = tpu.concatenate %16, %19 in 0 : vector<1x128xf32>, vector<1x128xf32> -> vector<2x128xf32>
      %21 = vector.shape_cast %20 : vector<2x128xf32> to vector<1x2x128xf32>
      %c0_16 = arith.constant 0 : index
      %c0_17 = arith.constant 0 : index
      %c0_18 = arith.constant 0 : index
      %22 = vector.load %arg6[%c0_16, %c0_17, %c0_18] : memref<1x2x128xf32, #tpu.memory_space<vmem>>, vector<1x2x128xf32>
      tpu.vector_store %arg6[%c0_16, %c0_17, %c0_18], %21 {strides = array<i32>} : memref<1x2x128xf32, #tpu.memory_space<vmem>>, vector<1x2x128xf32>,
    } else {
    }
    return
  }
  func.func @transform_0(%arg0: i32, %arg1: i32, %arg2: i32) -> (i32, i32) {
    %c0_i32 = arith.constant 0 : i32
    return %arg0, %arg2 : i32, i32
  }
  func.func @transform_1(%arg0: i32, %arg1: i32, %arg2: i32) -> (i32, i32) {
    %c0_i32 = arith.constant 0 : i32
    return %arg2, %arg1 : i32, i32
  }
  func.func @transform_2(%arg0: i32, %arg1: i32, %arg2: i32) -> (i32, i32) {
    %c0_i32 = arith.constant 0 : i32
    return %arg0, %arg1 : i32, i32
  }
  func.func @transform_3(%arg0: i32, %arg1: i32, %arg2: i32) -> (i32, i32, i32) {
    %c0_i32 = arith.constant 0 : i32
    %c0_i32_0 = arith.constant 0 : i32
    return %arg0, %c0_i32, %arg1 : i32, i32, i32
  }
}

module attributes {stable_mosaic.version = 11 : i64} {
  func.func @_matmul_kernel(%arg0: i32, %arg1: i32, %arg2: i32, %arg3: memref<16x256xbf16, #tpu.memory_space<vmem>>, %arg4: memref<256x128xbf16, #tpu.memory_space<vmem>>, %arg5: memref<16x128xbf16, #tpu.memory_space<vmem>>, %arg6: memref<1x2x128xf32, #tpu.memory_space<vmem>>, %arg7: memref<16x128xf32, #tpu.memory_space<vmem>>) attributes {dimension_semantics = [#tpu.dimension_semantics<parallel>, #tpu.dimension_semantics<parallel>, #tpu.dimension_semantics<arbitrary>], iteration_bounds = array<i64: 1, 1, 5>, scalar_prefetch = 0 : i64, scratch_operands = 1 : i64, tpu.core_type = #tpu.core_type<tc>, window_params = [{transform_indices = @transform_0, window_bounds = array<i64: 16, 256>}, {transform_indices = @transform_1, window_bounds = array<i64: 256, 128>}, {transform_indices = @transform_2, window_bounds = array<i64: 16, 128>}, {transform_indices = @transform_3, window_bounds = array<i64: 1, 2, 128>}]} {
    %c0_i32 = arith.constant 0 : i32
    %0 = arith.cmpi eq, %arg2, %c0_i32 : i32
    %1 = arith.extui %0 : i1 to i32
    %c0_i32_0 = arith.constant 0 : i32
    %2 = arith.cmpi ne, %1, %c0_i32_0 : i32
    scf.if %2 {
      %cst_9 = arith.constant 0.000000e+00 : f32
      %12 = vector.broadcast %cst_9 : f32 to vector<16x128xf32>
      %c0_10 = arith.constant 0 : index
      %c0_11 = arith.constant 0 : index
      %13 = vector.load %arg7[%c0_10, %c0_11] : memref<16x128xf32, #tpu.memory_space<vmem>>, vector<16x128xf32>
      tpu.vector_store %arg7[%c0_10, %c0_11], %12 {strides = array<i32>} : memref<16x128xf32, #tpu.memory_space<vmem>>, vector<16x128xf32>,
    } else {
    }
    %c0 = arith.constant 0 : index
    %c0_1 = arith.constant 0 : index
    %3 = vector.load %arg7[%c0, %c0_1] : memref<16x128xf32, #tpu.memory_space<vmem>>, vector<16x128xf32>
    %c0_2 = arith.constant 0 : index
    %c0_3 = arith.constant 0 : index
    %4 = vector.load %arg3[%c0_2, %c0_3] : memref<16x256xbf16, #tpu.memory_space<vmem>>, vector<16x256xbf16>
    %c0_4 = arith.constant 0 : index
    %c0_5 = arith.constant 0 : index
    %5 = vector.load %arg4[%c0_4, %c0_5] : memref<256x128xbf16, #tpu.memory_space<vmem>>, vector<256x128xbf16>
    %cst = arith.constant dense<0.000000e+00> : vector<16x128xf32>
    %6 = tpu.matmul %4, %5, %cst {dimension_numbers = #tpu.dot_dimension_numbers<[1], [0], [0], [1], [0, 0, 1, 1], [], []>} : vector<16x256xbf16>, vector<256x128xbf16>, vector<16x128xf32> -> vector<16x128xf32>
    %7 = arith.addf %3, %6 : vector<16x128xf32>
    %c0_6 = arith.constant 0 : index
    %c0_7 = arith.constant 0 : index
    %8 = vector.load %arg7[%c0_6, %c0_7] : memref<16x128xf32, #tpu.memory_space<vmem>>, vector<16x128xf32>
    tpu.vector_store %arg7[%c0_6, %c0_7], %7 {strides = array<i32>} : memref<16x128xf32, #tpu.memory_space<vmem>>, vector<16x128xf32>,
    %c4_i32 = arith.constant 4 : i32
    %9 = arith.cmpi eq, %arg2, %c4_i32 : i32
    %10 = arith.extui %9 : i1 to i32
    %c0_i32_8 = arith.constant 0 : i32
    %11 = arith.cmpi ne, %10, %c0_i32_8 : i32
    scf.if %11 {
      %c0_9 = arith.constant 0 : index
      %c0_10 = arith.constant 0 : index
      %12 = vector.load %arg7[%c0_9, %c0_10] : memref<16x128xf32, #tpu.memory_space<vmem>>, vector<16x128xf32>
      %13 = arith.truncf %12 : vector<16x128xf32> to vector<16x128xbf16>
      %c0_11 = arith.constant 0 : index
      %c0_12 = arith.constant 0 : index
      %14 = vector.load %arg5[%c0_11, %c0_12] : memref<16x128xbf16, #tpu.memory_space<vmem>>, vector<16x128xbf16>
      tpu.vector_store %arg5[%c0_11, %c0_12], %13 {strides = array<i32>} : memref<16x128xbf16, #tpu.memory_space<vmem>>, vector<16x128xbf16>,
      %cst_13 = arith.constant dense<0.000000e+00> : vector<128xf32>
      %15 = vector.multi_reduction <add>, %12, %cst_13 [0] : vector<16x128xf32> to vector<128xf32>
      %16 = vector.shape_cast %15 : vector<128xf32> to vector<1x128xf32>
      %17 = arith.mulf %12, %12 : vector<16x128xf32>
      %cst_14 = arith.constant dense<0.000000e+00> : vector<128xf32>
      %18 = vector.multi_reduction <add>, %17, %cst_14 [0] : vector<16x128xf32> to vector<128xf32>
      %19 = vector.shape_cast %18 : vector<128xf32> to vector<1x128xf32>
      %20 = tpu.concatenate %16, %19 in 0 : vector<1x128xf32>, vector<1x128xf32> -> vector<2x128xf32>
      %21 = vector.shape_cast %20 : vector<2x128xf32> to vector<1x2x128xf32>
      %c0_15 = arith.constant 0 : index
      %c0_16 = arith.constant 0 : index
      %c0_17 = arith.constant 0 : index
      %22 = vector.load %arg6[%c0_15, %c0_16, %c0_17] : memref<1x2x128xf32, #tpu.memory_space<vmem>>, vector<1x2x128xf32>
      tpu.vector_store %arg6[%c0_15, %c0_16, %c0_17], %21 {strides = array<i32>} : memref<1x2x128xf32, #tpu.memory_space<vmem>>, vector<1x2x128xf32>,
    } else {
    }
    return
  }
  func.func @transform_0(%arg0: i32, %arg1: i32, %arg2: i32) -> (i32, i32) {
    %c0_i32 = arith.constant 0 : i32
    return %arg0, %arg2 : i32, i32
  }
  func.func @transform_1(%arg0: i32, %arg1: i32, %arg2: i32) -> (i32, i32) {
    %c0_i32 = arith.constant 0 : i32
    return %arg2, %arg1 : i32, i32
  }
  func.func @transform_2(%arg0: i32, %arg1: i32, %arg2: i32) -> (i32, i32) {
    %c0_i32 = arith.constant 0 : i32
    return %arg0, %arg1 : i32, i32
  }
  func.func @transform_3(%arg0: i32, %arg1: i32, %arg2: i32) -> (i32, i32, i32) {
    %c0_i32 = arith.constant 0 : i32
    %c0_i32_0 = arith.constant 0 : i32
    return %arg0, %c0_i32, %arg1 : i32, i32, i32
  }
}

module attributes {stable_mosaic.version = 11 : i64} {
  func.func @_bn_norm_kernel(%arg0: i32, %arg1: memref<16x128xbf16, #tpu.memory_space<vmem>>, %arg2: memref<1x128xf32, #tpu.memory_space<vmem>>, %arg3: memref<1x128xf32, #tpu.memory_space<vmem>>, %arg4: memref<16x128xbf16, #tpu.memory_space<vmem>>) attributes {dimension_semantics = [#tpu.dimension_semantics<parallel>], iteration_bounds = array<i64: 1>, scalar_prefetch = 0 : i64, scratch_operands = 0 : i64, tpu.core_type = #tpu.core_type<tc>, window_params = [{transform_indices = @transform_0, window_bounds = array<i64: 16, 128>}, {pipeline_mode = #tpu.pipeline_mode<synchronous>, transform_indices = @transform_1, window_bounds = array<i64: 1, 128>}, {pipeline_mode = #tpu.pipeline_mode<synchronous>, transform_indices = @transform_2, window_bounds = array<i64: 1, 128>}, {transform_indices = @transform_3, window_bounds = array<i64: 16, 128>}]} {
    %c0 = arith.constant 0 : index
    %c0_0 = arith.constant 0 : index
    %0 = vector.load %arg1[%c0, %c0_0] : memref<16x128xbf16, #tpu.memory_space<vmem>>, vector<16x128xbf16>
    %1 = arith.extf %0 : vector<16x128xbf16> to vector<16x128xf32>
    %c0_1 = arith.constant 0 : index
    %c0_2 = arith.constant 0 : index
    %2 = vector.load %arg2[%c0_1, %c0_2] : memref<1x128xf32, #tpu.memory_space<vmem>>, vector<1x128xf32>
    %3 = vector.broadcast %2 : vector<1x128xf32> to vector<16x128xf32>
    %4 = arith.mulf %1, %3 : vector<16x128xf32>
    %c0_3 = arith.constant 0 : index
    %c0_4 = arith.constant 0 : index
    %5 = vector.load %arg3[%c0_3, %c0_4] : memref<1x128xf32, #tpu.memory_space<vmem>>, vector<1x128xf32>
    %6 = vector.broadcast %5 : vector<1x128xf32> to vector<16x128xf32>
    %7 = arith.addf %4, %6 : vector<16x128xf32>
    %cst = arith.constant 0.000000e+00 : f32
    %8 = vector.broadcast %cst : f32 to vector<16x128xf32>
    %9 = arith.maximumf %7, %8 : vector<16x128xf32>
    %10 = arith.truncf %9 : vector<16x128xf32> to vector<16x128xbf16>
    %c0_5 = arith.constant 0 : index
    %c0_6 = arith.constant 0 : index
    %11 = vector.load %arg4[%c0_5, %c0_6] : memref<16x128xbf16, #tpu.memory_space<vmem>>, vector<16x128xbf16>
    tpu.vector_store %arg4[%c0_5, %c0_6], %10 {strides = array<i32>} : memref<16x128xbf16, #tpu.memory_space<vmem>>, vector<16x128xbf16>,
    return
  }
  func.func @transform_0(%arg0: i32) -> (i32, i32) {
    %c0_i32 = arith.constant 0 : i32
    %c0_i32_0 = arith.constant 0 : i32
    return %arg0, %c0_i32 : i32, i32
  }
  func.func @transform_1(%arg0: i32) -> (i32, i32) {
    %c0_i32 = arith.constant 0 : i32
    %c0_i32_0 = arith.constant 0 : i32
    %c0_i32_1 = arith.constant 0 : i32
    return %c0_i32, %c0_i32_0 : i32, i32
  }
  func.func @transform_2(%arg0: i32) -> (i32, i32) {
    %c0_i32 = arith.constant 0 : i32
    %c0_i32_0 = arith.constant 0 : i32
    %c0_i32_1 = arith.constant 0 : i32
    return %c0_i32, %c0_i32_0 : i32, i32
  }
  func.func @transform_3(%arg0: i32) -> (i32, i32) {
    %c0_i32 = arith.constant 0 : i32
    %c0_i32_0 = arith.constant 0 : i32
    return %arg0, %c0_i32 : i32, i32
  }
}

module attributes {stable_mosaic.version = 11 : i64} {
  func.func @_bn_norm_kernel(%arg0: i32, %arg1: memref<16x128xbf16, #tpu.memory_space<vmem>>, %arg2: memref<1x128xf32, #tpu.memory_space<vmem>>, %arg3: memref<1x128xf32, #tpu.memory_space<vmem>>, %arg4: memref<16x128xbf16, #tpu.memory_space<vmem>>, %arg5: memref<16x128xbf16, #tpu.memory_space<vmem>>) attributes {dimension_semantics = [#tpu.dimension_semantics<parallel>], iteration_bounds = array<i64: 1>, scalar_prefetch = 0 : i64, scratch_operands = 0 : i64, tpu.core_type = #tpu.core_type<tc>, window_params = [{transform_indices = @transform_0, window_bounds = array<i64: 16, 128>}, {pipeline_mode = #tpu.pipeline_mode<synchronous>, transform_indices = @transform_1, window_bounds = array<i64: 1, 128>}, {pipeline_mode = #tpu.pipeline_mode<synchronous>, transform_indices = @transform_2, window_bounds = array<i64: 1, 128>}, {transform_indices = @transform_3, window_bounds = array<i64: 16, 128>}, {transform_indices = @transform_4, window_bounds = array<i64: 16, 128>}]} {
    %c0 = arith.constant 0 : index
    %c0_0 = arith.constant 0 : index
    %0 = vector.load %arg1[%c0, %c0_0] : memref<16x128xbf16, #tpu.memory_space<vmem>>, vector<16x128xbf16>
    %1 = arith.extf %0 : vector<16x128xbf16> to vector<16x128xf32>
    %c0_1 = arith.constant 0 : index
    %c0_2 = arith.constant 0 : index
    %2 = vector.load %arg2[%c0_1, %c0_2] : memref<1x128xf32, #tpu.memory_space<vmem>>, vector<1x128xf32>
    %3 = vector.broadcast %2 : vector<1x128xf32> to vector<16x128xf32>
    %4 = arith.mulf %1, %3 : vector<16x128xf32>
    %c0_3 = arith.constant 0 : index
    %c0_4 = arith.constant 0 : index
    %5 = vector.load %arg3[%c0_3, %c0_4] : memref<1x128xf32, #tpu.memory_space<vmem>>, vector<1x128xf32>
    %6 = vector.broadcast %5 : vector<1x128xf32> to vector<16x128xf32>
    %7 = arith.addf %4, %6 : vector<16x128xf32>
    %c0_5 = arith.constant 0 : index
    %c0_6 = arith.constant 0 : index
    %8 = vector.load %arg4[%c0_5, %c0_6] : memref<16x128xbf16, #tpu.memory_space<vmem>>, vector<16x128xbf16>
    %9 = arith.extf %8 : vector<16x128xbf16> to vector<16x128xf32>
    %10 = arith.addf %7, %9 : vector<16x128xf32>
    %cst = arith.constant 0.000000e+00 : f32
    %11 = vector.broadcast %cst : f32 to vector<16x128xf32>
    %12 = arith.maximumf %10, %11 : vector<16x128xf32>
    %13 = arith.truncf %12 : vector<16x128xf32> to vector<16x128xbf16>
    %c0_7 = arith.constant 0 : index
    %c0_8 = arith.constant 0 : index
    %14 = vector.load %arg5[%c0_7, %c0_8] : memref<16x128xbf16, #tpu.memory_space<vmem>>, vector<16x128xbf16>
    tpu.vector_store %arg5[%c0_7, %c0_8], %13 {strides = array<i32>} : memref<16x128xbf16, #tpu.memory_space<vmem>>, vector<16x128xbf16>,
    return
  }
  func.func @transform_0(%arg0: i32) -> (i32, i32) {
    %c0_i32 = arith.constant 0 : i32
    %c0_i32_0 = arith.constant 0 : i32
    return %arg0, %c0_i32 : i32, i32
  }
  func.func @transform_1(%arg0: i32) -> (i32, i32) {
    %c0_i32 = arith.constant 0 : i32
    %c0_i32_0 = arith.constant 0 : i32
    %c0_i32_1 = arith.constant 0 : i32
    return %c0_i32, %c0_i32_0 : i32, i32
  }
  func.func @transform_2(%arg0: i32) -> (i32, i32) {
    %c0_i32 = arith.constant 0 : i32
    %c0_i32_0 = arith.constant 0 : i32
    %c0_i32_1 = arith.constant 0 : i32
    return %c0_i32, %c0_i32_0 : i32, i32
  }
  func.func @transform_3(%arg0: i32) -> (i32, i32) {
    %c0_i32 = arith.constant 0 : i32
    %c0_i32_0 = arith.constant 0 : i32
    return %arg0, %c0_i32 : i32, i32
  }
  func.func @transform_4(%arg0: i32) -> (i32, i32) {
    %c0_i32 = arith.constant 0 : i32
    %c0_i32_0 = arith.constant 0 : i32
    return %arg0, %c0_i32 : i32, i32
  }
}

module attributes {stable_mosaic.version = 11 : i64} {
  func.func @_matmul_kernel(%arg0: i32, %arg1: i32, %arg2: i32, %arg3: memref<16x128xbf16, #tpu.memory_space<vmem>>, %arg4: memref<128x256xbf16, #tpu.memory_space<vmem>>, %arg5: memref<16x256xbf16, #tpu.memory_space<vmem>>, %arg6: memref<1x2x256xf32, #tpu.memory_space<vmem>>, %arg7: memref<16x256xf32, #tpu.memory_space<vmem>>) attributes {dimension_semantics = [#tpu.dimension_semantics<parallel>, #tpu.dimension_semantics<parallel>, #tpu.dimension_semantics<arbitrary>], iteration_bounds = array<i64: 1, 1, 1>, scalar_prefetch = 0 : i64, scratch_operands = 1 : i64, tpu.core_type = #tpu.core_type<tc>, window_params = [{transform_indices = @transform_0, window_bounds = array<i64: 16, 128>}, {transform_indices = @transform_1, window_bounds = array<i64: 128, 256>}, {transform_indices = @transform_2, window_bounds = array<i64: 16, 256>}, {transform_indices = @transform_3, window_bounds = array<i64: 1, 2, 256>}]} {
    %c0_i32 = arith.constant 0 : i32
    %0 = arith.cmpi eq, %arg2, %c0_i32 : i32
    %1 = arith.extui %0 : i1 to i32
    %c0_i32_0 = arith.constant 0 : i32
    %2 = arith.cmpi ne, %1, %c0_i32_0 : i32
    scf.if %2 {
      %cst_10 = arith.constant 0.000000e+00 : f32
      %12 = vector.broadcast %cst_10 : f32 to vector<16x256xf32>
      %c0_11 = arith.constant 0 : index
      %c0_12 = arith.constant 0 : index
      %13 = vector.load %arg7[%c0_11, %c0_12] : memref<16x256xf32, #tpu.memory_space<vmem>>, vector<16x256xf32>
      tpu.vector_store %arg7[%c0_11, %c0_12], %12 {strides = array<i32>} : memref<16x256xf32, #tpu.memory_space<vmem>>, vector<16x256xf32>,
    } else {
    }
    %c0 = arith.constant 0 : index
    %c0_1 = arith.constant 0 : index
    %3 = vector.load %arg7[%c0, %c0_1] : memref<16x256xf32, #tpu.memory_space<vmem>>, vector<16x256xf32>
    %c0_2 = arith.constant 0 : index
    %c0_3 = arith.constant 0 : index
    %4 = vector.load %arg3[%c0_2, %c0_3] : memref<16x128xbf16, #tpu.memory_space<vmem>>, vector<16x128xbf16>
    %c0_4 = arith.constant 0 : index
    %c0_5 = arith.constant 0 : index
    %5 = vector.load %arg4[%c0_4, %c0_5] : memref<128x256xbf16, #tpu.memory_space<vmem>>, vector<128x256xbf16>
    %cst = arith.constant dense<0.000000e+00> : vector<16x256xf32>
    %6 = tpu.matmul %4, %5, %cst {dimension_numbers = #tpu.dot_dimension_numbers<[1], [0], [0], [1], [0, 0, 1, 1], [], []>} : vector<16x128xbf16>, vector<128x256xbf16>, vector<16x256xf32> -> vector<16x256xf32>
    %7 = arith.addf %3, %6 : vector<16x256xf32>
    %c0_6 = arith.constant 0 : index
    %c0_7 = arith.constant 0 : index
    %8 = vector.load %arg7[%c0_6, %c0_7] : memref<16x256xf32, #tpu.memory_space<vmem>>, vector<16x256xf32>
    tpu.vector_store %arg7[%c0_6, %c0_7], %7 {strides = array<i32>} : memref<16x256xf32, #tpu.memory_space<vmem>>, vector<16x256xf32>,
    %c0_i32_8 = arith.constant 0 : i32
    %9 = arith.cmpi eq, %arg2, %c0_i32_8 : i32
    %10 = arith.extui %9 : i1 to i32
    %c0_i32_9 = arith.constant 0 : i32
    %11 = arith.cmpi ne, %10, %c0_i32_9 : i32
    scf.if %11 {
      %c0_10 = arith.constant 0 : index
      %c0_11 = arith.constant 0 : index
      %12 = vector.load %arg7[%c0_10, %c0_11] : memref<16x256xf32, #tpu.memory_space<vmem>>, vector<16x256xf32>
      %13 = arith.truncf %12 : vector<16x256xf32> to vector<16x256xbf16>
      %c0_12 = arith.constant 0 : index
      %c0_13 = arith.constant 0 : index
      %14 = vector.load %arg5[%c0_12, %c0_13] : memref<16x256xbf16, #tpu.memory_space<vmem>>, vector<16x256xbf16>
      tpu.vector_store %arg5[%c0_12, %c0_13], %13 {strides = array<i32>} : memref<16x256xbf16, #tpu.memory_space<vmem>>, vector<16x256xbf16>,
      %cst_14 = arith.constant dense<0.000000e+00> : vector<256xf32>
      %15 = vector.multi_reduction <add>, %12, %cst_14 [0] : vector<16x256xf32> to vector<256xf32>
      %16 = vector.shape_cast %15 : vector<256xf32> to vector<1x256xf32>
      %17 = arith.mulf %12, %12 : vector<16x256xf32>
      %cst_15 = arith.constant dense<0.000000e+00> : vector<256xf32>
      %18 = vector.multi_reduction <add>, %17, %cst_15 [0] : vector<16x256xf32> to vector<256xf32>
      %19 = vector.shape_cast %18 : vector<256xf32> to vector<1x256xf32>
      %20 = tpu.concatenate %16, %19 in 0 : vector<1x256xf32>, vector<1x256xf32> -> vector<2x256xf32>
      %21 = vector.shape_cast %20 : vector<2x256xf32> to vector<1x2x256xf32>
      %c0_16 = arith.constant 0 : index
      %c0_17 = arith.constant 0 : index
      %c0_18 = arith.constant 0 : index
      %22 = vector.load %arg6[%c0_16, %c0_17, %c0_18] : memref<1x2x256xf32, #tpu.memory_space<vmem>>, vector<1x2x256xf32>
      tpu.vector_store %arg6[%c0_16, %c0_17, %c0_18], %21 {strides = array<i32>} : memref<1x2x256xf32, #tpu.memory_space<vmem>>, vector<1x2x256xf32>,
    } else {
    }
    return
  }
  func.func @transform_0(%arg0: i32, %arg1: i32, %arg2: i32) -> (i32, i32) {
    %c0_i32 = arith.constant 0 : i32
    return %arg0, %arg2 : i32, i32
  }
  func.func @transform_1(%arg0: i32, %arg1: i32, %arg2: i32) -> (i32, i32) {
    %c0_i32 = arith.constant 0 : i32
    return %arg2, %arg1 : i32, i32
  }
  func.func @transform_2(%arg0: i32, %arg1: i32, %arg2: i32) -> (i32, i32) {
    %c0_i32 = arith.constant 0 : i32
    return %arg0, %arg1 : i32, i32
  }
  func.func @transform_3(%arg0: i32, %arg1: i32, %arg2: i32) -> (i32, i32, i32) {
    %c0_i32 = arith.constant 0 : i32
    %c0_i32_0 = arith.constant 0 : i32
    return %arg0, %c0_i32, %arg1 : i32, i32, i32
  }
}

module attributes {stable_mosaic.version = 11 : i64} {
  func.func @_bn_norm_kernel(%arg0: i32, %arg1: memref<16x256xbf16, #tpu.memory_space<vmem>>, %arg2: memref<1x256xf32, #tpu.memory_space<vmem>>, %arg3: memref<1x256xf32, #tpu.memory_space<vmem>>, %arg4: memref<16x256xbf16, #tpu.memory_space<vmem>>) attributes {dimension_semantics = [#tpu.dimension_semantics<parallel>], iteration_bounds = array<i64: 1>, scalar_prefetch = 0 : i64, scratch_operands = 0 : i64, tpu.core_type = #tpu.core_type<tc>, window_params = [{transform_indices = @transform_0, window_bounds = array<i64: 16, 256>}, {pipeline_mode = #tpu.pipeline_mode<synchronous>, transform_indices = @transform_1, window_bounds = array<i64: 1, 256>}, {pipeline_mode = #tpu.pipeline_mode<synchronous>, transform_indices = @transform_2, window_bounds = array<i64: 1, 256>}, {transform_indices = @transform_3, window_bounds = array<i64: 16, 256>}]} {
    %c0 = arith.constant 0 : index
    %c0_0 = arith.constant 0 : index
    %0 = vector.load %arg1[%c0, %c0_0] : memref<16x256xbf16, #tpu.memory_space<vmem>>, vector<16x256xbf16>
    %1 = arith.extf %0 : vector<16x256xbf16> to vector<16x256xf32>
    %c0_1 = arith.constant 0 : index
    %c0_2 = arith.constant 0 : index
    %2 = vector.load %arg2[%c0_1, %c0_2] : memref<1x256xf32, #tpu.memory_space<vmem>>, vector<1x256xf32>
    %3 = vector.broadcast %2 : vector<1x256xf32> to vector<16x256xf32>
    %4 = arith.mulf %1, %3 : vector<16x256xf32>
    %c0_3 = arith.constant 0 : index
    %c0_4 = arith.constant 0 : index
    %5 = vector.load %arg3[%c0_3, %c0_4] : memref<1x256xf32, #tpu.memory_space<vmem>>, vector<1x256xf32>
    %6 = vector.broadcast %5 : vector<1x256xf32> to vector<16x256xf32>
    %7 = arith.addf %4, %6 : vector<16x256xf32>
    %8 = arith.truncf %7 : vector<16x256xf32> to vector<16x256xbf16>
    %c0_5 = arith.constant 0 : index
    %c0_6 = arith.constant 0 : index
    %9 = vector.load %arg4[%c0_5, %c0_6] : memref<16x256xbf16, #tpu.memory_space<vmem>>, vector<16x256xbf16>
    tpu.vector_store %arg4[%c0_5, %c0_6], %8 {strides = array<i32>} : memref<16x256xbf16, #tpu.memory_space<vmem>>, vector<16x256xbf16>,
    return
  }
  func.func @transform_0(%arg0: i32) -> (i32, i32) {
    %c0_i32 = arith.constant 0 : i32
    %c0_i32_0 = arith.constant 0 : i32
    return %arg0, %c0_i32 : i32, i32
  }
  func.func @transform_1(%arg0: i32) -> (i32, i32) {
    %c0_i32 = arith.constant 0 : i32
    %c0_i32_0 = arith.constant 0 : i32
    %c0_i32_1 = arith.constant 0 : i32
    return %c0_i32, %c0_i32_0 : i32, i32
  }
  func.func @transform_2(%arg0: i32) -> (i32, i32) {
    %c0_i32 = arith.constant 0 : i32
    %c0_i32_0 = arith.constant 0 : i32
    %c0_i32_1 = arith.constant 0 : i32
    return %c0_i32, %c0_i32_0 : i32, i32
  }
  func.func @transform_3(%arg0: i32) -> (i32, i32) {
    %c0_i32 = arith.constant 0 : i32
    %c0_i32_0 = arith.constant 0 : i32
    return %arg0, %c0_i32 : i32, i32
  }
}

module attributes {stable_mosaic.version = 11 : i64} {
  func.func @_matmul_kernel(%arg0: i32, %arg1: i32, %arg2: i32, %arg3: memref<16x256xbf16, #tpu.memory_space<vmem>>, %arg4: memref<256x256xbf16, #tpu.memory_space<vmem>>, %arg5: memref<16x256xbf16, #tpu.memory_space<vmem>>, %arg6: memref<1x2x256xf32, #tpu.memory_space<vmem>>, %arg7: memref<16x256xf32, #tpu.memory_space<vmem>>) attributes {dimension_semantics = [#tpu.dimension_semantics<parallel>, #tpu.dimension_semantics<parallel>, #tpu.dimension_semantics<arbitrary>], iteration_bounds = array<i64: 1, 1, 5>, scalar_prefetch = 0 : i64, scratch_operands = 1 : i64, tpu.core_type = #tpu.core_type<tc>, window_params = [{transform_indices = @transform_0, window_bounds = array<i64: 16, 256>}, {transform_indices = @transform_1, window_bounds = array<i64: 256, 256>}, {transform_indices = @transform_2, window_bounds = array<i64: 16, 256>}, {transform_indices = @transform_3, window_bounds = array<i64: 1, 2, 256>}]} {
    %c0_i32 = arith.constant 0 : i32
    %0 = arith.cmpi eq, %arg2, %c0_i32 : i32
    %1 = arith.extui %0 : i1 to i32
    %c0_i32_0 = arith.constant 0 : i32
    %2 = arith.cmpi ne, %1, %c0_i32_0 : i32
    scf.if %2 {
      %cst_9 = arith.constant 0.000000e+00 : f32
      %12 = vector.broadcast %cst_9 : f32 to vector<16x256xf32>
      %c0_10 = arith.constant 0 : index
      %c0_11 = arith.constant 0 : index
      %13 = vector.load %arg7[%c0_10, %c0_11] : memref<16x256xf32, #tpu.memory_space<vmem>>, vector<16x256xf32>
      tpu.vector_store %arg7[%c0_10, %c0_11], %12 {strides = array<i32>} : memref<16x256xf32, #tpu.memory_space<vmem>>, vector<16x256xf32>,
    } else {
    }
    %c0 = arith.constant 0 : index
    %c0_1 = arith.constant 0 : index
    %3 = vector.load %arg7[%c0, %c0_1] : memref<16x256xf32, #tpu.memory_space<vmem>>, vector<16x256xf32>
    %c0_2 = arith.constant 0 : index
    %c0_3 = arith.constant 0 : index
    %4 = vector.load %arg3[%c0_2, %c0_3] : memref<16x256xbf16, #tpu.memory_space<vmem>>, vector<16x256xbf16>
    %c0_4 = arith.constant 0 : index
    %c0_5 = arith.constant 0 : index
    %5 = vector.load %arg4[%c0_4, %c0_5] : memref<256x256xbf16, #tpu.memory_space<vmem>>, vector<256x256xbf16>
    %cst = arith.constant dense<0.000000e+00> : vector<16x256xf32>
    %6 = tpu.matmul %4, %5, %cst {dimension_numbers = #tpu.dot_dimension_numbers<[1], [0], [0], [1], [0, 0, 1, 1], [], []>} : vector<16x256xbf16>, vector<256x256xbf16>, vector<16x256xf32> -> vector<16x256xf32>
    %7 = arith.addf %3, %6 : vector<16x256xf32>
    %c0_6 = arith.constant 0 : index
    %c0_7 = arith.constant 0 : index
    %8 = vector.load %arg7[%c0_6, %c0_7] : memref<16x256xf32, #tpu.memory_space<vmem>>, vector<16x256xf32>
    tpu.vector_store %arg7[%c0_6, %c0_7], %7 {strides = array<i32>} : memref<16x256xf32, #tpu.memory_space<vmem>>, vector<16x256xf32>,
    %c4_i32 = arith.constant 4 : i32
    %9 = arith.cmpi eq, %arg2, %c4_i32 : i32
    %10 = arith.extui %9 : i1 to i32
    %c0_i32_8 = arith.constant 0 : i32
    %11 = arith.cmpi ne, %10, %c0_i32_8 : i32
    scf.if %11 {
      %c0_9 = arith.constant 0 : index
      %c0_10 = arith.constant 0 : index
      %12 = vector.load %arg7[%c0_9, %c0_10] : memref<16x256xf32, #tpu.memory_space<vmem>>, vector<16x256xf32>
      %13 = arith.truncf %12 : vector<16x256xf32> to vector<16x256xbf16>
      %c0_11 = arith.constant 0 : index
      %c0_12 = arith.constant 0 : index
      %14 = vector.load %arg5[%c0_11, %c0_12] : memref<16x256xbf16, #tpu.memory_space<vmem>>, vector<16x256xbf16>
      tpu.vector_store %arg5[%c0_11, %c0_12], %13 {strides = array<i32>} : memref<16x256xbf16, #tpu.memory_space<vmem>>, vector<16x256xbf16>,
      %cst_13 = arith.constant dense<0.000000e+00> : vector<256xf32>
      %15 = vector.multi_reduction <add>, %12, %cst_13 [0] : vector<16x256xf32> to vector<256xf32>
      %16 = vector.shape_cast %15 : vector<256xf32> to vector<1x256xf32>
      %17 = arith.mulf %12, %12 : vector<16x256xf32>
      %cst_14 = arith.constant dense<0.000000e+00> : vector<256xf32>
      %18 = vector.multi_reduction <add>, %17, %cst_14 [0] : vector<16x256xf32> to vector<256xf32>
      %19 = vector.shape_cast %18 : vector<256xf32> to vector<1x256xf32>
      %20 = tpu.concatenate %16, %19 in 0 : vector<1x256xf32>, vector<1x256xf32> -> vector<2x256xf32>
      %21 = vector.shape_cast %20 : vector<2x256xf32> to vector<1x2x256xf32>
      %c0_15 = arith.constant 0 : index
      %c0_16 = arith.constant 0 : index
      %c0_17 = arith.constant 0 : index
      %22 = vector.load %arg6[%c0_15, %c0_16, %c0_17] : memref<1x2x256xf32, #tpu.memory_space<vmem>>, vector<1x2x256xf32>
      tpu.vector_store %arg6[%c0_15, %c0_16, %c0_17], %21 {strides = array<i32>} : memref<1x2x256xf32, #tpu.memory_space<vmem>>, vector<1x2x256xf32>,
    } else {
    }
    return
  }
  func.func @transform_0(%arg0: i32, %arg1: i32, %arg2: i32) -> (i32, i32) {
    %c0_i32 = arith.constant 0 : i32
    return %arg0, %arg2 : i32, i32
  }
  func.func @transform_1(%arg0: i32, %arg1: i32, %arg2: i32) -> (i32, i32) {
    %c0_i32 = arith.constant 0 : i32
    return %arg2, %arg1 : i32, i32
  }
  func.func @transform_2(%arg0: i32, %arg1: i32, %arg2: i32) -> (i32, i32) {
    %c0_i32 = arith.constant 0 : i32
    return %arg0, %arg1 : i32, i32
  }
  func.func @transform_3(%arg0: i32, %arg1: i32, %arg2: i32) -> (i32, i32, i32) {
    %c0_i32 = arith.constant 0 : i32
    %c0_i32_0 = arith.constant 0 : i32
    return %arg0, %c0_i32, %arg1 : i32, i32, i32
  }
}

module attributes {stable_mosaic.version = 11 : i64} {
  func.func @_bn_norm_kernel(%arg0: i32, %arg1: memref<16x256xbf16, #tpu.memory_space<vmem>>, %arg2: memref<1x256xf32, #tpu.memory_space<vmem>>, %arg3: memref<1x256xf32, #tpu.memory_space<vmem>>, %arg4: memref<16x256xbf16, #tpu.memory_space<vmem>>) attributes {dimension_semantics = [#tpu.dimension_semantics<parallel>], iteration_bounds = array<i64: 1>, scalar_prefetch = 0 : i64, scratch_operands = 0 : i64, tpu.core_type = #tpu.core_type<tc>, window_params = [{transform_indices = @transform_0, window_bounds = array<i64: 16, 256>}, {pipeline_mode = #tpu.pipeline_mode<synchronous>, transform_indices = @transform_1, window_bounds = array<i64: 1, 256>}, {pipeline_mode = #tpu.pipeline_mode<synchronous>, transform_indices = @transform_2, window_bounds = array<i64: 1, 256>}, {transform_indices = @transform_3, window_bounds = array<i64: 16, 256>}]} {
    %c0 = arith.constant 0 : index
    %c0_0 = arith.constant 0 : index
    %0 = vector.load %arg1[%c0, %c0_0] : memref<16x256xbf16, #tpu.memory_space<vmem>>, vector<16x256xbf16>
    %1 = arith.extf %0 : vector<16x256xbf16> to vector<16x256xf32>
    %c0_1 = arith.constant 0 : index
    %c0_2 = arith.constant 0 : index
    %2 = vector.load %arg2[%c0_1, %c0_2] : memref<1x256xf32, #tpu.memory_space<vmem>>, vector<1x256xf32>
    %3 = vector.broadcast %2 : vector<1x256xf32> to vector<16x256xf32>
    %4 = arith.mulf %1, %3 : vector<16x256xf32>
    %c0_3 = arith.constant 0 : index
    %c0_4 = arith.constant 0 : index
    %5 = vector.load %arg3[%c0_3, %c0_4] : memref<1x256xf32, #tpu.memory_space<vmem>>, vector<1x256xf32>
    %6 = vector.broadcast %5 : vector<1x256xf32> to vector<16x256xf32>
    %7 = arith.addf %4, %6 : vector<16x256xf32>
    %cst = arith.constant 0.000000e+00 : f32
    %8 = vector.broadcast %cst : f32 to vector<16x256xf32>
    %9 = arith.maximumf %7, %8 : vector<16x256xf32>
    %10 = arith.truncf %9 : vector<16x256xf32> to vector<16x256xbf16>
    %c0_5 = arith.constant 0 : index
    %c0_6 = arith.constant 0 : index
    %11 = vector.load %arg4[%c0_5, %c0_6] : memref<16x256xbf16, #tpu.memory_space<vmem>>, vector<16x256xbf16>
    tpu.vector_store %arg4[%c0_5, %c0_6], %10 {strides = array<i32>} : memref<16x256xbf16, #tpu.memory_space<vmem>>, vector<16x256xbf16>,
    return
  }
  func.func @transform_0(%arg0: i32) -> (i32, i32) {
    %c0_i32 = arith.constant 0 : i32
    %c0_i32_0 = arith.constant 0 : i32
    return %arg0, %c0_i32 : i32, i32
  }
  func.func @transform_1(%arg0: i32) -> (i32, i32) {
    %c0_i32 = arith.constant 0 : i32
    %c0_i32_0 = arith.constant 0 : i32
    %c0_i32_1 = arith.constant 0 : i32
    return %c0_i32, %c0_i32_0 : i32, i32
  }
  func.func @transform_2(%arg0: i32) -> (i32, i32) {
    %c0_i32 = arith.constant 0 : i32
    %c0_i32_0 = arith.constant 0 : i32
    %c0_i32_1 = arith.constant 0 : i32
    return %c0_i32, %c0_i32_0 : i32, i32
  }
  func.func @transform_3(%arg0: i32) -> (i32, i32) {
    %c0_i32 = arith.constant 0 : i32
    %c0_i32_0 = arith.constant 0 : i32
    return %arg0, %c0_i32 : i32, i32
  }
}

module attributes {stable_mosaic.version = 11 : i64} {
  func.func @_matmul_kernel(%arg0: i32, %arg1: i32, %arg2: i32, %arg3: memref<16x256xbf16, #tpu.memory_space<vmem>>, %arg4: memref<256x256xbf16, #tpu.memory_space<vmem>>, %arg5: memref<16x256xbf16, #tpu.memory_space<vmem>>, %arg6: memref<1x2x256xf32, #tpu.memory_space<vmem>>, %arg7: memref<16x256xf32, #tpu.memory_space<vmem>>) attributes {dimension_semantics = [#tpu.dimension_semantics<parallel>, #tpu.dimension_semantics<parallel>, #tpu.dimension_semantics<arbitrary>], iteration_bounds = array<i64: 1, 1, 9>, scalar_prefetch = 0 : i64, scratch_operands = 1 : i64, tpu.core_type = #tpu.core_type<tc>, window_params = [{transform_indices = @transform_0, window_bounds = array<i64: 16, 256>}, {transform_indices = @transform_1, window_bounds = array<i64: 256, 256>}, {transform_indices = @transform_2, window_bounds = array<i64: 16, 256>}, {transform_indices = @transform_3, window_bounds = array<i64: 1, 2, 256>}]} {
    %c0_i32 = arith.constant 0 : i32
    %0 = arith.cmpi eq, %arg2, %c0_i32 : i32
    %1 = arith.extui %0 : i1 to i32
    %c0_i32_0 = arith.constant 0 : i32
    %2 = arith.cmpi ne, %1, %c0_i32_0 : i32
    scf.if %2 {
      %cst_9 = arith.constant 0.000000e+00 : f32
      %12 = vector.broadcast %cst_9 : f32 to vector<16x256xf32>
      %c0_10 = arith.constant 0 : index
      %c0_11 = arith.constant 0 : index
      %13 = vector.load %arg7[%c0_10, %c0_11] : memref<16x256xf32, #tpu.memory_space<vmem>>, vector<16x256xf32>
      tpu.vector_store %arg7[%c0_10, %c0_11], %12 {strides = array<i32>} : memref<16x256xf32, #tpu.memory_space<vmem>>, vector<16x256xf32>,
    } else {
    }
    %c0 = arith.constant 0 : index
    %c0_1 = arith.constant 0 : index
    %3 = vector.load %arg7[%c0, %c0_1] : memref<16x256xf32, #tpu.memory_space<vmem>>, vector<16x256xf32>
    %c0_2 = arith.constant 0 : index
    %c0_3 = arith.constant 0 : index
    %4 = vector.load %arg3[%c0_2, %c0_3] : memref<16x256xbf16, #tpu.memory_space<vmem>>, vector<16x256xbf16>
    %c0_4 = arith.constant 0 : index
    %c0_5 = arith.constant 0 : index
    %5 = vector.load %arg4[%c0_4, %c0_5] : memref<256x256xbf16, #tpu.memory_space<vmem>>, vector<256x256xbf16>
    %cst = arith.constant dense<0.000000e+00> : vector<16x256xf32>
    %6 = tpu.matmul %4, %5, %cst {dimension_numbers = #tpu.dot_dimension_numbers<[1], [0], [0], [1], [0, 0, 1, 1], [], []>} : vector<16x256xbf16>, vector<256x256xbf16>, vector<16x256xf32> -> vector<16x256xf32>
    %7 = arith.addf %3, %6 : vector<16x256xf32>
    %c0_6 = arith.constant 0 : index
    %c0_7 = arith.constant 0 : index
    %8 = vector.load %arg7[%c0_6, %c0_7] : memref<16x256xf32, #tpu.memory_space<vmem>>, vector<16x256xf32>
    tpu.vector_store %arg7[%c0_6, %c0_7], %7 {strides = array<i32>} : memref<16x256xf32, #tpu.memory_space<vmem>>, vector<16x256xf32>,
    %c8_i32 = arith.constant 8 : i32
    %9 = arith.cmpi eq, %arg2, %c8_i32 : i32
    %10 = arith.extui %9 : i1 to i32
    %c0_i32_8 = arith.constant 0 : i32
    %11 = arith.cmpi ne, %10, %c0_i32_8 : i32
    scf.if %11 {
      %c0_9 = arith.constant 0 : index
      %c0_10 = arith.constant 0 : index
      %12 = vector.load %arg7[%c0_9, %c0_10] : memref<16x256xf32, #tpu.memory_space<vmem>>, vector<16x256xf32>
      %13 = arith.truncf %12 : vector<16x256xf32> to vector<16x256xbf16>
      %c0_11 = arith.constant 0 : index
      %c0_12 = arith.constant 0 : index
      %14 = vector.load %arg5[%c0_11, %c0_12] : memref<16x256xbf16, #tpu.memory_space<vmem>>, vector<16x256xbf16>
      tpu.vector_store %arg5[%c0_11, %c0_12], %13 {strides = array<i32>} : memref<16x256xbf16, #tpu.memory_space<vmem>>, vector<16x256xbf16>,
      %cst_13 = arith.constant dense<0.000000e+00> : vector<256xf32>
      %15 = vector.multi_reduction <add>, %12, %cst_13 [0] : vector<16x256xf32> to vector<256xf32>
      %16 = vector.shape_cast %15 : vector<256xf32> to vector<1x256xf32>
      %17 = arith.mulf %12, %12 : vector<16x256xf32>
      %cst_14 = arith.constant dense<0.000000e+00> : vector<256xf32>
      %18 = vector.multi_reduction <add>, %17, %cst_14 [0] : vector<16x256xf32> to vector<256xf32>
      %19 = vector.shape_cast %18 : vector<256xf32> to vector<1x256xf32>
      %20 = tpu.concatenate %16, %19 in 0 : vector<1x256xf32>, vector<1x256xf32> -> vector<2x256xf32>
      %21 = vector.shape_cast %20 : vector<2x256xf32> to vector<1x2x256xf32>
      %c0_15 = arith.constant 0 : index
      %c0_16 = arith.constant 0 : index
      %c0_17 = arith.constant 0 : index
      %22 = vector.load %arg6[%c0_15, %c0_16, %c0_17] : memref<1x2x256xf32, #tpu.memory_space<vmem>>, vector<1x2x256xf32>
      tpu.vector_store %arg6[%c0_15, %c0_16, %c0_17], %21 {strides = array<i32>} : memref<1x2x256xf32, #tpu.memory_space<vmem>>, vector<1x2x256xf32>,
    } else {
    }
    return
  }
  func.func @transform_0(%arg0: i32, %arg1: i32, %arg2: i32) -> (i32, i32) {
    %c0_i32 = arith.constant 0 : i32
    return %arg0, %arg2 : i32, i32
  }
  func.func @transform_1(%arg0: i32, %arg1: i32, %arg2: i32) -> (i32, i32) {
    %c0_i32 = arith.constant 0 : i32
    return %arg2, %arg1 : i32, i32
  }
  func.func @transform_2(%arg0: i32, %arg1: i32, %arg2: i32) -> (i32, i32) {
    %c0_i32 = arith.constant 0 : i32
    return %arg0, %arg1 : i32, i32
  }
  func.func @transform_3(%arg0: i32, %arg1: i32, %arg2: i32) -> (i32, i32, i32) {
    %c0_i32 = arith.constant 0 : i32
    %c0_i32_0 = arith.constant 0 : i32
    return %arg0, %c0_i32, %arg1 : i32, i32, i32
  }
}

module attributes {stable_mosaic.version = 11 : i64} {
  func.func @_bn_norm_kernel(%arg0: i32, %arg1: memref<16x256xbf16, #tpu.memory_space<vmem>>, %arg2: memref<1x256xf32, #tpu.memory_space<vmem>>, %arg3: memref<1x256xf32, #tpu.memory_space<vmem>>, %arg4: memref<16x256xbf16, #tpu.memory_space<vmem>>, %arg5: memref<16x256xbf16, #tpu.memory_space<vmem>>) attributes {dimension_semantics = [#tpu.dimension_semantics<parallel>], iteration_bounds = array<i64: 1>, scalar_prefetch = 0 : i64, scratch_operands = 0 : i64, tpu.core_type = #tpu.core_type<tc>, window_params = [{transform_indices = @transform_0, window_bounds = array<i64: 16, 256>}, {pipeline_mode = #tpu.pipeline_mode<synchronous>, transform_indices = @transform_1, window_bounds = array<i64: 1, 256>}, {pipeline_mode = #tpu.pipeline_mode<synchronous>, transform_indices = @transform_2, window_bounds = array<i64: 1, 256>}, {transform_indices = @transform_3, window_bounds = array<i64: 16, 256>}, {transform_indices = @transform_4, window_bounds = array<i64: 16, 256>}]} {
    %c0 = arith.constant 0 : index
    %c0_0 = arith.constant 0 : index
    %0 = vector.load %arg1[%c0, %c0_0] : memref<16x256xbf16, #tpu.memory_space<vmem>>, vector<16x256xbf16>
    %1 = arith.extf %0 : vector<16x256xbf16> to vector<16x256xf32>
    %c0_1 = arith.constant 0 : index
    %c0_2 = arith.constant 0 : index
    %2 = vector.load %arg2[%c0_1, %c0_2] : memref<1x256xf32, #tpu.memory_space<vmem>>, vector<1x256xf32>
    %3 = vector.broadcast %2 : vector<1x256xf32> to vector<16x256xf32>
    %4 = arith.mulf %1, %3 : vector<16x256xf32>
    %c0_3 = arith.constant 0 : index
    %c0_4 = arith.constant 0 : index
    %5 = vector.load %arg3[%c0_3, %c0_4] : memref<1x256xf32, #tpu.memory_space<vmem>>, vector<1x256xf32>
    %6 = vector.broadcast %5 : vector<1x256xf32> to vector<16x256xf32>
    %7 = arith.addf %4, %6 : vector<16x256xf32>
    %c0_5 = arith.constant 0 : index
    %c0_6 = arith.constant 0 : index
    %8 = vector.load %arg4[%c0_5, %c0_6] : memref<16x256xbf16, #tpu.memory_space<vmem>>, vector<16x256xbf16>
    %9 = arith.extf %8 : vector<16x256xbf16> to vector<16x256xf32>
    %10 = arith.addf %7, %9 : vector<16x256xf32>
    %cst = arith.constant 0.000000e+00 : f32
    %11 = vector.broadcast %cst : f32 to vector<16x256xf32>
    %12 = arith.maximumf %10, %11 : vector<16x256xf32>
    %13 = arith.truncf %12 : vector<16x256xf32> to vector<16x256xbf16>
    %c0_7 = arith.constant 0 : index
    %c0_8 = arith.constant 0 : index
    %14 = vector.load %arg5[%c0_7, %c0_8] : memref<16x256xbf16, #tpu.memory_space<vmem>>, vector<16x256xbf16>
    tpu.vector_store %arg5[%c0_7, %c0_8], %13 {strides = array<i32>} : memref<16x256xbf16, #tpu.memory_space<vmem>>, vector<16x256xbf16>,
    return
  }
  func.func @transform_0(%arg0: i32) -> (i32, i32) {
    %c0_i32 = arith.constant 0 : i32
    %c0_i32_0 = arith.constant 0 : i32
    return %arg0, %c0_i32 : i32, i32
  }
  func.func @transform_1(%arg0: i32) -> (i32, i32) {
    %c0_i32 = arith.constant 0 : i32
    %c0_i32_0 = arith.constant 0 : i32
    %c0_i32_1 = arith.constant 0 : i32
    return %c0_i32, %c0_i32_0 : i32, i32
  }
  func.func @transform_2(%arg0: i32) -> (i32, i32) {
    %c0_i32 = arith.constant 0 : i32
    %c0_i32_0 = arith.constant 0 : i32
    %c0_i32_1 = arith.constant 0 : i32
    return %c0_i32, %c0_i32_0 : i32, i32
  }
  func.func @transform_3(%arg0: i32) -> (i32, i32) {
    %c0_i32 = arith.constant 0 : i32
    %c0_i32_0 = arith.constant 0 : i32
    return %arg0, %c0_i32 : i32, i32
  }
  func.func @transform_4(%arg0: i32) -> (i32, i32) {
    %c0_i32 = arith.constant 0 : i32
    %c0_i32_0 = arith.constant 0 : i32
    return %arg0, %c0_i32 : i32, i32
  }
}

module attributes {stable_mosaic.version = 11 : i64} {
  func.func @_matmul_kernel(%arg0: i32, %arg1: i32, %arg2: i32, %arg3: memref<16x256xbf16, #tpu.memory_space<vmem>>, %arg4: memref<256x512xbf16, #tpu.memory_space<vmem>>, %arg5: memref<16x512xbf16, #tpu.memory_space<vmem>>, %arg6: memref<1x2x512xf32, #tpu.memory_space<vmem>>, %arg7: memref<16x512xf32, #tpu.memory_space<vmem>>) attributes {dimension_semantics = [#tpu.dimension_semantics<parallel>, #tpu.dimension_semantics<parallel>, #tpu.dimension_semantics<arbitrary>], iteration_bounds = array<i64: 1, 1, 1>, scalar_prefetch = 0 : i64, scratch_operands = 1 : i64, tpu.core_type = #tpu.core_type<tc>, window_params = [{transform_indices = @transform_0, window_bounds = array<i64: 16, 256>}, {transform_indices = @transform_1, window_bounds = array<i64: 256, 512>}, {transform_indices = @transform_2, window_bounds = array<i64: 16, 512>}, {transform_indices = @transform_3, window_bounds = array<i64: 1, 2, 512>}]} {
    %c0_i32 = arith.constant 0 : i32
    %0 = arith.cmpi eq, %arg2, %c0_i32 : i32
    %1 = arith.extui %0 : i1 to i32
    %c0_i32_0 = arith.constant 0 : i32
    %2 = arith.cmpi ne, %1, %c0_i32_0 : i32
    scf.if %2 {
      %cst_10 = arith.constant 0.000000e+00 : f32
      %12 = vector.broadcast %cst_10 : f32 to vector<16x512xf32>
      %c0_11 = arith.constant 0 : index
      %c0_12 = arith.constant 0 : index
      %13 = vector.load %arg7[%c0_11, %c0_12] : memref<16x512xf32, #tpu.memory_space<vmem>>, vector<16x512xf32>
      tpu.vector_store %arg7[%c0_11, %c0_12], %12 {strides = array<i32>} : memref<16x512xf32, #tpu.memory_space<vmem>>, vector<16x512xf32>,
    } else {
    }
    %c0 = arith.constant 0 : index
    %c0_1 = arith.constant 0 : index
    %3 = vector.load %arg7[%c0, %c0_1] : memref<16x512xf32, #tpu.memory_space<vmem>>, vector<16x512xf32>
    %c0_2 = arith.constant 0 : index
    %c0_3 = arith.constant 0 : index
    %4 = vector.load %arg3[%c0_2, %c0_3] : memref<16x256xbf16, #tpu.memory_space<vmem>>, vector<16x256xbf16>
    %c0_4 = arith.constant 0 : index
    %c0_5 = arith.constant 0 : index
    %5 = vector.load %arg4[%c0_4, %c0_5] : memref<256x512xbf16, #tpu.memory_space<vmem>>, vector<256x512xbf16>
    %cst = arith.constant dense<0.000000e+00> : vector<16x512xf32>
    %6 = tpu.matmul %4, %5, %cst {dimension_numbers = #tpu.dot_dimension_numbers<[1], [0], [0], [1], [0, 0, 1, 1], [], []>} : vector<16x256xbf16>, vector<256x512xbf16>, vector<16x512xf32> -> vector<16x512xf32>
    %7 = arith.addf %3, %6 : vector<16x512xf32>
    %c0_6 = arith.constant 0 : index
    %c0_7 = arith.constant 0 : index
    %8 = vector.load %arg7[%c0_6, %c0_7] : memref<16x512xf32, #tpu.memory_space<vmem>>, vector<16x512xf32>
    tpu.vector_store %arg7[%c0_6, %c0_7], %7 {strides = array<i32>} : memref<16x512xf32, #tpu.memory_space<vmem>>, vector<16x512xf32>,
    %c0_i32_8 = arith.constant 0 : i32
    %9 = arith.cmpi eq, %arg2, %c0_i32_8 : i32
    %10 = arith.extui %9 : i1 to i32
    %c0_i32_9 = arith.constant 0 : i32
    %11 = arith.cmpi ne, %10, %c0_i32_9 : i32
    scf.if %11 {
      %c0_10 = arith.constant 0 : index
      %c0_11 = arith.constant 0 : index
      %12 = vector.load %arg7[%c0_10, %c0_11] : memref<16x512xf32, #tpu.memory_space<vmem>>, vector<16x512xf32>
      %13 = arith.truncf %12 : vector<16x512xf32> to vector<16x512xbf16>
      %c0_12 = arith.constant 0 : index
      %c0_13 = arith.constant 0 : index
      %14 = vector.load %arg5[%c0_12, %c0_13] : memref<16x512xbf16, #tpu.memory_space<vmem>>, vector<16x512xbf16>
      tpu.vector_store %arg5[%c0_12, %c0_13], %13 {strides = array<i32>} : memref<16x512xbf16, #tpu.memory_space<vmem>>, vector<16x512xbf16>,
      %cst_14 = arith.constant dense<0.000000e+00> : vector<512xf32>
      %15 = vector.multi_reduction <add>, %12, %cst_14 [0] : vector<16x512xf32> to vector<512xf32>
      %16 = vector.shape_cast %15 : vector<512xf32> to vector<1x512xf32>
      %17 = arith.mulf %12, %12 : vector<16x512xf32>
      %cst_15 = arith.constant dense<0.000000e+00> : vector<512xf32>
      %18 = vector.multi_reduction <add>, %17, %cst_15 [0] : vector<16x512xf32> to vector<512xf32>
      %19 = vector.shape_cast %18 : vector<512xf32> to vector<1x512xf32>
      %20 = tpu.concatenate %16, %19 in 0 : vector<1x512xf32>, vector<1x512xf32> -> vector<2x512xf32>
      %21 = vector.shape_cast %20 : vector<2x512xf32> to vector<1x2x512xf32>
      %c0_16 = arith.constant 0 : index
      %c0_17 = arith.constant 0 : index
      %c0_18 = arith.constant 0 : index
      %22 = vector.load %arg6[%c0_16, %c0_17, %c0_18] : memref<1x2x512xf32, #tpu.memory_space<vmem>>, vector<1x2x512xf32>
      tpu.vector_store %arg6[%c0_16, %c0_17, %c0_18], %21 {strides = array<i32>} : memref<1x2x512xf32, #tpu.memory_space<vmem>>, vector<1x2x512xf32>,
    } else {
    }
    return
  }
  func.func @transform_0(%arg0: i32, %arg1: i32, %arg2: i32) -> (i32, i32) {
    %c0_i32 = arith.constant 0 : i32
    return %arg0, %arg2 : i32, i32
  }
  func.func @transform_1(%arg0: i32, %arg1: i32, %arg2: i32) -> (i32, i32) {
    %c0_i32 = arith.constant 0 : i32
    return %arg2, %arg1 : i32, i32
  }
  func.func @transform_2(%arg0: i32, %arg1: i32, %arg2: i32) -> (i32, i32) {
    %c0_i32 = arith.constant 0 : i32
    return %arg0, %arg1 : i32, i32
  }
  func.func @transform_3(%arg0: i32, %arg1: i32, %arg2: i32) -> (i32, i32, i32) {
    %c0_i32 = arith.constant 0 : i32
    %c0_i32_0 = arith.constant 0 : i32
    return %arg0, %c0_i32, %arg1 : i32, i32, i32
  }
}

module attributes {stable_mosaic.version = 11 : i64} {
  func.func @_bn_norm_kernel(%arg0: i32, %arg1: memref<16x512xbf16, #tpu.memory_space<vmem>>, %arg2: memref<1x512xf32, #tpu.memory_space<vmem>>, %arg3: memref<1x512xf32, #tpu.memory_space<vmem>>, %arg4: memref<16x512xbf16, #tpu.memory_space<vmem>>) attributes {dimension_semantics = [#tpu.dimension_semantics<parallel>], iteration_bounds = array<i64: 1>, scalar_prefetch = 0 : i64, scratch_operands = 0 : i64, tpu.core_type = #tpu.core_type<tc>, window_params = [{transform_indices = @transform_0, window_bounds = array<i64: 16, 512>}, {pipeline_mode = #tpu.pipeline_mode<synchronous>, transform_indices = @transform_1, window_bounds = array<i64: 1, 512>}, {pipeline_mode = #tpu.pipeline_mode<synchronous>, transform_indices = @transform_2, window_bounds = array<i64: 1, 512>}, {transform_indices = @transform_3, window_bounds = array<i64: 16, 512>}]} {
    %c0 = arith.constant 0 : index
    %c0_0 = arith.constant 0 : index
    %0 = vector.load %arg1[%c0, %c0_0] : memref<16x512xbf16, #tpu.memory_space<vmem>>, vector<16x512xbf16>
    %1 = arith.extf %0 : vector<16x512xbf16> to vector<16x512xf32>
    %c0_1 = arith.constant 0 : index
    %c0_2 = arith.constant 0 : index
    %2 = vector.load %arg2[%c0_1, %c0_2] : memref<1x512xf32, #tpu.memory_space<vmem>>, vector<1x512xf32>
    %3 = vector.broadcast %2 : vector<1x512xf32> to vector<16x512xf32>
    %4 = arith.mulf %1, %3 : vector<16x512xf32>
    %c0_3 = arith.constant 0 : index
    %c0_4 = arith.constant 0 : index
    %5 = vector.load %arg3[%c0_3, %c0_4] : memref<1x512xf32, #tpu.memory_space<vmem>>, vector<1x512xf32>
    %6 = vector.broadcast %5 : vector<1x512xf32> to vector<16x512xf32>
    %7 = arith.addf %4, %6 : vector<16x512xf32>
    %8 = arith.truncf %7 : vector<16x512xf32> to vector<16x512xbf16>
    %c0_5 = arith.constant 0 : index
    %c0_6 = arith.constant 0 : index
    %9 = vector.load %arg4[%c0_5, %c0_6] : memref<16x512xbf16, #tpu.memory_space<vmem>>, vector<16x512xbf16>
    tpu.vector_store %arg4[%c0_5, %c0_6], %8 {strides = array<i32>} : memref<16x512xbf16, #tpu.memory_space<vmem>>, vector<16x512xbf16>,
    return
  }
  func.func @transform_0(%arg0: i32) -> (i32, i32) {
    %c0_i32 = arith.constant 0 : i32
    %c0_i32_0 = arith.constant 0 : i32
    return %arg0, %c0_i32 : i32, i32
  }
  func.func @transform_1(%arg0: i32) -> (i32, i32) {
    %c0_i32 = arith.constant 0 : i32
    %c0_i32_0 = arith.constant 0 : i32
    %c0_i32_1 = arith.constant 0 : i32
    return %c0_i32, %c0_i32_0 : i32, i32
  }
  func.func @transform_2(%arg0: i32) -> (i32, i32) {
    %c0_i32 = arith.constant 0 : i32
    %c0_i32_0 = arith.constant 0 : i32
    %c0_i32_1 = arith.constant 0 : i32
    return %c0_i32, %c0_i32_0 : i32, i32
  }
  func.func @transform_3(%arg0: i32) -> (i32, i32) {
    %c0_i32 = arith.constant 0 : i32
    %c0_i32_0 = arith.constant 0 : i32
    return %arg0, %c0_i32 : i32, i32
  }
}

module attributes {stable_mosaic.version = 11 : i64} {
  func.func @_matmul_kernel(%arg0: i32, %arg1: i32, %arg2: i32, %arg3: memref<16x256xbf16, #tpu.memory_space<vmem>>, %arg4: memref<256x512xbf16, #tpu.memory_space<vmem>>, %arg5: memref<16x512xbf16, #tpu.memory_space<vmem>>, %arg6: memref<1x2x512xf32, #tpu.memory_space<vmem>>, %arg7: memref<16x512xf32, #tpu.memory_space<vmem>>) attributes {dimension_semantics = [#tpu.dimension_semantics<parallel>, #tpu.dimension_semantics<parallel>, #tpu.dimension_semantics<arbitrary>], iteration_bounds = array<i64: 1, 1, 9>, scalar_prefetch = 0 : i64, scratch_operands = 1 : i64, tpu.core_type = #tpu.core_type<tc>, window_params = [{transform_indices = @transform_0, window_bounds = array<i64: 16, 256>}, {transform_indices = @transform_1, window_bounds = array<i64: 256, 512>}, {transform_indices = @transform_2, window_bounds = array<i64: 16, 512>}, {transform_indices = @transform_3, window_bounds = array<i64: 1, 2, 512>}]} {
    %c0_i32 = arith.constant 0 : i32
    %0 = arith.cmpi eq, %arg2, %c0_i32 : i32
    %1 = arith.extui %0 : i1 to i32
    %c0_i32_0 = arith.constant 0 : i32
    %2 = arith.cmpi ne, %1, %c0_i32_0 : i32
    scf.if %2 {
      %cst_9 = arith.constant 0.000000e+00 : f32
      %12 = vector.broadcast %cst_9 : f32 to vector<16x512xf32>
      %c0_10 = arith.constant 0 : index
      %c0_11 = arith.constant 0 : index
      %13 = vector.load %arg7[%c0_10, %c0_11] : memref<16x512xf32, #tpu.memory_space<vmem>>, vector<16x512xf32>
      tpu.vector_store %arg7[%c0_10, %c0_11], %12 {strides = array<i32>} : memref<16x512xf32, #tpu.memory_space<vmem>>, vector<16x512xf32>,
    } else {
    }
    %c0 = arith.constant 0 : index
    %c0_1 = arith.constant 0 : index
    %3 = vector.load %arg7[%c0, %c0_1] : memref<16x512xf32, #tpu.memory_space<vmem>>, vector<16x512xf32>
    %c0_2 = arith.constant 0 : index
    %c0_3 = arith.constant 0 : index
    %4 = vector.load %arg3[%c0_2, %c0_3] : memref<16x256xbf16, #tpu.memory_space<vmem>>, vector<16x256xbf16>
    %c0_4 = arith.constant 0 : index
    %c0_5 = arith.constant 0 : index
    %5 = vector.load %arg4[%c0_4, %c0_5] : memref<256x512xbf16, #tpu.memory_space<vmem>>, vector<256x512xbf16>
    %cst = arith.constant dense<0.000000e+00> : vector<16x512xf32>
    %6 = tpu.matmul %4, %5, %cst {dimension_numbers = #tpu.dot_dimension_numbers<[1], [0], [0], [1], [0, 0, 1, 1], [], []>} : vector<16x256xbf16>, vector<256x512xbf16>, vector<16x512xf32> -> vector<16x512xf32>
    %7 = arith.addf %3, %6 : vector<16x512xf32>
    %c0_6 = arith.constant 0 : index
    %c0_7 = arith.constant 0 : index
    %8 = vector.load %arg7[%c0_6, %c0_7] : memref<16x512xf32, #tpu.memory_space<vmem>>, vector<16x512xf32>
    tpu.vector_store %arg7[%c0_6, %c0_7], %7 {strides = array<i32>} : memref<16x512xf32, #tpu.memory_space<vmem>>, vector<16x512xf32>,
    %c8_i32 = arith.constant 8 : i32
    %9 = arith.cmpi eq, %arg2, %c8_i32 : i32
    %10 = arith.extui %9 : i1 to i32
    %c0_i32_8 = arith.constant 0 : i32
    %11 = arith.cmpi ne, %10, %c0_i32_8 : i32
    scf.if %11 {
      %c0_9 = arith.constant 0 : index
      %c0_10 = arith.constant 0 : index
      %12 = vector.load %arg7[%c0_9, %c0_10] : memref<16x512xf32, #tpu.memory_space<vmem>>, vector<16x512xf32>
      %13 = arith.truncf %12 : vector<16x512xf32> to vector<16x512xbf16>
      %c0_11 = arith.constant 0 : index
      %c0_12 = arith.constant 0 : index
      %14 = vector.load %arg5[%c0_11, %c0_12] : memref<16x512xbf16, #tpu.memory_space<vmem>>, vector<16x512xbf16>
      tpu.vector_store %arg5[%c0_11, %c0_12], %13 {strides = array<i32>} : memref<16x512xbf16, #tpu.memory_space<vmem>>, vector<16x512xbf16>,
      %cst_13 = arith.constant dense<0.000000e+00> : vector<512xf32>
      %15 = vector.multi_reduction <add>, %12, %cst_13 [0] : vector<16x512xf32> to vector<512xf32>
      %16 = vector.shape_cast %15 : vector<512xf32> to vector<1x512xf32>
      %17 = arith.mulf %12, %12 : vector<16x512xf32>
      %cst_14 = arith.constant dense<0.000000e+00> : vector<512xf32>
      %18 = vector.multi_reduction <add>, %17, %cst_14 [0] : vector<16x512xf32> to vector<512xf32>
      %19 = vector.shape_cast %18 : vector<512xf32> to vector<1x512xf32>
      %20 = tpu.concatenate %16, %19 in 0 : vector<1x512xf32>, vector<1x512xf32> -> vector<2x512xf32>
      %21 = vector.shape_cast %20 : vector<2x512xf32> to vector<1x2x512xf32>
      %c0_15 = arith.constant 0 : index
      %c0_16 = arith.constant 0 : index
      %c0_17 = arith.constant 0 : index
      %22 = vector.load %arg6[%c0_15, %c0_16, %c0_17] : memref<1x2x512xf32, #tpu.memory_space<vmem>>, vector<1x2x512xf32>
      tpu.vector_store %arg6[%c0_15, %c0_16, %c0_17], %21 {strides = array<i32>} : memref<1x2x512xf32, #tpu.memory_space<vmem>>, vector<1x2x512xf32>,
    } else {
    }
    return
  }
  func.func @transform_0(%arg0: i32, %arg1: i32, %arg2: i32) -> (i32, i32) {
    %c0_i32 = arith.constant 0 : i32
    return %arg0, %arg2 : i32, i32
  }
  func.func @transform_1(%arg0: i32, %arg1: i32, %arg2: i32) -> (i32, i32) {
    %c0_i32 = arith.constant 0 : i32
    return %arg2, %arg1 : i32, i32
  }
  func.func @transform_2(%arg0: i32, %arg1: i32, %arg2: i32) -> (i32, i32) {
    %c0_i32 = arith.constant 0 : i32
    return %arg0, %arg1 : i32, i32
  }
  func.func @transform_3(%arg0: i32, %arg1: i32, %arg2: i32) -> (i32, i32, i32) {
    %c0_i32 = arith.constant 0 : i32
    %c0_i32_0 = arith.constant 0 : i32
    return %arg0, %c0_i32, %arg1 : i32, i32, i32
  }
}

module attributes {stable_mosaic.version = 11 : i64} {
  func.func @_bn_norm_kernel(%arg0: i32, %arg1: memref<16x512xbf16, #tpu.memory_space<vmem>>, %arg2: memref<1x512xf32, #tpu.memory_space<vmem>>, %arg3: memref<1x512xf32, #tpu.memory_space<vmem>>, %arg4: memref<16x512xbf16, #tpu.memory_space<vmem>>) attributes {dimension_semantics = [#tpu.dimension_semantics<parallel>], iteration_bounds = array<i64: 1>, scalar_prefetch = 0 : i64, scratch_operands = 0 : i64, tpu.core_type = #tpu.core_type<tc>, window_params = [{transform_indices = @transform_0, window_bounds = array<i64: 16, 512>}, {pipeline_mode = #tpu.pipeline_mode<synchronous>, transform_indices = @transform_1, window_bounds = array<i64: 1, 512>}, {pipeline_mode = #tpu.pipeline_mode<synchronous>, transform_indices = @transform_2, window_bounds = array<i64: 1, 512>}, {transform_indices = @transform_3, window_bounds = array<i64: 16, 512>}]} {
    %c0 = arith.constant 0 : index
    %c0_0 = arith.constant 0 : index
    %0 = vector.load %arg1[%c0, %c0_0] : memref<16x512xbf16, #tpu.memory_space<vmem>>, vector<16x512xbf16>
    %1 = arith.extf %0 : vector<16x512xbf16> to vector<16x512xf32>
    %c0_1 = arith.constant 0 : index
    %c0_2 = arith.constant 0 : index
    %2 = vector.load %arg2[%c0_1, %c0_2] : memref<1x512xf32, #tpu.memory_space<vmem>>, vector<1x512xf32>
    %3 = vector.broadcast %2 : vector<1x512xf32> to vector<16x512xf32>
    %4 = arith.mulf %1, %3 : vector<16x512xf32>
    %c0_3 = arith.constant 0 : index
    %c0_4 = arith.constant 0 : index
    %5 = vector.load %arg3[%c0_3, %c0_4] : memref<1x512xf32, #tpu.memory_space<vmem>>, vector<1x512xf32>
    %6 = vector.broadcast %5 : vector<1x512xf32> to vector<16x512xf32>
    %7 = arith.addf %4, %6 : vector<16x512xf32>
    %cst = arith.constant 0.000000e+00 : f32
    %8 = vector.broadcast %cst : f32 to vector<16x512xf32>
    %9 = arith.maximumf %7, %8 : vector<16x512xf32>
    %10 = arith.truncf %9 : vector<16x512xf32> to vector<16x512xbf16>
    %c0_5 = arith.constant 0 : index
    %c0_6 = arith.constant 0 : index
    %11 = vector.load %arg4[%c0_5, %c0_6] : memref<16x512xbf16, #tpu.memory_space<vmem>>, vector<16x512xbf16>
    tpu.vector_store %arg4[%c0_5, %c0_6], %10 {strides = array<i32>} : memref<16x512xbf16, #tpu.memory_space<vmem>>, vector<16x512xbf16>,
    return
  }
  func.func @transform_0(%arg0: i32) -> (i32, i32) {
    %c0_i32 = arith.constant 0 : i32
    %c0_i32_0 = arith.constant 0 : i32
    return %arg0, %c0_i32 : i32, i32
  }
  func.func @transform_1(%arg0: i32) -> (i32, i32) {
    %c0_i32 = arith.constant 0 : i32
    %c0_i32_0 = arith.constant 0 : i32
    %c0_i32_1 = arith.constant 0 : i32
    return %c0_i32, %c0_i32_0 : i32, i32
  }
  func.func @transform_2(%arg0: i32) -> (i32, i32) {
    %c0_i32 = arith.constant 0 : i32
    %c0_i32_0 = arith.constant 0 : i32
    %c0_i32_1 = arith.constant 0 : i32
    return %c0_i32, %c0_i32_0 : i32, i32
  }
  func.func @transform_3(%arg0: i32) -> (i32, i32) {
    %c0_i32 = arith.constant 0 : i32
    %c0_i32_0 = arith.constant 0 : i32
    return %arg0, %c0_i32 : i32, i32
  }
}

module attributes {stable_mosaic.version = 11 : i64} {
  func.func @_matmul_kernel(%arg0: i32, %arg1: i32, %arg2: i32, %arg3: memref<16x512xbf16, #tpu.memory_space<vmem>>, %arg4: memref<512x512xbf16, #tpu.memory_space<vmem>>, %arg5: memref<16x512xbf16, #tpu.memory_space<vmem>>, %arg6: memref<1x2x512xf32, #tpu.memory_space<vmem>>, %arg7: memref<16x512xf32, #tpu.memory_space<vmem>>) attributes {dimension_semantics = [#tpu.dimension_semantics<parallel>, #tpu.dimension_semantics<parallel>, #tpu.dimension_semantics<arbitrary>], iteration_bounds = array<i64: 1, 1, 9>, scalar_prefetch = 0 : i64, scratch_operands = 1 : i64, tpu.core_type = #tpu.core_type<tc>, window_params = [{transform_indices = @transform_0, window_bounds = array<i64: 16, 512>}, {transform_indices = @transform_1, window_bounds = array<i64: 512, 512>}, {transform_indices = @transform_2, window_bounds = array<i64: 16, 512>}, {transform_indices = @transform_3, window_bounds = array<i64: 1, 2, 512>}]} {
    %c0_i32 = arith.constant 0 : i32
    %0 = arith.cmpi eq, %arg2, %c0_i32 : i32
    %1 = arith.extui %0 : i1 to i32
    %c0_i32_0 = arith.constant 0 : i32
    %2 = arith.cmpi ne, %1, %c0_i32_0 : i32
    scf.if %2 {
      %cst_9 = arith.constant 0.000000e+00 : f32
      %12 = vector.broadcast %cst_9 : f32 to vector<16x512xf32>
      %c0_10 = arith.constant 0 : index
      %c0_11 = arith.constant 0 : index
      %13 = vector.load %arg7[%c0_10, %c0_11] : memref<16x512xf32, #tpu.memory_space<vmem>>, vector<16x512xf32>
      tpu.vector_store %arg7[%c0_10, %c0_11], %12 {strides = array<i32>} : memref<16x512xf32, #tpu.memory_space<vmem>>, vector<16x512xf32>,
    } else {
    }
    %c0 = arith.constant 0 : index
    %c0_1 = arith.constant 0 : index
    %3 = vector.load %arg7[%c0, %c0_1] : memref<16x512xf32, #tpu.memory_space<vmem>>, vector<16x512xf32>
    %c0_2 = arith.constant 0 : index
    %c0_3 = arith.constant 0 : index
    %4 = vector.load %arg3[%c0_2, %c0_3] : memref<16x512xbf16, #tpu.memory_space<vmem>>, vector<16x512xbf16>
    %c0_4 = arith.constant 0 : index
    %c0_5 = arith.constant 0 : index
    %5 = vector.load %arg4[%c0_4, %c0_5] : memref<512x512xbf16, #tpu.memory_space<vmem>>, vector<512x512xbf16>
    %cst = arith.constant dense<0.000000e+00> : vector<16x512xf32>
    %6 = tpu.matmul %4, %5, %cst {dimension_numbers = #tpu.dot_dimension_numbers<[1], [0], [0], [1], [0, 0, 1, 1], [], []>} : vector<16x512xbf16>, vector<512x512xbf16>, vector<16x512xf32> -> vector<16x512xf32>
    %7 = arith.addf %3, %6 : vector<16x512xf32>
    %c0_6 = arith.constant 0 : index
    %c0_7 = arith.constant 0 : index
    %8 = vector.load %arg7[%c0_6, %c0_7] : memref<16x512xf32, #tpu.memory_space<vmem>>, vector<16x512xf32>
    tpu.vector_store %arg7[%c0_6, %c0_7], %7 {strides = array<i32>} : memref<16x512xf32, #tpu.memory_space<vmem>>, vector<16x512xf32>,
    %c8_i32 = arith.constant 8 : i32
    %9 = arith.cmpi eq, %arg2, %c8_i32 : i32
    %10 = arith.extui %9 : i1 to i32
    %c0_i32_8 = arith.constant 0 : i32
    %11 = arith.cmpi ne, %10, %c0_i32_8 : i32
    scf.if %11 {
      %c0_9 = arith.constant 0 : index
      %c0_10 = arith.constant 0 : index
      %12 = vector.load %arg7[%c0_9, %c0_10] : memref<16x512xf32, #tpu.memory_space<vmem>>, vector<16x512xf32>
      %13 = arith.truncf %12 : vector<16x512xf32> to vector<16x512xbf16>
      %c0_11 = arith.constant 0 : index
      %c0_12 = arith.constant 0 : index
      %14 = vector.load %arg5[%c0_11, %c0_12] : memref<16x512xbf16, #tpu.memory_space<vmem>>, vector<16x512xbf16>
      tpu.vector_store %arg5[%c0_11, %c0_12], %13 {strides = array<i32>} : memref<16x512xbf16, #tpu.memory_space<vmem>>, vector<16x512xbf16>,
      %cst_13 = arith.constant dense<0.000000e+00> : vector<512xf32>
      %15 = vector.multi_reduction <add>, %12, %cst_13 [0] : vector<16x512xf32> to vector<512xf32>
      %16 = vector.shape_cast %15 : vector<512xf32> to vector<1x512xf32>
      %17 = arith.mulf %12, %12 : vector<16x512xf32>
      %cst_14 = arith.constant dense<0.000000e+00> : vector<512xf32>
      %18 = vector.multi_reduction <add>, %17, %cst_14 [0] : vector<16x512xf32> to vector<512xf32>
      %19 = vector.shape_cast %18 : vector<512xf32> to vector<1x512xf32>
      %20 = tpu.concatenate %16, %19 in 0 : vector<1x512xf32>, vector<1x512xf32> -> vector<2x512xf32>
      %21 = vector.shape_cast %20 : vector<2x512xf32> to vector<1x2x512xf32>
      %c0_15 = arith.constant 0 : index
      %c0_16 = arith.constant 0 : index
      %c0_17 = arith.constant 0 : index
      %22 = vector.load %arg6[%c0_15, %c0_16, %c0_17] : memref<1x2x512xf32, #tpu.memory_space<vmem>>, vector<1x2x512xf32>
      tpu.vector_store %arg6[%c0_15, %c0_16, %c0_17], %21 {strides = array<i32>} : memref<1x2x512xf32, #tpu.memory_space<vmem>>, vector<1x2x512xf32>,
    } else {
    }
    return
  }
  func.func @transform_0(%arg0: i32, %arg1: i32, %arg2: i32) -> (i32, i32) {
    %c0_i32 = arith.constant 0 : i32
    return %arg0, %arg2 : i32, i32
  }
  func.func @transform_1(%arg0: i32, %arg1: i32, %arg2: i32) -> (i32, i32) {
    %c0_i32 = arith.constant 0 : i32
    return %arg2, %arg1 : i32, i32
  }
  func.func @transform_2(%arg0: i32, %arg1: i32, %arg2: i32) -> (i32, i32) {
    %c0_i32 = arith.constant 0 : i32
    return %arg0, %arg1 : i32, i32
  }
  func.func @transform_3(%arg0: i32, %arg1: i32, %arg2: i32) -> (i32, i32, i32) {
    %c0_i32 = arith.constant 0 : i32
    %c0_i32_0 = arith.constant 0 : i32
    return %arg0, %c0_i32, %arg1 : i32, i32, i32
  }
}

module attributes {stable_mosaic.version = 11 : i64} {
  func.func @_bn_norm_kernel(%arg0: i32, %arg1: memref<16x512xbf16, #tpu.memory_space<vmem>>, %arg2: memref<1x512xf32, #tpu.memory_space<vmem>>, %arg3: memref<1x512xf32, #tpu.memory_space<vmem>>, %arg4: memref<16x512xbf16, #tpu.memory_space<vmem>>, %arg5: memref<16x512xbf16, #tpu.memory_space<vmem>>) attributes {dimension_semantics = [#tpu.dimension_semantics<parallel>], iteration_bounds = array<i64: 1>, scalar_prefetch = 0 : i64, scratch_operands = 0 : i64, tpu.core_type = #tpu.core_type<tc>, window_params = [{transform_indices = @transform_0, window_bounds = array<i64: 16, 512>}, {pipeline_mode = #tpu.pipeline_mode<synchronous>, transform_indices = @transform_1, window_bounds = array<i64: 1, 512>}, {pipeline_mode = #tpu.pipeline_mode<synchronous>, transform_indices = @transform_2, window_bounds = array<i64: 1, 512>}, {transform_indices = @transform_3, window_bounds = array<i64: 16, 512>}, {transform_indices = @transform_4, window_bounds = array<i64: 16, 512>}]} {
    %c0 = arith.constant 0 : index
    %c0_0 = arith.constant 0 : index
    %0 = vector.load %arg1[%c0, %c0_0] : memref<16x512xbf16, #tpu.memory_space<vmem>>, vector<16x512xbf16>
    %1 = arith.extf %0 : vector<16x512xbf16> to vector<16x512xf32>
    %c0_1 = arith.constant 0 : index
    %c0_2 = arith.constant 0 : index
    %2 = vector.load %arg2[%c0_1, %c0_2] : memref<1x512xf32, #tpu.memory_space<vmem>>, vector<1x512xf32>
    %3 = vector.broadcast %2 : vector<1x512xf32> to vector<16x512xf32>
    %4 = arith.mulf %1, %3 : vector<16x512xf32>
    %c0_3 = arith.constant 0 : index
    %c0_4 = arith.constant 0 : index
    %5 = vector.load %arg3[%c0_3, %c0_4] : memref<1x512xf32, #tpu.memory_space<vmem>>, vector<1x512xf32>
    %6 = vector.broadcast %5 : vector<1x512xf32> to vector<16x512xf32>
    %7 = arith.addf %4, %6 : vector<16x512xf32>
    %c0_5 = arith.constant 0 : index
    %c0_6 = arith.constant 0 : index
    %8 = vector.load %arg4[%c0_5, %c0_6] : memref<16x512xbf16, #tpu.memory_space<vmem>>, vector<16x512xbf16>
    %9 = arith.extf %8 : vector<16x512xbf16> to vector<16x512xf32>
    %10 = arith.addf %7, %9 : vector<16x512xf32>
    %cst = arith.constant 0.000000e+00 : f32
    %11 = vector.broadcast %cst : f32 to vector<16x512xf32>
    %12 = arith.maximumf %10, %11 : vector<16x512xf32>
    %13 = arith.truncf %12 : vector<16x512xf32> to vector<16x512xbf16>
    %c0_7 = arith.constant 0 : index
    %c0_8 = arith.constant 0 : index
    %14 = vector.load %arg5[%c0_7, %c0_8] : memref<16x512xbf16, #tpu.memory_space<vmem>>, vector<16x512xbf16>
    tpu.vector_store %arg5[%c0_7, %c0_8], %13 {strides = array<i32>} : memref<16x512xbf16, #tpu.memory_space<vmem>>, vector<16x512xbf16>,
    return
  }
  func.func @transform_0(%arg0: i32) -> (i32, i32) {
    %c0_i32 = arith.constant 0 : i32
    %c0_i32_0 = arith.constant 0 : i32
    return %arg0, %c0_i32 : i32, i32
  }
  func.func @transform_1(%arg0: i32) -> (i32, i32) {
    %c0_i32 = arith.constant 0 : i32
    %c0_i32_0 = arith.constant 0 : i32
    %c0_i32_1 = arith.constant 0 : i32
    return %c0_i32, %c0_i32_0 : i32, i32
  }
  func.func @transform_2(%arg0: i32) -> (i32, i32) {
    %c0_i32 = arith.constant 0 : i32
    %c0_i32_0 = arith.constant 0 : i32
    %c0_i32_1 = arith.constant 0 : i32
    return %c0_i32, %c0_i32_0 : i32, i32
  }
  func.func @transform_3(%arg0: i32) -> (i32, i32) {
    %c0_i32 = arith.constant 0 : i32
    %c0_i32_0 = arith.constant 0 : i32
    return %arg0, %c0_i32 : i32, i32
  }
  func.func @transform_4(%arg0: i32) -> (i32, i32) {
    %c0_i32 = arith.constant 0 : i32
    %c0_i32_0 = arith.constant 0 : i32
    return %arg0, %c0_i32 : i32, i32
  }
}

module attributes {stable_mosaic.version = 11 : i64} {
  func.func @_matmul_kernel(%arg0: i32, %arg1: i32, %arg2: i32, %arg3: memref<16x512xbf16, #tpu.memory_space<vmem>>, %arg4: memref<512x512xbf16, #tpu.memory_space<vmem>>, %arg5: memref<16x512xbf16, #tpu.memory_space<vmem>>, %arg6: memref<1x2x512xf32, #tpu.memory_space<vmem>>, %arg7: memref<16x512xf32, #tpu.memory_space<vmem>>) attributes {dimension_semantics = [#tpu.dimension_semantics<parallel>, #tpu.dimension_semantics<parallel>, #tpu.dimension_semantics<arbitrary>], iteration_bounds = array<i64: 1, 2, 1>, scalar_prefetch = 0 : i64, scratch_operands = 1 : i64, tpu.core_type = #tpu.core_type<tc>, window_params = [{transform_indices = @transform_0, window_bounds = array<i64: 16, 512>}, {transform_indices = @transform_1, window_bounds = array<i64: 512, 512>}, {transform_indices = @transform_2, window_bounds = array<i64: 16, 512>}, {transform_indices = @transform_3, window_bounds = array<i64: 1, 2, 512>}]} {
    %c0_i32 = arith.constant 0 : i32
    %0 = arith.cmpi eq, %arg2, %c0_i32 : i32
    %1 = arith.extui %0 : i1 to i32
    %c0_i32_0 = arith.constant 0 : i32
    %2 = arith.cmpi ne, %1, %c0_i32_0 : i32
    scf.if %2 {
      %cst_10 = arith.constant 0.000000e+00 : f32
      %12 = vector.broadcast %cst_10 : f32 to vector<16x512xf32>
      %c0_11 = arith.constant 0 : index
      %c0_12 = arith.constant 0 : index
      %13 = vector.load %arg7[%c0_11, %c0_12] : memref<16x512xf32, #tpu.memory_space<vmem>>, vector<16x512xf32>
      tpu.vector_store %arg7[%c0_11, %c0_12], %12 {strides = array<i32>} : memref<16x512xf32, #tpu.memory_space<vmem>>, vector<16x512xf32>,
    } else {
    }
    %c0 = arith.constant 0 : index
    %c0_1 = arith.constant 0 : index
    %3 = vector.load %arg7[%c0, %c0_1] : memref<16x512xf32, #tpu.memory_space<vmem>>, vector<16x512xf32>
    %c0_2 = arith.constant 0 : index
    %c0_3 = arith.constant 0 : index
    %4 = vector.load %arg3[%c0_2, %c0_3] : memref<16x512xbf16, #tpu.memory_space<vmem>>, vector<16x512xbf16>
    %c0_4 = arith.constant 0 : index
    %c0_5 = arith.constant 0 : index
    %5 = vector.load %arg4[%c0_4, %c0_5] : memref<512x512xbf16, #tpu.memory_space<vmem>>, vector<512x512xbf16>
    %cst = arith.constant dense<0.000000e+00> : vector<16x512xf32>
    %6 = tpu.matmul %4, %5, %cst {dimension_numbers = #tpu.dot_dimension_numbers<[1], [0], [0], [1], [0, 0, 1, 1], [], []>} : vector<16x512xbf16>, vector<512x512xbf16>, vector<16x512xf32> -> vector<16x512xf32>
    %7 = arith.addf %3, %6 : vector<16x512xf32>
    %c0_6 = arith.constant 0 : index
    %c0_7 = arith.constant 0 : index
    %8 = vector.load %arg7[%c0_6, %c0_7] : memref<16x512xf32, #tpu.memory_space<vmem>>, vector<16x512xf32>
    tpu.vector_store %arg7[%c0_6, %c0_7], %7 {strides = array<i32>} : memref<16x512xf32, #tpu.memory_space<vmem>>, vector<16x512xf32>,
    %c0_i32_8 = arith.constant 0 : i32
    %9 = arith.cmpi eq, %arg2, %c0_i32_8 : i32
    %10 = arith.extui %9 : i1 to i32
    %c0_i32_9 = arith.constant 0 : i32
    %11 = arith.cmpi ne, %10, %c0_i32_9 : i32
    scf.if %11 {
      %c0_10 = arith.constant 0 : index
      %c0_11 = arith.constant 0 : index
      %12 = vector.load %arg7[%c0_10, %c0_11] : memref<16x512xf32, #tpu.memory_space<vmem>>, vector<16x512xf32>
      %13 = arith.truncf %12 : vector<16x512xf32> to vector<16x512xbf16>
      %c0_12 = arith.constant 0 : index
      %c0_13 = arith.constant 0 : index
      %14 = vector.load %arg5[%c0_12, %c0_13] : memref<16x512xbf16, #tpu.memory_space<vmem>>, vector<16x512xbf16>
      tpu.vector_store %arg5[%c0_12, %c0_13], %13 {strides = array<i32>} : memref<16x512xbf16, #tpu.memory_space<vmem>>, vector<16x512xbf16>,
      %cst_14 = arith.constant dense<0.000000e+00> : vector<512xf32>
      %15 = vector.multi_reduction <add>, %12, %cst_14 [0] : vector<16x512xf32> to vector<512xf32>
      %16 = vector.shape_cast %15 : vector<512xf32> to vector<1x512xf32>
      %17 = arith.mulf %12, %12 : vector<16x512xf32>
      %cst_15 = arith.constant dense<0.000000e+00> : vector<512xf32>
      %18 = vector.multi_reduction <add>, %17, %cst_15 [0] : vector<16x512xf32> to vector<512xf32>
      %19 = vector.shape_cast %18 : vector<512xf32> to vector<1x512xf32>
      %20 = tpu.concatenate %16, %19 in 0 : vector<1x512xf32>, vector<1x512xf32> -> vector<2x512xf32>
      %21 = vector.shape_cast %20 : vector<2x512xf32> to vector<1x2x512xf32>
      %c0_16 = arith.constant 0 : index
      %c0_17 = arith.constant 0 : index
      %c0_18 = arith.constant 0 : index
      %22 = vector.load %arg6[%c0_16, %c0_17, %c0_18] : memref<1x2x512xf32, #tpu.memory_space<vmem>>, vector<1x2x512xf32>
      tpu.vector_store %arg6[%c0_16, %c0_17, %c0_18], %21 {strides = array<i32>} : memref<1x2x512xf32, #tpu.memory_space<vmem>>, vector<1x2x512xf32>,
    } else {
    }
    return
  }
  func.func @transform_0(%arg0: i32, %arg1: i32, %arg2: i32) -> (i32, i32) {
    %c0_i32 = arith.constant 0 : i32
    return %arg0, %arg2 : i32, i32
  }
  func.func @transform_1(%arg0: i32, %arg1: i32, %arg2: i32) -> (i32, i32) {
    %c0_i32 = arith.constant 0 : i32
    return %arg2, %arg1 : i32, i32
  }
  func.func @transform_2(%arg0: i32, %arg1: i32, %arg2: i32) -> (i32, i32) {
    %c0_i32 = arith.constant 0 : i32
    return %arg0, %arg1 : i32, i32
  }
  func.func @transform_3(%arg0: i32, %arg1: i32, %arg2: i32) -> (i32, i32, i32) {
    %c0_i32 = arith.constant 0 : i32
    %c0_i32_0 = arith.constant 0 : i32
    return %arg0, %c0_i32, %arg1 : i32, i32, i32
  }
}

module attributes {stable_mosaic.version = 11 : i64} {
  func.func @_bn_norm_kernel(%arg0: i32, %arg1: memref<16x1024xbf16, #tpu.memory_space<vmem>>, %arg2: memref<1x1024xf32, #tpu.memory_space<vmem>>, %arg3: memref<1x1024xf32, #tpu.memory_space<vmem>>, %arg4: memref<16x1024xbf16, #tpu.memory_space<vmem>>) attributes {dimension_semantics = [#tpu.dimension_semantics<parallel>], iteration_bounds = array<i64: 1>, scalar_prefetch = 0 : i64, scratch_operands = 0 : i64, tpu.core_type = #tpu.core_type<tc>, window_params = [{transform_indices = @transform_0, window_bounds = array<i64: 16, 1024>}, {pipeline_mode = #tpu.pipeline_mode<synchronous>, transform_indices = @transform_1, window_bounds = array<i64: 1, 1024>}, {pipeline_mode = #tpu.pipeline_mode<synchronous>, transform_indices = @transform_2, window_bounds = array<i64: 1, 1024>}, {transform_indices = @transform_3, window_bounds = array<i64: 16, 1024>}]} {
    %c0 = arith.constant 0 : index
    %c0_0 = arith.constant 0 : index
    %0 = vector.load %arg1[%c0, %c0_0] : memref<16x1024xbf16, #tpu.memory_space<vmem>>, vector<16x1024xbf16>
    %1 = arith.extf %0 : vector<16x1024xbf16> to vector<16x1024xf32>
    %c0_1 = arith.constant 0 : index
    %c0_2 = arith.constant 0 : index
    %2 = vector.load %arg2[%c0_1, %c0_2] : memref<1x1024xf32, #tpu.memory_space<vmem>>, vector<1x1024xf32>
    %3 = vector.broadcast %2 : vector<1x1024xf32> to vector<16x1024xf32>
    %4 = arith.mulf %1, %3 : vector<16x1024xf32>
    %c0_3 = arith.constant 0 : index
    %c0_4 = arith.constant 0 : index
    %5 = vector.load %arg3[%c0_3, %c0_4] : memref<1x1024xf32, #tpu.memory_space<vmem>>, vector<1x1024xf32>
    %6 = vector.broadcast %5 : vector<1x1024xf32> to vector<16x1024xf32>
    %7 = arith.addf %4, %6 : vector<16x1024xf32>
    %cst = arith.constant 0.000000e+00 : f32
    %8 = vector.broadcast %cst : f32 to vector<16x1024xf32>
    %9 = arith.maximumf %7, %8 : vector<16x1024xf32>
    %10 = arith.truncf %9 : vector<16x1024xf32> to vector<16x1024xbf16>
    %c0_5 = arith.constant 0 : index
    %c0_6 = arith.constant 0 : index
    %11 = vector.load %arg4[%c0_5, %c0_6] : memref<16x1024xbf16, #tpu.memory_space<vmem>>, vector<16x1024xbf16>
    tpu.vector_store %arg4[%c0_5, %c0_6], %10 {strides = array<i32>} : memref<16x1024xbf16, #tpu.memory_space<vmem>>, vector<16x1024xbf16>,
    return
  }
  func.func @transform_0(%arg0: i32) -> (i32, i32) {
    %c0_i32 = arith.constant 0 : i32
    %c0_i32_0 = arith.constant 0 : i32
    return %arg0, %c0_i32 : i32, i32
  }
  func.func @transform_1(%arg0: i32) -> (i32, i32) {
    %c0_i32 = arith.constant 0 : i32
    %c0_i32_0 = arith.constant 0 : i32
    %c0_i32_1 = arith.constant 0 : i32
    return %c0_i32, %c0_i32_0 : i32, i32
  }
  func.func @transform_2(%arg0: i32) -> (i32, i32) {
    %c0_i32 = arith.constant 0 : i32
    %c0_i32_0 = arith.constant 0 : i32
    %c0_i32_1 = arith.constant 0 : i32
    return %c0_i32, %c0_i32_0 : i32, i32
  }
  func.func @transform_3(%arg0: i32) -> (i32, i32) {
    %c0_i32 = arith.constant 0 : i32
    %c0_i32_0 = arith.constant 0 : i32
    return %arg0, %c0_i32 : i32, i32
  }
}

module attributes {stable_mosaic.version = 11 : i64} {
  func.func @_matmul_kernel(%arg0: i32, %arg1: i32, %arg2: i32, %arg3: memref<16x512xbf16, #tpu.memory_space<vmem>>, %arg4: memref<512x512xbf16, #tpu.memory_space<vmem>>, %arg5: memref<1x512xf32, #tpu.memory_space<vmem>>, %arg6: memref<16x512xf32, #tpu.memory_space<vmem>>, %arg7: memref<16x512xf32, #tpu.memory_space<vmem>>) attributes {dimension_semantics = [#tpu.dimension_semantics<parallel>, #tpu.dimension_semantics<parallel>, #tpu.dimension_semantics<arbitrary>], iteration_bounds = array<i64: 1, 1, 2>, scalar_prefetch = 0 : i64, scratch_operands = 1 : i64, tpu.core_type = #tpu.core_type<tc>, window_params = [{transform_indices = @transform_0, window_bounds = array<i64: 16, 512>}, {transform_indices = @transform_1, window_bounds = array<i64: 512, 512>}, {transform_indices = @transform_2, window_bounds = array<i64: 1, 512>}, {transform_indices = @transform_3, window_bounds = array<i64: 16, 512>}]} {
    %c0_i32 = arith.constant 0 : i32
    %0 = arith.cmpi eq, %arg2, %c0_i32 : i32
    %1 = arith.extui %0 : i1 to i32
    %c0_i32_0 = arith.constant 0 : i32
    %2 = arith.cmpi ne, %1, %c0_i32_0 : i32
    scf.if %2 {
      %cst_9 = arith.constant 0.000000e+00 : f32
      %12 = vector.broadcast %cst_9 : f32 to vector<16x512xf32>
      %c0_10 = arith.constant 0 : index
      %c0_11 = arith.constant 0 : index
      %13 = vector.load %arg7[%c0_10, %c0_11] : memref<16x512xf32, #tpu.memory_space<vmem>>, vector<16x512xf32>
      tpu.vector_store %arg7[%c0_10, %c0_11], %12 {strides = array<i32>} : memref<16x512xf32, #tpu.memory_space<vmem>>, vector<16x512xf32>,
    } else {
    }
    %c0 = arith.constant 0 : index
    %c0_1 = arith.constant 0 : index
    %3 = vector.load %arg7[%c0, %c0_1] : memref<16x512xf32, #tpu.memory_space<vmem>>, vector<16x512xf32>
    %c0_2 = arith.constant 0 : index
    %c0_3 = arith.constant 0 : index
    %4 = vector.load %arg3[%c0_2, %c0_3] : memref<16x512xbf16, #tpu.memory_space<vmem>>, vector<16x512xbf16>
    %c0_4 = arith.constant 0 : index
    %c0_5 = arith.constant 0 : index
    %5 = vector.load %arg4[%c0_4, %c0_5] : memref<512x512xbf16, #tpu.memory_space<vmem>>, vector<512x512xbf16>
    %cst = arith.constant dense<0.000000e+00> : vector<16x512xf32>
    %6 = tpu.matmul %4, %5, %cst {dimension_numbers = #tpu.dot_dimension_numbers<[1], [0], [0], [1], [0, 0, 1, 1], [], []>} : vector<16x512xbf16>, vector<512x512xbf16>, vector<16x512xf32> -> vector<16x512xf32>
    %7 = arith.addf %3, %6 : vector<16x512xf32>
    %c0_6 = arith.constant 0 : index
    %c0_7 = arith.constant 0 : index
    %8 = vector.load %arg7[%c0_6, %c0_7] : memref<16x512xf32, #tpu.memory_space<vmem>>, vector<16x512xf32>
    tpu.vector_store %arg7[%c0_6, %c0_7], %7 {strides = array<i32>} : memref<16x512xf32, #tpu.memory_space<vmem>>, vector<16x512xf32>,
    %c1_i32 = arith.constant 1 : i32
    %9 = arith.cmpi eq, %arg2, %c1_i32 : i32
    %10 = arith.extui %9 : i1 to i32
    %c0_i32_8 = arith.constant 0 : i32
    %11 = arith.cmpi ne, %10, %c0_i32_8 : i32
    scf.if %11 {
      %c0_9 = arith.constant 0 : index
      %c0_10 = arith.constant 0 : index
      %12 = vector.load %arg7[%c0_9, %c0_10] : memref<16x512xf32, #tpu.memory_space<vmem>>, vector<16x512xf32>
      %c0_11 = arith.constant 0 : index
      %c0_12 = arith.constant 0 : index
      %13 = vector.load %arg5[%c0_11, %c0_12] : memref<1x512xf32, #tpu.memory_space<vmem>>, vector<1x512xf32>
      %14 = vector.broadcast %13 : vector<1x512xf32> to vector<16x512xf32>
      %15 = arith.addf %12, %14 : vector<16x512xf32>
      %c0_13 = arith.constant 0 : index
      %c0_14 = arith.constant 0 : index
      %16 = vector.load %arg6[%c0_13, %c0_14] : memref<16x512xf32, #tpu.memory_space<vmem>>, vector<16x512xf32>
      tpu.vector_store %arg6[%c0_13, %c0_14], %15 {strides = array<i32>} : memref<16x512xf32, #tpu.memory_space<vmem>>, vector<16x512xf32>,
    } else {
    }
    return
  }
  func.func @transform_0(%arg0: i32, %arg1: i32, %arg2: i32) -> (i32, i32) {
    %c0_i32 = arith.constant 0 : i32
    return %arg0, %arg2 : i32, i32
  }
  func.func @transform_1(%arg0: i32, %arg1: i32, %arg2: i32) -> (i32, i32) {
    %c0_i32 = arith.constant 0 : i32
    return %arg2, %arg1 : i32, i32
  }
  func.func @transform_2(%arg0: i32, %arg1: i32, %arg2: i32) -> (i32, i32) {
    %c0_i32 = arith.constant 0 : i32
    %c0_i32_0 = arith.constant 0 : i32
    return %c0_i32, %arg1 : i32, i32
  }
  func.func @transform_3(%arg0: i32, %arg1: i32, %arg2: i32) -> (i32, i32) {
    %c0_i32 = arith.constant 0 : i32
    return %arg0, %arg1 : i32, i32
  }
}

</mosaic_0001>

<bundles_post_ra>
// kernel: viewpoint_forward.45
= control target key start
LH: loop header
LB: loop body
LE: loop exit
PB: predicated region body
PF: predicated region fallthrough
CT: control target
= control target key end

     0   :  { %s422_s0 = inlined_call_operand.vmem [shape: bf16[128,128], index: 0, kind: input, shape index: {}]   ;;  %s423_s1 = inlined_call_operand.vmem [shape: f32[1,128], index: 1, kind: input, shape index: {}]   ;;  %s424_s2 = inlined_call_operand.vmem [shape: f32[1,128], index: 2, kind: input, shape index: {}]   ;;  %s425_s3 = inlined_call_operand.vmem [shape: bf16[128,128], index: 3, kind: output, shape index: {}]  }
   0x1   :  { %v227_v0 = vld [vmem:[%s422_s0] sm:$0xff]   ;;  %v298_v4 = vld [vmem:[%s422_s0 + $0x8] sm:$0xff]   ;;  %v299_v5 = vld [vmem:[%s422_s0 + $0x10] sm:$0xff]  }
   0x2   :  { %v338_v1 = vld [vmem:[%s423_s1] ss:$0 sm:$0xff]  ;;  %v228_v2 = vunpack.c.l.bf16 %v227_v0  ;;  %v229_v3 = vunpack.c.h.bf16 %v227_v0  ;;  %v300_v6 = vld [vmem:[%s422_s0 + $0x18] sm:$0xff]   ;;  %v232_v8 = vunpack.c.l.bf16 %v298_v4  ;;  %v233_v9 = vunpack.c.h.bf16 %v298_v4  ;;  %v302_v33 = vld [vmem:[%s422_s0 + $0x28] sm:$0xff]  }
   0x3   :  { %v352_v7 = vld [vmem:[%s424_s2] ss:$0 sm:$0xff]  ;;  %v236_v10 = vunpack.c.l.bf16 %v299_v5  ;;  %v237_v11 = vunpack.c.h.bf16 %v299_v5  ;;  %v240_v14 = vunpack.c.l.bf16 %v300_v6  ;;  %v241_v15 = vunpack.c.h.bf16 %v300_v6  ;;  %v303_v38 = vld [vmem:[%s422_s0 + $0x30] sm:$0xff]   ;;  %v304_v43 = vld [vmem:[%s422_s0 + $0x38] sm:$0xff]  }
   0x4   :  { %v53_v12 = vmul.f32 %v228_v2, %v338_v1  ;;  %v54_v13 = vmul.f32 %v229_v3, %v338_v1  ;;  %v55_v16 = vmul.f32 %v232_v8, %v338_v1  ;;  %v56_v17 = vmul.f32 %v233_v9, %v338_v1  ;;  %v301_v28 = vld [vmem:[%s422_s0 + $0x20] sm:$0xff]  }
   0x5   :  { %v57_v18 = vmul.f32 %v236_v10, %v338_v1  ;;  %v58_v19 = vmul.f32 %v237_v11, %v338_v1  ;;  %v59_v22 = vmul.f32 %v240_v14, %v338_v1  ;;  %v60_v23 = vmul.f32 %v241_v15, %v338_v1 }
   0x6   :  { %v76_v20 = vadd.f32 %v352_v7, %v53_v12  ;;  %v77_v21 = vadd.f32 %v352_v7, %v54_v13  ;;  %v78_v24 = vadd.f32 %v352_v7, %v55_v16  ;;  %v79_v25 = vadd.f32 %v352_v7, %v56_v17 }
   0x7   :  { %v80_v26 = vadd.f32 %v352_v7, %v57_v18  ;;  %v81_v27 = vadd.f32 %v352_v7, %v58_v19  ;;  %v82_v31 = vadd.f32 %v352_v7, %v59_v22  ;;  %v83_v32 = vadd.f32 %v352_v7, %v60_v23 }
   0x8   :  { %v92_v29 = vmax.f32 %v76_v20, 0.0  ;;  %v93_v30 = vmax.f32 %v77_v21, 0.0  ;;  %v94_v34 = vmax.f32 %v78_v24, 0.0  ;;  %v95_v35 = vmax.f32 %v79_v25, 0.0 }
   0x9   :  { %v96_v36 = vmax.f32 %v80_v26, 0.0  ;;  %v97_v37 = vmax.f32 %v81_v27, 0.0  ;;  %v98_v40 = vmax.f32 %v82_v31, 0.0  ;;  %v99_v41 = vmax.f32 %v83_v32, 0.0 }
   0xa   :  { %v261_v39 = vpack.c.bf16 %v93_v30, %v92_v29  ;;  %v244_v42 = vunpack.c.l.bf16 %v301_v28  ;;  %v266_v44 = vpack.c.bf16 %v95_v35, %v94_v34  ;;  %v245_v46 = vunpack.c.h.bf16 %v301_v28 }
   0xb   :  { %v271_v45 = vpack.c.bf16 %v97_v37, %v96_v36  ;;  %v248_v47 = vunpack.c.l.bf16 %v302_v33  ;;  %v276_v48 = vpack.c.bf16 %v99_v41, %v98_v40  ;;  %v249_v50 = vunpack.c.h.bf16 %v302_v33 }
   0xc   :  { %262 = vst [vmem:[%s425_s3] sm:$0xff] %v261_v39   ;;  %v61_v49 = vmul.f32 %v244_v42, %v338_v1  ;;  %v252_v51 = vunpack.c.l.bf16 %v303_v38  ;;  %305 = vst [vmem:[%s425_s3 + $0x8] sm:$0xff] %v266_v44   ;;  %v62_v52 = vmul.f32 %v245_v46, %v338_v1  ;;  %v253_v54 = vunpack.c.h.bf16 %v303_v38 }
   0xd   :  { %306 = vst [vmem:[%s425_s3 + $0x10] sm:$0xff] %v271_v45   ;;  %v63_v53 = vmul.f32 %v248_v47, %v338_v1  ;;  %v256_v55 = vunpack.c.l.bf16 %v304_v43  ;;  %307 = vst [vmem:[%s425_s3 + $0x18] sm:$0xff] %v276_v48   ;;  %v64_v57 = vmul.f32 %v249_v50, %v338_v1  ;;  %v257_v59 = vunpack.c.h.bf16 %v304_v43 }
   0xe   :  { %v84_v56 = vadd.f32 %v352_v7, %v61_v49  ;;  %v65_v58 = vmul.f32 %v252_v51, %v338_v1  ;;  %v85_v60 = vadd.f32 %v352_v7, %v62_v52  ;;  %v66_v62 = vmul.f32 %v253_v54, %v338_v1 }
   0xf   :  { %v86_v61 = vadd.f32 %v352_v7, %v63_v53  ;;  %v67_v63 = vmul.f32 %v256_v55, %v338_v1  ;;  %v87_v2 = vadd.f32 %v352_v7, %v64_v57  ;;  %v68_v4 = vmul.f32 %v257_v59, %v338_v1 }
  0x10   :  { %v100_v0 = vmax.f32 %v84_v56, 0.0  ;;  %v88_v3 = vadd.f32 %v352_v7, %v65_v58  ;;  %v101_v5 = vmax.f32 %v85_v60, 0.0  ;;  %v89_v8 = vadd.f32 %v352_v7, %v66_v62 }
  0x11   :  { %v102_v6 = vmax.f32 %v86_v61, 0.0  ;;  %v90_v9 = vadd.f32 %v352_v7, %v67_v63  ;;  %v103_v10 = vmax.f32 %v87_v2, 0.0  ;;  %v91_v12 = vadd.f32 %v352_v7, %v68_v4 }
  0x12   :  { %v104_v11 = vmax.f32 %v88_v3, 0.0  ;;  %v281_v13 = vpack.c.bf16 %v101_v5, %v100_v0  ;;  %v105_v14 = vmax.f32 %v89_v8, 0.0 }
  0x13   :  { %v106_v15 = vmax.f32 %v90_v9, 0.0  ;;  %v286_v16 = vpack.c.bf16 %v103_v10, %v102_v6  ;;  %v107_v17 = vmax.f32 %v91_v12, 0.0 }
  0x14   :  { %308 = vst [vmem:[%s425_s3 + $0x20] sm:$0xff] %v281_v13   ;;  %v291_v1 = vpack.c.bf16 %v105_v14, %v104_v11 }
  0x15   :  { %309 = vst [vmem:[%s425_s3 + $0x28] sm:$0xff] %v286_v16   ;;  %v296_v18 = vpack.c.bf16 %v107_v17, %v106_v15 }
  0x16   :  { %310 = vst [vmem:[%s425_s3 + $0x30] sm:$0xff] %v291_v1  }
  0x17   :  { %311 = vst [vmem:[%s425_s3 + $0x38] sm:$0xff] %v296_v18  }

// kernel: viewpoint_forward.46
= control target key start
LH: loop header
LB: loop body
LE: loop exit
PB: predicated region body
PF: predicated region fallthrough
CT: control target
= control target key end

     0   :  { %s549_s15 = smov 0   ;;  %s626_s0 = inlined_call_operand.vmem [shape: bf16[2,5,5,128], index: 0, kind: input, shape index: {}]   ;;  %s627_s1 = inlined_call_operand.vmem [shape: bf16[2,5,5,128], index: 1, kind: input, shape index: {}]   ;;  %s628_s2 = inlined_call_operand.vmem [shape: bf16[2,5,5,128], index: 2, kind: input, shape index: {}]   ;;  %s629_s3 = inlined_call_operand.vmem [shape: bf16[2,5,5,128], index: 3, kind: input, shape index: {}]   ;;  %s630_s4 = inlined_call_operand.vmem [shape: bf16[2,4,4,128], index: 4, kind: output, shape index: {}]  }
   0x1 LB: > { %s493_s16 = sadd.s32 4294967295, %s522_s15   ;;  %p497_p0 = scmp.ge.s32.totalorder %s522_s15, 1  ;;  %s522_s15 = sphi %s549_s15, %s14_s15  }
   0x2   : > { %p192_p1 = scmp.lt.s32.totalorder %s522_s15, 3 }
   0x4   : > { %p193_p2 = pnand %p497_p0, %p192_p1 }
   0x5   : > { %p233_p3 = scmp.lt.s32.totalorder (!%p193_p2), %s493_s16, 1 }
   0x6   : > { %196 = sbr.rel (%p193_p2) target bundleno = 48 (0x30), region = 36 }
   0xb   : > { %s632_s16 = smov (!%p233_p3, %s493_s16), 1 }
   0xc   : > { %s560_s17 = smul.u32 20, %s632_s16  ;;  %s506_s30 = sshll.u32 %s632_s16, 3 }
   0xd   : > { %s257_s7 = scalar_lea.vmem %s630_s4, %s506_s30 }
   0xe   : > { %s566_s20 = scalar_lea.vmem %s626_s0, %s560_s17  ;;  %s572_s23 = scalar_lea.vmem %s628_s2, %s560_s17 }
   0xf   : > { %v258_v0 = vld [vmem:[%s566_s20] sm:$0x7]  ;;  %v259_v1 = vld [vmem:[%s566_s20 + $0x4] sm:$0x7]  ;;  %v260_v7 = vld [vmem:[%s566_s20 + $0x8] sm:$0x7]  ;;  %s596_s26 = scalar_lea.vmem %s627_s1, %s560_s17  ;;  %s608_s29 = scalar_lea.vmem %s629_s3, %s560_s17 }
  0x10   : > { %v577_v2 = vld [vmem:[%s572_s23] sm:$0x7]  ;;  %v277_v3 = vshrl.u32 %v258_v0, 16  ;;  %v280_v4 = vshll.u32 %v258_v0, 16  ;;  %v286_v5 = vshrl.u32 %v259_v1, 16  ;;  %v289_v6 = vshll.u32 %v259_v1, 16 }
  0x11   : > { %v351_v8 = vshrl.u32 %v577_v2, 16  ;;  %v354_v9 = vshll.u32 %v577_v2, 16  ;;  %v583_v10 = vld [vmem:[%s572_s23 + $0x4] sm:$0x7]  ;;  %v295_v17 = vshrl.u32 %v260_v7, 16  ;;  %v298_v18 = vshll.u32 %v260_v7, 16 }
  0x12   : > { %v279_v11 = vrot.slane %v277_v3, 4  ;;  %v282_v12 = vrot.slane %v280_v4, 5  ;;  %v288_v13 = vrot.slane %v286_v5, 4  ;;  %v291_v14 = vrot.slane %v289_v6, 5  ;;  %v261_v19 = vld [vmem:[%s566_s20 + $0xc] sm:$0x7] }
  0x13   : > { %v353_v15 = vrot.slane %v351_v8, 4  ;;  %v356_v16 = vrot.slane %v354_v9, 5  ;;  %v360_v22 = vshrl.u32 %v583_v10, 16  ;;  %v363_v23 = vshll.u32 %v583_v10, 16  ;;  %v589_v26 = vld [vmem:[%s572_s23 + $0x8] sm:$0x7] }
  0x14   : > { %v283_v20 = vor.u32 %v282_v12, %v279_v11  ;;  %v292_v21 = vor.u32 %v291_v14, %v288_v13  ;;  %v297_v24 = vrot.slane %v295_v17, 4  ;;  %v300_v25 = vrot.slane %v298_v18, 5  ;;  %v262_v32 = vld [vmem:[%s566_s20 + $0x10] sm:$0x7]  ;;  %v271_v43 = vld [vmem:[%s572_s23 + $0xc] sm:$0x7] }
  0x15   : > { %v304_v27 = vshrl.u32 %v261_v19, 16  ;;  %v362_v30 = vrot.slane %v360_v22, 4  ;;  %v365_v31 = vrot.slane %v363_v23, 5  ;;  %v307_v35 = vshll.u32 %v261_v19, 16  ;;  %v263_v49 = vld [vmem:[%s596_s26] sm:$0x7] }
  0x16   : > { %v284_v28 = vrot.slane %v283_v20, 4  ;;  %v293_v29 = vrot.slane %v292_v21, 4  ;;  %v301_v33 = vor.u32 %v300_v25, %v297_v24  ;;  %v357_v37 = vor.u32 %v356_v16, %v353_v15  ;;  %v264_v50 = vld [vmem:[%s596_s26 + $0x4] sm:$0x7]  ;;  %v266_v18 = vld [vmem:[%s596_s26 + $0xc] sm:$0x7] }
  0x17   : > { %v306_v34 = vrot.slane %v304_v27, 4  ;;  %v369_v39 = vshrl.u32 %v589_v26, 16  ;;  %v309_v41 = vrot.slane %v307_v35, 5  ;;  %v372_v42 = vshll.u32 %v589_v26, 16  ;;  %v272_v20 = vld [vmem:[%s608_s29] sm:$0x7] }
  0x18   : > { %v316_v36 = vmax.bf16 %v284_v28, %v258_v0  ;;  %v317_v38 = vmax.bf16 %v293_v29, %v259_v1  ;;  %v302_v40 = vrot.slane %v301_v33, 4  ;;  %v325_v44 = vshrl.u32 %v262_v32, 16  ;;  %v265_v0 = vld [vmem:[%s596_s26 + $0x8] sm:$0x7]  ;;  %v273_v21 = vld [vmem:[%s608_s29 + $0x4] sm:$0x7] }
  0x19   : > { %v366_v47 = vor.u32 %v365_v31, %v362_v30  ;;  %v371_v48 = vrot.slane %v369_v39, 4  ;;  %v310_v51 = vor.u32 %v309_v41, %v306_v34  ;;  %v374_v53 = vrot.slane %v372_v42, 5  ;;  %v274_v31 = vld [vmem:[%s608_s29 + $0x8] sm:$0x7] }
  0x1a   : > { %v320_v45 = vmax.bf16 %v316_v36, %v259_v1  ;;  %v321_v46 = vmax.bf16 %v317_v38, %v260_v7  ;;  %v318_v52 = vmax.bf16 %v302_v40, %v260_v7  ;;  %v327_v54 = vrot.slane %v325_v44, 4  ;;  %v275_v38 = vld [vmem:[%s608_s29 + $0xc] sm:$0x7] }
  0x1b   : > { %v328_v57 = vshll.u32 %v262_v32, 16  ;;  %v378_v58 = vshrl.u32 %v271_v43, 16  ;;  %v358_v59 = vrot.slane %v357_v37, 4  ;;  %v311_v60 = vrot.slane %v310_v51, 4 }
  0x1c   : > { %v334_v55 = vmax.bf16 %v320_v45, %v293_v29  ;;  %v335_v56 = vmax.bf16 %v321_v46, %v302_v40  ;;  %v322_v61 = vmax.bf16 %v318_v52, %v261_v19  ;;  %v381_v62 = vshll.u32 %v271_v43, 16  ;;  %v267_v29 = vld [vmem:[%s596_s26 + $0x10] sm:$0x7] }
  0x1d   : > { %v367_v3 = vrot.slane %v366_v47, 4  ;;  %v330_v4 = vrot.slane %v328_v57, 5  ;;  %v375_v6 = vor.u32 %v374_v53, %v371_v48  ;;  %v319_v7 = vmax.bf16 %v311_v60, %v261_v19 }
  0x1e   : > { %v338_v63 = vmax.bf16 %v334_v55, %v263_v49  ;;  %v339_v1 = vmax.bf16 %v335_v56, %v264_v50  ;;  %v336_v5 = vmax.bf16 %v322_v61, %v311_v60  ;;  %v380_v8 = vrot.slane %v378_v58, 4 }
  0x1f   : > { %v331_v12 = vor.u32 %v330_v4, %v327_v54  ;;  %v383_v13 = vrot.slane %v381_v62, 5  ;;  %v323_v15 = vmax.bf16 %v319_v7, %v262_v32  ;;  %v376_v23 = vrot.slane %v375_v6, 4 }
  0x20   : > { %v342_v9 = vmax.bf16 %v338_v63, %v264_v50  ;;  %v343_v11 = vmax.bf16 %v339_v1, %v265_v0  ;;  %v340_v14 = vmax.bf16 %v336_v5, %v265_v0 }
  0x21   : > { %v332_v19 = vrot.slane %v331_v12, 4  ;;  %v384_v28 = vor.u32 %v383_v13, %v380_v8 }
  0x22   : > { %v346_v16 = vmax.bf16 %v342_v9, %v577_v2  ;;  %v347_v17 = vmax.bf16 %v343_v11, %v583_v10  ;;  %v344_v22 = vmax.bf16 %v340_v14, %v266_v18 }
  0x23   : > { %v337_v27 = vmax.bf16 %v332_v19, %v323_v15  ;;  %v385_v35 = vrot.slane %v384_v28, 4 }
  0x24   : > { %v390_v24 = vmax.bf16 %v358_v59, %v346_v16  ;;  %v391_v25 = vmax.bf16 %v367_v3, %v347_v17  ;;  %v348_v2 = vmax.bf16 %v344_v22, %v589_v26 }
  0x25   : > { %v341_v32 = vmax.bf16 %v337_v27, %v266_v18 }
  0x26   : > { %v394_v10 = vmax.bf16 %v390_v24, %v272_v20  ;;  %v395_v30 = vmax.bf16 %v391_v25, %v273_v21  ;;  %v392_v33 = vmax.bf16 %v376_v23, %v348_v2 }
  0x27   : > { %v345_v34 = vmax.bf16 %v341_v32, %v267_v29 }
  0x28   : > { %398 = vst [vmem:[%s257_s7] sm:$0x3] %v394_v10  ;;  %399 = vst [vmem:[%s257_s7 + $0x2] sm:$0x3] %v395_v30  ;;  %v396_v36 = vmax.bf16 %v392_v33, %v274_v31 }
  0x29   : > { %v349_v37 = vmax.bf16 %v345_v34, %v271_v43 }
  0x2a   : > { %400 = vst [vmem:[%s257_s7 + $0x4] sm:$0x3] %v396_v36 }
  0x2b   : > { %v393_v39 = vmax.bf16 %v385_v35, %v349_v37 }
  0x2d   : > { %v397_v40 = vmax.bf16 %v393_v39, %v275_v38 }
  0x2f   : > { %401 = vst [vmem:[%s257_s7 + $0x6] sm:$0x3] %v397_v40 }
  0x30 PF: > { %s14_s15 = sadd.s32 1, %s522_s15  }
  0x31   : > { %p11_p4 = scmp.ge.s32.totalorder %s14_s15, 4  }
  0x33   :  { %13 = sbr.rel (!%p11_p4) target bundleno = 1 (0x1), region = 75 }

// kernel: viewpoint_forward.44
= control target key start
LH: loop header
LB: loop body
LE: loop exit
PB: predicated region body
PF: predicated region fallthrough
CT: control target
= control target key end

     0   :  { %vm560_vm0 = vcmask 1040384   ;;  %s969_s1 = inlined_call_operand.vmem [shape: bf16[256,128], index: 1, kind: input, shape index: {}]   ;;  %s970_s0 = inlined_call_operand.vmem [shape: bf16[128,256], index: 0, kind: input, shape index: {}]   ;;  %s971_s2 = inlined_call_operand.vmem [shape: bf16[128,128], index: 2, kind: output, shape index: {0}]   ;;  %s972_s3 = inlined_call_operand.vmem [shape: f32[1,2,128], index: 3, kind: output, shape index: {1}]  }
   0x1   :  { %v762_v0 = vld [vmem:[%s969_s1 + $0x78] sm:$0xff]   ;;  %v764_v2 = vld [vmem:[%s969_s1 + $0x70] sm:$0xff]   ;;  %v766_v4 = vld [vmem:[%s969_s1 + $0x68] sm:$0xff]  }
   0x2   :  { %v763_v1 = vld [vmem:[%s969_s1 + $0x38] sm:$0xff]   ;;  %682 = vmatprep.subr.bf16.mxu0 %v762_v0  ;;  %746 = vmatprep.subr.bf16.mxu1 %v762_v0  ;;  %v765_v3 = vld [vmem:[%s969_s1 + $0x30] sm:$0xff]   ;;  %v767_v5 = vld [vmem:[%s969_s1 + $0x28] sm:$0xff]  }
   0x3   :  { %683 = vmatpush3.bf16.msra.mxu0 %v763_v1  ;;  %754 = vmatpush3.bf16.msra.mxu1 %v763_v1  ;;  %v768_v6 = vld [vmem:[%s969_s1 + $0x60] sm:$0xff]   ;;  %v770_v8 = vld [vmem:[%s969_s1 + $0x58] sm:$0xff]   ;;  %v772_v10 = vld [vmem:[%s969_s1 + $0x50] sm:$0xff]  }
   0x4   :  { %684 = vmatprep.subr.bf16.mxu0 %v764_v2  ;;  %747 = vmatprep.subr.bf16.mxu1 %v764_v2  ;;  %v769_v7 = vld [vmem:[%s969_s1 + $0x20] sm:$0xff]   ;;  %v771_v9 = vld [vmem:[%s969_s1 + $0x18] sm:$0xff]   ;;  %v773_v12 = vld [vmem:[%s969_s1 + $0x10] sm:$0xff]  }
   0x5   :  { %v780_v11 = vld [vmem:[%s970_s0 + $0x4] ss:$8 sps:$4 sm:$0xff]   ;;  %v778_v18 = vld [vmem:[%s970_s0] ss:$8 sps:$4 sm:$0xff]   ;;  %v781_v20 = vld [vmem:[%s970_s0 + $0x14] ss:$8 sps:$4 sm:$0xff]  }
   0x6   :  { %v786_v13 = vld [vmem:[%s970_s0 + $0x44] ss:$8 sps:$4 sm:$0xff]   ;;  %306 = vmatprep.mubr.bf16.mxu0 %v780_v11  ;;  %v784_v19 = vld [vmem:[%s970_s0 + $0x40] ss:$8 sps:$4 sm:$0xff]   ;;  %v790_v21 = vld [vmem:[%s970_s0 + $0x54] ss:$8 sps:$4 sm:$0xff]  }
   0x7   :  { %685 = vmatpush3.bf16.msra.mxu0 %v765_v3  ;;  %755 = vmatpush3.bf16.msra.mxu1 %v765_v3  ;;  %v774_v14 = vld [vmem:[%s969_s1 + $0x48] sm:$0xff]   ;;  %v776_v16 = vld [vmem:[%s969_s1 + $0x40] sm:$0xff]   ;;  %v783_v22 = vld [vmem:[%s970_s0 + $0x10] ss:$8 sps:$4 sm:$0xff]  }
   0x8   :  { %686 = vmatprep.subr.bf16.mxu0 %v766_v4  ;;  %748 = vmatprep.subr.bf16.mxu1 %v766_v4  ;;  %v775_v15 = vld [vmem:[%s969_s1 + $0x8] sm:$0xff]   ;;  %v777_v17 = vld [vmem:[%s969_s1] sm:$0xff]   ;;  %v792_v23 = vld [vmem:[%s970_s0 + $0x50] ss:$8 sps:$4 sm:$0xff]  }
   0x9   :  { %338 = vmatprep.mubr.bf16.mxu1 %v786_v13  ;;  %v787_v24 = vld [vmem:[%s970_s0 + $0x24] ss:$8 sps:$4 sm:$0xff]   ;;  %v789_v26 = vld [vmem:[%s970_s0 + $0x20] ss:$8 sps:$4 sm:$0xff]   ;;  %v793_v28 = vld [vmem:[%s970_s0 + $0x34] ss:$8 sps:$4 sm:$0xff]  }
   0xa   :  { %v796_v25 = vld [vmem:[%s970_s0 + $0x64] ss:$8 sps:$4 sm:$0xff]   ;;  %v798_v27 = vld [vmem:[%s970_s0 + $0x60] ss:$8 sps:$4 sm:$0xff]   ;;  %v799_v29 = vld [vmem:[%s970_s0 + $0x74] ss:$8 sps:$4 sm:$0xff]  }
   0xb   :  { %687 = vmatpush3.bf16.msra.mxu0 %v767_v5  ;;  %756 = vmatpush3.bf16.msra.mxu1 %v767_v5  ;;  %v795_v30 = vld [vmem:[%s970_s0 + $0x30] ss:$8 sps:$4 sm:$0xff]  }
   0xc   :  { %688 = vmatprep.subr.bf16.mxu0 %v768_v6  ;;  %749 = vmatprep.subr.bf16.mxu1 %v768_v6  ;;  %v801_v31 = vld [vmem:[%s970_s0 + $0x70] ss:$8 sps:$4 sm:$0xff]  }
   0xf   :  { %689 = vmatpush3.bf16.msra.mxu0 %v769_v7  ;;  %757 = vmatpush3.bf16.msra.mxu1 %v769_v7 }
  0x10   :  { %690 = vmatprep.subr.bf16.mxu0 %v770_v8  ;;  %750 = vmatprep.subr.bf16.mxu1 %v770_v8 }
  0x13   :  { %691 = vmatpush3.bf16.msra.mxu0 %v771_v9  ;;  %758 = vmatpush3.bf16.msra.mxu1 %v771_v9 }
  0x14   :  { %692 = vmatprep.subr.bf16.mxu0 %v772_v10  ;;  %751 = vmatprep.subr.bf16.mxu1 %v772_v10 }
  0x17   :  { %693 = vmatpush3.bf16.msra.mxu0 %v773_v12  ;;  %759 = vmatpush3.bf16.msra.mxu1 %v773_v12 }
  0x18   :  { %694 = vmatprep.subr.bf16.mxu0 %v774_v14  ;;  %752 = vmatprep.subr.bf16.mxu1 %v774_v14 }
  0x1b   :  { %695 = vmatpush3.bf16.msra.mxu0 %v775_v15  ;;  %760 = vmatpush3.bf16.msra.mxu1 %v775_v15 }
  0x1c   :  { %696 = vmatprep.subr.bf16.mxu0 %v776_v16  ;;  %753 = vmatprep.subr.bf16.mxu1 %v776_v16 }
  0x1f   :  { %697 = vmatpush3.bf16.msra.mxu0 %v777_v17  ;;  %761 = vmatpush3.bf16.msra.mxu1 %v777_v17 }
  0x22   :  { %307 = vmatmul.mubr.bf16.vlgmr.msra.gmra.mxu0 %v778_v18  ;;  %339 = vmatmul.mubr.bf16.vlgmr.msra.gmra.mxu1 %v784_v19 }
  0x23   :  { %314 = vmatprep.mubr.bf16.mxu0 %v781_v20  ;;  %346 = vmatprep.mubr.bf16.mxu1 %v790_v21 }
  0x2a   :  { %315 = vmatmul.mubr.bf16.gmra.mxu0 %v783_v22  ;;  %347 = vmatmul.mubr.bf16.gmra.mxu1 %v792_v23 }
  0x2b   :  { %322 = vmatprep.mubr.bf16.mxu0 %v787_v24  ;;  %354 = vmatprep.mubr.bf16.mxu1 %v796_v25 }
  0x32   :  { %323 = vmatmul.mubr.bf16.gmra.mxu0 %v789_v26  ;;  %355 = vmatmul.mubr.bf16.gmra.mxu1 %v798_v27 }
  0x33   :  { %330 = vmatprep.mubr.bf16.mxu0 %v793_v28  ;;  %362 = vmatprep.mubr.bf16.mxu1 %v799_v29 }
  0x3a   :  { %331 = vmatmul.mubr.bf16.gmra.mxu0 %v795_v30  ;;  %363 = vmatmul.mubr.bf16.gmra.mxu1 %v801_v31 }
  0xe2   :  { %v698_v32 = vpop.f32.mrf.mxu0  ;;  %v722_v33 = vpop.f32.mrf.mxu1 }
  0xe4   :  { %v699_v34 = vpop.f32.mrf.mxu0  ;;  %v723_v35 = vpop.f32.mrf.mxu1 }
  0xe5   :  { %v918_v38 = vadd.f32 %v723_v35, %v722_v33  ;;  %v700_v41 = vadd.f32 %v699_v34, %v698_v32 }
  0xe6   :  { %v701_v36 = vpop.f32.mrf.mxu0  ;;  %v725_v37 = vpop.f32.mrf.mxu1 }
  0xe7   :  { %v523_v1 = vmul.f32 %v700_v41, %v700_v41 }
  0xe8   :  { %v702_v39 = vpop.f32.mrf.mxu0  ;;  %v726_v40 = vpop.f32.mrf.mxu1 }
  0xe9   :  { %v703_v42 = vadd.f32 %v702_v39, %v701_v36  ;;  %v920_v43 = vadd.f32 %v726_v40, %v725_v37 }
  0xea   :  { %v704_v44 = vpop.f32.mrf.mxu0  ;;  %v728_v45 = vpop.f32.mrf.mxu1 }
  0xeb   :  { %v638_v46 = vpack.c.bf16 %v703_v42, %v700_v41  ;;  %v658_v47 = vpack.c.bf16 %v920_v43, %v918_v38  ;;  %v524_v62 = vmul.f32 %v703_v42, %v703_v42  ;;  %v502_v6 = vadd.f32 %v703_v42, %v700_v41 }
  0xec   :  { %v705_v48 = vpop.f32.mrf.mxu0  ;;  %v729_v49 = vpop.f32.mrf.mxu1 }
  0xed   :  { %639 = vst [vmem:[%s971_s2] sm:$0xff] %v638_v46   ;;  %678 = vst [vmem:[%s971_s2 + $0x20] sm:$0xff] %v658_v47   ;;  %v930_v52 = vadd.f32 %v729_v49, %v728_v45  ;;  %v706_v55 = vadd.f32 %v705_v48, %v704_v44  ;;  %v539_v8 = vadd.f32 %v524_v62, %v523_v1 }
  0xee   :  { %v707_v50 = vpop.f32.mrf.mxu0  ;;  %v731_v51 = vpop.f32.mrf.mxu1  ;;  %v531_v47 = vmul.f32 %v918_v38, %v918_v38 }
  0xef   :  { %v525_v2 = vmul.f32 %v706_v55, %v706_v55  ;;  %v503_v12 = vadd.f32 %v706_v55, %v502_v6 }
  0xf0   :  { %v708_v53 = vpop.f32.mrf.mxu0  ;;  %v732_v54 = vpop.f32.mrf.mxu1 }
  0xf1   :  { %v709_v56 = vadd.f32 %v708_v53, %v707_v50  ;;  %v932_v57 = vadd.f32 %v732_v54, %v731_v51  ;;  %v540_v15 = vadd.f32 %v539_v8, %v525_v2  ;;  %v532_v50 = vmul.f32 %v920_v43, %v920_v43 }
  0xf2   :  { %v710_v58 = vpop.f32.mrf.mxu0  ;;  %v734_v59 = vpop.f32.mrf.mxu1  ;;  %v533_v54 = vmul.f32 %v930_v52, %v930_v52 }
  0xf3   :  { %v643_v60 = vpack.c.bf16 %v709_v56, %v706_v55  ;;  %v663_v61 = vpack.c.bf16 %v932_v57, %v930_v52  ;;  %v526_v9 = vmul.f32 %v709_v56, %v709_v56  ;;  %v504_v19 = vadd.f32 %v709_v56, %v503_v12 }
  0xf4   :  { %v711_v63 = vpop.f32.mrf.mxu0  ;;  %v735_v0 = vpop.f32.mrf.mxu1 }
  0xf5   :  { %675 = vst [vmem:[%s971_s2 + $0x8] sm:$0xff] %v643_v60   ;;  %679 = vst [vmem:[%s971_s2 + $0x28] sm:$0xff] %v663_v61   ;;  %v712_v3 = vadd.f32 %v711_v63, %v710_v58  ;;  %v736_v7 = vadd.f32 %v735_v0, %v734_v59  ;;  %v541_v22 = vadd.f32 %v540_v15, %v526_v9 }
  0xf6   :  { %v713_v4 = vpop.f32.mrf.mxu0  ;;  %v737_v5 = vpop.f32.mrf.mxu1 }
  0xf7   :  { %v527_v16 = vmul.f32 %v712_v3, %v712_v3  ;;  %v505_v26 = vadd.f32 %v712_v3, %v504_v19  ;;  %v535_v60 = vmul.f32 %v736_v7, %v736_v7 }
  0xf8   :  { %v714_v10 = vpop.f32.mrf.mxu0  ;;  %v738_v11 = vpop.f32.mrf.mxu1 }
  0xf9   :  { %v715_v13 = vadd.f32 %v714_v10, %v713_v4  ;;  %v739_v14 = vadd.f32 %v738_v11, %v737_v5  ;;  %v542_v28 = vadd.f32 %v541_v22, %v527_v16 }
  0xfa   :  { %v716_v17 = vpop.f32.mrf.mxu0  ;;  %v740_v18 = vpop.f32.mrf.mxu1 }
  0xfb   :  { %v648_v20 = vpack.c.bf16 %v715_v13, %v712_v3  ;;  %v668_v21 = vpack.c.bf16 %v739_v14, %v736_v7  ;;  %v528_v23 = vmul.f32 %v715_v13, %v715_v13  ;;  %v506_v31 = vadd.f32 %v715_v13, %v505_v26 }
  0xfc   :  { %v717_v24 = vpop.f32.mrf.mxu0  ;;  %v741_v25 = vpop.f32.mrf.mxu1  ;;  %v536_v0 = vmul.f32 %v739_v14, %v739_v14 }
  0xfd   :  { %676 = vst [vmem:[%s971_s2 + $0x10] sm:$0xff] %v648_v20   ;;  %v718_v27 = vadd.f32 %v717_v24, %v716_v17  ;;  %680 = vst [vmem:[%s971_s2 + $0x30] sm:$0xff] %v668_v21   ;;  %v742_v33 = vadd.f32 %v741_v25, %v740_v18  ;;  %v543_v34 = vadd.f32 %v542_v28, %v528_v23 }
  0xfe   :  { %v719_v29 = vpop.f32.mrf.mxu0  ;;  %v743_v30 = vpop.f32.mrf.mxu1 }
  0xff   :  { %v529_v32 = vmul.f32 %v718_v27, %v718_v27  ;;  %v507_v37 = vadd.f32 %v718_v27, %v506_v31  ;;  %v537_v3 = vmul.f32 %v742_v33, %v742_v33 }
 0x100   :  { %v720_v35 = vpop.f32.mrf.mxu0  ;;  %v744_v36 = vpop.f32.mrf.mxu1 }
 0x101   :  { %v721_v39 = vadd.f32 %v720_v35, %v719_v29  ;;  %v745_v40 = vadd.f32 %v744_v36, %v743_v30  ;;  %v544_v41 = vadd.f32 %v543_v34, %v529_v32 }
 0x103   :  { %v653_v42 = vpack.c.bf16 %v721_v39, %v718_v27  ;;  %v508_v44 = vadd.f32 %v721_v39, %v507_v37  ;;  %v530_v45 = vmul.f32 %v721_v39, %v721_v39  ;;  %v673_v46 = vpack.c.bf16 %v745_v40, %v742_v33 }
 0x104   :  { %v538_v6 = vmul.f32 %v745_v40, %v745_v40 }
 0x105   :  { %677 = vst [vmem:[%s971_s2 + $0x18] sm:$0xff] %v653_v42   ;;  %v509_v48 = vadd.f32 %v918_v38, %v508_v44  ;;  %v545_v49 = vadd.f32 %v544_v41, %v530_v45  ;;  %681 = vst [vmem:[%s971_s2 + $0x38] sm:$0xff] %v673_v46   ;;  %v534_v38 = vmul.f32 %v932_v57, %v932_v57 }
 0x107   :  { %v510_v51 = vadd.f32 %v920_v43, %v509_v48  ;;  %v546_v53 = vadd.f32 %v545_v49, %v531_v47 }
 0x109   :  { %v547_v55 = vadd.f32 %v546_v53, %v532_v50  ;;  %v511_v56 = vadd.f32 %v930_v52, %v510_v51 }
 0x10b   :  { %v512_v58 = vadd.f32 %v932_v57, %v511_v56  ;;  %v548_v59 = vadd.f32 %v547_v55, %v533_v54 }
 0x10d   :  { %v513_v61 = vadd.f32 %v736_v7, %v512_v58  ;;  %v549_v62 = vadd.f32 %v548_v59, %v534_v38 }
 0x10f   :  { %v514_v63 = vadd.f32 %v739_v14, %v513_v61  ;;  %v550_v1 = vadd.f32 %v549_v62, %v535_v60 }
 0x111   :  { %v551_v43 = vadd.f32 %v550_v1, %v536_v0  ;;  %v515_v2 = vadd.f32 %v742_v33, %v514_v63 }
 0x113   :  { %v552_v4 = vadd.f32 %v551_v43, %v537_v3  ;;  %v516_v5 = vadd.f32 %v745_v40, %v515_v2 }
 0x115   :  { %v517_v8 = vrot.slane %v516_v5, 4  ;;  %v553_v52 = vadd.f32 %v552_v4, %v538_v6 }
 0x117   :  { %v518_v9 = vadd.f32 %v517_v8, %v516_v5  ;;  %v554_v10 = vrot.slane %v553_v52, 4 }
 0x119   :  { %v519_v11 = vrot.slane %v518_v9, 2  ;;  %v555_v12 = vadd.f32 %v554_v10, %v553_v52 }
 0x11b   :  { %v520_v57 = vadd.f32 %v519_v11, %v518_v9  ;;  %v556_v13 = vrot.slane %v555_v12, 2 }
 0x11d   :  { %v521_v15 = vrot.slane %v520_v57, 1  ;;  %v557_v7 = vadd.f32 %v556_v13, %v555_v12 }
 0x11f   :  { %v558_v16 = vrot.slane %v557_v7, 1  ;;  %v522_v14 = vadd.f32 %v521_v15, %v520_v57 }
 0x121   :  { %v559_v17 = vadd.f32 %v558_v16, %v557_v7 }
 0x123   :  { %v561_v18 = vsel %vm560_vm0, %v522_v14, %v559_v17 }
 0x124   :  { %562 = vst [vmem:[%s972_s3] sm:$0x3] %v561_v18 }

// kernel: viewpoint_forward.48
= control target key start
LH: loop header
LB: loop body
LE: loop exit
PB: predicated region body
PF: predicated region fallthrough
CT: control target
= control target key end

     0   :  { %s140_s0 = inlined_call_operand.vmem [shape: bf16[32,128], index: 0, kind: input, shape index: {}]   ;;  %s141_s1 = inlined_call_operand.vmem [shape: f32[1,128], index: 1, kind: input, shape index: {}]   ;;  %s142_s2 = inlined_call_operand.vmem [shape: f32[1,128], index: 2, kind: input, shape index: {}]   ;;  %s143_s3 = inlined_call_operand.vmem [shape: bf16[32,128], index: 3, kind: output, shape index: {}]  }
   0x1   :  { %v83_v0 = vld [vmem:[%s140_s0] sm:$0xff]   ;;  %v100_v4 = vld [vmem:[%s140_s0 + $0x8] sm:$0xff]  }
   0x2   :  { %v72_v1 = vld [vmem:[%s141_s1] ss:$0 sm:$0xff]  ;;  %v84_v2 = vunpack.c.l.bf16 %v83_v0  ;;  %v85_v3 = vunpack.c.h.bf16 %v83_v0  ;;  %v88_v6 = vunpack.c.l.bf16 %v100_v4  ;;  %v89_v7 = vunpack.c.h.bf16 %v100_v4 }
   0x3   :  { %v73_v5 = vld [vmem:[%s142_s2] ss:$0 sm:$0xff] }
   0x4   :  { %v29_v8 = vmul.f32 %v84_v2, %v72_v1  ;;  %v30_v9 = vmul.f32 %v85_v3, %v72_v1  ;;  %v31_v10 = vmul.f32 %v88_v6, %v72_v1  ;;  %v32_v11 = vmul.f32 %v89_v7, %v72_v1 }
   0x6   :  { %v40_v12 = vadd.f32 %v73_v5, %v29_v8  ;;  %v41_v13 = vadd.f32 %v73_v5, %v30_v9  ;;  %v42_v14 = vadd.f32 %v73_v5, %v31_v10  ;;  %v43_v15 = vadd.f32 %v73_v5, %v32_v11 }
   0x8   :  { %v44_v16 = vmax.f32 %v40_v12, 0.0  ;;  %v45_v17 = vmax.f32 %v41_v13, 0.0  ;;  %v46_v18 = vmax.f32 %v42_v14, 0.0  ;;  %v47_v19 = vmax.f32 %v43_v15, 0.0 }
   0xa   :  { %v93_v20 = vpack.c.bf16 %v45_v17, %v44_v16  ;;  %v98_v21 = vpack.c.bf16 %v47_v19, %v46_v18 }
   0xc   :  { %94 = vst [vmem:[%s143_s3] sm:$0xff] %v93_v20   ;;  %101 = vst [vmem:[%s143_s3 + $0x8] sm:$0xff] %v98_v21  }

// kernel: viewpoint_forward.47
= control target key start
LH: loop header
LB: loop body
LE: loop exit
PB: predicated region body
PF: predicated region fallthrough
CT: control target
= control target key end

     0   :  { %s943_s12 = smov 0   ;;  %s945_s13 = smov 0   ;;  %s1043_s0 = inlined_call_operand.vmem [shape: bf16[32,1280], index: 0, kind: input, shape index: {}]   ;;  %s1044_s1 = inlined_call_operand.vmem [shape: bf16[1280,128], index: 1, kind: input, shape index: {}]   ;;  %s1045_s2 = inlined_call_operand.vmem [shape: bf16[32,128], index: 2, kind: output, shape index: {0}]   ;;  %s1046_s3 = inlined_call_operand.vmem [shape: f32[1,2,128], index: 3, kind: output, shape index: {1}]  }
   0x1   :  { %s947_s14 = smov 0   ;;  %s949_s15 = smov 0  }
   0x2   :  { %s951_s16 = smov 0  }
   0x3 LB: > { %s26_s17 = sadd.s32 1, %s916_s15  ;;  %p49_p1 = scmp.ne.s32.totalorder %s908_s13, %s904_s12  ;;  %s920_s16 = sphi %s951_s16, %s14_s16   ;;  %s916_s15 = sphi %s949_s15, %s1050_s15   ;;  %s912_s14 = sphi %s947_s14, %s1049_s14   ;;  %s908_s13 = sphi %s945_s13, %s1048_s13   ;;  %s904_s12 = sphi %s943_s12, %s1047_s12  }
   0x4   : > { %p27_p0 = scmp.ge.s32.totalorder %s26_s17, 5  ;;  %p50_p2 = scmp.eq.s32.totalorder %s920_s16, 0 }
   0x5   : > { %s42_s19 = sadd.s32 1, %s908_s13  ;;  %p720_p5 = scmp.ge.s32.totalorder %s920_s16, 5 }
   0x6   : > { %s1052_s17 = smov (%p27_p0, %s26_s17), 0  ;;  %p51_p3 = por %p50_p2, %p49_p1 }
   0x7   : > { %s38_s18 = ssub.s32 %s916_s15, %s1052_s17  ;;  %159 = sbr.rel (%p720_p5) target bundleno = 18 (0x12), region = 16 }
   0x8   : > { %p40_p4 = scmp.eq.s32.totalorder %s38_s18, 0 }
   0xa   : > { %s978_s20 = scalar_select %p40_p4, %s908_s13, %s42_s19  }
   0xc   : > { %162 = sbr.rel (!%p51_p3) target bundleno = 18 (0x12), region = 20  ;;  %s164_s21 = sand.u32 (%p51_p3), 1, %s908_s13  }
   0xd   : > { %s759_s22 = sshll.u32 (%p51_p3), %s916_s15, 3  ;;  %s721_s23 = sshll.u32 (%p51_p3), %s164_s21, 5 }
   0xe   : > { %s172_s26 = scalar_lea.vmem (%p51_p3), %s1043_s0, %s759_s22  ;;  %s166_s27 = scalar_lea.vmem (%p51_p3), [#allocation3], %s721_s23 }
   0xf   : > { %v207_v0 = vld [vmem:[%s172_s26] sm:$0xff] (%p51_p3)  ;;  %v209_v1 = vld [vmem:[%s172_s26 + $0x28] sm:$0xff] (%p51_p3)  ;;  %v211_v2 = vld [vmem:[%s172_s26 + $0x50] sm:$0xff] (%p51_p3) }
  0x10   : > { %208 = vst [vmem:[%s166_s27] sm:$0xff] (%p51_p3), %v207_v0  ;;  %210 = vst [vmem:[%s166_s27 + $0x8] sm:$0xff] (%p51_p3), %v209_v1  ;;  %v213_v3 = vld [vmem:[%s172_s26 + $0x78] sm:$0xff] (%p51_p3) }
  0x11   : > { %212 = vst [vmem:[%s166_s27 + $0x10] sm:$0xff] %v211_v2  ;;  %214 = vst [vmem:[%s166_s27 + $0x18] sm:$0xff] %v213_v3 }
  0x12 PF: > { %p724_p6 = scmp.ge.s32.totalorder %s920_s16, 1  ;;  %p231_p7 = scmp.lt.s32.totalorder %s920_s16, 6 }
  0x14   : > { %p232_p8 = pnand %p724_p6, %p231_p7 }
  0x15   : > { %s238_s28 = sand.u32 (!%p232_p8), 1, %s904_s12   ;;  %s726_s29 = sshll.u32 (!%p232_p8), %s912_s14, 5 }
  0x16   : > { %235 = sbr.rel (%p232_p8) target bundleno = 301 (0x12d), region = 62  ;;  %s725_s30 = sshll.u32 (!%p232_p8), %s238_s28, 5 }
  0x17   : > { %p282_p9 = scmp.lt.s32.totalorder (!%p232_p8), %s726_s29, 159  ;;  %s995_s8 = scalar_lea.vmem (!%p232_p8), [#allocation3], %s725_s30 }
  0x18   : > { %p728_p10 = scmp.ne.s32.totalorder (!%p232_p8), %s912_s14, 0 }
  0x1b   : > { %s1054_s29 = smov (!%p282_p9, %s726_s29), 159  ;;  %310 = sbr.rel (%p728_p10) target bundleno = 35 (0x23), region = 70 }
  0x1c   : > { %s727_s4 = sshll.u32 %s1054_s29, 2 }
  0x1d   : > { %s993_s7 = scalar_lea.vmem %s1044_s1, %s727_s4 }
  0x20   : > { %v922_v4 = vmov 0.0  }
  0x21   : > { %311 = vst [vmem:[#allocation2 + $0x10] sm:$0xff] %v922_v4  ;;  %312 = vst [vmem:[#allocation2] sm:$0xff] %v922_v4 }
  0x22   : > { %313 = vst [vmem:[#allocation2 + $0x18] sm:$0xff] %v922_v4  ;;  %314 = vst [vmem:[#allocation2 + $0x8] sm:$0xff] %v922_v4 }
  0x23 PF: > { %v860_v5 = vld [vmem:[%s993_s7 + $0x78] sm:$0xff]   ;;  %v862_v7 = vld [vmem:[%s993_s7 + $0x70] sm:$0xff]   ;;  %v864_v9 = vld [vmem:[%s993_s7 + $0x68] sm:$0xff]   ;;  %p749_p11 = scmp.ne.s32.totalorder %s912_s14, 4 }
  0x24   : > { %v861_v6 = vld [vmem:[%s993_s7 + $0x38] sm:$0xff]   ;;  %775 = vmatprep.subr.bf16.mxu0 %v860_v5  ;;  %803 = vmatprep.subr.bf16.mxu1 %v860_v5  ;;  %v863_v8 = vld [vmem:[%s993_s7 + $0x30] sm:$0xff]   ;;  %v865_v10 = vld [vmem:[%s993_s7 + $0x28] sm:$0xff]  }
  0x25   : > { %776 = vmatpush3.bf16.msra.mxu0 %v861_v6  ;;  %811 = vmatpush3.bf16.msra.mxu1 %v861_v6  ;;  %v866_v11 = vld [vmem:[%s993_s7 + $0x60] sm:$0xff]   ;;  %v868_v13 = vld [vmem:[%s993_s7 + $0x58] sm:$0xff]   ;;  %v870_v15 = vld [vmem:[%s993_s7 + $0x50] sm:$0xff]  }
  0x26   : > { %777 = vmatprep.subr.bf16.mxu0 %v862_v7  ;;  %804 = vmatprep.subr.bf16.mxu1 %v862_v7  ;;  %v867_v12 = vld [vmem:[%s993_s7 + $0x20] sm:$0xff]   ;;  %v869_v14 = vld [vmem:[%s993_s7 + $0x18] sm:$0xff]   ;;  %v871_v18 = vld [vmem:[%s993_s7 + $0x10] sm:$0xff]  }
  0x27   : > { %v878_v16 = vld [vmem:[%s995_s8 + $0x4] ss:$8 sps:$4 sm:$0xff]   ;;  %v881_v17 = vld [vmem:[%s995_s8 + $0x14] ss:$8 sps:$4 sm:$0xff]   ;;  %v876_v23 = vld [vmem:[%s995_s8] ss:$8 sps:$4 sm:$0xff]  }
  0x28   : > { %v872_v19 = vld [vmem:[%s993_s7 + $0x48] sm:$0xff]   ;;  %503 = vmatprep.mubr.bf16.mxu0 %v878_v16  ;;  %511 = vmatprep.mubr.bf16.mxu1 %v881_v17  ;;  %v874_v21 = vld [vmem:[%s993_s7 + $0x40] sm:$0xff]   ;;  %v879_v24 = vld [vmem:[%s995_s8 + $0x10] ss:$8 sps:$4 sm:$0xff]  }
  0x29   : > { %778 = vmatpush3.bf16.msra.mxu0 %v863_v8  ;;  %812 = vmatpush3.bf16.msra.mxu1 %v863_v8  ;;  %v873_v20 = vld [vmem:[%s993_s7 + $0x8] sm:$0xff]   ;;  %v875_v22 = vld [vmem:[%s993_s7] sm:$0xff]   ;;  %v315_v27 = vld [vmem:[#allocation2 + $0x10] sm:$0xff] }
  0x2a   : > { %779 = vmatprep.subr.bf16.mxu0 %v864_v9  ;;  %805 = vmatprep.subr.bf16.mxu1 %v864_v9  ;;  %v317_v29 = vld [vmem:[#allocation2 + $0x18] sm:$0xff]  ;;  %v316_v37 = vld [vmem:[#allocation2] sm:$0xff]  ;;  %v318_v39 = vld [vmem:[#allocation2 + $0x8] sm:$0xff] }
  0x2d   : > { %780 = vmatpush3.bf16.msra.mxu0 %v865_v10  ;;  %813 = vmatpush3.bf16.msra.mxu1 %v865_v10 }
  0x2e   : > { %781 = vmatprep.subr.bf16.mxu0 %v866_v11  ;;  %806 = vmatprep.subr.bf16.mxu1 %v866_v11 }
  0x31   : > { %782 = vmatpush3.bf16.msra.mxu0 %v867_v12  ;;  %814 = vmatpush3.bf16.msra.mxu1 %v867_v12 }
  0x32   : > { %783 = vmatprep.subr.bf16.mxu0 %v868_v13  ;;  %807 = vmatprep.subr.bf16.mxu1 %v868_v13 }
  0x35   : > { %784 = vmatpush3.bf16.msra.mxu0 %v869_v14  ;;  %815 = vmatpush3.bf16.msra.mxu1 %v869_v14 }
  0x36   : > { %785 = vmatprep.subr.bf16.mxu0 %v870_v15  ;;  %808 = vmatprep.subr.bf16.mxu1 %v870_v15 }
  0x39   : > { %786 = vmatpush3.bf16.msra.mxu0 %v871_v18  ;;  %816 = vmatpush3.bf16.msra.mxu1 %v871_v18 }
  0x3a   : > { %787 = vmatprep.subr.bf16.mxu0 %v872_v19  ;;  %809 = vmatprep.subr.bf16.mxu1 %v872_v19 }
  0x3d   : > { %788 = vmatpush3.bf16.msra.mxu0 %v873_v20  ;;  %817 = vmatpush3.bf16.msra.mxu1 %v873_v20 }
  0x3e   : > { %789 = vmatprep.subr.bf16.mxu0 %v874_v21  ;;  %810 = vmatprep.subr.bf16.mxu1 %v874_v21 }
  0x41   : > { %790 = vmatpush3.bf16.msra.mxu0 %v875_v22  ;;  %818 = vmatpush3.bf16.msra.mxu1 %v875_v22 }
  0x44   : > { %504 = vmatmul.mubr.bf16.vlgmr.msra.gmra.mxu0 %v876_v23  ;;  %512 = vmatmul.mubr.bf16.vlgmr.msra.gmra.mxu1 %v879_v24 }
 0x104   : > { %v791_v25 = vpop.f32.mrf.mxu0  ;;  %v797_v26 = vpop.f32.mrf.mxu1 }
 0x106   : > { %v792_v28 = vpop.f32.mrf.mxu0  ;;  %v798_v30 = vpop.f32.mrf.mxu1 }
 0x107   : > { %v793_v31 = vadd.f32 %v792_v28, %v791_v25  ;;  %v799_v32 = vadd.f32 %v798_v30, %v797_v26 }
 0x108   : > { %v794_v33 = vpop.f32.mrf.mxu0  ;;  %v800_v34 = vpop.f32.mrf.mxu1 }
 0x109   : > { %v520_v35 = vadd.f32 %v793_v31, %v315_v27  ;;  %v522_v36 = vadd.f32 %v799_v32, %v317_v29 }
 0x10a   : > { %v795_v38 = vpop.f32.mrf.mxu0  ;;  %v801_v40 = vpop.f32.mrf.mxu1 }
 0x10b   : > { %524 = vst [vmem:[#allocation2 + $0x10] sm:$0xff] %v520_v35  ;;  %526 = vst [vmem:[#allocation2 + $0x18] sm:$0xff] %v522_v36  ;;  %v796_v41 = vadd.f32 %v795_v38, %v794_v33  ;;  %v802_v42 = vadd.f32 %v801_v40, %v800_v34  ;;  %531 = sbr.rel (%p749_p11) target bundleno = 301 (0x12d), region = 74 }
 0x10d   : > { %v521_v43 = vadd.f32 %v796_v41, %v316_v37  ;;  %v523_v44 = vadd.f32 %v802_v42, %v318_v39 }
 0x10f   : > { %525 = vst [vmem:[#allocation2] sm:$0xff] %v521_v43  ;;  %527 = vst [vmem:[#allocation2 + $0x8] sm:$0xff] %v523_v44 }
 0x110   : > { %vm578_vm0 = vcmask 1040384  }
 0x112   : > { %v532_v45 = vld [vmem:[#allocation2 + $0x10] sm:$0xff]  ;;  %v534_v47 = vld [vmem:[#allocation2 + $0x18] sm:$0xff] }
 0x113   : > { %v565_v50 = vmul.f32 %v532_v45, %v532_v45  ;;  %v567_v54 = vmul.f32 %v534_v47, %v534_v47 }
 0x116   : > { %v533_v46 = vld [vmem:[#allocation2] sm:$0xff]  ;;  %v535_v52 = vld [vmem:[#allocation2 + $0x8] sm:$0xff] }
 0x117   : > { %v767_v48 = vpack.c.bf16 %v533_v46, %v532_v45  ;;  %v556_v49 = vadd.f32 %v533_v46, %v532_v45  ;;  %v566_v51 = vmul.f32 %v533_v46, %v533_v46  ;;  %v772_v53 = vpack.c.bf16 %v535_v52, %v534_v47 }
 0x118   : > { %v568_v57 = vmul.f32 %v535_v52, %v535_v52 }
 0x119   : > { %768 = vst [vmem:[%s1045_s2] sm:$0xff] %v767_v48   ;;  %v569_v55 = vadd.f32 %v566_v51, %v565_v50  ;;  %v557_v56 = vadd.f32 %v556_v49, %v534_v47  ;;  %774 = vst [vmem:[%s1045_s2 + $0x8] sm:$0xff] %v772_v53  }
 0x11b   : > { %v558_v58 = vadd.f32 %v557_v56, %v535_v52  ;;  %v570_v59 = vadd.f32 %v569_v55, %v567_v54 }
 0x11d   : > { %v559_v60 = vrot.slane %v558_v58, 4  ;;  %v571_v61 = vadd.f32 %v570_v59, %v568_v57 }
 0x11f   : > { %v560_v62 = vadd.f32 %v559_v60, %v558_v58  ;;  %v572_v63 = vrot.slane %v571_v61, 4 }
 0x121   : > { %v561_v0 = vrot.slane %v560_v62, 2  ;;  %v573_v1 = vadd.f32 %v572_v63, %v571_v61 }
 0x123   : > { %v562_v2 = vadd.f32 %v561_v0, %v560_v62  ;;  %v574_v3 = vrot.slane %v573_v1, 2 }
 0x125   : > { %v563_v4 = vrot.slane %v562_v2, 1  ;;  %v575_v5 = vadd.f32 %v574_v3, %v573_v1 }
 0x127   : > { %v564_v6 = vadd.f32 %v563_v4, %v562_v2  ;;  %v576_v7 = vrot.slane %v575_v5, 1 }
 0x129   : > { %v577_v8 = vadd.f32 %v576_v7, %v575_v5 }
 0x12b   : > { %v579_v9 = vsel %vm578_vm0, %v564_v6, %v577_v8 }
 0x12c   : > { %580 = vst [vmem:[%s1046_s3] sm:$0x3] %v579_v9 }
 0x12d PF: > { %s14_s16 = sadd.s32 1, %s920_s16   ;;  %s1047_s12 = smov %s908_s13 }
 0x12e   : > { %p11_p12 = scmp.ge.s32.totalorder %s14_s16, 7   ;;  %s1048_s13 = smov %s978_s20 }
 0x12f   : > { %s1049_s14 = smov %s916_s15  ;;  %s1050_s15 = smov %s1052_s17 }
 0x130   :  { %13 = sbr.rel (!%p11_p12) target bundleno = 3 (0x3), region = 124 }

// kernel: viewpoint_forward.50
= control target key start
LH: loop header
LB: loop body
LE: loop exit
PB: predicated region body
PF: predicated region fallthrough
CT: control target
= control target key end

     0   :  { %s175_s0 = inlined_call_operand.vmem [shape: bf16[32,128], index: 0, kind: input, shape index: {}]   ;;  %s176_s1 = inlined_call_operand.vmem [shape: f32[1,128], index: 1, kind: input, shape index: {}]   ;;  %s177_s2 = inlined_call_operand.vmem [shape: f32[1,128], index: 2, kind: input, shape index: {}]   ;;  %s178_s3 = inlined_call_operand.vmem [shape: bf16[32,128], index: 3, kind: input, shape index: {}]   ;;  %s179_s4 = inlined_call_operand.vmem [shape: bf16[32,128], index: 4, kind: output, shape index: {}]  }
   0x1   :  { %v98_v0 = vld [vmem:[%s175_s0] sm:$0xff]   ;;  %v123_v5 = vld [vmem:[%s175_s0 + $0x8] sm:$0xff]  }
   0x2   :  { %v87_v1 = vld [vmem:[%s176_s1] ss:$0 sm:$0xff]  ;;  %v99_v2 = vunpack.c.l.bf16 %v98_v0  ;;  %v100_v3 = vunpack.c.h.bf16 %v98_v0  ;;  %v124_v6 = vld [vmem:[%s178_s3 + $0x8] sm:$0xff]   ;;  %v103_v8 = vunpack.c.l.bf16 %v123_v5  ;;  %v104_v9 = vunpack.c.h.bf16 %v123_v5 }
   0x3   :  { %v106_v4 = vld [vmem:[%s178_s3] sm:$0xff]   ;;  %v111_v16 = vunpack.c.l.bf16 %v124_v6  ;;  %v112_v17 = vunpack.c.h.bf16 %v124_v6 }
   0x4   :  { %v88_v7 = vld [vmem:[%s177_s2] ss:$0 sm:$0xff]  ;;  %v32_v10 = vmul.f32 %v99_v2, %v87_v1  ;;  %v33_v11 = vmul.f32 %v100_v3, %v87_v1  ;;  %v107_v12 = vunpack.c.l.bf16 %v106_v4  ;;  %v108_v13 = vunpack.c.h.bf16 %v106_v4 }
   0x5   :  { %v34_v14 = vmul.f32 %v103_v8, %v87_v1  ;;  %v35_v15 = vmul.f32 %v104_v9, %v87_v1 }
   0x6   :  { %v43_v18 = vadd.f32 %v88_v7, %v32_v10  ;;  %v44_v19 = vadd.f32 %v88_v7, %v33_v11 }
   0x7   :  { %v45_v20 = vadd.f32 %v88_v7, %v34_v14  ;;  %v46_v21 = vadd.f32 %v88_v7, %v35_v15 }
   0x8   :  { %v55_v22 = vadd.f32 %v107_v12, %v43_v18  ;;  %v56_v23 = vadd.f32 %v108_v13, %v44_v19 }
   0x9   :  { %v57_v24 = vadd.f32 %v111_v16, %v45_v20  ;;  %v58_v25 = vadd.f32 %v112_v17, %v46_v21 }
   0xa   :  { %v59_v26 = vmax.f32 %v55_v22, 0.0  ;;  %v60_v27 = vmax.f32 %v56_v23, 0.0 }
   0xb   :  { %v61_v28 = vmax.f32 %v57_v24, 0.0  ;;  %v62_v29 = vmax.f32 %v58_v25, 0.0 }
   0xc   :  { %v116_v30 = vpack.c.bf16 %v60_v27, %v59_v26 }
   0xd   :  { %v121_v31 = vpack.c.bf16 %v62_v29, %v61_v28 }
   0xe   :  { %117 = vst [vmem:[%s179_s4] sm:$0xff] %v116_v30  }
   0xf   :  { %125 = vst [vmem:[%s179_s4 + $0x8] sm:$0xff] %v121_v31  }

// kernel: viewpoint_forward.56
= control target key start
LH: loop header
LB: loop body
LE: loop exit
PB: predicated region body
PF: predicated region fallthrough
CT: control target
= control target key end

     0   :  { %s97_s0 = inlined_call_operand.vmem [shape: bf16[16,128], index: 0, kind: input, shape index: {}]   ;;  %s98_s1 = inlined_call_operand.vmem [shape: f32[1,128], index: 1, kind: input, shape index: {}]   ;;  %s99_s2 = inlined_call_operand.vmem [shape: f32[1,128], index: 2, kind: input, shape index: {}]   ;;  %s100_s3 = inlined_call_operand.vmem [shape: bf16[16,128], index: 3, kind: output, shape index: {}]  }
   0x1   :  { %v57_v0 = vld [vmem:[%s97_s0] sm:$0xff]  }
   0x2   :  { %v50_v1 = vld [vmem:[%s98_s1] ss:$0 sm:$0xff]  ;;  %v58_v2 = vunpack.c.l.bf16 %v57_v0  ;;  %v59_v3 = vunpack.c.h.bf16 %v57_v0 }
   0x3   :  { %v51_v4 = vld [vmem:[%s99_s2] ss:$0 sm:$0xff] }
   0x4   :  { %v25_v5 = vmul.f32 %v58_v2, %v50_v1  ;;  %v26_v6 = vmul.f32 %v59_v3, %v50_v1 }
   0x6   :  { %v34_v7 = vadd.f32 %v51_v4, %v25_v5  ;;  %v35_v8 = vadd.f32 %v51_v4, %v26_v6 }
   0x8   :  { %v63_v9 = vpack.c.bf16 %v35_v8, %v34_v7 }
   0xa   :  { %64 = vst [vmem:[%s100_s3] sm:$0xff] %v63_v9  }

// kernel: viewpoint_forward.55
= control target key start
LH: loop header
LB: loop body
LE: loop exit
PB: predicated region body
PF: predicated region fallthrough
CT: control target
= control target key end

     0   :  { %v239_v0 = vmov 0.0   ;;  %vm240_vm0 = vmmov 0   ;;  %vm170_vm1 = vcmask 1040384   ;;  %s294_s1 = inlined_call_operand.vmem [shape: bf16[128,128], index: 1, kind: input, shape index: {}]   ;;  %s295_s0 = inlined_call_operand.vmem [shape: bf16[16,128], index: 0, kind: input, shape index: {}]   ;;  %s296_s2 = inlined_call_operand.vmem [shape: bf16[16,128], index: 2, kind: output, shape index: {0}]   ;;  %s297_s3 = inlined_call_operand.vmem [shape: f32[1,2,128], index: 3, kind: output, shape index: {1}]  }
   0x1   :  { %208 = vmatprep.subr.bf16.mxu0 %v239_v0  ;;  %v230_v1 = vld [vmem:[%s294_s1 + $0x38] sm:$0xff]   ;;  %224 = vmatprep.mubr.msk.bf16.mxu0 %vm240_vm0, %v239_v0  ;;  %v231_v2 = vld [vmem:[%s294_s1 + $0x30] sm:$0xff]   ;;  %v232_v3 = vld [vmem:[%s294_s1 + $0x28] sm:$0xff]  }
   0x2   :  { %209 = vmatpush3.bf16.msra.mxu0 %v230_v1  ;;  %v233_v4 = vld [vmem:[%s294_s1 + $0x20] sm:$0xff]   ;;  %v234_v5 = vld [vmem:[%s294_s1 + $0x18] sm:$0xff]   ;;  %v235_v6 = vld [vmem:[%s294_s1 + $0x10] sm:$0xff]  }
   0x3   :  { %210 = vmatprep.subr.bf16.mxu0 %v239_v0  ;;  %v236_v7 = vld [vmem:[%s294_s1 + $0x8] sm:$0xff]   ;;  %v237_v8 = vld [vmem:[%s294_s1] sm:$0xff]  }
   0x4   :  { %v238_v9 = vld [vmem:[%s295_s0] sm:$0xff]  }
   0x6   :  { %211 = vmatpush3.bf16.msra.mxu0 %v231_v2 }
   0x7   :  { %212 = vmatprep.subr.bf16.mxu0 %v239_v0 }
   0xa   :  { %213 = vmatpush3.bf16.msra.mxu0 %v232_v3 }
   0xb   :  { %214 = vmatprep.subr.bf16.mxu0 %v239_v0 }
   0xe   :  { %215 = vmatpush3.bf16.msra.mxu0 %v233_v4 }
   0xf   :  { %216 = vmatprep.subr.bf16.mxu0 %v239_v0 }
  0x12   :  { %217 = vmatpush3.bf16.msra.mxu0 %v234_v5 }
  0x13   :  { %218 = vmatprep.subr.bf16.mxu0 %v239_v0 }
  0x16   :  { %219 = vmatpush3.bf16.msra.mxu0 %v235_v6 }
  0x17   :  { %220 = vmatprep.subr.bf16.mxu0 %v239_v0 }
  0x1a   :  { %221 = vmatpush3.bf16.msra.mxu0 %v236_v7 }
  0x1b   :  { %222 = vmatprep.subr.bf16.mxu0 %v239_v0 }
  0x1e   :  { %223 = vmatpush3.bf16.msra.mxu0 %v237_v8 }
  0x21   :  { %225 = vmatmul.mubr.bf16.vlgmr.msra.gmra.mxu0 %v238_v9 }
  0xe1   :  { %v128_v10 = vpop.f32.mrf.mxu0 }
  0xe2   :  { %v161_v13 = vmul.f32 %v128_v10, %v128_v10 }
  0xe3   :  { %v226_v11 = vpop.f32.mrf.mxu0 }
  0xe5   :  { %v131_v12 = vpop.f32.mrf.mxu0 }
  0xe6   :  { %v197_v14 = vpack.c.bf16 %v131_v12, %v128_v10  ;;  %v154_v15 = vadd.f32 %v131_v12, %v128_v10  ;;  %v162_v16 = vmul.f32 %v131_v12, %v131_v12 }
  0xe7   :  { %v227_v17 = vpop.f32.mrf.mxu0 }
  0xe8   :  { %198 = vst [vmem:[%s296_s2] sm:$0xff] %v197_v14   ;;  %v155_v18 = vrot.slane %v154_v15, 4  ;;  %v163_v19 = vadd.f32 %v162_v16, %v161_v13 }
  0xea   :  { %v156_v20 = vadd.f32 %v155_v18, %v154_v15  ;;  %v164_v21 = vrot.slane %v163_v19, 4 }
  0xec   :  { %v157_v22 = vrot.slane %v156_v20, 2  ;;  %v165_v23 = vadd.f32 %v164_v21, %v163_v19 }
  0xee   :  { %v158_v24 = vadd.f32 %v157_v22, %v156_v20  ;;  %v166_v25 = vrot.slane %v165_v23, 2 }
  0xf0   :  { %v159_v26 = vrot.slane %v158_v24, 1  ;;  %v167_v27 = vadd.f32 %v166_v25, %v165_v23 }
  0xf2   :  { %v168_v28 = vrot.slane %v167_v27, 1  ;;  %v160_v29 = vadd.f32 %v159_v26, %v158_v24 }
  0xf4   :  { %v169_v30 = vadd.f32 %v168_v28, %v167_v27 }
  0xf6   :  { %v171_v31 = vsel %vm170_vm1, %v160_v29, %v169_v30 }
  0xf7   :  { %172 = vst [vmem:[%s297_s3] sm:$0x3] %v171_v31 }

// kernel: viewpoint_forward.58
= control target key start
LH: loop header
LB: loop body
LE: loop exit
PB: predicated region body
PF: predicated region fallthrough
CT: control target
= control target key end

     0   :  { %s99_s0 = inlined_call_operand.vmem [shape: bf16[16,128], index: 0, kind: input, shape index: {}]   ;;  %s100_s1 = inlined_call_operand.vmem [shape: f32[1,128], index: 1, kind: input, shape index: {}]   ;;  %s101_s2 = inlined_call_operand.vmem [shape: f32[1,128], index: 2, kind: input, shape index: {}]   ;;  %s102_s3 = inlined_call_operand.vmem [shape: bf16[16,128], index: 3, kind: output, shape index: {}]  }
   0x1   :  { %v59_v0 = vld [vmem:[%s99_s0] sm:$0xff]  }
   0x2   :  { %v52_v1 = vld [vmem:[%s100_s1] ss:$0 sm:$0xff]  ;;  %v60_v2 = vunpack.c.l.bf16 %v59_v0  ;;  %v61_v3 = vunpack.c.h.bf16 %v59_v0 }
   0x3   :  { %v53_v4 = vld [vmem:[%s101_s2] ss:$0 sm:$0xff] }
   0x4   :  { %v25_v5 = vmul.f32 %v60_v2, %v52_v1  ;;  %v26_v6 = vmul.f32 %v61_v3, %v52_v1 }
   0x6   :  { %v34_v7 = vadd.f32 %v53_v4, %v25_v5  ;;  %v35_v8 = vadd.f32 %v53_v4, %v26_v6 }
   0x8   :  { %v36_v9 = vmax.f32 %v34_v7, 0.0  ;;  %v37_v10 = vmax.f32 %v35_v8, 0.0 }
   0xa   :  { %v65_v11 = vpack.c.bf16 %v37_v10, %v36_v9 }
   0xc   :  { %66 = vst [vmem:[%s102_s3] sm:$0xff] %v65_v11  }

// kernel: viewpoint_forward.57
= control target key start
LH: loop header
LB: loop body
LE: loop exit
PB: predicated region body
PF: predicated region fallthrough
CT: control target
= control target key end

     0   :  { %s852_s12 = smov 0   ;;  %s854_s13 = smov 0   ;;  %s950_s0 = inlined_call_operand.vmem [shape: bf16[16,1280], index: 0, kind: input, shape index: {}]   ;;  %s951_s1 = inlined_call_operand.vmem [shape: bf16[1280,128], index: 1, kind: input, shape index: {}]   ;;  %s952_s2 = inlined_call_operand.vmem [shape: bf16[16,128], index: 2, kind: output, shape index: {0}]   ;;  %s953_s3 = inlined_call_operand.vmem [shape: f32[1,2,128], index: 3, kind: output, shape index: {1}]  }
   0x1   :  { %s856_s14 = smov 0   ;;  %s858_s15 = smov 0  }
   0x2   :  { %s860_s16 = smov 0  }
   0x3 LB: > { %s26_s17 = sadd.s32 1, %s825_s15  ;;  %p49_p1 = scmp.ne.s32.totalorder %s817_s13, %s813_s12  ;;  %s829_s16 = sphi %s860_s16, %s14_s16   ;;  %s825_s15 = sphi %s858_s15, %s957_s15   ;;  %s821_s14 = sphi %s856_s14, %s956_s14   ;;  %s817_s13 = sphi %s854_s13, %s955_s13   ;;  %s813_s12 = sphi %s852_s12, %s954_s12  }
   0x4   : > { %p27_p0 = scmp.ge.s32.totalorder %s26_s17, 5  ;;  %p50_p2 = scmp.eq.s32.totalorder %s829_s16, 0 }
   0x5   : > { %s42_s19 = sadd.s32 1, %s817_s13  ;;  %p666_p5 = scmp.ge.s32.totalorder %s829_s16, 5 }
   0x6   : > { %s959_s17 = smov (%p27_p0, %s26_s17), 0  ;;  %p51_p3 = por %p50_p2, %p49_p1 }
   0x7   : > { %s38_s18 = ssub.s32 %s825_s15, %s959_s17  ;;  %159 = sbr.rel (%p666_p5) target bundleno = 17 (0x11), region = 16 }
   0x8   : > { %p40_p4 = scmp.eq.s32.totalorder %s38_s18, 0 }
   0xa   : > { %s887_s20 = scalar_select %p40_p4, %s817_s13, %s42_s19  }
   0xc   : > { %162 = sbr.rel (!%p51_p3) target bundleno = 17 (0x11), region = 20  ;;  %s164_s21 = sand.u32 (%p51_p3), 1, %s817_s13  }
   0xd   : > { %s701_s22 = sshll.u32 (%p51_p3), %s825_s15, 3  ;;  %s667_s23 = sshll.u32 (%p51_p3), %s164_s21, 4 }
   0xe   : > { %s172_s26 = scalar_lea.vmem (%p51_p3), %s950_s0, %s701_s22  ;;  %s166_s27 = scalar_lea.vmem (%p51_p3), [#allocation3], %s667_s23 }
   0xf   : > { %v203_v0 = vld [vmem:[%s172_s26] sm:$0xff] (%p51_p3)  ;;  %v205_v1 = vld [vmem:[%s172_s26 + $0x28] sm:$0xff] (%p51_p3) }
  0x10   : > { %204 = vst [vmem:[%s166_s27] sm:$0xff] (%p51_p3), %v203_v0  ;;  %206 = vst [vmem:[%s166_s27 + $0x8] sm:$0xff] (%p51_p3), %v205_v1 }
  0x11 PF: > { %p670_p6 = scmp.ge.s32.totalorder %s829_s16, 1  ;;  %p223_p7 = scmp.lt.s32.totalorder %s829_s16, 6 }
  0x13   : > { %p224_p8 = pnand %p670_p6, %p223_p7 }
  0x14   : > { %s230_s28 = sand.u32 (!%p224_p8), 1, %s813_s12   ;;  %s672_s29 = sshll.u32 (!%p224_p8), %s821_s14, 5 }
  0x15   : > { %227 = sbr.rel (%p224_p8) target bundleno = 295 (0x127), region = 62  ;;  %s899_s30 = sshll.u32 (!%p224_p8), %s230_s28, 4 }
  0x16   : > { %p274_p9 = scmp.lt.s32.totalorder (!%p224_p8), %s672_s29, 159  ;;  %s232_s8 = scalar_lea.vmem (!%p224_p8), [#allocation3], %s899_s30 }
  0x17   : > { %p674_p10 = scmp.ne.s32.totalorder (!%p224_p8), %s821_s14, 0 }
  0x1a   : > { %s961_s29 = smov (!%p274_p9, %s672_s29), 159  ;;  %302 = sbr.rel (%p674_p10) target bundleno = 33 (0x21), region = 70 }
  0x1b   : > { %s673_s4 = sshll.u32 %s961_s29, 2 }
  0x1c   : > { %s904_s7 = scalar_lea.vmem %s951_s1, %s673_s4 }
  0x1f   : > { %v831_v2 = vmov 0.0  }
  0x20   : > { %303 = vst [vmem:[#allocation2] sm:$0xff] %v831_v2  ;;  %304 = vst [vmem:[#allocation2 + $0x8] sm:$0xff] %v831_v2 }
  0x21 PF: > { %v772_v3 = vld [vmem:[%s904_s7 + $0x78] sm:$0xff]   ;;  %v774_v5 = vld [vmem:[%s904_s7 + $0x70] sm:$0xff]   ;;  %v776_v7 = vld [vmem:[%s904_s7 + $0x68] sm:$0xff]   ;;  %p693_p11 = scmp.ne.s32.totalorder %s821_s14, 4 }
  0x22   : > { %v773_v4 = vld [vmem:[%s904_s7 + $0x38] sm:$0xff]   ;;  %709 = vmatprep.subr.bf16.mxu0 %v772_v3  ;;  %v775_v6 = vld [vmem:[%s904_s7 + $0x30] sm:$0xff]   ;;  %v777_v8 = vld [vmem:[%s904_s7 + $0x28] sm:$0xff]  }
  0x23   : > { %710 = vmatpush3.bf16.msra.mxu0 %v773_v4  ;;  %v778_v9 = vld [vmem:[%s904_s7 + $0x60] sm:$0xff]   ;;  %v780_v11 = vld [vmem:[%s904_s7 + $0x58] sm:$0xff]   ;;  %v782_v13 = vld [vmem:[%s904_s7 + $0x50] sm:$0xff]  }
  0x24   : > { %711 = vmatprep.subr.bf16.mxu0 %v774_v5  ;;  %v779_v10 = vld [vmem:[%s904_s7 + $0x20] sm:$0xff]   ;;  %v781_v12 = vld [vmem:[%s904_s7 + $0x18] sm:$0xff]   ;;  %v783_v15 = vld [vmem:[%s904_s7 + $0x10] sm:$0xff]  }
  0x25   : > { %v790_v14 = vld [vmem:[%s232_s8 + $0x4] ss:$8 sps:$4 sm:$0xff]   ;;  %v788_v20 = vld [vmem:[%s232_s8] ss:$8 sps:$4 sm:$0xff]  }
  0x26   : > { %479 = vmatprep.mubr.bf16.mxu0 %v790_v14  ;;  %v784_v16 = vld [vmem:[%s904_s7 + $0x48] sm:$0xff]   ;;  %v786_v18 = vld [vmem:[%s904_s7 + $0x40] sm:$0xff]  }
  0x27   : > { %712 = vmatpush3.bf16.msra.mxu0 %v775_v6  ;;  %v785_v17 = vld [vmem:[%s904_s7 + $0x8] sm:$0xff]   ;;  %v787_v19 = vld [vmem:[%s904_s7] sm:$0xff]  }
  0x28   : > { %713 = vmatprep.subr.bf16.mxu0 %v776_v7  ;;  %v305_v22 = vld [vmem:[#allocation2] sm:$0xff]  ;;  %v306_v27 = vld [vmem:[#allocation2 + $0x8] sm:$0xff] }
  0x2b   : > { %714 = vmatpush3.bf16.msra.mxu0 %v777_v8 }
  0x2c   : > { %715 = vmatprep.subr.bf16.mxu0 %v778_v9 }
  0x2f   : > { %716 = vmatpush3.bf16.msra.mxu0 %v779_v10 }
  0x30   : > { %717 = vmatprep.subr.bf16.mxu0 %v780_v11 }
  0x33   : > { %718 = vmatpush3.bf16.msra.mxu0 %v781_v12 }
  0x34   : > { %719 = vmatprep.subr.bf16.mxu0 %v782_v13 }
  0x37   : > { %720 = vmatpush3.bf16.msra.mxu0 %v783_v15 }
  0x38   : > { %721 = vmatprep.subr.bf16.mxu0 %v784_v16 }
  0x3b   : > { %722 = vmatpush3.bf16.msra.mxu0 %v785_v17 }
  0x3c   : > { %723 = vmatprep.subr.bf16.mxu0 %v786_v18 }
  0x3f   : > { %724 = vmatpush3.bf16.msra.mxu0 %v787_v19 }
  0x42   : > { %480 = vmatmul.mubr.bf16.vlgmr.msra.gmra.mxu0 %v788_v20 }
 0x102   : > { %v725_v21 = vpop.f32.mrf.mxu0 }
 0x104   : > { %v726_v23 = vpop.f32.mrf.mxu0 }
 0x105   : > { %v727_v24 = vadd.f32 %v726_v23, %v725_v21 }
 0x106   : > { %v728_v25 = vpop.f32.mrf.mxu0 }
 0x107   : > { %v488_v26 = vadd.f32 %v727_v24, %v305_v22 }
 0x108   : > { %v729_v28 = vpop.f32.mrf.mxu0 }
 0x109   : > { %490 = vst [vmem:[#allocation2] sm:$0xff] %v488_v26  ;;  %v730_v29 = vadd.f32 %v729_v28, %v728_v25  ;;  %495 = sbr.rel (%p693_p11) target bundleno = 295 (0x127), region = 74 }
 0x10b   : > { %v489_v30 = vadd.f32 %v730_v29, %v306_v27 }
 0x10d   : > { %491 = vst [vmem:[#allocation2 + $0x8] sm:$0xff] %v489_v30 }
 0x10e   : > { %vm524_vm0 = vcmask 1040384  }
 0x110   : > { %v496_v31 = vld [vmem:[#allocation2] sm:$0xff] }
 0x111   : > { %v515_v35 = vmul.f32 %v496_v31, %v496_v31 }
 0x114   : > { %v497_v32 = vld [vmem:[#allocation2 + $0x8] sm:$0xff] }
 0x115   : > { %v707_v33 = vpack.c.bf16 %v497_v32, %v496_v31  ;;  %v508_v34 = vadd.f32 %v497_v32, %v496_v31  ;;  %v516_v36 = vmul.f32 %v497_v32, %v497_v32 }
 0x117   : > { %708 = vst [vmem:[%s952_s2] sm:$0xff] %v707_v33   ;;  %v509_v37 = vrot.slane %v508_v34, 4  ;;  %v517_v38 = vadd.f32 %v516_v36, %v515_v35 }
 0x119   : > { %v510_v39 = vadd.f32 %v509_v37, %v508_v34  ;;  %v518_v40 = vrot.slane %v517_v38, 4 }
 0x11b   : > { %v511_v41 = vrot.slane %v510_v39, 2  ;;  %v519_v42 = vadd.f32 %v518_v40, %v517_v38 }
 0x11d   : > { %v512_v43 = vadd.f32 %v511_v41, %v510_v39  ;;  %v520_v44 = vrot.slane %v519_v42, 2 }
 0x11f   : > { %v513_v45 = vrot.slane %v512_v43, 1  ;;  %v521_v46 = vadd.f32 %v520_v44, %v519_v42 }
 0x121   : > { %v514_v47 = vadd.f32 %v513_v45, %v512_v43  ;;  %v522_v48 = vrot.slane %v521_v46, 1 }
 0x123   : > { %v523_v49 = vadd.f32 %v522_v48, %v521_v46 }
 0x125   : > { %v525_v50 = vsel %vm524_vm0, %v514_v47, %v523_v49 }
 0x126   : > { %526 = vst [vmem:[%s953_s3] sm:$0x3] %v525_v50 }
 0x127 PF: > { %s14_s16 = sadd.s32 1, %s829_s16   ;;  %s954_s12 = smov %s817_s13 }
 0x128   : > { %p11_p12 = scmp.ge.s32.totalorder %s14_s16, 7   ;;  %s955_s13 = smov %s887_s20 }
 0x129   : > { %s956_s14 = smov %s825_s15  ;;  %s957_s15 = smov %s959_s17 }
 0x12a   :  { %13 = sbr.rel (!%p11_p12) target bundleno = 3 (0x3), region = 124 }

// kernel: viewpoint_forward.60
= control target key start
LH: loop header
LB: loop body
LE: loop exit
PB: predicated region body
PF: predicated region fallthrough
CT: control target
= control target key end

     0   :  { %s120_s0 = inlined_call_operand.vmem [shape: bf16[16,128], index: 0, kind: input, shape index: {}]   ;;  %s121_s1 = inlined_call_operand.vmem [shape: f32[1,128], index: 1, kind: input, shape index: {}]   ;;  %s122_s2 = inlined_call_operand.vmem [shape: f32[1,128], index: 2, kind: input, shape index: {}]   ;;  %s123_s3 = inlined_call_operand.vmem [shape: bf16[16,128], index: 3, kind: input, shape index: {}]   ;;  %s124_s4 = inlined_call_operand.vmem [shape: bf16[16,128], index: 4, kind: output, shape index: {}]  }
   0x1   :  { %v68_v0 = vld [vmem:[%s120_s0] sm:$0xff]  }
   0x2   :  { %v61_v1 = vld [vmem:[%s121_s1] ss:$0 sm:$0xff]  ;;  %v69_v2 = vunpack.c.l.bf16 %v68_v0  ;;  %v70_v3 = vunpack.c.h.bf16 %v68_v0 }
   0x3   :  { %v72_v4 = vld [vmem:[%s123_s3] sm:$0xff]  }
   0x4   :  { %v62_v5 = vld [vmem:[%s122_s2] ss:$0 sm:$0xff]  ;;  %v28_v6 = vmul.f32 %v69_v2, %v61_v1  ;;  %v29_v7 = vmul.f32 %v70_v3, %v61_v1  ;;  %v73_v8 = vunpack.c.l.bf16 %v72_v4  ;;  %v74_v9 = vunpack.c.h.bf16 %v72_v4 }
   0x6   :  { %v37_v10 = vadd.f32 %v62_v5, %v28_v6  ;;  %v38_v11 = vadd.f32 %v62_v5, %v29_v7 }
   0x8   :  { %v43_v12 = vadd.f32 %v73_v8, %v37_v10  ;;  %v44_v13 = vadd.f32 %v74_v9, %v38_v11 }
   0xa   :  { %v45_v14 = vmax.f32 %v43_v12, 0.0  ;;  %v46_v15 = vmax.f32 %v44_v13, 0.0 }
   0xc   :  { %v78_v16 = vpack.c.bf16 %v46_v15, %v45_v14 }
   0xe   :  { %79 = vst [vmem:[%s124_s4] sm:$0xff] %v78_v16  }

// kernel: viewpoint_forward.66
= control target key start
LH: loop header
LB: loop body
LE: loop exit
PB: predicated region body
PF: predicated region fallthrough
CT: control target
= control target key end

     0   :  { %v22_v0 = vlaneseq  ;;  %s112_s0 = inlined_call_operand.vmem [shape: bf16[16,256], index: 0, kind: input, shape index: {}]   ;;  %s113_s1 = inlined_call_operand.vmem [shape: f32[1,256], index: 1, kind: input, shape index: {}]   ;;  %s114_s2 = inlined_call_operand.vmem [shape: f32[1,256], index: 2, kind: input, shape index: {}]   ;;  %s115_s3 = inlined_call_operand.vmem [shape: bf16[16,256], index: 3, kind: output, shape index: {}]  }
   0x1   :  { %v14_v1 = vld [vmem:[%s112_s0] sm:$0xff]  ;;  %v15_v3 = vld [vmem:[%s112_s0 + $0x8] sm:$0xff] }
   0x2   :  { %v23_v2 = vshrl.u32 %v22_v0, 7  ;;  %v16_v4 = vunpack.c.l.bf16 %v14_v1  ;;  %v17_v5 = vunpack.c.h.bf16 %v14_v1  ;;  %v20_v6 = vld [vmem:[%s113_s1] sm:$0x3]  ;;  %v18_v10 = vunpack.c.l.bf16 %v15_v3 }
   0x3   :  { %v36_v7 = vld [vmem:[%s114_s2] sm:$0x3]  ;;  %v19_v11 = vunpack.c.h.bf16 %v15_v3 }
   0x4   :  { %v24_v8 = vsub.s32 0, %v23_v2  ;;  %v28_v9 = vsub.s32 1, %v23_v2 }
   0x6   :  { %v25_v12 = vrot.slane %v20_v6, %v24_v8  ;;  %v29_v13 = vrot.slane %v20_v6, %v28_v9  ;;  %v41_v14 = vrot.slane %v36_v7, %v24_v8  ;;  %v45_v15 = vrot.slane %v36_v7, %v28_v9 }
   0x8   :  { %v32_v16 = vmul.f32 %v25_v12, %v16_v4  ;;  %v33_v17 = vmul.f32 %v29_v13, %v17_v5  ;;  %v34_v18 = vmul.f32 %v25_v12, %v18_v10  ;;  %v35_v19 = vmul.f32 %v29_v13, %v19_v11 }
   0xa   :  { %v48_v20 = vadd.f32 %v41_v14, %v32_v16  ;;  %v49_v21 = vadd.f32 %v45_v15, %v33_v17  ;;  %v50_v22 = vadd.f32 %v41_v14, %v34_v18  ;;  %v51_v23 = vadd.f32 %v45_v15, %v35_v19 }
   0xc   :  { %v72_v24 = vpack.c.bf16 %v49_v21, %v48_v20  ;;  %v73_v25 = vpack.c.bf16 %v51_v23, %v50_v22 }
   0xe   :  { %64 = vst [vmem:[%s115_s3] sm:$0xff] %v72_v24  ;;  %65 = vst [vmem:[%s115_s3 + $0x8] sm:$0xff] %v73_v25 }

// kernel: viewpoint_forward.65
= control target key start
LH: loop header
LB: loop body
LE: loop exit
PB: predicated region body
PF: predicated region fallthrough
CT: control target
= control target key end

     0   :  { %v305_v1 = vmov 0   ;;  %vm234_vm0 = vcmask 1040384   ;;  %s386_s1 = inlined_call_operand.vmem [shape: bf16[128,256], index: 1, kind: input, shape index: {}]   ;;  %s387_s0 = inlined_call_operand.vmem [shape: bf16[16,128], index: 0, kind: input, shape index: {}]   ;;  %s388_s2 = inlined_call_operand.vmem [shape: bf16[16,256], index: 2, kind: output, shape index: {0}]   ;;  %s389_s3 = inlined_call_operand.vmem [shape: f32[1,2,256], index: 3, kind: output, shape index: {1}]  }
   0x1   :  { %v280_v0 = vld [vmem:[%s386_s1 + $0x74] ss:$8 sps:$4 sm:$0xff]   ;;  %162 = vmatprep.mubr.bf16.mxu0 %v305_v1  ;;  %v282_v2 = vld [vmem:[%s386_s1 + $0x70] ss:$8 sps:$4 sm:$0xff]   ;;  %v283_v3 = vld [vmem:[%s386_s1 + $0x64] ss:$8 sps:$4 sm:$0xff]  }
   0x2   :  { %130 = vmatprep.subr.bf16.mxu0 %v280_v0  ;;  %v285_v4 = vld [vmem:[%s386_s1 + $0x60] ss:$8 sps:$4 sm:$0xff]   ;;  %v286_v5 = vld [vmem:[%s386_s1 + $0x54] ss:$8 sps:$4 sm:$0xff]   ;;  %v288_v6 = vld [vmem:[%s386_s1 + $0x50] ss:$8 sps:$4 sm:$0xff]  }
   0x3   :  { %131 = vmatpush1.bf16.msra.mxu0 %v282_v2  ;;  %v289_v7 = vld [vmem:[%s386_s1 + $0x44] ss:$8 sps:$4 sm:$0xff]   ;;  %v291_v8 = vld [vmem:[%s386_s1 + $0x40] ss:$8 sps:$4 sm:$0xff]   ;;  %v292_v9 = vld [vmem:[%s386_s1 + $0x34] ss:$8 sps:$4 sm:$0xff]  }
   0x4   :  { %132 = vmatprep.subr.bf16.mxu0 %v283_v3  ;;  %v294_v10 = vld [vmem:[%s386_s1 + $0x30] ss:$8 sps:$4 sm:$0xff]   ;;  %v295_v11 = vld [vmem:[%s386_s1 + $0x24] ss:$8 sps:$4 sm:$0xff]   ;;  %v297_v12 = vld [vmem:[%s386_s1 + $0x20] ss:$8 sps:$4 sm:$0xff]  }
   0x5   :  { %v298_v13 = vld [vmem:[%s386_s1 + $0x14] ss:$8 sps:$4 sm:$0xff]   ;;  %v300_v14 = vld [vmem:[%s386_s1 + $0x10] ss:$8 sps:$4 sm:$0xff]   ;;  %v301_v15 = vld [vmem:[%s386_s1 + $0x4] ss:$8 sps:$4 sm:$0xff]  }
   0x6   :  { %v303_v16 = vld [vmem:[%s386_s1] ss:$8 sps:$4 sm:$0xff]  }
   0x7   :  { %133 = vmatpush1.bf16.msra.mxu0 %v285_v4  ;;  %v304_v17 = vld [vmem:[%s387_s0] sm:$0xff]  }
   0x8   :  { %134 = vmatprep.subr.bf16.mxu0 %v286_v5 }
   0xb   :  { %135 = vmatpush1.bf16.msra.mxu0 %v288_v6 }
   0xc   :  { %136 = vmatprep.subr.bf16.mxu0 %v289_v7 }
   0xf   :  { %137 = vmatpush1.bf16.msra.mxu0 %v291_v8 }
  0x10   :  { %138 = vmatprep.subr.bf16.mxu0 %v292_v9 }
  0x13   :  { %139 = vmatpush1.bf16.msra.mxu0 %v294_v10 }
  0x14   :  { %140 = vmatprep.subr.bf16.mxu0 %v295_v11 }
  0x17   :  { %141 = vmatpush1.bf16.msra.mxu0 %v297_v12 }
  0x18   :  { %142 = vmatprep.subr.bf16.mxu0 %v298_v13 }
  0x1b   :  { %143 = vmatpush1.bf16.msra.mxu0 %v300_v14 }
  0x1c   :  { %144 = vmatprep.subr.bf16.mxu0 %v301_v15 }
  0x1f   :  { %145 = vmatpush1.bf16.msra.mxu0 %v303_v16 }
  0x22   :  { %163 = vmatmul.mubr.bf16.vlgmr.msra.gmra.mxu0 %v304_v17 }
  0xe2   :  { %v164_v18 = vpop.f32.mrf.mxu0 }
  0xe3   :  { %v216_v22 = vmul.f32 %v164_v18, %v164_v18 }
  0xe4   :  { %v166_v19 = vpop.f32.mrf.mxu0 }
  0xe5   :  { %v277_v20 = vpack.c.bf16 %v166_v19, %v164_v18  ;;  %v217_v30 = vmul.f32 %v166_v19, %v166_v19 }
  0xe6   :  { %v168_v21 = vpop.f32.mrf.mxu0 }
  0xe7   :  { %v202_v23 = vadd.f32 %v168_v21, %v164_v18  ;;  %v218_v24 = vmul.f32 %v168_v21, %v168_v21  ;;  %200 = vst [vmem:[%s388_s2] sm:$0xff] %v277_v20 }
  0xe8   :  { %v170_v25 = vpop.f32.mrf.mxu0 }
  0xe9   :  { %v203_v26 = vrot.slane %v202_v23, 4  ;;  %v220_v27 = vadd.f32 %v218_v24, %v216_v22  ;;  %v278_v28 = vpack.c.bf16 %v170_v25, %v168_v21  ;;  %v209_v29 = vadd.f32 %v170_v25, %v166_v19 }
  0xea   :  { %v219_v31 = vmul.f32 %v170_v25, %v170_v25 }
  0xeb   :  { %v204_v32 = vadd.f32 %v203_v26, %v202_v23  ;;  %v221_v33 = vrot.slane %v220_v27, 4  ;;  %201 = vst [vmem:[%s388_s2 + $0x8] sm:$0xff] %v278_v28  ;;  %v210_v34 = vrot.slane %v209_v29, 4 }
  0xec   :  { %v227_v35 = vadd.f32 %v219_v31, %v217_v30 }
  0xed   :  { %v205_v36 = vrot.slane %v204_v32, 2  ;;  %v222_v37 = vadd.f32 %v221_v33, %v220_v27  ;;  %v211_v38 = vadd.f32 %v210_v34, %v209_v29 }
  0xee   :  { %v228_v39 = vrot.slane %v227_v35, 4 }
  0xef   :  { %v223_v40 = vrot.slane %v222_v37, 2  ;;  %v212_v41 = vrot.slane %v211_v38, 2  ;;  %v206_v42 = vadd.f32 %v205_v36, %v204_v32 }
  0xf0   :  { %v229_v43 = vadd.f32 %v228_v39, %v227_v35 }
  0xf1   :  { %v224_v44 = vadd.f32 %v223_v40, %v222_v37  ;;  %v213_v45 = vadd.f32 %v212_v41, %v211_v38  ;;  %v207_v48 = vrot.slane %v206_v42, 1 }
  0xf2   :  { %v230_v46 = vrot.slane %v229_v43, 2 }
  0xf3   :  { %v225_v47 = vrot.slane %v224_v44, 1  ;;  %v214_v49 = vrot.slane %v213_v45, 1  ;;  %v208_v53 = vadd.f32 %v207_v48, %v206_v42 }
  0xf4   :  { %v231_v50 = vadd.f32 %v230_v46, %v229_v43 }
  0xf5   :  { %v226_v51 = vadd.f32 %v225_v47, %v224_v44  ;;  %v215_v54 = vadd.f32 %v214_v49, %v213_v45 }
  0xf6   :  { %v232_v52 = vrot.slane %v231_v50, 1 }
  0xf7   :  { %v235_v56 = vsel %vm234_vm0, %v208_v53, %v226_v51 }
  0xf8   :  { %v233_v55 = vadd.f32 %v232_v52, %v231_v50 }
  0xfa   :  { %v236_v57 = vsel %vm234_vm0, %v215_v54, %v233_v55 }
  0xfb   :  { %v239_v58 = vcombine.low %v235_v56, %v236_v57 }
  0xfd   :  { %276 = vst.sshfl [vmem:[%s389_s3] sm:$0x33 pattern:$0x76325410] %v239_v58 }

// kernel: viewpoint_forward.68
= control target key start
LH: loop header
LB: loop body
LE: loop exit
PB: predicated region body
PF: predicated region fallthrough
CT: control target
= control target key end

     0   :  { %v22_v0 = vlaneseq  ;;  %s116_s0 = inlined_call_operand.vmem [shape: bf16[16,256], index: 0, kind: input, shape index: {}]   ;;  %s117_s1 = inlined_call_operand.vmem [shape: f32[1,256], index: 1, kind: input, shape index: {}]   ;;  %s118_s2 = inlined_call_operand.vmem [shape: f32[1,256], index: 2, kind: input, shape index: {}]   ;;  %s119_s3 = inlined_call_operand.vmem [shape: bf16[16,256], index: 3, kind: output, shape index: {}]  }
   0x1   :  { %v14_v1 = vld [vmem:[%s116_s0] sm:$0xff]  ;;  %v15_v3 = vld [vmem:[%s116_s0 + $0x8] sm:$0xff] }
   0x2   :  { %v23_v2 = vshrl.u32 %v22_v0, 7  ;;  %v16_v4 = vunpack.c.l.bf16 %v14_v1  ;;  %v17_v5 = vunpack.c.h.bf16 %v14_v1  ;;  %v20_v6 = vld [vmem:[%s117_s1] sm:$0x3]  ;;  %v18_v10 = vunpack.c.l.bf16 %v15_v3 }
   0x3   :  { %v36_v7 = vld [vmem:[%s118_s2] sm:$0x3]  ;;  %v19_v11 = vunpack.c.h.bf16 %v15_v3 }
   0x4   :  { %v24_v8 = vsub.s32 0, %v23_v2  ;;  %v28_v9 = vsub.s32 1, %v23_v2 }
   0x6   :  { %v25_v12 = vrot.slane %v20_v6, %v24_v8  ;;  %v29_v13 = vrot.slane %v20_v6, %v28_v9  ;;  %v41_v14 = vrot.slane %v36_v7, %v24_v8  ;;  %v45_v15 = vrot.slane %v36_v7, %v28_v9 }
   0x8   :  { %v32_v16 = vmul.f32 %v25_v12, %v16_v4  ;;  %v33_v17 = vmul.f32 %v29_v13, %v17_v5  ;;  %v34_v18 = vmul.f32 %v25_v12, %v18_v10  ;;  %v35_v19 = vmul.f32 %v29_v13, %v19_v11 }
   0xa   :  { %v48_v20 = vadd.f32 %v41_v14, %v32_v16  ;;  %v49_v21 = vadd.f32 %v45_v15, %v33_v17  ;;  %v50_v22 = vadd.f32 %v41_v14, %v34_v18  ;;  %v51_v23 = vadd.f32 %v45_v15, %v35_v19 }
   0xc   :  { %v52_v24 = vmax.f32 %v48_v20, 0.0  ;;  %v53_v25 = vmax.f32 %v49_v21, 0.0  ;;  %v54_v26 = vmax.f32 %v50_v22, 0.0  ;;  %v55_v27 = vmax.f32 %v51_v23, 0.0 }
   0xe   :  { %v76_v28 = vpack.c.bf16 %v53_v25, %v52_v24  ;;  %v77_v29 = vpack.c.bf16 %v55_v27, %v54_v26 }
  0x10   :  { %68 = vst [vmem:[%s119_s3] sm:$0xff] %v76_v28  ;;  %69 = vst [vmem:[%s119_s3 + $0x8] sm:$0xff] %v77_v29 }

// kernel: viewpoint_forward.67
= control target key start
LH: loop header
LB: loop body
LE: loop exit
PB: predicated region body
PF: predicated region fallthrough
CT: control target
= control target key end

     0   :  { %s1023_s12 = smov 0   ;;  %s1025_s13 = smov 0   ;;  %s1140_s0 = inlined_call_operand.vmem [shape: bf16[16,1280], index: 0, kind: input, shape index: {}]   ;;  %s1141_s1 = inlined_call_operand.vmem [shape: bf16[1280,256], index: 1, kind: input, shape index: {}]   ;;  %s1142_s2 = inlined_call_operand.vmem [shape: bf16[16,256], index: 2, kind: output, shape index: {0}]   ;;  %s1143_s3 = inlined_call_operand.vmem [shape: f32[1,2,256], index: 3, kind: output, shape index: {1}]  }
   0x1   :  { %s1027_s14 = smov 0   ;;  %s1029_s15 = smov 0  }
   0x2   :  { %s1031_s16 = smov 0  }
   0x3 LB: > { %s26_s17 = sadd.s32 1, %s996_s15  ;;  %p49_p1 = scmp.ne.s32.totalorder %s988_s13, %s984_s12  ;;  %s1000_s16 = sphi %s1031_s16, %s14_s16   ;;  %s996_s15 = sphi %s1029_s15, %s1147_s15   ;;  %s992_s14 = sphi %s1027_s14, %s1146_s14   ;;  %s988_s13 = sphi %s1025_s13, %s1145_s13   ;;  %s984_s12 = sphi %s1023_s12, %s1144_s12  }
   0x4   : > { %p27_p0 = scmp.ge.s32.totalorder %s26_s17, 5  ;;  %p50_p2 = scmp.eq.s32.totalorder %s1000_s16, 0 }
   0x5   : > { %s42_s19 = sadd.s32 1, %s988_s13  ;;  %p812_p5 = scmp.ge.s32.totalorder %s1000_s16, 5 }
   0x6   : > { %s1149_s17 = smov (%p27_p0, %s26_s17), 0  ;;  %p51_p3 = por %p50_p2, %p49_p1 }
   0x7   : > { %s38_s18 = ssub.s32 %s996_s15, %s1149_s17  ;;  %159 = sbr.rel (%p812_p5) target bundleno = 17 (0x11), region = 16 }
   0x8   : > { %p40_p4 = scmp.eq.s32.totalorder %s38_s18, 0 }
   0xa   : > { %s1058_s20 = scalar_select %p40_p4, %s988_s13, %s42_s19  }
   0xc   : > { %162 = sbr.rel (!%p51_p3) target bundleno = 17 (0x11), region = 20  ;;  %s164_s21 = sand.u32 (%p51_p3), 1, %s988_s13  }
   0xd   : > { %s866_s22 = sshll.u32 (%p51_p3), %s996_s15, 3  ;;  %s813_s23 = sshll.u32 (%p51_p3), %s164_s21, 4 }
   0xe   : > { %s172_s26 = scalar_lea.vmem (%p51_p3), %s1140_s0, %s866_s22  ;;  %s166_s27 = scalar_lea.vmem (%p51_p3), [#allocation3], %s813_s23 }
   0xf   : > { %v203_v0 = vld [vmem:[%s172_s26] sm:$0xff] (%p51_p3)  ;;  %v205_v1 = vld [vmem:[%s172_s26 + $0x28] sm:$0xff] (%p51_p3) }
  0x10   : > { %204 = vst [vmem:[%s166_s27] sm:$0xff] (%p51_p3), %v203_v0  ;;  %206 = vst [vmem:[%s166_s27 + $0x8] sm:$0xff] (%p51_p3), %v205_v1 }
  0x11 PF: > { %p816_p6 = scmp.ge.s32.totalorder %s1000_s16, 1  ;;  %p226_p7 = scmp.lt.s32.totalorder %s1000_s16, 6 }
  0x13   : > { %p227_p8 = pnand %p816_p6, %p226_p7 }
  0x14   : > { %s233_s28 = sand.u32 (!%p227_p8), 1, %s984_s12   ;;  %s818_s29 = sshll.u32 (!%p227_p8), %s992_s14, 5 }
  0x15   : > { %230 = sbr.rel (%p227_p8) target bundleno = 328 (0x148), region = 62  ;;  %s1070_s30 = sshll.u32 (!%p227_p8), %s233_s28, 4 }
  0x16   : > { %p284_p9 = scmp.lt.s32.totalorder (!%p227_p8), %s818_s29, 159  ;;  %s235_s8 = scalar_lea.vmem (!%p227_p8), [#allocation3], %s1070_s30 }
  0x17   : > { %p821_p10 = scmp.ne.s32.totalorder (!%p227_p8), %s992_s14, 0 }
  0x1a   : > { %s1151_s29 = smov (!%p284_p9, %s818_s29), 159  ;;  %319 = sbr.rel (%p821_p10) target bundleno = 34 (0x22), region = 70 }
  0x1b   : > { %s867_s4 = sshll.u32 %s1151_s29, 3 }
  0x1c   : > { %s1075_s7 = scalar_lea.vmem %s1141_s1, %s867_s4 }
  0x1f   : > { %v1002_v2 = vmov 0.0  }
  0x20   : > { %320 = vst [vmem:[#allocation2 + $0x10] sm:$0xff] %v1002_v2  ;;  %321 = vst [vmem:[#allocation2] sm:$0xff] %v1002_v2 }
  0x21   : > { %322 = vst [vmem:[#allocation2 + $0x18] sm:$0xff] %v1002_v2  ;;  %323 = vst [vmem:[#allocation2 + $0x8] sm:$0xff] %v1002_v2 }
  0x22 PF: > { %v911_v3 = vld [vmem:[%s1075_s7 + $0x74] ss:$8 sps:$4 sm:$0xff]   ;;  %v913_v4 = vld [vmem:[%s1075_s7 + $0x70] ss:$8 sps:$4 sm:$0xff]   ;;  %v914_v5 = vld [vmem:[%s1075_s7 + $0x64] ss:$8 sps:$4 sm:$0xff]  }
  0x23   : > { %532 = vmatprep.subr.bf16.mxu0 %v911_v3  ;;  %v916_v6 = vld [vmem:[%s1075_s7 + $0x60] ss:$8 sps:$4 sm:$0xff]   ;;  %v917_v7 = vld [vmem:[%s1075_s7 + $0x54] ss:$8 sps:$4 sm:$0xff]   ;;  %v919_v8 = vld [vmem:[%s1075_s7 + $0x50] ss:$8 sps:$4 sm:$0xff]  }
  0x24   : > { %533 = vmatpush1.bf16.msra.mxu0 %v913_v4  ;;  %v920_v9 = vld [vmem:[%s1075_s7 + $0x44] ss:$8 sps:$4 sm:$0xff]   ;;  %v922_v10 = vld [vmem:[%s1075_s7 + $0x40] ss:$8 sps:$4 sm:$0xff]   ;;  %v923_v11 = vld [vmem:[%s1075_s7 + $0x34] ss:$8 sps:$4 sm:$0xff]  }
  0x25   : > { %534 = vmatprep.subr.bf16.mxu0 %v914_v5  ;;  %v925_v12 = vld [vmem:[%s1075_s7 + $0x30] ss:$8 sps:$4 sm:$0xff]   ;;  %v926_v13 = vld [vmem:[%s1075_s7 + $0x24] ss:$8 sps:$4 sm:$0xff]   ;;  %v928_v14 = vld [vmem:[%s1075_s7 + $0x20] ss:$8 sps:$4 sm:$0xff]  }
  0x26   : > { %v929_v15 = vld [vmem:[%s1075_s7 + $0x14] ss:$8 sps:$4 sm:$0xff]   ;;  %v931_v17 = vld [vmem:[%s1075_s7 + $0x10] ss:$8 sps:$4 sm:$0xff]   ;;  %v932_v18 = vld [vmem:[%s1075_s7 + $0x4] ss:$8 sps:$4 sm:$0xff]  }
  0x27   : > { %v961_v16 = vld [vmem:[%s235_s8 + $0x4] ss:$8 sps:$4 sm:$0xff]   ;;  %v934_v19 = vld [vmem:[%s1075_s7] ss:$8 sps:$4 sm:$0xff]   ;;  %v937_v21 = vld [vmem:[%s1075_s7 + $0xf0] ss:$8 sps:$4 sm:$0xff]  }
  0x28   : > { %535 = vmatpush1.bf16.msra.mxu0 %v916_v6  ;;  %564 = vmatprep.mubr.bf16.mxu0 %v961_v16  ;;  %v935_v20 = vld [vmem:[%s1075_s7 + $0xf4] ss:$8 sps:$4 sm:$0xff]   ;;  %v938_v22 = vld [vmem:[%s1075_s7 + $0xe4] ss:$8 sps:$4 sm:$0xff]   ;;  %v940_v23 = vld [vmem:[%s1075_s7 + $0xe0] ss:$8 sps:$4 sm:$0xff]  }
  0x29   : > { %536 = vmatprep.subr.bf16.mxu0 %v917_v7  ;;  %v941_v24 = vld [vmem:[%s1075_s7 + $0xd4] ss:$8 sps:$4 sm:$0xff]   ;;  %v943_v25 = vld [vmem:[%s1075_s7 + $0xd0] ss:$8 sps:$4 sm:$0xff]   ;;  %v944_v26 = vld [vmem:[%s1075_s7 + $0xc4] ss:$8 sps:$4 sm:$0xff]  }
  0x2a   : > { %v946_v27 = vld [vmem:[%s1075_s7 + $0xc0] ss:$8 sps:$4 sm:$0xff]   ;;  %v947_v28 = vld [vmem:[%s1075_s7 + $0xb4] ss:$8 sps:$4 sm:$0xff]   ;;  %v949_v29 = vld [vmem:[%s1075_s7 + $0xb0] ss:$8 sps:$4 sm:$0xff]  }
  0x2b   : > { %v950_v30 = vld [vmem:[%s1075_s7 + $0xa4] ss:$8 sps:$4 sm:$0xff]   ;;  %v952_v31 = vld [vmem:[%s1075_s7 + $0xa0] ss:$8 sps:$4 sm:$0xff]   ;;  %v953_v32 = vld [vmem:[%s1075_s7 + $0x94] ss:$8 sps:$4 sm:$0xff]  }
  0x2c   : > { %537 = vmatpush1.bf16.msra.mxu0 %v919_v8  ;;  %v955_v33 = vld [vmem:[%s1075_s7 + $0x90] ss:$8 sps:$4 sm:$0xff]   ;;  %v956_v34 = vld [vmem:[%s1075_s7 + $0x84] ss:$8 sps:$4 sm:$0xff]   ;;  %v958_v35 = vld [vmem:[%s1075_s7 + $0x80] ss:$8 sps:$4 sm:$0xff]  }
  0x2d   : > { %538 = vmatprep.subr.bf16.mxu0 %v920_v9  ;;  %v959_v36 = vld [vmem:[%s235_s8] ss:$8 sps:$4 sm:$0xff]   ;;  %p856_p11 = scmp.ne.s32.totalorder %s992_s14, 4 }
  0x2e   : > { %v324_v37 = vld [vmem:[#allocation2 + $0x10] sm:$0xff]  ;;  %v325_v39 = vld [vmem:[#allocation2] sm:$0xff]  ;;  %v326_v42 = vld [vmem:[#allocation2 + $0x18] sm:$0xff] }
  0x2f   : > { %v327_v45 = vld [vmem:[#allocation2 + $0x8] sm:$0xff] }
  0x30   : > { %539 = vmatpush1.bf16.msra.mxu0 %v922_v10 }
  0x31   : > { %540 = vmatprep.subr.bf16.mxu0 %v923_v11 }
  0x34   : > { %541 = vmatpush1.bf16.msra.mxu0 %v925_v12 }
  0x35   : > { %542 = vmatprep.subr.bf16.mxu0 %v926_v13 }
  0x38   : > { %543 = vmatpush1.bf16.msra.mxu0 %v928_v14 }
  0x39   : > { %544 = vmatprep.subr.bf16.mxu0 %v929_v15 }
  0x3c   : > { %545 = vmatpush1.bf16.msra.mxu0 %v931_v17 }
  0x3d   : > { %546 = vmatprep.subr.bf16.mxu0 %v932_v18 }
  0x40   : > { %547 = vmatpush1.bf16.msra.mxu0 %v934_v19 }
  0x41   : > { %548 = vmatprep.subr.bf16.mxu0 %v935_v20 }
  0x44   : > { %549 = vmatpush2.bf16.msra.mxu0 %v937_v21 }
  0x45   : > { %550 = vmatprep.subr.bf16.mxu0 %v938_v22 }
  0x48   : > { %551 = vmatpush2.bf16.msra.mxu0 %v940_v23 }
  0x49   : > { %552 = vmatprep.subr.bf16.mxu0 %v941_v24 }
  0x4c   : > { %553 = vmatpush2.bf16.msra.mxu0 %v943_v25 }
  0x4d   : > { %554 = vmatprep.subr.bf16.mxu0 %v944_v26 }
  0x50   : > { %555 = vmatpush2.bf16.msra.mxu0 %v946_v27 }
  0x51   : > { %556 = vmatprep.subr.bf16.mxu0 %v947_v28 }
  0x54   : > { %557 = vmatpush2.bf16.msra.mxu0 %v949_v29 }
  0x55   : > { %558 = vmatprep.subr.bf16.mxu0 %v950_v30 }
  0x58   : > { %559 = vmatpush2.bf16.msra.mxu0 %v952_v31 }
  0x59   : > { %560 = vmatprep.subr.bf16.mxu0 %v953_v32 }
  0x5c   : > { %561 = vmatpush2.bf16.msra.mxu0 %v955_v33 }
  0x5d   : > { %562 = vmatprep.subr.bf16.mxu0 %v956_v34 }
  0x60   : > { %563 = vmatpush2.bf16.msra.mxu0 %v958_v35 }
  0x63   : > { %565 = vmatmul.mubr.bf16.vlgmr.msra.gmra.mxu0 %v959_v36 }
 0x123   : > { %v566_v38 = vpop.f32.mrf.mxu0 }
 0x124   : > { %v575_v40 = vadd.f32 %v566_v38, %v324_v37 }
 0x125   : > { %v568_v41 = vpop.f32.mrf.mxu0 }
 0x126   : > { %579 = vst [vmem:[#allocation2 + $0x10] sm:$0xff] %v575_v40  ;;  %v576_v43 = vadd.f32 %v568_v41, %v325_v39 }
 0x127   : > { %v570_v44 = vpop.f32.mrf.mxu0 }
 0x128   : > { %580 = vst [vmem:[#allocation2] sm:$0xff] %v576_v43  ;;  %v577_v46 = vadd.f32 %v570_v44, %v326_v42  ;;  %586 = sbr.rel (%p856_p11) target bundleno = 328 (0x148), region = 74 }
 0x129   : > { %v572_v47 = vpop.f32.mrf.mxu0 }
 0x12a   : > { %581 = vst [vmem:[#allocation2 + $0x18] sm:$0xff] %v577_v46  ;;  %v578_v48 = vadd.f32 %v572_v47, %v327_v45 }
 0x12c   : > { %582 = vst [vmem:[#allocation2 + $0x8] sm:$0xff] %v578_v48 }
 0x12d   : > { %v587_v49 = vld [vmem:[#allocation2 + $0x10] sm:$0xff]  ;;  %vm637_vm0 = vcmask 1040384  }
 0x12e   : > { %v619_v53 = vmul.f32 %v587_v49, %v587_v49 }
 0x12f   : > { %v588_v50 = vld [vmem:[#allocation2] sm:$0xff] }
 0x130   : > { %v868_v52 = vpack.c.bf16 %v588_v50, %v587_v49  ;;  %v620_v54 = vmul.f32 %v588_v50, %v588_v50 }
 0x131   : > { %v589_v51 = vld [vmem:[#allocation2 + $0x18] sm:$0xff] }
 0x132   : > { %v605_v56 = vadd.f32 %v589_v51, %v587_v49  ;;  %v621_v59 = vmul.f32 %v589_v51, %v589_v51  ;;  %603 = vst [vmem:[%s1142_s2] sm:$0xff] %v868_v52 }
 0x133   : > { %v590_v55 = vld [vmem:[#allocation2 + $0x8] sm:$0xff] }
 0x134   : > { %v869_v57 = vpack.c.bf16 %v590_v55, %v589_v51  ;;  %v612_v58 = vadd.f32 %v590_v55, %v588_v50  ;;  %v622_v60 = vmul.f32 %v590_v55, %v590_v55  ;;  %v606_v61 = vrot.slane %v605_v56, 4 }
 0x135   : > { %v623_v63 = vadd.f32 %v621_v59, %v619_v53 }
 0x136   : > { %604 = vst [vmem:[%s1142_s2 + $0x8] sm:$0xff] %v869_v57  ;;  %v613_v62 = vrot.slane %v612_v58, 4  ;;  %v630_v0 = vadd.f32 %v622_v60, %v620_v54  ;;  %v607_v1 = vadd.f32 %v606_v61, %v605_v56 }
 0x137   : > { %v624_v3 = vrot.slane %v623_v63, 4 }
 0x138   : > { %v614_v2 = vadd.f32 %v613_v62, %v612_v58  ;;  %v631_v4 = vrot.slane %v630_v0, 4  ;;  %v608_v5 = vrot.slane %v607_v1, 2 }
 0x139   : > { %v625_v7 = vadd.f32 %v624_v3, %v623_v63 }
 0x13a   : > { %v615_v6 = vrot.slane %v614_v2, 2  ;;  %v632_v8 = vadd.f32 %v631_v4, %v630_v0  ;;  %v609_v9 = vadd.f32 %v608_v5, %v607_v1 }
 0x13b   : > { %v626_v11 = vrot.slane %v625_v7, 2 }
 0x13c   : > { %v616_v10 = vadd.f32 %v615_v6, %v614_v2  ;;  %v633_v12 = vrot.slane %v632_v8, 2  ;;  %v610_v13 = vrot.slane %v609_v9, 1 }
 0x13d   : > { %v627_v15 = vadd.f32 %v626_v11, %v625_v7 }
 0x13e   : > { %v617_v14 = vrot.slane %v616_v10, 1  ;;  %v634_v16 = vadd.f32 %v633_v12, %v632_v8  ;;  %v611_v17 = vadd.f32 %v610_v13, %v609_v9 }
 0x13f   : > { %v628_v19 = vrot.slane %v627_v15, 1 }
 0x140   : > { %v618_v18 = vadd.f32 %v617_v14, %v616_v10  ;;  %v635_v20 = vrot.slane %v634_v16, 1 }
 0x141   : > { %v629_v21 = vadd.f32 %v628_v19, %v627_v15 }
 0x142   : > { %v636_v22 = vadd.f32 %v635_v20, %v634_v16 }
 0x143   : > { %v638_v23 = vsel %vm637_vm0, %v611_v17, %v629_v21 }
 0x144   : > { %v639_v24 = vsel %vm637_vm0, %v618_v18, %v636_v22 }
 0x145   : > { %v642_v25 = vcombine.low %v638_v23, %v639_v24 }
 0x147   : > { %859 = vst.sshfl [vmem:[%s1143_s3] sm:$0x33 pattern:$0x76325410] %v642_v25 }
 0x148 PF: > { %s14_s16 = sadd.s32 1, %s1000_s16   ;;  %s1144_s12 = smov %s988_s13 }
 0x149   : > { %p11_p12 = scmp.ge.s32.totalorder %s14_s16, 7   ;;  %s1145_s13 = smov %s1058_s20 }
 0x14a   : > { %s1146_s14 = smov %s996_s15  ;;  %s1147_s15 = smov %s1149_s17 }
 0x14b   :  { %13 = sbr.rel (!%p11_p12) target bundleno = 3 (0x3), region = 124 }

// kernel: viewpoint_forward.70
= control target key start
LH: loop header
LB: loop body
LE: loop exit
PB: predicated region body
PF: predicated region fallthrough
CT: control target
= control target key end

     0   :  { %v25_v0 = vlaneseq  ;;  %s140_s0 = inlined_call_operand.vmem [shape: bf16[16,256], index: 0, kind: input, shape index: {}]   ;;  %s141_s1 = inlined_call_operand.vmem [shape: f32[1,256], index: 1, kind: input, shape index: {}]   ;;  %s142_s2 = inlined_call_operand.vmem [shape: f32[1,256], index: 2, kind: input, shape index: {}]   ;;  %s143_s3 = inlined_call_operand.vmem [shape: bf16[16,256], index: 3, kind: input, shape index: {}]   ;;  %s144_s4 = inlined_call_operand.vmem [shape: bf16[16,256], index: 4, kind: output, shape index: {}]  }
   0x1   :  { %v17_v1 = vld [vmem:[%s140_s0] sm:$0xff]  ;;  %v18_v3 = vld [vmem:[%s140_s0 + $0x8] sm:$0xff] }
   0x2   :  { %v26_v2 = vshrl.u32 %v25_v0, 7  ;;  %v19_v4 = vunpack.c.l.bf16 %v17_v1  ;;  %v20_v5 = vunpack.c.h.bf16 %v17_v1  ;;  %v23_v6 = vld [vmem:[%s141_s1] sm:$0x3]  ;;  %v21_v11 = vunpack.c.l.bf16 %v18_v3  ;;  %v56_v13 = vld [vmem:[%s143_s3 + $0x8] sm:$0xff] }
   0x3   :  { %v39_v7 = vld [vmem:[%s142_s2] sm:$0x3]  ;;  %v22_v12 = vunpack.c.h.bf16 %v18_v3  ;;  %v59_v20 = vunpack.c.l.bf16 %v56_v13  ;;  %v60_v21 = vunpack.c.h.bf16 %v56_v13 }
   0x4   :  { %v27_v8 = vsub.s32 0, %v26_v2  ;;  %v31_v9 = vsub.s32 1, %v26_v2  ;;  %v55_v10 = vld [vmem:[%s143_s3] sm:$0xff] }
   0x5   :  { %v57_v18 = vunpack.c.l.bf16 %v55_v10  ;;  %v58_v19 = vunpack.c.h.bf16 %v55_v10 }
   0x6   :  { %v28_v14 = vrot.slane %v23_v6, %v27_v8  ;;  %v32_v15 = vrot.slane %v23_v6, %v31_v9  ;;  %v44_v16 = vrot.slane %v39_v7, %v27_v8  ;;  %v48_v17 = vrot.slane %v39_v7, %v31_v9 }
   0x8   :  { %v35_v22 = vmul.f32 %v28_v14, %v19_v4  ;;  %v36_v23 = vmul.f32 %v32_v15, %v20_v5  ;;  %v37_v24 = vmul.f32 %v28_v14, %v21_v11  ;;  %v38_v25 = vmul.f32 %v32_v15, %v22_v12 }
   0xa   :  { %v51_v26 = vadd.f32 %v44_v16, %v35_v22  ;;  %v52_v27 = vadd.f32 %v48_v17, %v36_v23  ;;  %v53_v28 = vadd.f32 %v44_v16, %v37_v24  ;;  %v54_v29 = vadd.f32 %v48_v17, %v38_v25 }
   0xc   :  { %v61_v30 = vadd.f32 %v57_v18, %v51_v26  ;;  %v62_v31 = vadd.f32 %v58_v19, %v52_v27  ;;  %v63_v32 = vadd.f32 %v59_v20, %v53_v28  ;;  %v64_v33 = vadd.f32 %v60_v21, %v54_v29 }
   0xe   :  { %v65_v34 = vmax.f32 %v61_v30, 0.0  ;;  %v66_v35 = vmax.f32 %v62_v31, 0.0  ;;  %v67_v36 = vmax.f32 %v63_v32, 0.0  ;;  %v68_v37 = vmax.f32 %v64_v33, 0.0 }
  0x10   :  { %v89_v38 = vpack.c.bf16 %v66_v35, %v65_v34  ;;  %v90_v39 = vpack.c.bf16 %v68_v37, %v67_v36 }
  0x12   :  { %81 = vst [vmem:[%s144_s4] sm:$0xff] %v89_v38  ;;  %82 = vst [vmem:[%s144_s4 + $0x8] sm:$0xff] %v90_v39 }

// kernel: viewpoint_forward.69
= control target key start
LH: loop header
LB: loop body
LE: loop exit
PB: predicated region body
PF: predicated region fallthrough
CT: control target
= control target key end

     0   :  { %s1023_s12 = smov 0   ;;  %s1025_s13 = smov 0   ;;  %s1140_s0 = inlined_call_operand.vmem [shape: bf16[16,2304], index: 0, kind: input, shape index: {}]   ;;  %s1141_s1 = inlined_call_operand.vmem [shape: bf16[2304,256], index: 1, kind: input, shape index: {}]   ;;  %s1142_s2 = inlined_call_operand.vmem [shape: bf16[16,256], index: 2, kind: output, shape index: {0}]   ;;  %s1143_s3 = inlined_call_operand.vmem [shape: f32[1,2,256], index: 3, kind: output, shape index: {1}]  }
   0x1   :  { %s1027_s14 = smov 0   ;;  %s1029_s15 = smov 0  }
   0x2   :  { %s1031_s16 = smov 0  }
   0x3 LB: > { %s26_s17 = sadd.s32 1, %s996_s15  ;;  %p49_p1 = scmp.ne.s32.totalorder %s988_s13, %s984_s12  ;;  %s1000_s16 = sphi %s1031_s16, %s14_s16   ;;  %s996_s15 = sphi %s1029_s15, %s1147_s15   ;;  %s992_s14 = sphi %s1027_s14, %s1146_s14   ;;  %s988_s13 = sphi %s1025_s13, %s1145_s13   ;;  %s984_s12 = sphi %s1023_s12, %s1144_s12  }
   0x4   : > { %p27_p0 = scmp.ge.s32.totalorder %s26_s17, 9  ;;  %p50_p2 = scmp.eq.s32.totalorder %s1000_s16, 0 }
   0x5   : > { %s42_s19 = sadd.s32 1, %s988_s13  ;;  %p812_p5 = scmp.ge.s32.totalorder %s1000_s16, 9 }
   0x6   : > { %s1149_s17 = smov (%p27_p0, %s26_s17), 0  ;;  %p51_p3 = por %p50_p2, %p49_p1 }
   0x7   : > { %s38_s18 = ssub.s32 %s996_s15, %s1149_s17  ;;  %159 = sbr.rel (%p812_p5) target bundleno = 17 (0x11), region = 16 }
   0x8   : > { %p40_p4 = scmp.eq.s32.totalorder %s38_s18, 0 }
   0xa   : > { %s1058_s20 = scalar_select %p40_p4, %s988_s13, %s42_s19  }
   0xc   : > { %162 = sbr.rel (!%p51_p3) target bundleno = 17 (0x11), region = 20  ;;  %s164_s21 = sand.u32 (%p51_p3), 1, %s988_s13  }
   0xd   : > { %s866_s22 = sshll.u32 (%p51_p3), %s996_s15, 3  ;;  %s813_s23 = sshll.u32 (%p51_p3), %s164_s21, 4 }
   0xe   : > { %s172_s26 = scalar_lea.vmem (%p51_p3), %s1140_s0, %s866_s22  ;;  %s166_s27 = scalar_lea.vmem (%p51_p3), [#allocation3], %s813_s23 }
   0xf   : > { %v203_v0 = vld [vmem:[%s172_s26] sm:$0xff] (%p51_p3)  ;;  %v205_v1 = vld [vmem:[%s172_s26 + $0x48] sm:$0xff] (%p51_p3) }
  0x10   : > { %204 = vst [vmem:[%s166_s27] sm:$0xff] (%p51_p3), %v203_v0  ;;  %206 = vst [vmem:[%s166_s27 + $0x8] sm:$0xff] (%p51_p3), %v205_v1 }
  0x11 PF: > { %p816_p6 = scmp.ge.s32.totalorder %s1000_s16, 1  ;;  %p226_p7 = scmp.lt.s32.totalorder %s1000_s16, 10 }
  0x13   : > { %p227_p8 = pnand %p816_p6, %p226_p7 }
  0x14   : > { %s233_s28 = sand.u32 (!%p227_p8), 1, %s984_s12   ;;  %s818_s29 = sshll.u32 (!%p227_p8), %s992_s14, 5 }
  0x15   : > { %230 = sbr.rel (%p227_p8) target bundleno = 328 (0x148), region = 62  ;;  %s1070_s30 = sshll.u32 (!%p227_p8), %s233_s28, 4 }
  0x16   : > { %p284_p9 = scmp.lt.s32.totalorder (!%p227_p8), %s818_s29, 287  ;;  %s235_s8 = scalar_lea.vmem (!%p227_p8), [#allocation3], %s1070_s30 }
  0x17   : > { %p821_p10 = scmp.ne.s32.totalorder (!%p227_p8), %s992_s14, 0 }
  0x1a   : > { %s1151_s29 = smov (!%p284_p9, %s818_s29), 287  ;;  %319 = sbr.rel (%p821_p10) target bundleno = 34 (0x22), region = 70 }
  0x1b   : > { %s867_s4 = sshll.u32 %s1151_s29, 3 }
  0x1c   : > { %s1075_s7 = scalar_lea.vmem %s1141_s1, %s867_s4 }
  0x1f   : > { %v1002_v2 = vmov 0.0  }
  0x20   : > { %320 = vst [vmem:[#allocation2 + $0x10] sm:$0xff] %v1002_v2  ;;  %321 = vst [vmem:[#allocation2] sm:$0xff] %v1002_v2 }
  0x21   : > { %322 = vst [vmem:[#allocation2 + $0x18] sm:$0xff] %v1002_v2  ;;  %323 = vst [vmem:[#allocation2 + $0x8] sm:$0xff] %v1002_v2 }
  0x22 PF: > { %v911_v3 = vld [vmem:[%s1075_s7 + $0x74] ss:$8 sps:$4 sm:$0xff]   ;;  %v913_v4 = vld [vmem:[%s1075_s7 + $0x70] ss:$8 sps:$4 sm:$0xff]   ;;  %v914_v5 = vld [vmem:[%s1075_s7 + $0x64] ss:$8 sps:$4 sm:$0xff]  }
  0x23   : > { %532 = vmatprep.subr.bf16.mxu0 %v911_v3  ;;  %v916_v6 = vld [vmem:[%s1075_s7 + $0x60] ss:$8 sps:$4 sm:$0xff]   ;;  %v917_v7 = vld [vmem:[%s1075_s7 + $0x54] ss:$8 sps:$4 sm:$0xff]   ;;  %v919_v8 = vld [vmem:[%s1075_s7 + $0x50] ss:$8 sps:$4 sm:$0xff]  }
  0x24   : > { %533 = vmatpush1.bf16.msra.mxu0 %v913_v4  ;;  %v920_v9 = vld [vmem:[%s1075_s7 + $0x44] ss:$8 sps:$4 sm:$0xff]   ;;  %v922_v10 = vld [vmem:[%s1075_s7 + $0x40] ss:$8 sps:$4 sm:$0xff]   ;;  %v923_v11 = vld [vmem:[%s1075_s7 + $0x34] ss:$8 sps:$4 sm:$0xff]  }
  0x25   : > { %534 = vmatprep.subr.bf16.mxu0 %v914_v5  ;;  %v925_v12 = vld [vmem:[%s1075_s7 + $0x30] ss:$8 sps:$4 sm:$0xff]   ;;  %v926_v13 = vld [vmem:[%s1075_s7 + $0x24] ss:$8 sps:$4 sm:$0xff]   ;;  %v928_v14 = vld [vmem:[%s1075_s7 + $0x20] ss:$8 sps:$4 sm:$0xff]  }
  0x26   : > { %v929_v15 = vld [vmem:[%s1075_s7 + $0x14] ss:$8 sps:$4 sm:$0xff]   ;;  %v931_v17 = vld [vmem:[%s1075_s7 + $0x10] ss:$8 sps:$4 sm:$0xff]   ;;  %v932_v18 = vld [vmem:[%s1075_s7 + $0x4] ss:$8 sps:$4 sm:$0xff]  }
  0x27   : > { %v961_v16 = vld [vmem:[%s235_s8 + $0x4] ss:$8 sps:$4 sm:$0xff]   ;;  %v934_v19 = vld [vmem:[%s1075_s7] ss:$8 sps:$4 sm:$0xff]   ;;  %v937_v21 = vld [vmem:[%s1075_s7 + $0xf0] ss:$8 sps:$4 sm:$0xff]  }
  0x28   : > { %535 = vmatpush1.bf16.msra.mxu0 %v916_v6  ;;  %564 = vmatprep.mubr.bf16.mxu0 %v961_v16  ;;  %v935_v20 = vld [vmem:[%s1075_s7 + $0xf4] ss:$8 sps:$4 sm:$0xff]   ;;  %v938_v22 = vld [vmem:[%s1075_s7 + $0xe4] ss:$8 sps:$4 sm:$0xff]   ;;  %v940_v23 = vld [vmem:[%s1075_s7 + $0xe0] ss:$8 sps:$4 sm:$0xff]  }
  0x29   : > { %536 = vmatprep.subr.bf16.mxu0 %v917_v7  ;;  %v941_v24 = vld [vmem:[%s1075_s7 + $0xd4] ss:$8 sps:$4 sm:$0xff]   ;;  %v943_v25 = vld [vmem:[%s1075_s7 + $0xd0] ss:$8 sps:$4 sm:$0xff]   ;;  %v944_v26 = vld [vmem:[%s1075_s7 + $0xc4] ss:$8 sps:$4 sm:$0xff]  }
  0x2a   : > { %v946_v27 = vld [vmem:[%s1075_s7 + $0xc0] ss:$8 sps:$4 sm:$0xff]   ;;  %v947_v28 = vld [vmem:[%s1075_s7 + $0xb4] ss:$8 sps:$4 sm:$0xff]   ;;  %v949_v29 = vld [vmem:[%s1075_s7 + $0xb0] ss:$8 sps:$4 sm:$0xff]  }
  0x2b   : > { %v950_v30 = vld [vmem:[%s1075_s7 + $0xa4] ss:$8 sps:$4 sm:$0xff]   ;;  %v952_v31 = vld [vmem:[%s1075_s7 + $0xa0] ss:$8 sps:$4 sm:$0xff]   ;;  %v953_v32 = vld [vmem:[%s1075_s7 + $0x94] ss:$8 sps:$4 sm:$0xff]  }
  0x2c   : > { %537 = vmatpush1.bf16.msra.mxu0 %v919_v8  ;;  %v955_v33 = vld [vmem:[%s1075_s7 + $0x90] ss:$8 sps:$4 sm:$0xff]   ;;  %v956_v34 = vld [vmem:[%s1075_s7 + $0x84] ss:$8 sps:$4 sm:$0xff]   ;;  %v958_v35 = vld [vmem:[%s1075_s7 + $0x80] ss:$8 sps:$4 sm:$0xff]  }
  0x2d   : > { %538 = vmatprep.subr.bf16.mxu0 %v920_v9  ;;  %v959_v36 = vld [vmem:[%s235_s8] ss:$8 sps:$4 sm:$0xff]   ;;  %p856_p11 = scmp.ne.s32.totalorder %s992_s14, 8 }
  0x2e   : > { %v324_v37 = vld [vmem:[#allocation2 + $0x10] sm:$0xff]  ;;  %v325_v39 = vld [vmem:[#allocation2] sm:$0xff]  ;;  %v326_v42 = vld [vmem:[#allocation2 + $0x18] sm:$0xff] }
  0x2f   : > { %v327_v45 = vld [vmem:[#allocation2 + $0x8] sm:$0xff] }
  0x30   : > { %539 = vmatpush1.bf16.msra.mxu0 %v922_v10 }
  0x31   : > { %540 = vmatprep.subr.bf16.mxu0 %v923_v11 }
  0x34   : > { %541 = vmatpush1.bf16.msra.mxu0 %v925_v12 }
  0x35   : > { %542 = vmatprep.subr.bf16.mxu0 %v926_v13 }
  0x38   : > { %543 = vmatpush1.bf16.msra.mxu0 %v928_v14 }
  0x39   : > { %544 = vmatprep.subr.bf16.mxu0 %v929_v15 }
  0x3c   : > { %545 = vmatpush1.bf16.msra.mxu0 %v931_v17 }
  0x3d   : > { %546 = vmatprep.subr.bf16.mxu0 %v932_v18 }
  0x40   : > { %547 = vmatpush1.bf16.msra.mxu0 %v934_v19 }
  0x41   : > { %548 = vmatprep.subr.bf16.mxu0 %v935_v20 }
  0x44   : > { %549 = vmatpush2.bf16.msra.mxu0 %v937_v21 }
  0x45   : > { %550 = vmatprep.subr.bf16.mxu0 %v938_v22 }
  0x48   : > { %551 = vmatpush2.bf16.msra.mxu0 %v940_v23 }
  0x49   : > { %552 = vmatprep.subr.bf16.mxu0 %v941_v24 }
  0x4c   : > { %553 = vmatpush2.bf16.msra.mxu0 %v943_v25 }
  0x4d   : > { %554 = vmatprep.subr.bf16.mxu0 %v944_v26 }
  0x50   : > { %555 = vmatpush2.bf16.msra.mxu0 %v946_v27 }
  0x51   : > { %556 = vmatprep.subr.bf16.mxu0 %v947_v28 }
  0x54   : > { %557 = vmatpush2.bf16.msra.mxu0 %v949_v29 }
  0x55   : > { %558 = vmatprep.subr.bf16.mxu0 %v950_v30 }
  0x58   : > { %559 = vmatpush2.bf16.msra.mxu0 %v952_v31 }
  0x59   : > { %560 = vmatprep.subr.bf16.mxu0 %v953_v32 }
  0x5c   : > { %561 = vmatpush2.bf16.msra.mxu0 %v955_v33 }
  0x5d   : > { %562 = vmatprep.subr.bf16.mxu0 %v956_v34 }
  0x60   : > { %563 = vmatpush2.bf16.msra.mxu0 %v958_v35 }
  0x63   : > { %565 = vmatmul.mubr.bf16.vlgmr.msra.gmra.mxu0 %v959_v36 }
 0x123   : > { %v566_v38 = vpop.f32.mrf.mxu0 }
 0x124   : > { %v575_v40 = vadd.f32 %v566_v38, %v324_v37 }
 0x125   : > { %v568_v41 = vpop.f32.mrf.mxu0 }
 0x126   : > { %579 = vst [vmem:[#allocation2 + $0x10] sm:$0xff] %v575_v40  ;;  %v576_v43 = vadd.f32 %v568_v41, %v325_v39 }
 0x127   : > { %v570_v44 = vpop.f32.mrf.mxu0 }
 0x128   : > { %580 = vst [vmem:[#allocation2] sm:$0xff] %v576_v43  ;;  %v577_v46 = vadd.f32 %v570_v44, %v326_v42  ;;  %586 = sbr.rel (%p856_p11) target bundleno = 328 (0x148), region = 74 }
 0x129   : > { %v572_v47 = vpop.f32.mrf.mxu0 }
 0x12a   : > { %581 = vst [vmem:[#allocation2 + $0x18] sm:$0xff] %v577_v46  ;;  %v578_v48 = vadd.f32 %v572_v47, %v327_v45 }
 0x12c   : > { %582 = vst [vmem:[#allocation2 + $0x8] sm:$0xff] %v578_v48 }
 0x12d   : > { %v587_v49 = vld [vmem:[#allocation2 + $0x10] sm:$0xff]  ;;  %vm637_vm0 = vcmask 1040384  }
 0x12e   : > { %v619_v53 = vmul.f32 %v587_v49, %v587_v49 }
 0x12f   : > { %v588_v50 = vld [vmem:[#allocation2] sm:$0xff] }
 0x130   : > { %v868_v52 = vpack.c.bf16 %v588_v50, %v587_v49  ;;  %v620_v54 = vmul.f32 %v588_v50, %v588_v50 }
 0x131   : > { %v589_v51 = vld [vmem:[#allocation2 + $0x18] sm:$0xff] }
 0x132   : > { %v605_v56 = vadd.f32 %v589_v51, %v587_v49  ;;  %v621_v59 = vmul.f32 %v589_v51, %v589_v51  ;;  %603 = vst [vmem:[%s1142_s2] sm:$0xff] %v868_v52 }
 0x133   : > { %v590_v55 = vld [vmem:[#allocation2 + $0x8] sm:$0xff] }
 0x134   : > { %v869_v57 = vpack.c.bf16 %v590_v55, %v589_v51  ;;  %v612_v58 = vadd.f32 %v590_v55, %v588_v50  ;;  %v622_v60 = vmul.f32 %v590_v55, %v590_v55  ;;  %v606_v61 = vrot.slane %v605_v56, 4 }
 0x135   : > { %v623_v63 = vadd.f32 %v621_v59, %v619_v53 }
 0x136   : > { %604 = vst [vmem:[%s1142_s2 + $0x8] sm:$0xff] %v869_v57  ;;  %v613_v62 = vrot.slane %v612_v58, 4  ;;  %v630_v0 = vadd.f32 %v622_v60, %v620_v54  ;;  %v607_v1 = vadd.f32 %v606_v61, %v605_v56 }
 0x137   : > { %v624_v3 = vrot.slane %v623_v63, 4 }
 0x138   : > { %v614_v2 = vadd.f32 %v613_v62, %v612_v58  ;;  %v631_v4 = vrot.slane %v630_v0, 4  ;;  %v608_v5 = vrot.slane %v607_v1, 2 }
 0x139   : > { %v625_v7 = vadd.f32 %v624_v3, %v623_v63 }
 0x13a   : > { %v615_v6 = vrot.slane %v614_v2, 2  ;;  %v632_v8 = vadd.f32 %v631_v4, %v630_v0  ;;  %v609_v9 = vadd.f32 %v608_v5, %v607_v1 }
 0x13b   : > { %v626_v11 = vrot.slane %v625_v7, 2 }
 0x13c   : > { %v616_v10 = vadd.f32 %v615_v6, %v614_v2  ;;  %v633_v12 = vrot.slane %v632_v8, 2  ;;  %v610_v13 = vrot.slane %v609_v9, 1 }
 0x13d   : > { %v627_v15 = vadd.f32 %v626_v11, %v625_v7 }
 0x13e   : > { %v617_v14 = vrot.slane %v616_v10, 1  ;;  %v634_v16 = vadd.f32 %v633_v12, %v632_v8  ;;  %v611_v17 = vadd.f32 %v610_v13, %v609_v9 }
 0x13f   : > { %v628_v19 = vrot.slane %v627_v15, 1 }
 0x140   : > { %v618_v18 = vadd.f32 %v617_v14, %v616_v10  ;;  %v635_v20 = vrot.slane %v634_v16, 1 }
 0x141   : > { %v629_v21 = vadd.f32 %v628_v19, %v627_v15 }
 0x142   : > { %v636_v22 = vadd.f32 %v635_v20, %v634_v16 }
 0x143   : > { %v638_v23 = vsel %vm637_vm0, %v611_v17, %v629_v21 }
 0x144   : > { %v639_v24 = vsel %vm637_vm0, %v618_v18, %v636_v22 }
 0x145   : > { %v642_v25 = vcombine.low %v638_v23, %v639_v24 }
 0x147   : > { %859 = vst.sshfl [vmem:[%s1143_s3] sm:$0x33 pattern:$0x76325410] %v642_v25 }
 0x148 PF: > { %s14_s16 = sadd.s32 1, %s1000_s16   ;;  %s1144_s12 = smov %s988_s13 }
 0x149   : > { %p11_p12 = scmp.ge.s32.totalorder %s14_s16, 11   ;;  %s1145_s13 = smov %s1058_s20 }
 0x14a   : > { %s1146_s14 = smov %s996_s15  ;;  %s1147_s15 = smov %s1149_s17 }
 0x14b   :  { %13 = sbr.rel (!%p11_p12) target bundleno = 3 (0x3), region = 124 }

// kernel: viewpoint_forward.76
= control target key start
LH: loop header
LB: loop body
LE: loop exit
PB: predicated region body
PF: predicated region fallthrough
CT: control target
= control target key end

     0   :  { %v28_v0 = vlaneseq  ;;  %s176_s0 = inlined_call_operand.vmem [shape: bf16[16,512], index: 0, kind: input, shape index: {}]   ;;  %s177_s1 = inlined_call_operand.vmem [shape: f32[1,512], index: 1, kind: input, shape index: {}]   ;;  %s178_s2 = inlined_call_operand.vmem [shape: f32[1,512], index: 2, kind: input, shape index: {}]   ;;  %s179_s3 = inlined_call_operand.vmem [shape: bf16[16,512], index: 3, kind: output, shape index: {}]  }
   0x1   :  { %v14_v1 = vld [vmem:[%s176_s0] sm:$0xff]  ;;  %v15_v3 = vld [vmem:[%s176_s0 + $0x8] sm:$0xff]  ;;  %v16_v4 = vld [vmem:[%s176_s0 + $0x10] sm:$0xff] }
   0x2   :  { %v29_v2 = vshrl.u32 %v28_v0, 7  ;;  %v17_v5 = vld [vmem:[%s176_s0 + $0x18] sm:$0xff]  ;;  %v18_v6 = vunpack.c.l.bf16 %v14_v1  ;;  %v19_v7 = vunpack.c.h.bf16 %v14_v1  ;;  %v26_v8 = vld [vmem:[%s177_s1] sm:$0xf]  ;;  %v22_v10 = vunpack.c.l.bf16 %v16_v4 }
   0x3   :  { %v56_v9 = vld [vmem:[%s178_s2] sm:$0xf]  ;;  %v23_v11 = vunpack.c.h.bf16 %v16_v4  ;;  %v20_v16 = vunpack.c.l.bf16 %v15_v3  ;;  %v21_v17 = vunpack.c.h.bf16 %v15_v3  ;;  %v24_v18 = vunpack.c.l.bf16 %v17_v5 }
   0x4   :  { %v30_v12 = vsub.s32 0, %v29_v2  ;;  %v34_v13 = vsub.s32 1, %v29_v2  ;;  %v38_v14 = vsub.s32 2, %v29_v2  ;;  %v42_v15 = vsub.s32 3, %v29_v2 }
   0x5   :  { %v25_v19 = vunpack.c.h.bf16 %v17_v5 }
   0x6   :  { %v31_v20 = vrot.slane %v26_v8, %v30_v12  ;;  %v35_v21 = vrot.slane %v26_v8, %v34_v13  ;;  %v61_v22 = vrot.slane %v56_v9, %v30_v12  ;;  %v65_v23 = vrot.slane %v56_v9, %v34_v13 }
   0x7   :  { %v39_v24 = vrot.slane %v26_v8, %v38_v14  ;;  %v43_v25 = vrot.slane %v26_v8, %v42_v15  ;;  %v69_v26 = vrot.slane %v56_v9, %v38_v14  ;;  %v73_v27 = vrot.slane %v56_v9, %v42_v15 }
   0x8   :  { %v48_v28 = vmul.f32 %v31_v20, %v18_v6  ;;  %v49_v29 = vmul.f32 %v35_v21, %v19_v7  ;;  %v52_v30 = vmul.f32 %v31_v20, %v22_v10  ;;  %v53_v31 = vmul.f32 %v35_v21, %v23_v11 }
   0x9   :  { %v50_v32 = vmul.f32 %v39_v24, %v20_v16  ;;  %v51_v33 = vmul.f32 %v43_v25, %v21_v17  ;;  %v54_v34 = vmul.f32 %v39_v24, %v24_v18  ;;  %v55_v35 = vmul.f32 %v43_v25, %v25_v19 }
   0xa   :  { %v78_v36 = vadd.f32 %v61_v22, %v48_v28  ;;  %v79_v37 = vadd.f32 %v65_v23, %v49_v29  ;;  %v82_v38 = vadd.f32 %v61_v22, %v52_v30  ;;  %v83_v39 = vadd.f32 %v65_v23, %v53_v31 }
   0xb   :  { %v80_v40 = vadd.f32 %v69_v26, %v50_v32  ;;  %v81_v41 = vadd.f32 %v73_v27, %v51_v33  ;;  %v84_v42 = vadd.f32 %v69_v26, %v54_v34  ;;  %v85_v43 = vadd.f32 %v73_v27, %v55_v35 }
   0xc   :  { %v122_v44 = vpack.c.bf16 %v79_v37, %v78_v36  ;;  %v124_v45 = vpack.c.bf16 %v83_v39, %v82_v38 }
   0xd   :  { %v123_v46 = vpack.c.bf16 %v81_v41, %v80_v40  ;;  %v125_v47 = vpack.c.bf16 %v85_v43, %v84_v42 }
   0xe   :  { %110 = vst [vmem:[%s179_s3] sm:$0xff] %v122_v44  ;;  %112 = vst [vmem:[%s179_s3 + $0x10] sm:$0xff] %v124_v45 }
   0xf   :  { %111 = vst [vmem:[%s179_s3 + $0x8] sm:$0xff] %v123_v46  ;;  %113 = vst [vmem:[%s179_s3 + $0x18] sm:$0xff] %v125_v47 }

// kernel: viewpoint_forward.75
= control target key start
LH: loop header
LB: loop body
LE: loop exit
PB: predicated region body
PF: predicated region fallthrough
CT: control target
= control target key end

     0   :  { %vm634_vm0 = vcmask 1040384   ;;  %s1078_s1 = inlined_call_operand.vmem [shape: bf16[256,512], index: 1, kind: input, shape index: {}]   ;;  %s1079_s0 = inlined_call_operand.vmem [shape: bf16[16,256], index: 0, kind: input, shape index: {}]   ;;  %s1080_s2 = inlined_call_operand.vmem [shape: bf16[16,512], index: 2, kind: output, shape index: {0}]   ;;  %s1081_s3 = inlined_call_operand.vmem [shape: f32[1,2,512], index: 3, kind: output, shape index: {1}]  }
   0x1   :  { %v745_v0 = vld [vmem:[%s1078_s1 + $0xe4] ss:$16 sps:$4 sm:$0xff]   ;;  %v747_v1 = vld [vmem:[%s1078_s1 + $0xec] ss:$16 sps:$4 sm:$0xff]   ;;  %v749_v2 = vld [vmem:[%s1078_s1 + $0xe0] ss:$16 sps:$4 sm:$0xff]  }
   0x2   :  { %429 = vmatprep.subr.bf16.mxu0 %v745_v0  ;;  %v750_v3 = vld [vmem:[%s1078_s1 + $0xe8] ss:$16 sps:$4 sm:$0xff]   ;;  %472 = vmatprep.subr.bf16.mxu1 %v747_v1  ;;  %v751_v4 = vld [vmem:[%s1078_s1 + $0xc4] ss:$16 sps:$4 sm:$0xff]   ;;  %v753_v5 = vld [vmem:[%s1078_s1 + $0xcc] ss:$16 sps:$4 sm:$0xff]  }
   0x3   :  { %430 = vmatpush1.bf16.msra.mxu0 %v749_v2  ;;  %473 = vmatpush1.bf16.msra.mxu1 %v750_v3  ;;  %v755_v6 = vld [vmem:[%s1078_s1 + $0xc0] ss:$16 sps:$4 sm:$0xff]   ;;  %v756_v7 = vld [vmem:[%s1078_s1 + $0xc8] ss:$16 sps:$4 sm:$0xff]   ;;  %v757_v8 = vld [vmem:[%s1078_s1 + $0xa4] ss:$16 sps:$4 sm:$0xff]  }
   0x4   :  { %431 = vmatprep.subr.bf16.mxu0 %v751_v4  ;;  %474 = vmatprep.subr.bf16.mxu1 %v753_v5  ;;  %v759_v9 = vld [vmem:[%s1078_s1 + $0xac] ss:$16 sps:$4 sm:$0xff]   ;;  %v761_v10 = vld [vmem:[%s1078_s1 + $0xa0] ss:$16 sps:$4 sm:$0xff]   ;;  %v762_v11 = vld [vmem:[%s1078_s1 + $0xa8] ss:$16 sps:$4 sm:$0xff]  }
   0x5   :  { %v763_v12 = vld [vmem:[%s1078_s1 + $0x84] ss:$16 sps:$4 sm:$0xff]   ;;  %v765_v13 = vld [vmem:[%s1078_s1 + $0x8c] ss:$16 sps:$4 sm:$0xff]   ;;  %v767_v14 = vld [vmem:[%s1078_s1 + $0x80] ss:$16 sps:$4 sm:$0xff]  }
   0x6   :  { %v768_v15 = vld [vmem:[%s1078_s1 + $0x88] ss:$16 sps:$4 sm:$0xff]   ;;  %v769_v16 = vld [vmem:[%s1078_s1 + $0x64] ss:$16 sps:$4 sm:$0xff]   ;;  %v771_v17 = vld [vmem:[%s1078_s1 + $0x6c] ss:$16 sps:$4 sm:$0xff]  }
   0x7   :  { %432 = vmatpush1.bf16.msra.mxu0 %v755_v6  ;;  %475 = vmatpush1.bf16.msra.mxu1 %v756_v7  ;;  %v773_v18 = vld [vmem:[%s1078_s1 + $0x60] ss:$16 sps:$4 sm:$0xff]   ;;  %v774_v19 = vld [vmem:[%s1078_s1 + $0x68] ss:$16 sps:$4 sm:$0xff]   ;;  %v775_v20 = vld [vmem:[%s1078_s1 + $0x44] ss:$16 sps:$4 sm:$0xff]  }
   0x8   :  { %433 = vmatprep.subr.bf16.mxu0 %v757_v8  ;;  %476 = vmatprep.subr.bf16.mxu1 %v759_v9  ;;  %v777_v21 = vld [vmem:[%s1078_s1 + $0x4c] ss:$16 sps:$4 sm:$0xff]   ;;  %v779_v22 = vld [vmem:[%s1078_s1 + $0x40] ss:$16 sps:$4 sm:$0xff]   ;;  %v780_v23 = vld [vmem:[%s1078_s1 + $0x48] ss:$16 sps:$4 sm:$0xff]  }
   0x9   :  { %v781_v24 = vld [vmem:[%s1078_s1 + $0x24] ss:$16 sps:$4 sm:$0xff]   ;;  %v783_v25 = vld [vmem:[%s1078_s1 + $0x2c] ss:$16 sps:$4 sm:$0xff]   ;;  %v785_v26 = vld [vmem:[%s1078_s1 + $0x20] ss:$16 sps:$4 sm:$0xff]  }
   0xa   :  { %v786_v27 = vld [vmem:[%s1078_s1 + $0x28] ss:$16 sps:$4 sm:$0xff]   ;;  %v787_v28 = vld [vmem:[%s1078_s1 + $0x4] ss:$16 sps:$4 sm:$0xff]   ;;  %v789_v29 = vld [vmem:[%s1078_s1 + $0xc] ss:$16 sps:$4 sm:$0xff]  }
   0xb   :  { %434 = vmatpush1.bf16.msra.mxu0 %v761_v10  ;;  %477 = vmatpush1.bf16.msra.mxu1 %v762_v11  ;;  %v791_v30 = vld [vmem:[%s1078_s1] ss:$16 sps:$4 sm:$0xff]   ;;  %v792_v31 = vld [vmem:[%s1078_s1 + $0x8] ss:$16 sps:$4 sm:$0xff]   ;;  %v793_v32 = vld [vmem:[%s1078_s1 + $0x1e4] ss:$16 sps:$4 sm:$0xff]  }
   0xc   :  { %435 = vmatprep.subr.bf16.mxu0 %v763_v12  ;;  %478 = vmatprep.subr.bf16.mxu1 %v765_v13  ;;  %v795_v33 = vld [vmem:[%s1078_s1 + $0x1ec] ss:$16 sps:$4 sm:$0xff]   ;;  %v797_v34 = vld [vmem:[%s1078_s1 + $0x1e0] ss:$16 sps:$4 sm:$0xff]   ;;  %v798_v35 = vld [vmem:[%s1078_s1 + $0x1e8] ss:$16 sps:$4 sm:$0xff]  }
   0xd   :  { %v799_v36 = vld [vmem:[%s1078_s1 + $0x1c4] ss:$16 sps:$4 sm:$0xff]   ;;  %v801_v37 = vld [vmem:[%s1078_s1 + $0x1cc] ss:$16 sps:$4 sm:$0xff]   ;;  %v803_v38 = vld [vmem:[%s1078_s1 + $0x1c0] ss:$16 sps:$4 sm:$0xff]  }
   0xe   :  { %v804_v39 = vld [vmem:[%s1078_s1 + $0x1c8] ss:$16 sps:$4 sm:$0xff]   ;;  %v805_v40 = vld [vmem:[%s1078_s1 + $0x1a4] ss:$16 sps:$4 sm:$0xff]   ;;  %v807_v41 = vld [vmem:[%s1078_s1 + $0x1ac] ss:$16 sps:$4 sm:$0xff]  }
   0xf   :  { %436 = vmatpush1.bf16.msra.mxu0 %v767_v14  ;;  %479 = vmatpush1.bf16.msra.mxu1 %v768_v15  ;;  %v809_v42 = vld [vmem:[%s1078_s1 + $0x1a0] ss:$16 sps:$4 sm:$0xff]   ;;  %v810_v43 = vld [vmem:[%s1078_s1 + $0x1a8] ss:$16 sps:$4 sm:$0xff]   ;;  %v811_v44 = vld [vmem:[%s1078_s1 + $0x184] ss:$16 sps:$4 sm:$0xff]  }
  0x10   :  { %437 = vmatprep.subr.bf16.mxu0 %v769_v16  ;;  %480 = vmatprep.subr.bf16.mxu1 %v771_v17  ;;  %v813_v45 = vld [vmem:[%s1078_s1 + $0x18c] ss:$16 sps:$4 sm:$0xff]   ;;  %v815_v47 = vld [vmem:[%s1078_s1 + $0x180] ss:$16 sps:$4 sm:$0xff]   ;;  %v816_v48 = vld [vmem:[%s1078_s1 + $0x188] ss:$16 sps:$4 sm:$0xff]  }
  0x11   :  { %v843_v46 = vld [vmem:[%s1079_s0 + $0x4] ss:$8 sps:$4 sm:$0xff]   ;;  %v821_v51 = vld [vmem:[%s1078_s1 + $0x160] ss:$16 sps:$4 sm:$0xff]   ;;  %v822_v52 = vld [vmem:[%s1078_s1 + $0x168] ss:$16 sps:$4 sm:$0xff]  }
  0x12   :  { %v817_v49 = vld [vmem:[%s1078_s1 + $0x164] ss:$16 sps:$4 sm:$0xff]   ;;  %v819_v50 = vld [vmem:[%s1078_s1 + $0x16c] ss:$16 sps:$4 sm:$0xff]   ;;  %461 = vmatprep.mubr.bf16.mxu0 %v843_v46  ;;  %504 = vmatprep.mubr.bf16.mxu1 %v843_v46  ;;  %v827_v55 = vld [vmem:[%s1078_s1 + $0x140] ss:$16 sps:$4 sm:$0xff]  }
  0x13   :  { %438 = vmatpush1.bf16.msra.mxu0 %v773_v18  ;;  %481 = vmatpush1.bf16.msra.mxu1 %v774_v19  ;;  %v823_v53 = vld [vmem:[%s1078_s1 + $0x144] ss:$16 sps:$4 sm:$0xff]   ;;  %v825_v54 = vld [vmem:[%s1078_s1 + $0x14c] ss:$16 sps:$4 sm:$0xff]   ;;  %v828_v56 = vld [vmem:[%s1078_s1 + $0x148] ss:$16 sps:$4 sm:$0xff]  }
  0x14   :  { %439 = vmatprep.subr.bf16.mxu0 %v775_v20  ;;  %482 = vmatprep.subr.bf16.mxu1 %v777_v21  ;;  %v829_v57 = vld [vmem:[%s1078_s1 + $0x124] ss:$16 sps:$4 sm:$0xff]   ;;  %v831_v58 = vld [vmem:[%s1078_s1 + $0x12c] ss:$16 sps:$4 sm:$0xff]   ;;  %v833_v59 = vld [vmem:[%s1078_s1 + $0x120] ss:$16 sps:$4 sm:$0xff]  }
  0x15   :  { %v834_v60 = vld [vmem:[%s1078_s1 + $0x128] ss:$16 sps:$4 sm:$0xff]   ;;  %v835_v61 = vld [vmem:[%s1078_s1 + $0x104] ss:$16 sps:$4 sm:$0xff]   ;;  %v837_v62 = vld [vmem:[%s1078_s1 + $0x10c] ss:$16 sps:$4 sm:$0xff]  }
  0x16   :  { %v839_v63 = vld [vmem:[%s1078_s1 + $0x100] ss:$16 sps:$4 sm:$0xff]   ;;  %v840_v0 = vld [vmem:[%s1078_s1 + $0x108] ss:$16 sps:$4 sm:$0xff]  }
  0x17   :  { %440 = vmatpush1.bf16.msra.mxu0 %v779_v22  ;;  %483 = vmatpush1.bf16.msra.mxu1 %v780_v23  ;;  %v841_v1 = vld [vmem:[%s1079_s0] ss:$8 sps:$4 sm:$0xff]  }
  0x18   :  { %441 = vmatprep.subr.bf16.mxu0 %v781_v24  ;;  %484 = vmatprep.subr.bf16.mxu1 %v783_v25 }
  0x1b   :  { %442 = vmatpush1.bf16.msra.mxu0 %v785_v26  ;;  %485 = vmatpush1.bf16.msra.mxu1 %v786_v27 }
  0x1c   :  { %443 = vmatprep.subr.bf16.mxu0 %v787_v28  ;;  %486 = vmatprep.subr.bf16.mxu1 %v789_v29 }
  0x1f   :  { %444 = vmatpush1.bf16.msra.mxu0 %v791_v30  ;;  %487 = vmatpush1.bf16.msra.mxu1 %v792_v31 }
  0x20   :  { %445 = vmatprep.subr.bf16.mxu0 %v793_v32  ;;  %488 = vmatprep.subr.bf16.mxu1 %v795_v33 }
  0x23   :  { %446 = vmatpush2.bf16.msra.mxu0 %v797_v34  ;;  %489 = vmatpush2.bf16.msra.mxu1 %v798_v35 }
  0x24   :  { %447 = vmatprep.subr.bf16.mxu0 %v799_v36  ;;  %490 = vmatprep.subr.bf16.mxu1 %v801_v37 }
  0x27   :  { %448 = vmatpush2.bf16.msra.mxu0 %v803_v38  ;;  %491 = vmatpush2.bf16.msra.mxu1 %v804_v39 }
  0x28   :  { %449 = vmatprep.subr.bf16.mxu0 %v805_v40  ;;  %492 = vmatprep.subr.bf16.mxu1 %v807_v41 }
  0x2b   :  { %450 = vmatpush2.bf16.msra.mxu0 %v809_v42  ;;  %493 = vmatpush2.bf16.msra.mxu1 %v810_v43 }
  0x2c   :  { %451 = vmatprep.subr.bf16.mxu0 %v811_v44  ;;  %494 = vmatprep.subr.bf16.mxu1 %v813_v45 }
  0x2f   :  { %452 = vmatpush2.bf16.msra.mxu0 %v815_v47  ;;  %495 = vmatpush2.bf16.msra.mxu1 %v816_v48  ;;  %v844_v47 = vmov 1983009808  }
  0x30   :  { %453 = vmatprep.subr.bf16.mxu0 %v817_v49  ;;  %496 = vmatprep.subr.bf16.mxu1 %v819_v50  ;;  %v646_v48 = vunpack.c.l.s4 %v844_v47 }
  0x33   :  { %454 = vmatpush2.bf16.msra.mxu0 %v821_v51  ;;  %497 = vmatpush2.bf16.msra.mxu1 %v822_v52 }
  0x34   :  { %455 = vmatprep.subr.bf16.mxu0 %v823_v53  ;;  %498 = vmatprep.subr.bf16.mxu1 %v825_v54 }
  0x37   :  { %456 = vmatpush2.bf16.msra.mxu0 %v827_v55  ;;  %499 = vmatpush2.bf16.msra.mxu1 %v828_v56  ;;  %v648_v56 = vlaneseq }
  0x38   :  { %457 = vmatprep.subr.bf16.mxu0 %v829_v57  ;;  %500 = vmatprep.subr.bf16.mxu1 %v831_v58 }
  0x3b   :  { %458 = vmatpush2.bf16.msra.mxu0 %v833_v59  ;;  %501 = vmatpush2.bf16.msra.mxu1 %v834_v60 }
  0x3c   :  { %459 = vmatprep.subr.bf16.mxu0 %v835_v61  ;;  %502 = vmatprep.subr.bf16.mxu1 %v837_v62 }
  0x3f   :  { %460 = vmatpush2.bf16.msra.mxu0 %v839_v63  ;;  %503 = vmatpush2.bf16.msra.mxu1 %v840_v0 }
  0x42   :  { %462 = vmatmul.mubr.bf16.vlgmr.msra.gmra.mxu0 %v841_v1  ;;  %505 = vmatmul.mubr.bf16.vlgmr.msra.gmra.mxu1 %v841_v1 }
 0x102   :  { %v463_v2 = vpop.f32.mrf.mxu0  ;;  %v506_v3 = vpop.f32.mrf.mxu1 }
 0x103   :  { %v598_v8 = vmul.f32 %v463_v2, %v463_v2  ;;  %v600_v9 = vmul.f32 %v506_v3, %v506_v3 }
 0x104   :  { %v465_v4 = vpop.f32.mrf.mxu0  ;;  %v508_v5 = vpop.f32.mrf.mxu1 }
 0x105   :  { %v740_v6 = vpack.c.bf16 %v465_v4, %v463_v2  ;;  %v741_v7 = vpack.c.bf16 %v508_v5, %v506_v3  ;;  %v599_v16 = vmul.f32 %v465_v4, %v465_v4  ;;  %v601_v17 = vmul.f32 %v508_v5, %v508_v5 }
 0x106   :  { %v467_v10 = vpop.f32.mrf.mxu0  ;;  %v510_v11 = vpop.f32.mrf.mxu1 }
 0x107   :  { %566 = vst [vmem:[%s1080_s2] sm:$0xff] %v740_v6  ;;  %567 = vst [vmem:[%s1080_s2 + $0x8] sm:$0xff] %v741_v7  ;;  %v570_v12 = vadd.f32 %v467_v10, %v463_v2  ;;  %v602_v13 = vmul.f32 %v467_v10, %v467_v10  ;;  %v584_v14 = vadd.f32 %v510_v11, %v506_v3  ;;  %v649_v6 = vshrl.u32 %v648_v56, 7 }
 0x108   :  { %v604_v15 = vmul.f32 %v510_v11, %v510_v11  ;;  %v469_v18 = vpop.f32.mrf.mxu0  ;;  %v512_v19 = vpop.f32.mrf.mxu1 }
 0x109   :  { %v571_v20 = vrot.slane %v570_v12, 4  ;;  %v606_v21 = vadd.f32 %v602_v13, %v598_v8  ;;  %v585_v22 = vrot.slane %v584_v14, 4  ;;  %v742_v24 = vpack.c.bf16 %v469_v18, %v467_v10 }
 0x10a   :  { %v620_v23 = vadd.f32 %v604_v15, %v600_v9  ;;  %v577_v25 = vadd.f32 %v469_v18, %v465_v4  ;;  %v603_v26 = vmul.f32 %v469_v18, %v469_v18  ;;  %v743_v27 = vpack.c.bf16 %v512_v19, %v510_v11 }
 0x10b   :  { %v572_v28 = vadd.f32 %v571_v20, %v570_v12  ;;  %v607_v29 = vrot.slane %v606_v21, 4  ;;  %v586_v30 = vadd.f32 %v585_v22, %v584_v14  ;;  %568 = vst [vmem:[%s1080_s2 + $0x10] sm:$0xff] %v742_v24  ;;  %v591_v34 = vadd.f32 %v512_v19, %v508_v5 }
 0x10c   :  { %v621_v31 = vrot.slane %v620_v23, 4  ;;  %v578_v32 = vrot.slane %v577_v25, 4  ;;  %v613_v33 = vadd.f32 %v603_v26, %v599_v16  ;;  %569 = vst [vmem:[%s1080_s2 + $0x18] sm:$0xff] %v743_v27  ;;  %v605_v35 = vmul.f32 %v512_v19, %v512_v19 }
 0x10d   :  { %v573_v36 = vrot.slane %v572_v28, 2  ;;  %v608_v37 = vadd.f32 %v607_v29, %v606_v21  ;;  %v587_v38 = vrot.slane %v586_v30, 2  ;;  %v592_v42 = vrot.slane %v591_v34, 4 }
 0x10e   :  { %v622_v39 = vadd.f32 %v621_v31, %v620_v23  ;;  %v579_v40 = vadd.f32 %v578_v32, %v577_v25  ;;  %v614_v41 = vrot.slane %v613_v33, 4  ;;  %v627_v43 = vadd.f32 %v605_v35, %v601_v17 }
 0x10f   :  { %v574_v44 = vadd.f32 %v573_v36, %v572_v28  ;;  %v609_v45 = vrot.slane %v608_v37, 2  ;;  %v593_v51 = vadd.f32 %v592_v42, %v591_v34  ;;  %v588_v54 = vadd.f32 %v587_v38, %v586_v30 }
 0x110   :  { %v623_v46 = vrot.slane %v622_v39, 2  ;;  %v580_v49 = vrot.slane %v579_v40, 2  ;;  %v615_v50 = vadd.f32 %v614_v41, %v613_v33  ;;  %v628_v52 = vrot.slane %v627_v43, 4 }
 0x111   :  { %v610_v53 = vadd.f32 %v609_v45, %v608_v37  ;;  %v594_v59 = vrot.slane %v593_v51, 2  ;;  %v575_v61 = vrot.slane %v574_v44, 1  ;;  %v589_v4 = vrot.slane %v588_v54, 1 }
 0x112   :  { %v624_v55 = vadd.f32 %v623_v46, %v622_v39  ;;  %v581_v57 = vadd.f32 %v580_v49, %v579_v40  ;;  %v616_v58 = vrot.slane %v615_v50, 2  ;;  %v629_v60 = vadd.f32 %v628_v52, %v627_v43 }
 0x113   :  { %v611_v62 = vrot.slane %v610_v53, 1  ;;  %v595_v2 = vadd.f32 %v594_v59, %v593_v51  ;;  %v647_v5 = vunpack.c.0.s8 %v646_v48  ;;  %v576_v11 = vadd.f32 %v575_v61, %v574_v44 }
 0x114   :  { %v625_v63 = vrot.slane %v624_v55, 1  ;;  %v582_v0 = vrot.slane %v581_v57, 1  ;;  %v617_v1 = vadd.f32 %v616_v58, %v615_v50  ;;  %v630_v3 = vrot.slane %v629_v60, 2 }
 0x115   :  { %v612_v7 = vadd.f32 %v611_v62, %v610_v53  ;;  %v596_v9 = vrot.slane %v595_v2, 1  ;;  %v590_v16 = vadd.f32 %v589_v4, %v588_v54  ;;  %v650_v17 = vsub.s32 %v647_v5, %v649_v6 }
 0x116   :  { %v618_v8 = vrot.slane %v617_v1, 1  ;;  %v631_v10 = vadd.f32 %v630_v3, %v629_v60  ;;  %v626_v12 = vadd.f32 %v625_v63, %v624_v55  ;;  %v583_v13 = vadd.f32 %v582_v0, %v581_v57 }
 0x117   :  { %v635_v18 = vsel %vm634_vm0, %v576_v11, %v612_v7  ;;  %v597_v20 = vadd.f32 %v596_v9, %v595_v2 }
 0x118   :  { %v619_v14 = vadd.f32 %v618_v8, %v617_v1  ;;  %v632_v15 = vrot.slane %v631_v10, 1  ;;  %v637_v23 = vsel %vm634_vm0, %v590_v16, %v626_v12 }
 0x11a   :  { %v636_v19 = vsel %vm634_vm0, %v583_v13, %v619_v14  ;;  %v633_v21 = vadd.f32 %v632_v15, %v631_v10 }
 0x11b   :  { %v643_v22 = vcombine.low %v635_v18, %v636_v19 }
 0x11c   :  { %v638_v24 = vsel %vm634_vm0, %v597_v20, %v633_v21 }
 0x11d   :  { %v651_v25 = vrot.slane %v643_v22, %v650_v17  ;;  %v644_v26 = vcombine.low %v637_v23, %v638_v24 }
 0x11f   :  { %v658_v27 = vrot.slane %v644_v26, %v650_v17 }
 0x121   :  { %v659_v28 = vcombine.low %v651_v25, %v658_v27 }
 0x123   :  { %661 = vst [vmem:[%s1081_s3] sm:$0xff] %v659_v28 }

// kernel: viewpoint_forward.78
= control target key start
LH: loop header
LB: loop body
LE: loop exit
PB: predicated region body
PF: predicated region fallthrough
CT: control target
= control target key end

     0   :  { %v28_v0 = vlaneseq  ;;  %s184_s0 = inlined_call_operand.vmem [shape: bf16[16,512], index: 0, kind: input, shape index: {}]   ;;  %s185_s1 = inlined_call_operand.vmem [shape: f32[1,512], index: 1, kind: input, shape index: {}]   ;;  %s186_s2 = inlined_call_operand.vmem [shape: f32[1,512], index: 2, kind: input, shape index: {}]   ;;  %s187_s3 = inlined_call_operand.vmem [shape: bf16[16,512], index: 3, kind: output, shape index: {}]  }
   0x1   :  { %v14_v1 = vld [vmem:[%s184_s0] sm:$0xff]  ;;  %v15_v3 = vld [vmem:[%s184_s0 + $0x8] sm:$0xff]  ;;  %v16_v4 = vld [vmem:[%s184_s0 + $0x10] sm:$0xff] }
   0x2   :  { %v29_v2 = vshrl.u32 %v28_v0, 7  ;;  %v17_v5 = vld [vmem:[%s184_s0 + $0x18] sm:$0xff]  ;;  %v18_v6 = vunpack.c.l.bf16 %v14_v1  ;;  %v19_v7 = vunpack.c.h.bf16 %v14_v1  ;;  %v26_v8 = vld [vmem:[%s185_s1] sm:$0xf]  ;;  %v22_v10 = vunpack.c.l.bf16 %v16_v4 }
   0x3   :  { %v56_v9 = vld [vmem:[%s186_s2] sm:$0xf]  ;;  %v23_v11 = vunpack.c.h.bf16 %v16_v4  ;;  %v20_v16 = vunpack.c.l.bf16 %v15_v3  ;;  %v21_v17 = vunpack.c.h.bf16 %v15_v3  ;;  %v24_v18 = vunpack.c.l.bf16 %v17_v5 }
   0x4   :  { %v30_v12 = vsub.s32 0, %v29_v2  ;;  %v34_v13 = vsub.s32 1, %v29_v2  ;;  %v38_v14 = vsub.s32 2, %v29_v2  ;;  %v42_v15 = vsub.s32 3, %v29_v2 }
   0x5   :  { %v25_v19 = vunpack.c.h.bf16 %v17_v5 }
   0x6   :  { %v31_v20 = vrot.slane %v26_v8, %v30_v12  ;;  %v35_v21 = vrot.slane %v26_v8, %v34_v13  ;;  %v61_v22 = vrot.slane %v56_v9, %v30_v12  ;;  %v65_v23 = vrot.slane %v56_v9, %v34_v13 }
   0x7   :  { %v39_v24 = vrot.slane %v26_v8, %v38_v14  ;;  %v43_v25 = vrot.slane %v26_v8, %v42_v15  ;;  %v69_v26 = vrot.slane %v56_v9, %v38_v14  ;;  %v73_v27 = vrot.slane %v56_v9, %v42_v15 }
   0x8   :  { %v48_v28 = vmul.f32 %v31_v20, %v18_v6  ;;  %v49_v29 = vmul.f32 %v35_v21, %v19_v7  ;;  %v52_v30 = vmul.f32 %v31_v20, %v22_v10  ;;  %v53_v31 = vmul.f32 %v35_v21, %v23_v11 }
   0x9   :  { %v50_v32 = vmul.f32 %v39_v24, %v20_v16  ;;  %v51_v33 = vmul.f32 %v43_v25, %v21_v17  ;;  %v54_v34 = vmul.f32 %v39_v24, %v24_v18  ;;  %v55_v35 = vmul.f32 %v43_v25, %v25_v19 }
   0xa   :  { %v78_v36 = vadd.f32 %v61_v22, %v48_v28  ;;  %v79_v37 = vadd.f32 %v65_v23, %v49_v29  ;;  %v82_v38 = vadd.f32 %v61_v22, %v52_v30  ;;  %v83_v39 = vadd.f32 %v65_v23, %v53_v31 }
   0xb   :  { %v80_v40 = vadd.f32 %v69_v26, %v50_v32  ;;  %v81_v41 = vadd.f32 %v73_v27, %v51_v33  ;;  %v84_v42 = vadd.f32 %v69_v26, %v54_v34  ;;  %v85_v43 = vadd.f32 %v73_v27, %v55_v35 }
   0xc   :  { %v86_v44 = vmax.f32 %v78_v36, 0.0  ;;  %v87_v45 = vmax.f32 %v79_v37, 0.0  ;;  %v90_v46 = vmax.f32 %v82_v38, 0.0  ;;  %v91_v47 = vmax.f32 %v83_v39, 0.0 }
   0xd   :  { %v88_v48 = vmax.f32 %v80_v40, 0.0  ;;  %v89_v49 = vmax.f32 %v81_v41, 0.0  ;;  %v92_v50 = vmax.f32 %v84_v42, 0.0  ;;  %v93_v51 = vmax.f32 %v85_v43, 0.0 }
   0xe   :  { %v130_v52 = vpack.c.bf16 %v87_v45, %v86_v44  ;;  %v132_v53 = vpack.c.bf16 %v91_v47, %v90_v46 }
   0xf   :  { %v131_v54 = vpack.c.bf16 %v89_v49, %v88_v48  ;;  %v133_v55 = vpack.c.bf16 %v93_v51, %v92_v50 }
  0x10   :  { %118 = vst [vmem:[%s187_s3] sm:$0xff] %v130_v52  ;;  %120 = vst [vmem:[%s187_s3 + $0x10] sm:$0xff] %v132_v53 }
  0x11   :  { %119 = vst [vmem:[%s187_s3 + $0x8] sm:$0xff] %v131_v54  ;;  %121 = vst [vmem:[%s187_s3 + $0x18] sm:$0xff] %v133_v55 }

// kernel: viewpoint_forward.77
= control target key start
LH: loop header
LB: loop body
LE: loop exit
PB: predicated region body
PF: predicated region fallthrough
CT: control target
= control target key end

     0   :  { %s1422_s12 = smov 0   ;;  %s1424_s13 = smov 0   ;;  %s1582_s0 = inlined_call_operand.vmem [shape: bf16[16,2304], index: 0, kind: input, shape index: {}]   ;;  %s1583_s1 = inlined_call_operand.vmem [shape: bf16[2304,512], index: 1, kind: input, shape index: {}]   ;;  %s1584_s2 = inlined_call_operand.vmem [shape: bf16[16,512], index: 2, kind: output, shape index: {0}]   ;;  %s1585_s3 = inlined_call_operand.vmem [shape: f32[1,2,512], index: 3, kind: output, shape index: {1}]  }
   0x1   :  { %s1426_s14 = smov 0   ;;  %s1428_s15 = smov 0  }
   0x2   :  { %s1430_s16 = smov 0  }
   0x3 LB: > { %s26_s17 = sadd.s32 1, %s1394_s15  ;;  %p49_p1 = scmp.ne.s32.totalorder %s1386_s13, %s1382_s12  ;;  %s1398_s16 = sphi %s1430_s16, %s14_s16   ;;  %s1394_s15 = sphi %s1428_s15, %s1589_s15   ;;  %s1390_s14 = sphi %s1426_s14, %s1588_s14   ;;  %s1386_s13 = sphi %s1424_s13, %s1587_s13   ;;  %s1382_s12 = sphi %s1422_s12, %s1586_s12  }
   0x4   : > { %p27_p0 = scmp.ge.s32.totalorder %s26_s17, 9  ;;  %p50_p2 = scmp.eq.s32.totalorder %s1398_s16, 0 }
   0x5   : > { %s42_s19 = sadd.s32 1, %s1386_s13  ;;  %p1126_p5 = scmp.ge.s32.totalorder %s1398_s16, 9 }
   0x6   : > { %s1591_s17 = smov (%p27_p0, %s26_s17), 0  ;;  %p51_p3 = por %p50_p2, %p49_p1 }
   0x7   : > { %s38_s18 = ssub.s32 %s1394_s15, %s1591_s17  ;;  %159 = sbr.rel (%p1126_p5) target bundleno = 17 (0x11), region = 16 }
   0x8   : > { %p40_p4 = scmp.eq.s32.totalorder %s38_s18, 0 }
   0xa   : > { %s1457_s20 = scalar_select %p40_p4, %s1386_s13, %s42_s19  }
   0xc   : > { %162 = sbr.rel (!%p51_p3) target bundleno = 17 (0x11), region = 20  ;;  %s164_s21 = sand.u32 (%p51_p3), 1, %s1386_s13  }
   0xd   : > { %s1213_s22 = sshll.u32 (%p51_p3), %s1394_s15, 3  ;;  %s1127_s23 = sshll.u32 (%p51_p3), %s164_s21, 4 }
   0xe   : > { %s172_s26 = scalar_lea.vmem (%p51_p3), %s1582_s0, %s1213_s22  ;;  %s166_s27 = scalar_lea.vmem (%p51_p3), [#allocation3], %s1127_s23 }
   0xf   : > { %v203_v0 = vld [vmem:[%s172_s26] sm:$0xff] (%p51_p3)  ;;  %v205_v1 = vld [vmem:[%s172_s26 + $0x48] sm:$0xff] (%p51_p3) }
  0x10   : > { %204 = vst [vmem:[%s166_s27] sm:$0xff] (%p51_p3), %v203_v0  ;;  %206 = vst [vmem:[%s166_s27 + $0x8] sm:$0xff] (%p51_p3), %v205_v1 }
  0x11 PF: > { %p1130_p6 = scmp.ge.s32.totalorder %s1398_s16, 1  ;;  %p226_p7 = scmp.lt.s32.totalorder %s1398_s16, 10 }
  0x13   : > { %p227_p8 = pnand %p1130_p6, %p226_p7 }
  0x14   : > { %s233_s28 = sand.u32 (!%p227_p8), 1, %s1382_s12   ;;  %s1132_s29 = sshll.u32 (!%p227_p8), %s1390_s14, 5 }
  0x15   : > { %230 = sbr.rel (%p227_p8) target bundleno = 335 (0x14f), region = 62  ;;  %s1469_s30 = sshll.u32 (!%p227_p8), %s233_s28, 4 }
  0x16   : > { %p284_p9 = scmp.lt.s32.totalorder (!%p227_p8), %s1132_s29, 287  ;;  %s235_s8 = scalar_lea.vmem (!%p227_p8), [#allocation3], %s1469_s30 }
  0x17   : > { %p1135_p10 = scmp.ne.s32.totalorder (!%p227_p8), %s1390_s14, 0 }
  0x1a   : > { %s1593_s29 = smov (!%p284_p9, %s1132_s29), 287  ;;  %319 = sbr.rel (%p1135_p10) target bundleno = 36 (0x24), region = 70 }
  0x1b   : > { %s1214_s4 = sshll.u32 %s1593_s29, 4 }
  0x1c   : > { %s1474_s7 = scalar_lea.vmem %s1583_s1, %s1214_s4 }
  0x1f   : > { %v1400_v2 = vmov 0.0  }
  0x20   : > { %320 = vst [vmem:[#allocation2 + $0x30] sm:$0xff] %v1400_v2  ;;  %321 = vst [vmem:[#allocation2] sm:$0xff] %v1400_v2 }
  0x21   : > { %322 = vst [vmem:[#allocation2 + $0x18] sm:$0xff] %v1400_v2  ;;  %323 = vst [vmem:[#allocation2 + $0x10] sm:$0xff] %v1400_v2 }
  0x22   : > { %324 = vst [vmem:[#allocation2 + $0x8] sm:$0xff] %v1400_v2  ;;  %325 = vst [vmem:[#allocation2 + $0x20] sm:$0xff] %v1400_v2 }
  0x23   : > { %326 = vst [vmem:[#allocation2 + $0x28] sm:$0xff] %v1400_v2  ;;  %327 = vst [vmem:[#allocation2 + $0x38] sm:$0xff] %v1400_v2 }
  0x24 PF: > { %v1261_v3 = vld [vmem:[%s1474_s7 + $0xe4] ss:$16 sps:$4 sm:$0xff]   ;;  %v1263_v4 = vld [vmem:[%s1474_s7 + $0xec] ss:$16 sps:$4 sm:$0xff]   ;;  %v1265_v5 = vld [vmem:[%s1474_s7 + $0xe0] ss:$16 sps:$4 sm:$0xff]  }
  0x25   : > { %732 = vmatprep.subr.bf16.mxu0 %v1261_v3  ;;  %v1266_v6 = vld [vmem:[%s1474_s7 + $0xe8] ss:$16 sps:$4 sm:$0xff]   ;;  %775 = vmatprep.subr.bf16.mxu1 %v1263_v4  ;;  %v1267_v7 = vld [vmem:[%s1474_s7 + $0xc4] ss:$16 sps:$4 sm:$0xff]   ;;  %v1269_v8 = vld [vmem:[%s1474_s7 + $0xcc] ss:$16 sps:$4 sm:$0xff]  }
  0x26   : > { %733 = vmatpush1.bf16.msra.mxu0 %v1265_v5  ;;  %776 = vmatpush1.bf16.msra.mxu1 %v1266_v6  ;;  %v1271_v9 = vld [vmem:[%s1474_s7 + $0xc0] ss:$16 sps:$4 sm:$0xff]   ;;  %v1272_v10 = vld [vmem:[%s1474_s7 + $0xc8] ss:$16 sps:$4 sm:$0xff]   ;;  %v1273_v11 = vld [vmem:[%s1474_s7 + $0xa4] ss:$16 sps:$4 sm:$0xff]  }
  0x27   : > { %734 = vmatprep.subr.bf16.mxu0 %v1267_v7  ;;  %777 = vmatprep.subr.bf16.mxu1 %v1269_v8  ;;  %v1275_v12 = vld [vmem:[%s1474_s7 + $0xac] ss:$16 sps:$4 sm:$0xff]   ;;  %v1277_v13 = vld [vmem:[%s1474_s7 + $0xa0] ss:$16 sps:$4 sm:$0xff]   ;;  %v1278_v14 = vld [vmem:[%s1474_s7 + $0xa8] ss:$16 sps:$4 sm:$0xff]  }
  0x28   : > { %v1279_v15 = vld [vmem:[%s1474_s7 + $0x84] ss:$16 sps:$4 sm:$0xff]   ;;  %v1281_v16 = vld [vmem:[%s1474_s7 + $0x8c] ss:$16 sps:$4 sm:$0xff]   ;;  %v1283_v17 = vld [vmem:[%s1474_s7 + $0x80] ss:$16 sps:$4 sm:$0xff]  }
  0x29   : > { %v1284_v18 = vld [vmem:[%s1474_s7 + $0x88] ss:$16 sps:$4 sm:$0xff]   ;;  %v1285_v19 = vld [vmem:[%s1474_s7 + $0x64] ss:$16 sps:$4 sm:$0xff]   ;;  %v1287_v20 = vld [vmem:[%s1474_s7 + $0x6c] ss:$16 sps:$4 sm:$0xff]  }
  0x2a   : > { %735 = vmatpush1.bf16.msra.mxu0 %v1271_v9  ;;  %778 = vmatpush1.bf16.msra.mxu1 %v1272_v10  ;;  %v1289_v21 = vld [vmem:[%s1474_s7 + $0x60] ss:$16 sps:$4 sm:$0xff]   ;;  %v1290_v22 = vld [vmem:[%s1474_s7 + $0x68] ss:$16 sps:$4 sm:$0xff]   ;;  %v1291_v23 = vld [vmem:[%s1474_s7 + $0x44] ss:$16 sps:$4 sm:$0xff]  }
  0x2b   : > { %736 = vmatprep.subr.bf16.mxu0 %v1273_v11  ;;  %779 = vmatprep.subr.bf16.mxu1 %v1275_v12  ;;  %v1293_v24 = vld [vmem:[%s1474_s7 + $0x4c] ss:$16 sps:$4 sm:$0xff]   ;;  %v1295_v25 = vld [vmem:[%s1474_s7 + $0x40] ss:$16 sps:$4 sm:$0xff]   ;;  %v1296_v26 = vld [vmem:[%s1474_s7 + $0x48] ss:$16 sps:$4 sm:$0xff]  }
  0x2c   : > { %v1297_v27 = vld [vmem:[%s1474_s7 + $0x24] ss:$16 sps:$4 sm:$0xff]   ;;  %v1299_v28 = vld [vmem:[%s1474_s7 + $0x2c] ss:$16 sps:$4 sm:$0xff]   ;;  %v1301_v29 = vld [vmem:[%s1474_s7 + $0x20] ss:$16 sps:$4 sm:$0xff]  }
  0x2d   : > { %v1302_v30 = vld [vmem:[%s1474_s7 + $0x28] ss:$16 sps:$4 sm:$0xff]   ;;  %v1303_v31 = vld [vmem:[%s1474_s7 + $0x4] ss:$16 sps:$4 sm:$0xff]   ;;  %v1305_v32 = vld [vmem:[%s1474_s7 + $0xc] ss:$16 sps:$4 sm:$0xff]  }
  0x2e   : > { %737 = vmatpush1.bf16.msra.mxu0 %v1277_v13  ;;  %780 = vmatpush1.bf16.msra.mxu1 %v1278_v14  ;;  %v1307_v33 = vld [vmem:[%s1474_s7] ss:$16 sps:$4 sm:$0xff]   ;;  %v1308_v34 = vld [vmem:[%s1474_s7 + $0x8] ss:$16 sps:$4 sm:$0xff]   ;;  %v1309_v35 = vld [vmem:[%s1474_s7 + $0x1e4] ss:$16 sps:$4 sm:$0xff]  }
  0x2f   : > { %738 = vmatprep.subr.bf16.mxu0 %v1279_v15  ;;  %781 = vmatprep.subr.bf16.mxu1 %v1281_v16  ;;  %v1311_v36 = vld [vmem:[%s1474_s7 + $0x1ec] ss:$16 sps:$4 sm:$0xff]   ;;  %v1313_v37 = vld [vmem:[%s1474_s7 + $0x1e0] ss:$16 sps:$4 sm:$0xff]   ;;  %v1314_v38 = vld [vmem:[%s1474_s7 + $0x1e8] ss:$16 sps:$4 sm:$0xff]  }
  0x30   : > { %v1315_v39 = vld [vmem:[%s1474_s7 + $0x1c4] ss:$16 sps:$4 sm:$0xff]   ;;  %v1317_v40 = vld [vmem:[%s1474_s7 + $0x1cc] ss:$16 sps:$4 sm:$0xff]   ;;  %v1319_v41 = vld [vmem:[%s1474_s7 + $0x1c0] ss:$16 sps:$4 sm:$0xff]  }
  0x31   : > { %v1320_v42 = vld [vmem:[%s1474_s7 + $0x1c8] ss:$16 sps:$4 sm:$0xff]   ;;  %v1321_v43 = vld [vmem:[%s1474_s7 + $0x1a4] ss:$16 sps:$4 sm:$0xff]   ;;  %v1323_v44 = vld [vmem:[%s1474_s7 + $0x1ac] ss:$16 sps:$4 sm:$0xff]  }
  0x32   : > { %739 = vmatpush1.bf16.msra.mxu0 %v1283_v17  ;;  %782 = vmatpush1.bf16.msra.mxu1 %v1284_v18  ;;  %v1325_v45 = vld [vmem:[%s1474_s7 + $0x1a0] ss:$16 sps:$4 sm:$0xff]   ;;  %v1326_v46 = vld [vmem:[%s1474_s7 + $0x1a8] ss:$16 sps:$4 sm:$0xff]   ;;  %v1327_v47 = vld [vmem:[%s1474_s7 + $0x184] ss:$16 sps:$4 sm:$0xff]  }
  0x33   : > { %740 = vmatprep.subr.bf16.mxu0 %v1285_v19  ;;  %783 = vmatprep.subr.bf16.mxu1 %v1287_v20  ;;  %v1329_v48 = vld [vmem:[%s1474_s7 + $0x18c] ss:$16 sps:$4 sm:$0xff]   ;;  %v1331_v50 = vld [vmem:[%s1474_s7 + $0x180] ss:$16 sps:$4 sm:$0xff]   ;;  %v1332_v51 = vld [vmem:[%s1474_s7 + $0x188] ss:$16 sps:$4 sm:$0xff]  }
  0x34   : > { %v1359_v49 = vld [vmem:[%s235_s8 + $0x4] ss:$8 sps:$4 sm:$0xff]   ;;  %v1337_v54 = vld [vmem:[%s1474_s7 + $0x160] ss:$16 sps:$4 sm:$0xff]   ;;  %v1338_v55 = vld [vmem:[%s1474_s7 + $0x168] ss:$16 sps:$4 sm:$0xff]  }
  0x35   : > { %v1333_v52 = vld [vmem:[%s1474_s7 + $0x164] ss:$16 sps:$4 sm:$0xff]   ;;  %v1335_v53 = vld [vmem:[%s1474_s7 + $0x16c] ss:$16 sps:$4 sm:$0xff]   ;;  %764 = vmatprep.mubr.bf16.mxu0 %v1359_v49  ;;  %807 = vmatprep.mubr.bf16.mxu1 %v1359_v49  ;;  %v1343_v58 = vld [vmem:[%s1474_s7 + $0x140] ss:$16 sps:$4 sm:$0xff]  }
  0x36   : > { %741 = vmatpush1.bf16.msra.mxu0 %v1289_v21  ;;  %784 = vmatpush1.bf16.msra.mxu1 %v1290_v22  ;;  %v1339_v56 = vld [vmem:[%s1474_s7 + $0x144] ss:$16 sps:$4 sm:$0xff]   ;;  %v1341_v57 = vld [vmem:[%s1474_s7 + $0x14c] ss:$16 sps:$4 sm:$0xff]   ;;  %v1344_v59 = vld [vmem:[%s1474_s7 + $0x148] ss:$16 sps:$4 sm:$0xff]  }
  0x37   : > { %742 = vmatprep.subr.bf16.mxu0 %v1291_v23  ;;  %785 = vmatprep.subr.bf16.mxu1 %v1293_v24  ;;  %v1345_v60 = vld [vmem:[%s1474_s7 + $0x124] ss:$16 sps:$4 sm:$0xff]   ;;  %v1347_v61 = vld [vmem:[%s1474_s7 + $0x12c] ss:$16 sps:$4 sm:$0xff]   ;;  %v1349_v62 = vld [vmem:[%s1474_s7 + $0x120] ss:$16 sps:$4 sm:$0xff]  }
  0x38   : > { %v1350_v63 = vld [vmem:[%s1474_s7 + $0x128] ss:$16 sps:$4 sm:$0xff]   ;;  %v1351_v0 = vld [vmem:[%s1474_s7 + $0x104] ss:$16 sps:$4 sm:$0xff]   ;;  %v1353_v1 = vld [vmem:[%s1474_s7 + $0x10c] ss:$16 sps:$4 sm:$0xff]  }
  0x39   : > { %v1355_v2 = vld [vmem:[%s1474_s7 + $0x100] ss:$16 sps:$4 sm:$0xff]   ;;  %v1356_v3 = vld [vmem:[%s1474_s7 + $0x108] ss:$16 sps:$4 sm:$0xff]   ;;  %p1202_p11 = scmp.ne.s32.totalorder %s1390_s14, 8 }
  0x3a   : > { %743 = vmatpush1.bf16.msra.mxu0 %v1295_v25  ;;  %786 = vmatpush1.bf16.msra.mxu1 %v1296_v26  ;;  %v1357_v4 = vld [vmem:[%s235_s8] ss:$8 sps:$4 sm:$0xff]  }
  0x3b   : > { %744 = vmatprep.subr.bf16.mxu0 %v1297_v27  ;;  %787 = vmatprep.subr.bf16.mxu1 %v1299_v28  ;;  %v328_v5 = vld [vmem:[#allocation2 + $0x30] sm:$0xff]  ;;  %v330_v6 = vld [vmem:[#allocation2 + $0x18] sm:$0xff]  ;;  %v329_v9 = vld [vmem:[#allocation2] sm:$0xff] }
  0x3c   : > { %v331_v10 = vld [vmem:[#allocation2 + $0x10] sm:$0xff]  ;;  %v332_v15 = vld [vmem:[#allocation2 + $0x8] sm:$0xff]  ;;  %v333_v21 = vld [vmem:[#allocation2 + $0x20] sm:$0xff] }
  0x3d   : > { %v334_v16 = vld [vmem:[#allocation2 + $0x28] sm:$0xff]  ;;  %v335_v22 = vld [vmem:[#allocation2 + $0x38] sm:$0xff] }
  0x3e   : > { %745 = vmatpush1.bf16.msra.mxu0 %v1301_v29  ;;  %788 = vmatpush1.bf16.msra.mxu1 %v1302_v30 }
  0x3f   : > { %746 = vmatprep.subr.bf16.mxu0 %v1303_v31  ;;  %789 = vmatprep.subr.bf16.mxu1 %v1305_v32 }
  0x42   : > { %747 = vmatpush1.bf16.msra.mxu0 %v1307_v33  ;;  %790 = vmatpush1.bf16.msra.mxu1 %v1308_v34 }
  0x43   : > { %748 = vmatprep.subr.bf16.mxu0 %v1309_v35  ;;  %791 = vmatprep.subr.bf16.mxu1 %v1311_v36 }
  0x46   : > { %749 = vmatpush2.bf16.msra.mxu0 %v1313_v37  ;;  %792 = vmatpush2.bf16.msra.mxu1 %v1314_v38 }
  0x47   : > { %750 = vmatprep.subr.bf16.mxu0 %v1315_v39  ;;  %793 = vmatprep.subr.bf16.mxu1 %v1317_v40 }
  0x4a   : > { %751 = vmatpush2.bf16.msra.mxu0 %v1319_v41  ;;  %794 = vmatpush2.bf16.msra.mxu1 %v1320_v42 }
  0x4b   : > { %752 = vmatprep.subr.bf16.mxu0 %v1321_v43  ;;  %795 = vmatprep.subr.bf16.mxu1 %v1323_v44 }
  0x4e   : > { %753 = vmatpush2.bf16.msra.mxu0 %v1325_v45  ;;  %796 = vmatpush2.bf16.msra.mxu1 %v1326_v46 }
  0x4f   : > { %754 = vmatprep.subr.bf16.mxu0 %v1327_v47  ;;  %797 = vmatprep.subr.bf16.mxu1 %v1329_v48 }
  0x52   : > { %755 = vmatpush2.bf16.msra.mxu0 %v1331_v50  ;;  %798 = vmatpush2.bf16.msra.mxu1 %v1332_v51 }
  0x53   : > { %756 = vmatprep.subr.bf16.mxu0 %v1333_v52  ;;  %799 = vmatprep.subr.bf16.mxu1 %v1335_v53 }
  0x56   : > { %757 = vmatpush2.bf16.msra.mxu0 %v1337_v54  ;;  %800 = vmatpush2.bf16.msra.mxu1 %v1338_v55 }
  0x57   : > { %758 = vmatprep.subr.bf16.mxu0 %v1339_v56  ;;  %801 = vmatprep.subr.bf16.mxu1 %v1341_v57 }
  0x5a   : > { %759 = vmatpush2.bf16.msra.mxu0 %v1343_v58  ;;  %802 = vmatpush2.bf16.msra.mxu1 %v1344_v59 }
  0x5b   : > { %760 = vmatprep.subr.bf16.mxu0 %v1345_v60  ;;  %803 = vmatprep.subr.bf16.mxu1 %v1347_v61 }
  0x5e   : > { %761 = vmatpush2.bf16.msra.mxu0 %v1349_v62  ;;  %804 = vmatpush2.bf16.msra.mxu1 %v1350_v63 }
  0x5f   : > { %762 = vmatprep.subr.bf16.mxu0 %v1351_v0  ;;  %805 = vmatprep.subr.bf16.mxu1 %v1353_v1 }
  0x62   : > { %763 = vmatpush2.bf16.msra.mxu0 %v1355_v2  ;;  %806 = vmatpush2.bf16.msra.mxu1 %v1356_v3 }
  0x65   : > { %765 = vmatmul.mubr.bf16.vlgmr.msra.gmra.mxu0 %v1357_v4  ;;  %808 = vmatmul.mubr.bf16.vlgmr.msra.gmra.mxu1 %v1357_v4 }
 0x125   : > { %v766_v7 = vpop.f32.mrf.mxu0  ;;  %v809_v8 = vpop.f32.mrf.mxu1 }
 0x126   : > { %v818_v11 = vadd.f32 %v766_v7, %v328_v5  ;;  %v820_v12 = vadd.f32 %v809_v8, %v330_v6 }
 0x127   : > { %v768_v13 = vpop.f32.mrf.mxu0  ;;  %v811_v14 = vpop.f32.mrf.mxu1 }
 0x128   : > { %826 = vst [vmem:[#allocation2 + $0x30] sm:$0xff] %v818_v11  ;;  %828 = vst [vmem:[#allocation2 + $0x18] sm:$0xff] %v820_v12  ;;  %v819_v17 = vadd.f32 %v768_v13, %v329_v9  ;;  %v821_v18 = vadd.f32 %v811_v14, %v331_v10 }
 0x129   : > { %v770_v19 = vpop.f32.mrf.mxu0  ;;  %v813_v20 = vpop.f32.mrf.mxu1 }
 0x12a   : > { %827 = vst [vmem:[#allocation2] sm:$0xff] %v819_v17  ;;  %829 = vst [vmem:[#allocation2 + $0x10] sm:$0xff] %v821_v18  ;;  %v822_v23 = vadd.f32 %v770_v19, %v332_v15  ;;  %v824_v24 = vadd.f32 %v813_v20, %v334_v16  ;;  %837 = sbr.rel (%p1202_p11) target bundleno = 335 (0x14f), region = 74 }
 0x12b   : > { %v772_v25 = vpop.f32.mrf.mxu0  ;;  %v815_v26 = vpop.f32.mrf.mxu1 }
 0x12c   : > { %830 = vst [vmem:[#allocation2 + $0x8] sm:$0xff] %v822_v23  ;;  %832 = vst [vmem:[#allocation2 + $0x28] sm:$0xff] %v824_v24  ;;  %v823_v27 = vadd.f32 %v772_v25, %v333_v21  ;;  %v825_v28 = vadd.f32 %v815_v26, %v335_v22 }
 0x12e   : > { %831 = vst [vmem:[#allocation2 + $0x20] sm:$0xff] %v823_v27  ;;  %833 = vst [vmem:[#allocation2 + $0x38] sm:$0xff] %v825_v28 }
 0x12f   : > { %v838_v29 = vld [vmem:[#allocation2 + $0x30] sm:$0xff]  ;;  %v840_v31 = vld [vmem:[#allocation2 + $0x18] sm:$0xff]  ;;  %v952_v32 = vlaneseq  ;;  %vm938_vm0 = vcmask 1040384  }
 0x130   : > { %v902_v34 = vmul.f32 %v838_v29, %v838_v29  ;;  %v904_v37 = vmul.f32 %v840_v31, %v840_v31 }
 0x131   : > { %v839_v30 = vld [vmem:[#allocation2] sm:$0xff]  ;;  %v841_v36 = vld [vmem:[#allocation2 + $0x10] sm:$0xff] }
 0x132   : > { %v1215_v33 = vpack.c.bf16 %v839_v30, %v838_v29  ;;  %v903_v35 = vmul.f32 %v839_v30, %v839_v30  ;;  %v1216_v40 = vpack.c.bf16 %v841_v36, %v840_v31  ;;  %v905_v41 = vmul.f32 %v841_v36, %v841_v36 }
 0x133   : > { %v842_v38 = vld [vmem:[#allocation2 + $0x8] sm:$0xff] }
 0x134   : > { %v874_v43 = vadd.f32 %v842_v38, %v838_v29  ;;  %v844_v44 = vld [vmem:[#allocation2 + $0x28] sm:$0xff]  ;;  %870 = vst [vmem:[%s1584_s2] sm:$0xff] %v1215_v33  ;;  %v906_v47 = vmul.f32 %v842_v38, %v842_v38  ;;  %871 = vst [vmem:[%s1584_s2 + $0x8] sm:$0xff] %v1216_v40 }
 0x135   : > { %v843_v39 = vld [vmem:[#allocation2 + $0x20] sm:$0xff]  ;;  %v845_v45 = vld [vmem:[#allocation2 + $0x38] sm:$0xff]  ;;  %v888_v51 = vadd.f32 %v844_v44, %v840_v31  ;;  %v908_v53 = vmul.f32 %v844_v44, %v844_v44 }
 0x136   : > { %v1217_v42 = vpack.c.bf16 %v843_v39, %v842_v38  ;;  %v881_v46 = vadd.f32 %v843_v39, %v839_v30  ;;  %v907_v48 = vmul.f32 %v843_v39, %v843_v39  ;;  %v1218_v49 = vpack.c.bf16 %v845_v45, %v844_v44 }
 0x137   : > { %v875_v50 = vrot.slane %v874_v43, 4  ;;  %v895_v52 = vadd.f32 %v845_v45, %v841_v36  ;;  %v910_v55 = vadd.f32 %v906_v47, %v902_v34  ;;  %v909_v57 = vmul.f32 %v845_v45, %v845_v45 }
 0x138   : > { %872 = vst [vmem:[%s1584_s2 + $0x10] sm:$0xff] %v1217_v42  ;;  %v882_v54 = vrot.slane %v881_v46, 4  ;;  %v917_v56 = vadd.f32 %v907_v48, %v903_v35  ;;  %873 = vst [vmem:[%s1584_s2 + $0x18] sm:$0xff] %v1218_v49  ;;  %v889_v59 = vrot.slane %v888_v51, 4  ;;  %v924_v61 = vadd.f32 %v908_v53, %v904_v37 }
 0x139   : > { %v876_v58 = vadd.f32 %v875_v50, %v874_v43  ;;  %v896_v60 = vrot.slane %v895_v52, 4  ;;  %v911_v63 = vrot.slane %v910_v55, 4  ;;  %v931_v1 = vadd.f32 %v909_v57, %v905_v41 }
 0x13a   : > { %v883_v62 = vadd.f32 %v882_v54, %v881_v46  ;;  %v918_v0 = vrot.slane %v917_v56, 4  ;;  %v890_v3 = vadd.f32 %v889_v59, %v888_v51  ;;  %v925_v5 = vrot.slane %v924_v61, 4 }
 0x13b   : > { %v877_v2 = vrot.slane %v876_v58, 2  ;;  %v897_v4 = vadd.f32 %v896_v60, %v895_v52  ;;  %v912_v7 = vadd.f32 %v911_v63, %v910_v55  ;;  %v932_v9 = vrot.slane %v931_v1, 4 }
 0x13c   : > { %v884_v6 = vrot.slane %v883_v62, 2  ;;  %v919_v8 = vadd.f32 %v918_v0, %v917_v56  ;;  %v891_v11 = vrot.slane %v890_v3, 2  ;;  %v926_v13 = vadd.f32 %v925_v5, %v924_v61 }
 0x13d   : > { %v878_v10 = vadd.f32 %v877_v2, %v876_v58  ;;  %v898_v12 = vrot.slane %v897_v4, 2  ;;  %v913_v15 = vrot.slane %v912_v7, 2  ;;  %v933_v17 = vadd.f32 %v932_v9, %v931_v1 }
 0x13e   : > { %v885_v14 = vadd.f32 %v884_v6, %v883_v62  ;;  %v920_v16 = vrot.slane %v919_v8, 2  ;;  %v892_v19 = vadd.f32 %v891_v11, %v890_v3  ;;  %v927_v21 = vrot.slane %v926_v13, 2 }
 0x13f   : > { %v879_v18 = vrot.slane %v878_v10, 1  ;;  %v899_v20 = vadd.f32 %v898_v12, %v897_v4  ;;  %v914_v23 = vadd.f32 %v913_v15, %v912_v7  ;;  %v934_v25 = vrot.slane %v933_v17, 2 }
 0x140   : > { %v886_v22 = vrot.slane %v885_v14, 1  ;;  %v921_v24 = vadd.f32 %v920_v16, %v919_v8  ;;  %v893_v26 = vrot.slane %v892_v19, 1  ;;  %v928_v28 = vadd.f32 %v927_v21, %v926_v13 }
 0x141   : > { %v900_v27 = vrot.slane %v899_v20, 1  ;;  %v880_v29 = vadd.f32 %v879_v18, %v878_v10  ;;  %v935_v30 = vadd.f32 %v934_v25, %v933_v17  ;;  %v915_v33 = vrot.slane %v914_v23, 1 }
 0x142   : > { %v887_v31 = vadd.f32 %v886_v22, %v885_v14  ;;  %v922_v34 = vrot.slane %v921_v24, 1  ;;  %v894_v35 = vadd.f32 %v893_v26, %v892_v19  ;;  %v929_v37 = vrot.slane %v928_v28, 1 }
 0x143   : > { %v901_v36 = vadd.f32 %v900_v27, %v899_v20  ;;  %v1401_v38 = vmov 1983009808   ;;  %v916_v40 = vadd.f32 %v915_v33, %v914_v23  ;;  %v936_v42 = vrot.slane %v935_v30, 1 }
 0x144   : > { %v950_v39 = vunpack.c.l.s4 %v1401_v38  ;;  %v923_v41 = vadd.f32 %v922_v34, %v921_v24  ;;  %v953_v43 = vshrl.u32 %v952_v32, 7  ;;  %v930_v44 = vadd.f32 %v929_v37, %v928_v28 }
 0x145   : > { %v937_v46 = vadd.f32 %v936_v42, %v935_v30  ;;  %v939_v47 = vsel %vm938_vm0, %v880_v29, %v916_v40 }
 0x146   : > { %v951_v45 = vunpack.c.0.s8 %v950_v39  ;;  %v940_v48 = vsel %vm938_vm0, %v887_v31, %v923_v41  ;;  %v941_v49 = vsel %vm938_vm0, %v894_v35, %v930_v44 }
 0x147   : > { %v947_v50 = vcombine.low %v939_v47, %v940_v48  ;;  %v942_v52 = vsel %vm938_vm0, %v901_v36, %v937_v46 }
 0x148   : > { %v954_v51 = vsub.s32 %v951_v45, %v953_v43  ;;  %v948_v53 = vcombine.low %v941_v49, %v942_v52 }
 0x14a   : > { %v955_v54 = vrot.slane %v947_v50, %v954_v51  ;;  %v962_v55 = vrot.slane %v948_v53, %v954_v51 }
 0x14c   : > { %v963_v56 = vcombine.low %v955_v54, %v962_v55 }
 0x14e   : > { %965 = vst [vmem:[%s1585_s3] sm:$0xff] %v963_v56 }
 0x14f PF: > { %s14_s16 = sadd.s32 1, %s1398_s16   ;;  %s1586_s12 = smov %s1386_s13 }
 0x150   : > { %p11_p12 = scmp.ge.s32.totalorder %s14_s16, 11   ;;  %s1587_s13 = smov %s1457_s20 }
 0x151   : > { %s1588_s14 = smov %s1394_s15  ;;  %s1589_s15 = smov %s1591_s17 }
 0x152   :  { %13 = sbr.rel (!%p11_p12) target bundleno = 3 (0x3), region = 124 }

// kernel: viewpoint_forward.80
= control target key start
LH: loop header
LB: loop body
LE: loop exit
PB: predicated region body
PF: predicated region fallthrough
CT: control target
= control target key end

     0   :  { %v31_v0 = vlaneseq  ;;  %s224_s0 = inlined_call_operand.vmem [shape: bf16[16,512], index: 0, kind: input, shape index: {}]   ;;  %s225_s1 = inlined_call_operand.vmem [shape: f32[1,512], index: 1, kind: input, shape index: {}]   ;;  %s226_s2 = inlined_call_operand.vmem [shape: f32[1,512], index: 2, kind: input, shape index: {}]   ;;  %s227_s3 = inlined_call_operand.vmem [shape: bf16[16,512], index: 3, kind: input, shape index: {}]   ;;  %s228_s4 = inlined_call_operand.vmem [shape: bf16[16,512], index: 4, kind: output, shape index: {}]  }
   0x1   :  { %v17_v1 = vld [vmem:[%s224_s0] sm:$0xff]  ;;  %v18_v6 = vld [vmem:[%s224_s0 + $0x8] sm:$0xff]  ;;  %v19_v14 = vld [vmem:[%s224_s0 + $0x10] sm:$0xff] }
   0x2   :  { %v21_v2 = vunpack.c.l.bf16 %v17_v1  ;;  %v22_v3 = vunpack.c.h.bf16 %v17_v1  ;;  %v32_v4 = vshrl.u32 %v31_v0, 7  ;;  %v89_v5 = vld [vmem:[%s227_s3] sm:$0xff]  ;;  %v90_v7 = vld [vmem:[%s227_s3 + $0x8] sm:$0xff]  ;;  %v23_v12 = vunpack.c.l.bf16 %v18_v6  ;;  %v91_v27 = vld [vmem:[%s227_s3 + $0x10] sm:$0xff] }
   0x3   :  { %v29_v8 = vld [vmem:[%s225_s1] sm:$0xf]  ;;  %v93_v10 = vunpack.c.l.bf16 %v89_v5  ;;  %v94_v11 = vunpack.c.h.bf16 %v89_v5  ;;  %v24_v13 = vunpack.c.h.bf16 %v18_v6  ;;  %v95_v19 = vunpack.c.l.bf16 %v90_v7  ;;  %v20_v36 = vld [vmem:[%s224_s0 + $0x18] sm:$0xff] }
   0x4   :  { %v59_v9 = vld [vmem:[%s226_s2] sm:$0xf]  ;;  %v33_v15 = vsub.s32 0, %v32_v4  ;;  %v37_v16 = vsub.s32 1, %v32_v4  ;;  %v41_v17 = vsub.s32 2, %v32_v4  ;;  %v45_v18 = vsub.s32 3, %v32_v4 }
   0x5   :  { %v96_v20 = vunpack.c.h.bf16 %v90_v7  ;;  %v25_v21 = vunpack.c.l.bf16 %v19_v14  ;;  %v26_v22 = vunpack.c.h.bf16 %v19_v14  ;;  %v97_v39 = vunpack.c.l.bf16 %v91_v27  ;;  %v92_v57 = vld [vmem:[%s227_s3 + $0x18] sm:$0xff] }
   0x6   :  { %v34_v23 = vrot.slane %v29_v8, %v33_v15  ;;  %v38_v24 = vrot.slane %v29_v8, %v37_v16  ;;  %v64_v25 = vrot.slane %v59_v9, %v33_v15  ;;  %v68_v26 = vrot.slane %v59_v9, %v37_v16 }
   0x7   :  { %v42_v28 = vrot.slane %v29_v8, %v41_v17  ;;  %v46_v29 = vrot.slane %v29_v8, %v45_v18  ;;  %v72_v30 = vrot.slane %v59_v9, %v41_v17  ;;  %v76_v31 = vrot.slane %v59_v9, %v45_v18 }
   0x8   :  { %v51_v32 = vmul.f32 %v34_v23, %v21_v2  ;;  %v52_v33 = vmul.f32 %v38_v24, %v22_v3  ;;  %v55_v34 = vmul.f32 %v34_v23, %v25_v21  ;;  %v56_v35 = vmul.f32 %v38_v24, %v26_v22 }
   0x9   :  { %v53_v37 = vmul.f32 %v42_v28, %v23_v12  ;;  %v54_v38 = vmul.f32 %v46_v29, %v24_v13  ;;  %v98_v40 = vunpack.c.h.bf16 %v91_v27  ;;  %v27_v47 = vunpack.c.l.bf16 %v20_v36 }
   0xa   :  { %v81_v41 = vadd.f32 %v64_v25, %v51_v32  ;;  %v82_v42 = vadd.f32 %v68_v26, %v52_v33  ;;  %v85_v43 = vadd.f32 %v64_v25, %v55_v34  ;;  %v86_v44 = vadd.f32 %v68_v26, %v56_v35 }
   0xb   :  { %v83_v45 = vadd.f32 %v72_v30, %v53_v37  ;;  %v84_v46 = vadd.f32 %v76_v31, %v54_v38  ;;  %v28_v48 = vunpack.c.h.bf16 %v20_v36  ;;  %v57_v55 = vmul.f32 %v42_v28, %v27_v47 }
   0xc   :  { %v101_v49 = vadd.f32 %v93_v10, %v81_v41  ;;  %v102_v50 = vadd.f32 %v94_v11, %v82_v42  ;;  %v105_v51 = vadd.f32 %v97_v39, %v85_v43  ;;  %v106_v52 = vadd.f32 %v98_v40, %v86_v44 }
   0xd   :  { %v103_v53 = vadd.f32 %v95_v19, %v83_v45  ;;  %v104_v54 = vadd.f32 %v96_v20, %v84_v46  ;;  %v58_v56 = vmul.f32 %v46_v29, %v28_v48  ;;  %v87_v0 = vadd.f32 %v72_v30, %v57_v55 }
   0xe   :  { %v109_v58 = vmax.f32 %v101_v49, 0.0  ;;  %v110_v59 = vmax.f32 %v102_v50, 0.0  ;;  %v113_v60 = vmax.f32 %v105_v51, 0.0  ;;  %v114_v61 = vmax.f32 %v106_v52, 0.0 }
   0xf   :  { %v111_v62 = vmax.f32 %v103_v53, 0.0  ;;  %v112_v63 = vmax.f32 %v104_v54, 0.0  ;;  %v88_v1 = vadd.f32 %v76_v31, %v58_v56  ;;  %v99_v4 = vunpack.c.l.bf16 %v92_v57 }
  0x10   :  { %v153_v2 = vpack.c.bf16 %v110_v59, %v109_v58  ;;  %v155_v3 = vpack.c.bf16 %v114_v61, %v113_v60  ;;  %v100_v5 = vunpack.c.h.bf16 %v92_v57 }
  0x11   :  { %v154_v6 = vpack.c.bf16 %v112_v63, %v111_v62  ;;  %v107_v7 = vadd.f32 %v99_v4, %v87_v0 }
  0x12   :  { %141 = vst [vmem:[%s228_s4] sm:$0xff] %v153_v2  ;;  %143 = vst [vmem:[%s228_s4 + $0x10] sm:$0xff] %v155_v3  ;;  %v108_v8 = vadd.f32 %v100_v5, %v88_v1 }
  0x13   :  { %142 = vst [vmem:[%s228_s4 + $0x8] sm:$0xff] %v154_v6  ;;  %v115_v9 = vmax.f32 %v107_v7, 0.0 }
  0x14   :  { %v116_v10 = vmax.f32 %v108_v8, 0.0 }
  0x16   :  { %v156_v11 = vpack.c.bf16 %v116_v10, %v115_v9 }
  0x18   :  { %144 = vst [vmem:[%s228_s4 + $0x18] sm:$0xff] %v156_v11 }

// kernel: viewpoint_forward.79
= control target key start
LH: loop header
LB: loop body
LE: loop exit
PB: predicated region body
PF: predicated region fallthrough
CT: control target
= control target key end

     0   :  { %s2055_s12 = smov 0   ;;  %s2057_s13 = smov 0   ;;  %s2286_s0 = inlined_call_operand.vmem [shape: bf16[16,4608], index: 0, kind: input, shape index: {}]   ;;  %s2287_s1 = inlined_call_operand.vmem [shape: bf16[4608,512], index: 1, kind: input, shape index: {}]   ;;  %s2288_s2 = inlined_call_operand.vmem [shape: bf16[16,512], index: 2, kind: output, shape index: {0}]   ;;  %s2289_s3 = inlined_call_operand.vmem [shape: f32[1,2,512], index: 3, kind: output, shape index: {1}]  }
   0x1   :  { %s2059_s14 = smov 0   ;;  %s2061_s15 = smov 0  }
   0x2   :  { %s2063_s16 = smov 0  }
   0x3 LB: > { %s26_s17 = sadd.s32 1, %s2027_s15  ;;  %p49_p1 = scmp.ne.s32.totalorder %s2019_s13, %s2015_s12  ;;  %s2031_s16 = sphi %s2063_s16, %s14_s16   ;;  %s2027_s15 = sphi %s2061_s15, %s2293_s15   ;;  %s2023_s14 = sphi %s2059_s14, %s2292_s14   ;;  %s2019_s13 = sphi %s2057_s13, %s2291_s13   ;;  %s2015_s12 = sphi %s2055_s12, %s2290_s12  }
   0x4   : > { %p27_p0 = scmp.ge.s32.totalorder %s26_s17, 9  ;;  %p50_p2 = scmp.eq.s32.totalorder %s2031_s16, 0 }
   0x5   : > { %s42_s19 = sadd.s32 1, %s2019_s13  ;;  %p1594_p5 = scmp.ge.s32.totalorder %s2031_s16, 9 }
   0x6   : > { %s2295_s17 = smov (%p27_p0, %s26_s17), 0  ;;  %p51_p3 = por %p50_p2, %p49_p1 }
   0x7   : > { %s38_s18 = ssub.s32 %s2027_s15, %s2295_s17  ;;  %159 = sbr.rel (%p1594_p5) target bundleno = 18 (0x12), region = 16 }
   0x8   : > { %p40_p4 = scmp.eq.s32.totalorder %s38_s18, 0 }
   0xa   : > { %s2090_s20 = scalar_select %p40_p4, %s2019_s13, %s42_s19  }
   0xc   : > { %162 = sbr.rel (!%p51_p3) target bundleno = 18 (0x12), region = 20  ;;  %s164_s21 = sand.u32 (%p51_p3), 1, %s2019_s13  }
   0xd   : > { %s1747_s22 = sshll.u32 (%p51_p3), %s2027_s15, 4  ;;  %s1595_s23 = sshll.u32 (%p51_p3), %s164_s21, 5 }
   0xe   : > { %s172_s26 = scalar_lea.vmem (%p51_p3), %s2286_s0, %s1747_s22  ;;  %s166_s27 = scalar_lea.vmem (%p51_p3), [#allocation3], %s1595_s23 }
   0xf   : > { %v185_v0 = vld [vmem:[%s172_s26] sm:$0xff] (%p51_p3)  ;;  %v187_v1 = vld [vmem:[%s172_s26 + $0x8] sm:$0xff] (%p51_p3)  ;;  %v189_v2 = vld [vmem:[%s172_s26 + $0x90] sm:$0xff] (%p51_p3) }
  0x10   : > { %186 = vst [vmem:[%s166_s27] sm:$0xff] (%p51_p3), %v185_v0  ;;  %188 = vst [vmem:[%s166_s27 + $0x8] sm:$0xff] (%p51_p3), %v187_v1  ;;  %v191_v3 = vld [vmem:[%s172_s26 + $0x98] sm:$0xff] (%p51_p3) }
  0x11   : > { %190 = vst [vmem:[%s166_s27 + $0x10] sm:$0xff] %v189_v2  ;;  %192 = vst [vmem:[%s166_s27 + $0x18] sm:$0xff] %v191_v3 }
  0x12 PF: > { %p1598_p6 = scmp.ge.s32.totalorder %s2031_s16, 1  ;;  %p212_p7 = scmp.lt.s32.totalorder %s2031_s16, 10 }
  0x14   : > { %p213_p8 = pnand %p1598_p6, %p212_p7 }
  0x15   : > { %s219_s28 = sand.u32 (!%p213_p8), 1, %s2015_s12   ;;  %s1600_s29 = sshll.u32 (!%p213_p8), %s2023_s14, 6 }
  0x16   : > { %216 = sbr.rel (%p213_p8) target bundleno = 402 (0x192), region = 47  ;;  %s1599_s30 = sshll.u32 (!%p213_p8), %s219_s28, 5 }
  0x17   : > { %p270_p9 = scmp.lt.s32.totalorder (!%p213_p8), %s1600_s29, 575  ;;  %s2107_s8 = scalar_lea.vmem (!%p213_p8), [#allocation3], %s1599_s30 }
  0x18   : > { %p1603_p10 = scmp.ne.s32.totalorder (!%p213_p8), %s2023_s14, 0 }
  0x1b   : > { %s2297_s29 = smov (!%p270_p9, %s1600_s29), 575  ;;  %305 = sbr.rel (%p1603_p10) target bundleno = 37 (0x25), region = 55 }
  0x1c   : > { %s1748_s4 = sshll.u32 %s2297_s29, 4 }
  0x1d   : > { %s2105_s7 = scalar_lea.vmem %s2287_s1, %s1748_s4 }
  0x20   : > { %v2033_v4 = vmov 0.0  }
  0x21   : > { %306 = vst [vmem:[#allocation2 + $0x30] sm:$0xff] %v2033_v4  ;;  %307 = vst [vmem:[#allocation2] sm:$0xff] %v2033_v4 }
  0x22   : > { %308 = vst [vmem:[#allocation2 + $0x18] sm:$0xff] %v2033_v4  ;;  %309 = vst [vmem:[#allocation2 + $0x10] sm:$0xff] %v2033_v4 }
  0x23   : > { %310 = vst [vmem:[#allocation2 + $0x8] sm:$0xff] %v2033_v4  ;;  %311 = vst [vmem:[#allocation2 + $0x20] sm:$0xff] %v2033_v4 }
  0x24   : > { %312 = vst [vmem:[#allocation2 + $0x28] sm:$0xff] %v2033_v4  ;;  %313 = vst [vmem:[#allocation2 + $0x38] sm:$0xff] %v2033_v4 }
  0x25 PF: > { %v1795_v5 = vld [vmem:[%s2105_s7 + $0xe4] ss:$16 sps:$4 sm:$0xff]   ;;  %v1799_v7 = vld [vmem:[%s2105_s7 + $0xe0] ss:$16 sps:$4 sm:$0xff]   ;;  %v1896_v56 = vld [vmem:[%s2107_s8 + $0xc] ss:$16 sps:$4 sm:$0xff]  }
  0x26   : > { %v1797_v6 = vld [vmem:[%s2105_s7 + $0x2e4] ss:$16 sps:$4 sm:$0xff]   ;;  %1114 = vmatprep.subr.bf16.mxu0 %v1795_v5  ;;  %v1800_v8 = vld [vmem:[%s2105_s7 + $0x2e0] ss:$16 sps:$4 sm:$0xff]   ;;  %1189 = vmatprep.mubr.bf16.mxu1 %v1896_v56  ;;  %p1736_p11 = scmp.ne.s32.totalorder %s2023_s14, 8 }
  0x27   : > { %1157 = vmatprep.subr.bf16.mxu1 %v1797_v6  ;;  %v1801_v9 = vld [vmem:[%s2105_s7 + $0xc4] ss:$16 sps:$4 sm:$0xff]   ;;  %1115 = vmatpush1.bf16.msra.mxu0 %v1799_v7  ;;  %v1805_v11 = vld [vmem:[%s2105_s7 + $0xc0] ss:$16 sps:$4 sm:$0xff]   ;;  %v1899_v7 = vld [vmem:[%s2105_s7 + $0xec] ss:$16 sps:$4 sm:$0xff]  }
  0x28   : > { %1158 = vmatpush1.bf16.msra.mxu1 %v1800_v8  ;;  %v1803_v10 = vld [vmem:[%s2105_s7 + $0x2c4] ss:$16 sps:$4 sm:$0xff]   ;;  %1116 = vmatprep.subr.bf16.mxu0 %v1801_v9  ;;  %v1806_v12 = vld [vmem:[%s2105_s7 + $0x2c0] ss:$16 sps:$4 sm:$0xff]   ;;  %v1902_v8 = vld [vmem:[%s2105_s7 + $0x2ec] ss:$16 sps:$4 sm:$0xff]  }
  0x29   : > { %1159 = vmatprep.subr.bf16.mxu1 %v1803_v10  ;;  %v1807_v13 = vld [vmem:[%s2105_s7 + $0xa4] ss:$16 sps:$4 sm:$0xff]   ;;  %v1811_v15 = vld [vmem:[%s2105_s7 + $0xa0] ss:$16 sps:$4 sm:$0xff]   ;;  %v2182_v10 = vld [vmem:[%s2107_s8 + $0x8] ss:$16 sps:$4 sm:$0xff]  }
  0x2a   : > { %v1809_v14 = vld [vmem:[%s2105_s7 + $0x2a4] ss:$16 sps:$4 sm:$0xff]   ;;  %v1812_v16 = vld [vmem:[%s2105_s7 + $0x2a0] ss:$16 sps:$4 sm:$0xff]  }
  0x2b   : > { %1117 = vmatpush1.bf16.msra.mxu0 %v1805_v11  ;;  %v1813_v17 = vld [vmem:[%s2105_s7 + $0x84] ss:$16 sps:$4 sm:$0xff]   ;;  %v1817_v19 = vld [vmem:[%s2105_s7 + $0x80] ss:$16 sps:$4 sm:$0xff]   ;;  %v1897_v11 = vld [vmem:[%s2105_s7 + $0xe8] ss:$16 sps:$4 sm:$0xff]  }
  0x2c   : > { %1160 = vmatpush1.bf16.msra.mxu1 %v1806_v12  ;;  %1118 = vmatprep.subr.bf16.mxu0 %v1807_v13  ;;  %v1815_v18 = vld [vmem:[%s2105_s7 + $0x284] ss:$16 sps:$4 sm:$0xff]   ;;  %v1818_v20 = vld [vmem:[%s2105_s7 + $0x280] ss:$16 sps:$4 sm:$0xff]   ;;  %v1900_v12 = vld [vmem:[%s2105_s7 + $0x2e8] ss:$16 sps:$4 sm:$0xff]  }
  0x2d   : > { %1161 = vmatprep.subr.bf16.mxu1 %v1809_v14  ;;  %v1819_v21 = vld [vmem:[%s2105_s7 + $0x64] ss:$16 sps:$4 sm:$0xff]   ;;  %v1823_v23 = vld [vmem:[%s2105_s7 + $0x60] ss:$16 sps:$4 sm:$0xff]   ;;  %v1905_v13 = vld [vmem:[%s2105_s7 + $0xcc] ss:$16 sps:$4 sm:$0xff]  }
  0x2e   : > { %v1821_v22 = vld [vmem:[%s2105_s7 + $0x264] ss:$16 sps:$4 sm:$0xff]   ;;  %v1824_v24 = vld [vmem:[%s2105_s7 + $0x260] ss:$16 sps:$4 sm:$0xff]   ;;  %v1908_v14 = vld [vmem:[%s2105_s7 + $0x2cc] ss:$16 sps:$4 sm:$0xff]  }
  0x2f   : > { %1119 = vmatpush1.bf16.msra.mxu0 %v1811_v15  ;;  %v1825_v25 = vld [vmem:[%s2105_s7 + $0x44] ss:$16 sps:$4 sm:$0xff]   ;;  %v1829_v27 = vld [vmem:[%s2105_s7 + $0x40] ss:$16 sps:$4 sm:$0xff]   ;;  %v1903_v15 = vld [vmem:[%s2105_s7 + $0xc8] ss:$16 sps:$4 sm:$0xff]  }
  0x30   : > { %1162 = vmatpush1.bf16.msra.mxu1 %v1812_v16  ;;  %1120 = vmatprep.subr.bf16.mxu0 %v1813_v17  ;;  %v1827_v26 = vld [vmem:[%s2105_s7 + $0x244] ss:$16 sps:$4 sm:$0xff]   ;;  %v1830_v28 = vld [vmem:[%s2105_s7 + $0x240] ss:$16 sps:$4 sm:$0xff]   ;;  %v1906_v16 = vld [vmem:[%s2105_s7 + $0x2c8] ss:$16 sps:$4 sm:$0xff]  }
  0x31   : > { %1163 = vmatprep.subr.bf16.mxu1 %v1815_v18  ;;  %v1831_v29 = vld [vmem:[%s2105_s7 + $0x24] ss:$16 sps:$4 sm:$0xff]   ;;  %v1835_v31 = vld [vmem:[%s2105_s7 + $0x20] ss:$16 sps:$4 sm:$0xff]   ;;  %v1911_v17 = vld [vmem:[%s2105_s7 + $0xac] ss:$16 sps:$4 sm:$0xff]  }
  0x32   : > { %v1833_v30 = vld [vmem:[%s2105_s7 + $0x224] ss:$16 sps:$4 sm:$0xff]   ;;  %v1836_v32 = vld [vmem:[%s2105_s7 + $0x220] ss:$16 sps:$4 sm:$0xff]   ;;  %v1914_v18 = vld [vmem:[%s2105_s7 + $0x2ac] ss:$16 sps:$4 sm:$0xff]  }
  0x33   : > { %1121 = vmatpush1.bf16.msra.mxu0 %v1817_v19  ;;  %v1837_v33 = vld [vmem:[%s2105_s7 + $0x4] ss:$16 sps:$4 sm:$0xff]   ;;  %v1841_v35 = vld [vmem:[%s2105_s7] ss:$16 sps:$4 sm:$0xff]   ;;  %v1909_v19 = vld [vmem:[%s2105_s7 + $0xa8] ss:$16 sps:$4 sm:$0xff]  }
  0x34   : > { %1164 = vmatpush1.bf16.msra.mxu1 %v1818_v20  ;;  %1122 = vmatprep.subr.bf16.mxu0 %v1819_v21  ;;  %v1839_v34 = vld [vmem:[%s2105_s7 + $0x204] ss:$16 sps:$4 sm:$0xff]   ;;  %v1842_v36 = vld [vmem:[%s2105_s7 + $0x200] ss:$16 sps:$4 sm:$0xff]   ;;  %v1912_v20 = vld [vmem:[%s2105_s7 + $0x2a8] ss:$16 sps:$4 sm:$0xff]  }
  0x35   : > { %1165 = vmatprep.subr.bf16.mxu1 %v1821_v22  ;;  %v1843_v37 = vld [vmem:[%s2105_s7 + $0x1e4] ss:$16 sps:$4 sm:$0xff]   ;;  %v1847_v39 = vld [vmem:[%s2105_s7 + $0x1e0] ss:$16 sps:$4 sm:$0xff]   ;;  %v1917_v21 = vld [vmem:[%s2105_s7 + $0x8c] ss:$16 sps:$4 sm:$0xff]  }
  0x36   : > { %v1845_v38 = vld [vmem:[%s2105_s7 + $0x3e4] ss:$16 sps:$4 sm:$0xff]   ;;  %v1848_v40 = vld [vmem:[%s2105_s7 + $0x3e0] ss:$16 sps:$4 sm:$0xff]   ;;  %v1920_v22 = vld [vmem:[%s2105_s7 + $0x28c] ss:$16 sps:$4 sm:$0xff]  }
  0x37   : > { %1123 = vmatpush1.bf16.msra.mxu0 %v1823_v23  ;;  %v1849_v41 = vld [vmem:[%s2105_s7 + $0x1c4] ss:$16 sps:$4 sm:$0xff]   ;;  %v1853_v43 = vld [vmem:[%s2105_s7 + $0x1c0] ss:$16 sps:$4 sm:$0xff]   ;;  %v1915_v23 = vld [vmem:[%s2105_s7 + $0x88] ss:$16 sps:$4 sm:$0xff]  }
  0x38   : > { %1166 = vmatpush1.bf16.msra.mxu1 %v1824_v24  ;;  %1124 = vmatprep.subr.bf16.mxu0 %v1825_v25  ;;  %v1851_v42 = vld [vmem:[%s2105_s7 + $0x3c4] ss:$16 sps:$4 sm:$0xff]   ;;  %v1854_v44 = vld [vmem:[%s2105_s7 + $0x3c0] ss:$16 sps:$4 sm:$0xff]   ;;  %v1918_v24 = vld [vmem:[%s2105_s7 + $0x288] ss:$16 sps:$4 sm:$0xff]  }
  0x39   : > { %1167 = vmatprep.subr.bf16.mxu1 %v1827_v26  ;;  %v1855_v45 = vld [vmem:[%s2105_s7 + $0x1a4] ss:$16 sps:$4 sm:$0xff]   ;;  %v1859_v47 = vld [vmem:[%s2105_s7 + $0x1a0] ss:$16 sps:$4 sm:$0xff]   ;;  %v1923_v25 = vld [vmem:[%s2105_s7 + $0x6c] ss:$16 sps:$4 sm:$0xff]  }
  0x3a   : > { %v1857_v46 = vld [vmem:[%s2105_s7 + $0x3a4] ss:$16 sps:$4 sm:$0xff]   ;;  %v1860_v48 = vld [vmem:[%s2105_s7 + $0x3a0] ss:$16 sps:$4 sm:$0xff]   ;;  %v1926_v26 = vld [vmem:[%s2105_s7 + $0x26c] ss:$16 sps:$4 sm:$0xff]  }
  0x3b   : > { %1125 = vmatpush1.bf16.msra.mxu0 %v1829_v27  ;;  %v1861_v49 = vld [vmem:[%s2105_s7 + $0x184] ss:$16 sps:$4 sm:$0xff]   ;;  %v1865_v51 = vld [vmem:[%s2105_s7 + $0x180] ss:$16 sps:$4 sm:$0xff]   ;;  %v1921_v27 = vld [vmem:[%s2105_s7 + $0x68] ss:$16 sps:$4 sm:$0xff]  }
  0x3c   : > { %1168 = vmatpush1.bf16.msra.mxu1 %v1830_v28  ;;  %1126 = vmatprep.subr.bf16.mxu0 %v1831_v29  ;;  %v1863_v50 = vld [vmem:[%s2105_s7 + $0x384] ss:$16 sps:$4 sm:$0xff]   ;;  %v1866_v52 = vld [vmem:[%s2105_s7 + $0x380] ss:$16 sps:$4 sm:$0xff]   ;;  %v1924_v28 = vld [vmem:[%s2105_s7 + $0x268] ss:$16 sps:$4 sm:$0xff]  }
  0x3d   : > { %1169 = vmatprep.subr.bf16.mxu1 %v1833_v30  ;;  %v1867_v53 = vld [vmem:[%s2105_s7 + $0x164] ss:$16 sps:$4 sm:$0xff]   ;;  %v1871_v57 = vld [vmem:[%s2105_s7 + $0x160] ss:$16 sps:$4 sm:$0xff]   ;;  %v1929_v29 = vld [vmem:[%s2105_s7 + $0x4c] ss:$16 sps:$4 sm:$0xff]  }
  0x3e   : > { %v1893_v54 = vld [vmem:[%s2107_s8 + $0x4] ss:$16 sps:$4 sm:$0xff]   ;;  %v1872_v58 = vld [vmem:[%s2105_s7 + $0x360] ss:$16 sps:$4 sm:$0xff]   ;;  %v1932_v30 = vld [vmem:[%s2105_s7 + $0x24c] ss:$16 sps:$4 sm:$0xff]  }
  0x3f   : > { %1127 = vmatpush1.bf16.msra.mxu0 %v1835_v31  ;;  %v1869_v55 = vld [vmem:[%s2105_s7 + $0x364] ss:$16 sps:$4 sm:$0xff]   ;;  %1146 = vmatprep.mubr.bf16.mxu0 %v1893_v54  ;;  %v1877_v61 = vld [vmem:[%s2105_s7 + $0x140] ss:$16 sps:$4 sm:$0xff]   ;;  %v1927_v31 = vld [vmem:[%s2105_s7 + $0x48] ss:$16 sps:$4 sm:$0xff]  }
  0x40   : > { %1170 = vmatpush1.bf16.msra.mxu1 %v1836_v32  ;;  %1128 = vmatprep.subr.bf16.mxu0 %v1837_v33  ;;  %v1873_v59 = vld [vmem:[%s2105_s7 + $0x144] ss:$16 sps:$4 sm:$0xff]   ;;  %v1878_v62 = vld [vmem:[%s2105_s7 + $0x340] ss:$16 sps:$4 sm:$0xff]   ;;  %v1930_v32 = vld [vmem:[%s2105_s7 + $0x248] ss:$16 sps:$4 sm:$0xff]  }
  0x41   : > { %1171 = vmatprep.subr.bf16.mxu1 %v1839_v34  ;;  %v1875_v60 = vld [vmem:[%s2105_s7 + $0x344] ss:$16 sps:$4 sm:$0xff]   ;;  %v1883_v1 = vld [vmem:[%s2105_s7 + $0x120] ss:$16 sps:$4 sm:$0xff]   ;;  %v1935_v33 = vld [vmem:[%s2105_s7 + $0x2c] ss:$16 sps:$4 sm:$0xff]  }
  0x42   : > { %v1879_v63 = vld [vmem:[%s2105_s7 + $0x124] ss:$16 sps:$4 sm:$0xff]   ;;  %v1884_v2 = vld [vmem:[%s2105_s7 + $0x320] ss:$16 sps:$4 sm:$0xff]   ;;  %v1938_v34 = vld [vmem:[%s2105_s7 + $0x22c] ss:$16 sps:$4 sm:$0xff]  }
  0x43   : > { %1129 = vmatpush1.bf16.msra.mxu0 %v1841_v35  ;;  %v1881_v0 = vld [vmem:[%s2105_s7 + $0x324] ss:$16 sps:$4 sm:$0xff]   ;;  %v1889_v5 = vld [vmem:[%s2105_s7 + $0x100] ss:$16 sps:$4 sm:$0xff]   ;;  %v1933_v35 = vld [vmem:[%s2105_s7 + $0x28] ss:$16 sps:$4 sm:$0xff]  }
  0x44   : > { %1172 = vmatpush1.bf16.msra.mxu1 %v1842_v36  ;;  %1130 = vmatprep.subr.bf16.mxu0 %v1843_v37  ;;  %v1885_v3 = vld [vmem:[%s2105_s7 + $0x104] ss:$16 sps:$4 sm:$0xff]   ;;  %v1890_v6 = vld [vmem:[%s2105_s7 + $0x300] ss:$16 sps:$4 sm:$0xff]   ;;  %v1936_v36 = vld [vmem:[%s2105_s7 + $0x228] ss:$16 sps:$4 sm:$0xff]  }
  0x45   : > { %1173 = vmatprep.subr.bf16.mxu1 %v1845_v38  ;;  %v1887_v4 = vld [vmem:[%s2105_s7 + $0x304] ss:$16 sps:$4 sm:$0xff]   ;;  %v2179_v9 = vld [vmem:[%s2107_s8] ss:$16 sps:$4 sm:$0xff]   ;;  %v1941_v37 = vld [vmem:[%s2105_s7 + $0xc] ss:$16 sps:$4 sm:$0xff]  }
  0x46   : > { %v1944_v38 = vld [vmem:[%s2105_s7 + $0x20c] ss:$16 sps:$4 sm:$0xff]  }
  0x47   : > { %1131 = vmatpush2.bf16.msra.mxu0 %v1847_v39  ;;  %v1939_v39 = vld [vmem:[%s2105_s7 + $0x8] ss:$16 sps:$4 sm:$0xff]  }
  0x48   : > { %1174 = vmatpush2.bf16.msra.mxu1 %v1848_v40  ;;  %1132 = vmatprep.subr.bf16.mxu0 %v1849_v41  ;;  %v1942_v40 = vld [vmem:[%s2105_s7 + $0x208] ss:$16 sps:$4 sm:$0xff]   ;;  %v1947_v41 = vld [vmem:[%s2105_s7 + $0x1ec] ss:$16 sps:$4 sm:$0xff]  }
  0x49   : > { %1175 = vmatprep.subr.bf16.mxu1 %v1851_v42  ;;  %v1950_v42 = vld [vmem:[%s2105_s7 + $0x3ec] ss:$16 sps:$4 sm:$0xff]  }
  0x4b   : > { %1133 = vmatpush2.bf16.msra.mxu0 %v1853_v43  ;;  %v1945_v43 = vld [vmem:[%s2105_s7 + $0x1e8] ss:$16 sps:$4 sm:$0xff]  }
  0x4c   : > { %1176 = vmatpush2.bf16.msra.mxu1 %v1854_v44  ;;  %1134 = vmatprep.subr.bf16.mxu0 %v1855_v45  ;;  %v1948_v44 = vld [vmem:[%s2105_s7 + $0x3e8] ss:$16 sps:$4 sm:$0xff]   ;;  %v1953_v45 = vld [vmem:[%s2105_s7 + $0x1cc] ss:$16 sps:$4 sm:$0xff]  }
  0x4d   : > { %1177 = vmatprep.subr.bf16.mxu1 %v1857_v46  ;;  %v1956_v46 = vld [vmem:[%s2105_s7 + $0x3cc] ss:$16 sps:$4 sm:$0xff]  }
  0x4f   : > { %1135 = vmatpush2.bf16.msra.mxu0 %v1859_v47  ;;  %v1951_v47 = vld [vmem:[%s2105_s7 + $0x1c8] ss:$16 sps:$4 sm:$0xff]  }
  0x50   : > { %1178 = vmatpush2.bf16.msra.mxu1 %v1860_v48  ;;  %1136 = vmatprep.subr.bf16.mxu0 %v1861_v49  ;;  %v1954_v48 = vld [vmem:[%s2105_s7 + $0x3c8] ss:$16 sps:$4 sm:$0xff]   ;;  %v1959_v49 = vld [vmem:[%s2105_s7 + $0x1ac] ss:$16 sps:$4 sm:$0xff]  }
  0x51   : > { %1179 = vmatprep.subr.bf16.mxu1 %v1863_v50  ;;  %v1962_v50 = vld [vmem:[%s2105_s7 + $0x3ac] ss:$16 sps:$4 sm:$0xff]  }
  0x53   : > { %1137 = vmatpush2.bf16.msra.mxu0 %v1865_v51  ;;  %v1957_v51 = vld [vmem:[%s2105_s7 + $0x1a8] ss:$16 sps:$4 sm:$0xff]  }
  0x54   : > { %1180 = vmatpush2.bf16.msra.mxu1 %v1866_v52  ;;  %1138 = vmatprep.subr.bf16.mxu0 %v1867_v53  ;;  %v1960_v52 = vld [vmem:[%s2105_s7 + $0x3a8] ss:$16 sps:$4 sm:$0xff]   ;;  %v1965_v53 = vld [vmem:[%s2105_s7 + $0x18c] ss:$16 sps:$4 sm:$0xff]  }
  0x55   : > { %1181 = vmatprep.subr.bf16.mxu1 %v1869_v55  ;;  %v1963_v55 = vld [vmem:[%s2105_s7 + $0x188] ss:$16 sps:$4 sm:$0xff]  }
  0x57   : > { %1139 = vmatpush2.bf16.msra.mxu0 %v1871_v57  ;;  %v1971_v57 = vld [vmem:[%s2105_s7 + $0x16c] ss:$16 sps:$4 sm:$0xff]  }
  0x58   : > { %1182 = vmatpush2.bf16.msra.mxu1 %v1872_v58  ;;  %1140 = vmatprep.subr.bf16.mxu0 %v1873_v59  ;;  %v1974_v58 = vld [vmem:[%s2105_s7 + $0x36c] ss:$16 sps:$4 sm:$0xff]   ;;  %v1969_v59 = vld [vmem:[%s2105_s7 + $0x168] ss:$16 sps:$4 sm:$0xff]  }
  0x59   : > { %1183 = vmatprep.subr.bf16.mxu1 %v1875_v60  ;;  %v1972_v60 = vld [vmem:[%s2105_s7 + $0x368] ss:$16 sps:$4 sm:$0xff]  }
  0x5b   : > { %1141 = vmatpush2.bf16.msra.mxu0 %v1877_v61  ;;  %v1977_v61 = vld [vmem:[%s2105_s7 + $0x14c] ss:$16 sps:$4 sm:$0xff]  }
  0x5c   : > { %1184 = vmatpush2.bf16.msra.mxu1 %v1878_v62  ;;  %1142 = vmatprep.subr.bf16.mxu0 %v1879_v63  ;;  %v1980_v62 = vld [vmem:[%s2105_s7 + $0x34c] ss:$16 sps:$4 sm:$0xff]   ;;  %v1975_v63 = vld [vmem:[%s2105_s7 + $0x148] ss:$16 sps:$4 sm:$0xff]  }
  0x5d   : > { %1185 = vmatprep.subr.bf16.mxu1 %v1881_v0  ;;  %v1978_v0 = vld [vmem:[%s2105_s7 + $0x348] ss:$16 sps:$4 sm:$0xff]  }
  0x5f   : > { %1143 = vmatpush2.bf16.msra.mxu0 %v1883_v1  ;;  %v1983_v1 = vld [vmem:[%s2105_s7 + $0x12c] ss:$16 sps:$4 sm:$0xff]  }
  0x60   : > { %1186 = vmatpush2.bf16.msra.mxu1 %v1884_v2  ;;  %1144 = vmatprep.subr.bf16.mxu0 %v1885_v3  ;;  %v1986_v2 = vld [vmem:[%s2105_s7 + $0x32c] ss:$16 sps:$4 sm:$0xff]   ;;  %v1981_v3 = vld [vmem:[%s2105_s7 + $0x128] ss:$16 sps:$4 sm:$0xff]  }
  0x61   : > { %1187 = vmatprep.subr.bf16.mxu1 %v1887_v4  ;;  %v1984_v4 = vld [vmem:[%s2105_s7 + $0x328] ss:$16 sps:$4 sm:$0xff]  }
  0x63   : > { %1145 = vmatpush2.bf16.msra.mxu0 %v1889_v5  ;;  %v1989_v5 = vld [vmem:[%s2105_s7 + $0x10c] ss:$16 sps:$4 sm:$0xff]  }
  0x64   : > { %1188 = vmatpush2.bf16.msra.mxu1 %v1890_v6  ;;  %1200 = vmatprep.subr.bf16.mxu0 %v1899_v7  ;;  %v1992_v6 = vld [vmem:[%s2105_s7 + $0x30c] ss:$16 sps:$4 sm:$0xff]   ;;  %v1987_v7 = vld [vmem:[%s2105_s7 + $0x108] ss:$16 sps:$4 sm:$0xff]  }
  0x65   : > { %1243 = vmatprep.subr.bf16.mxu1 %v1902_v8  ;;  %v1990_v8 = vld [vmem:[%s2105_s7 + $0x308] ss:$16 sps:$4 sm:$0xff]  }
  0x66   : > { %1147 = vmatmul.mubr.bf16.vlgmr.msra.gmra.mxu0 %v2179_v9 }
  0x67   : > { %1190 = vmatmul.mubr.bf16.vlgmr.msra.gmra.mxu1 %v2182_v10  ;;  %1201 = vmatpush1.bf16.msra.mxu0 %v1897_v11 }
  0x68   : > { %1244 = vmatpush1.bf16.msra.mxu1 %v1900_v12  ;;  %1202 = vmatprep.subr.bf16.mxu0 %v1905_v13  ;;  %v314_v12 = vld [vmem:[#allocation2 + $0x30] sm:$0xff] }
  0x69   : > { %1245 = vmatprep.subr.bf16.mxu1 %v1908_v14  ;;  %1232 = vmatprep.mubr.bf16.mxu0 %v1893_v54  ;;  %v1968_v54 = vld [vmem:[%s2105_s7 + $0x38c] ss:$16 sps:$4 sm:$0xff]  }
  0x6a   : > { %1275 = vmatprep.mubr.bf16.mxu1 %v1896_v56  ;;  %v1966_v56 = vld [vmem:[%s2105_s7 + $0x388] ss:$16 sps:$4 sm:$0xff]  }
  0x6b   : > { %1203 = vmatpush1.bf16.msra.mxu0 %v1903_v15 }
  0x6c   : > { %1246 = vmatpush1.bf16.msra.mxu1 %v1906_v16  ;;  %1204 = vmatprep.subr.bf16.mxu0 %v1911_v17  ;;  %v315_v16 = vld [vmem:[#allocation2] sm:$0xff] }
  0x6d   : > { %1247 = vmatprep.subr.bf16.mxu1 %v1914_v18 }
  0x6f   : > { %1205 = vmatpush1.bf16.msra.mxu0 %v1909_v19 }
  0x70   : > { %1248 = vmatpush1.bf16.msra.mxu1 %v1912_v20  ;;  %1206 = vmatprep.subr.bf16.mxu0 %v1917_v21  ;;  %v318_v21 = vld [vmem:[#allocation2 + $0x8] sm:$0xff] }
  0x71   : > { %1249 = vmatprep.subr.bf16.mxu1 %v1920_v22 }
  0x73   : > { %1207 = vmatpush1.bf16.msra.mxu0 %v1915_v23 }
  0x74   : > { %1250 = vmatpush1.bf16.msra.mxu1 %v1918_v24  ;;  %1208 = vmatprep.subr.bf16.mxu0 %v1923_v25 }
  0x75   : > { %1251 = vmatprep.subr.bf16.mxu1 %v1926_v26  ;;  %v319_v26 = vld [vmem:[#allocation2 + $0x20] sm:$0xff] }
  0x77   : > { %1209 = vmatpush1.bf16.msra.mxu0 %v1921_v27 }
  0x78   : > { %1252 = vmatpush1.bf16.msra.mxu1 %v1924_v28  ;;  %1210 = vmatprep.subr.bf16.mxu0 %v1929_v29 }
  0x79   : > { %1253 = vmatprep.subr.bf16.mxu1 %v1932_v30  ;;  %v316_v30 = vld [vmem:[#allocation2 + $0x18] sm:$0xff] }
  0x7b   : > { %1211 = vmatpush1.bf16.msra.mxu0 %v1927_v31 }
  0x7c   : > { %1254 = vmatpush1.bf16.msra.mxu1 %v1930_v32  ;;  %1212 = vmatprep.subr.bf16.mxu0 %v1935_v33 }
  0x7d   : > { %1255 = vmatprep.subr.bf16.mxu1 %v1938_v34  ;;  %v317_v34 = vld [vmem:[#allocation2 + $0x10] sm:$0xff] }
  0x7f   : > { %1213 = vmatpush1.bf16.msra.mxu0 %v1933_v35 }
  0x80   : > { %1256 = vmatpush1.bf16.msra.mxu1 %v1936_v36  ;;  %1214 = vmatprep.subr.bf16.mxu0 %v1941_v37 }
  0x81   : > { %1257 = vmatprep.subr.bf16.mxu1 %v1944_v38 }
  0x83   : > { %1215 = vmatpush1.bf16.msra.mxu0 %v1939_v39  ;;  %v320_v39 = vld [vmem:[#allocation2 + $0x28] sm:$0xff] }
  0x84   : > { %1258 = vmatpush1.bf16.msra.mxu1 %v1942_v40  ;;  %1216 = vmatprep.subr.bf16.mxu0 %v1947_v41 }
  0x85   : > { %1259 = vmatprep.subr.bf16.mxu1 %v1950_v42 }
  0x87   : > { %1217 = vmatpush2.bf16.msra.mxu0 %v1945_v43 }
  0x88   : > { %1260 = vmatpush2.bf16.msra.mxu1 %v1948_v44  ;;  %1218 = vmatprep.subr.bf16.mxu0 %v1953_v45  ;;  %v321_v44 = vld [vmem:[#allocation2 + $0x38] sm:$0xff] }
  0x89   : > { %1261 = vmatprep.subr.bf16.mxu1 %v1956_v46 }
  0x8b   : > { %1219 = vmatpush2.bf16.msra.mxu0 %v1951_v47 }
  0x8c   : > { %1262 = vmatpush2.bf16.msra.mxu1 %v1954_v48  ;;  %1220 = vmatprep.subr.bf16.mxu0 %v1959_v49 }
  0x8d   : > { %1263 = vmatprep.subr.bf16.mxu1 %v1962_v50 }
  0x8f   : > { %1221 = vmatpush2.bf16.msra.mxu0 %v1957_v51 }
  0x90   : > { %1264 = vmatpush2.bf16.msra.mxu1 %v1960_v52  ;;  %1222 = vmatprep.subr.bf16.mxu0 %v1965_v53 }
  0x91   : > { %1265 = vmatprep.subr.bf16.mxu1 %v1968_v54 }
  0x93   : > { %1223 = vmatpush2.bf16.msra.mxu0 %v1963_v55 }
  0x94   : > { %1266 = vmatpush2.bf16.msra.mxu1 %v1966_v56  ;;  %1224 = vmatprep.subr.bf16.mxu0 %v1971_v57 }
  0x95   : > { %1267 = vmatprep.subr.bf16.mxu1 %v1974_v58 }
  0x97   : > { %1225 = vmatpush2.bf16.msra.mxu0 %v1969_v59 }
  0x98   : > { %1268 = vmatpush2.bf16.msra.mxu1 %v1972_v60  ;;  %1226 = vmatprep.subr.bf16.mxu0 %v1977_v61 }
  0x99   : > { %1269 = vmatprep.subr.bf16.mxu1 %v1980_v62 }
  0x9b   : > { %1227 = vmatpush2.bf16.msra.mxu0 %v1975_v63 }
  0x9c   : > { %1270 = vmatpush2.bf16.msra.mxu1 %v1978_v0  ;;  %1228 = vmatprep.subr.bf16.mxu0 %v1983_v1 }
  0x9d   : > { %1271 = vmatprep.subr.bf16.mxu1 %v1986_v2 }
  0x9f   : > { %1229 = vmatpush2.bf16.msra.mxu0 %v1981_v3 }
  0xa0   : > { %1272 = vmatpush2.bf16.msra.mxu1 %v1984_v4  ;;  %1230 = vmatprep.subr.bf16.mxu0 %v1989_v5 }
  0xa1   : > { %1273 = vmatprep.subr.bf16.mxu1 %v1992_v6 }
  0xa3   : > { %1231 = vmatpush2.bf16.msra.mxu0 %v1987_v7 }
  0xa4   : > { %1274 = vmatpush2.bf16.msra.mxu1 %v1990_v8 }
  0xa6   : > { %1233 = vmatmul.mubr.bf16.vlgmr.msra.gmra.mxu0 %v2179_v9 }
  0xa7   : > { %1276 = vmatmul.mubr.bf16.vlgmr.msra.gmra.mxu1 %v2182_v10 }
 0x126   : > { %v1148_v11 = vpop.f32.mrf.mxu0 }
 0x127   : > { %v1191_v13 = vpop.f32.mrf.mxu1 }
 0x128   : > { %v1192_v14 = vadd.f32 %v1191_v13, %v1148_v11  ;;  %v1150_v15 = vpop.f32.mrf.mxu0 }
 0x129   : > { %v1193_v17 = vpop.f32.mrf.mxu1 }
 0x12a   : > { %v1286_v18 = vadd.f32 %v1192_v14, %v314_v12  ;;  %v1194_v19 = vadd.f32 %v1193_v17, %v1150_v15  ;;  %v1152_v20 = vpop.f32.mrf.mxu0 }
 0x12b   : > { %v1195_v22 = vpop.f32.mrf.mxu1 }
 0x12c   : > { %1294 = vst [vmem:[#allocation2 + $0x30] sm:$0xff] %v1286_v18  ;;  %v1287_v23 = vadd.f32 %v1194_v19, %v315_v16  ;;  %v1196_v24 = vadd.f32 %v1195_v22, %v1152_v20  ;;  %v1154_v25 = vpop.f32.mrf.mxu0 }
 0x12d   : > { %v1197_v9 = vpop.f32.mrf.mxu1 }
 0x12e   : > { %1295 = vst [vmem:[#allocation2] sm:$0xff] %v1287_v23  ;;  %v1290_v10 = vadd.f32 %v1196_v24, %v318_v21  ;;  %v1198_v27 = vadd.f32 %v1197_v9, %v1154_v25 }
 0x130   : > { %1298 = vst [vmem:[#allocation2 + $0x8] sm:$0xff] %v1290_v10  ;;  %v1291_v28 = vadd.f32 %v1198_v27, %v319_v26 }
 0x132   : > { %1299 = vst [vmem:[#allocation2 + $0x20] sm:$0xff] %v1291_v28 }
 0x166   : > { %v1234_v29 = vpop.f32.mrf.mxu0 }
 0x167   : > { %v1277_v31 = vpop.f32.mrf.mxu1 }
 0x168   : > { %v1278_v32 = vadd.f32 %v1277_v31, %v1234_v29  ;;  %v1236_v33 = vpop.f32.mrf.mxu0 }
 0x169   : > { %v1279_v35 = vpop.f32.mrf.mxu1 }
 0x16a   : > { %v1288_v36 = vadd.f32 %v1278_v32, %v316_v30  ;;  %v1280_v37 = vadd.f32 %v1279_v35, %v1236_v33  ;;  %v1238_v38 = vpop.f32.mrf.mxu0 }
 0x16b   : > { %v1281_v40 = vpop.f32.mrf.mxu1 }
 0x16c   : > { %1296 = vst [vmem:[#allocation2 + $0x18] sm:$0xff] %v1288_v36  ;;  %v1289_v41 = vadd.f32 %v1280_v37, %v317_v34  ;;  %v1282_v42 = vadd.f32 %v1281_v40, %v1238_v38  ;;  %v1240_v43 = vpop.f32.mrf.mxu0 }
 0x16d   : > { %v1283_v45 = vpop.f32.mrf.mxu1 }
 0x16e   : > { %1297 = vst [vmem:[#allocation2 + $0x10] sm:$0xff] %v1289_v41  ;;  %v1292_v46 = vadd.f32 %v1282_v42, %v320_v39  ;;  %v1284_v47 = vadd.f32 %v1283_v45, %v1240_v43  ;;  %1305 = sbr.rel (%p1736_p11) target bundleno = 402 (0x192), region = 59 }
 0x170   : > { %1300 = vst [vmem:[#allocation2 + $0x28] sm:$0xff] %v1292_v46  ;;  %v1293_v48 = vadd.f32 %v1284_v47, %v321_v44 }
 0x172   : > { %1301 = vst [vmem:[#allocation2 + $0x38] sm:$0xff] %v1293_v48 }
 0x173   : > { %v1306_v49 = vld [vmem:[#allocation2 + $0x30] sm:$0xff]  ;;  %v1307_v50 = vld [vmem:[#allocation2] sm:$0xff]  ;;  %v1308_v51 = vld [vmem:[#allocation2 + $0x18] sm:$0xff]  ;;  %v1420_v52 = vlaneseq  ;;  %vm1406_vm0 = vcmask 1040384  }
 0x174   : > { %v1749_v53 = vpack.c.bf16 %v1307_v50, %v1306_v49  ;;  %v1370_v54 = vmul.f32 %v1306_v49, %v1306_v49  ;;  %v1371_v55 = vmul.f32 %v1307_v50, %v1307_v50  ;;  %v1372_v57 = vmul.f32 %v1308_v51, %v1308_v51  ;;  %v1310_v58 = vld [vmem:[#allocation2 + $0x8] sm:$0xff]  ;;  %v1311_v59 = vld [vmem:[#allocation2 + $0x20] sm:$0xff] }
 0x175   : > { %v1309_v56 = vld [vmem:[#allocation2 + $0x10] sm:$0xff]  ;;  %v1751_v62 = vpack.c.bf16 %v1311_v59, %v1310_v58  ;;  %v1342_v63 = vadd.f32 %v1310_v58, %v1306_v49  ;;  %v1349_v2 = vadd.f32 %v1311_v59, %v1307_v50  ;;  %v1374_v3 = vmul.f32 %v1310_v58, %v1310_v58 }
 0x176   : > { %v1750_v60 = vpack.c.bf16 %v1309_v56, %v1308_v51  ;;  %v1373_v61 = vmul.f32 %v1309_v56, %v1309_v56  ;;  %1338 = vst [vmem:[%s2288_s2] sm:$0xff] %v1749_v53  ;;  %v1375_v4 = vmul.f32 %v1311_v59, %v1311_v59  ;;  %v2034_v58 = vmov 1983009808  }
 0x177   : > { %v1312_v0 = vld [vmem:[#allocation2 + $0x28] sm:$0xff]  ;;  %1340 = vst [vmem:[%s2288_s2 + $0x10] sm:$0xff] %v1751_v62  ;;  %v1343_v6 = vrot.slane %v1342_v63, 4  ;;  %v1350_v12 = vrot.slane %v1349_v2, 4  ;;  %v1378_v13 = vadd.f32 %v1374_v3, %v1370_v54  ;;  %v1418_v59 = vunpack.c.l.s4 %v2034_v58 }
 0x178   : > { %1339 = vst [vmem:[%s2288_s2 + $0x8] sm:$0xff] %v1750_v60  ;;  %v1356_v7 = vadd.f32 %v1312_v0, %v1308_v51  ;;  %v1376_v11 = vmul.f32 %v1312_v0, %v1312_v0  ;;  %v1385_v14 = vadd.f32 %v1375_v4, %v1371_v55 }
 0x179   : > { %v1313_v1 = vld [vmem:[#allocation2 + $0x38] sm:$0xff]  ;;  %v1344_v16 = vadd.f32 %v1343_v6, %v1342_v63  ;;  %v1351_v20 = vadd.f32 %v1350_v12, %v1349_v2  ;;  %v1379_v21 = vrot.slane %v1378_v13, 4  ;;  %v1421_v63 = vshrl.u32 %v1420_v52, 7 }
 0x17a   : > { %v1752_v5 = vpack.c.bf16 %v1313_v1, %v1312_v0  ;;  %v1363_v8 = vadd.f32 %v1313_v1, %v1309_v56  ;;  %v1377_v15 = vmul.f32 %v1313_v1, %v1313_v1  ;;  %v1357_v17 = vrot.slane %v1356_v7, 4 }
 0x17b   : > { %v1392_v19 = vadd.f32 %v1376_v11, %v1372_v57  ;;  %v1386_v22 = vrot.slane %v1385_v14, 4  ;;  %v1345_v24 = vrot.slane %v1344_v16, 2  ;;  %v1352_v10 = vrot.slane %v1351_v20, 2 }
 0x17c   : > { %1341 = vst [vmem:[%s2288_s2 + $0x18] sm:$0xff] %v1752_v5  ;;  %v1364_v18 = vrot.slane %v1363_v8, 4  ;;  %v1399_v23 = vadd.f32 %v1377_v15, %v1373_v61  ;;  %v1358_v25 = vadd.f32 %v1357_v17, %v1356_v7  ;;  %v1380_v27 = vadd.f32 %v1379_v21, %v1378_v13 }
 0x17d   : > { %v1393_v9 = vrot.slane %v1392_v19, 4  ;;  %v1387_v28 = vadd.f32 %v1386_v22, %v1385_v14  ;;  %v1346_v30 = vadd.f32 %v1345_v24, %v1344_v16  ;;  %v1353_v34 = vadd.f32 %v1352_v10, %v1351_v20 }
 0x17e   : > { %v1365_v26 = vadd.f32 %v1364_v18, %v1363_v8  ;;  %v1400_v29 = vrot.slane %v1399_v23, 4  ;;  %v1359_v31 = vrot.slane %v1358_v25, 2  ;;  %v1381_v35 = vrot.slane %v1380_v27, 2 }
 0x17f   : > { %v1394_v33 = vadd.f32 %v1393_v9, %v1392_v19  ;;  %v1388_v36 = vrot.slane %v1387_v28, 2  ;;  %v1347_v38 = vrot.slane %v1346_v30, 1  ;;  %v1354_v42 = vrot.slane %v1353_v34, 1 }
 0x180   : > { %v1366_v32 = vrot.slane %v1365_v26, 2  ;;  %v1401_v37 = vadd.f32 %v1400_v29, %v1399_v23  ;;  %v1360_v39 = vadd.f32 %v1359_v31, %v1358_v25  ;;  %v1382_v43 = vadd.f32 %v1381_v35, %v1380_v27 }
 0x181   : > { %v1395_v41 = vrot.slane %v1394_v33, 2  ;;  %v1389_v44 = vadd.f32 %v1388_v36, %v1387_v28  ;;  %v1348_v49 = vadd.f32 %v1347_v38, %v1346_v30  ;;  %v1355_v51 = vadd.f32 %v1354_v42, %v1353_v34 }
 0x182   : > { %v1367_v40 = vadd.f32 %v1366_v32, %v1365_v26  ;;  %v1402_v45 = vrot.slane %v1401_v37, 2  ;;  %v1361_v46 = vrot.slane %v1360_v39, 1  ;;  %v1383_v53 = vrot.slane %v1382_v43, 1 }
 0x183   : > { %v1396_v48 = vadd.f32 %v1395_v41, %v1394_v33  ;;  %v1390_v54 = vrot.slane %v1389_v44, 1  ;;  %v1419_v1 = vunpack.c.0.s8 %v1418_v59 }
 0x184   : > { %v1368_v47 = vrot.slane %v1367_v40, 1  ;;  %v1403_v50 = vadd.f32 %v1402_v45, %v1401_v37  ;;  %v1362_v55 = vadd.f32 %v1361_v46, %v1360_v39  ;;  %v1384_v60 = vadd.f32 %v1383_v53, %v1382_v43 }
 0x185   : > { %v1397_v57 = vrot.slane %v1396_v48, 1  ;;  %v1391_v61 = vadd.f32 %v1390_v54, %v1389_v44  ;;  %v1422_v7 = vsub.s32 %v1419_v1, %v1421_v63 }
 0x186   : > { %v1369_v56 = vadd.f32 %v1368_v47, %v1367_v40  ;;  %v1404_v62 = vrot.slane %v1403_v50, 1  ;;  %v1407_v3 = vsel %vm1406_vm0, %v1348_v49, %v1384_v60 }
 0x187   : > { %v1398_v0 = vadd.f32 %v1397_v57, %v1396_v48  ;;  %v1408_v4 = vsel %vm1406_vm0, %v1355_v51, %v1391_v61 }
 0x188   : > { %v1405_v2 = vadd.f32 %v1404_v62, %v1403_v50  ;;  %v1415_v6 = vcombine.low %v1407_v3, %v1408_v4 }
 0x189   : > { %v1409_v5 = vsel %vm1406_vm0, %v1362_v55, %v1398_v0 }
 0x18a   : > { %v1410_v8 = vsel %vm1406_vm0, %v1369_v56, %v1405_v2  ;;  %v1423_v12 = vrot.slane %v1415_v6, %v1422_v7 }
 0x18b   : > { %v1416_v11 = vcombine.low %v1409_v5, %v1410_v8 }
 0x18d   : > { %v1430_v13 = vrot.slane %v1416_v11, %v1422_v7 }
 0x18f   : > { %v1431_v14 = vcombine.low %v1423_v12, %v1430_v13 }
 0x191   : > { %1433 = vst [vmem:[%s2289_s3] sm:$0xff] %v1431_v14 }
 0x192 PF: > { %s14_s16 = sadd.s32 1, %s2031_s16   ;;  %s2290_s12 = smov %s2019_s13 }
 0x193   : > { %p11_p12 = scmp.ge.s32.totalorder %s14_s16, 11   ;;  %s2291_s13 = smov %s2090_s20 }
 0x194   : > { %s2292_s14 = smov %s2027_s15  ;;  %s2293_s15 = smov %s2295_s17 }
 0x195   :  { %13 = sbr.rel (!%p11_p12) target bundleno = 3 (0x3), region = 109 }

// kernel: viewpoint_forward.85
= control target key start
LH: loop header
LB: loop body
LE: loop exit
PB: predicated region body
PF: predicated region fallthrough
CT: control target
= control target key end

     0   :  { %s2306_s12 = smov 0   ;;  %s2308_s13 = smov 0   ;;  %s2824_s0 = inlined_call_operand.vmem [shape: bf16[16,512], index: 0, kind: input, shape index: {}]   ;;  %s2825_s1 = inlined_call_operand.vmem [shape: bf16[512,1024], index: 1, kind: input, shape index: {}]   ;;  %s2826_s2 = inlined_call_operand.vmem [shape: bf16[16,1024], index: 2, kind: output, shape index: {0}]   ;;  %s2827_s3 = inlined_call_operand.vmem [shape: f32[1,2,1024], index: 3, kind: output, shape index: {1}]  }
   0x1   :  { %s2310_s14 = smov 0   ;;  %s2312_s15 = smov 0  }
   0x2   :  { %s2314_s16 = smov 0  }
   0x3 LB: > { %s29_s17 = sadd.s32 1, %s2279_s15  ;;  %s1846_s18 = sadd.s32 4294967295, %s2283_s16   ;;  %s2283_s16 = sphi %s2314_s16, %s14_s16   ;;  %s2279_s15 = sphi %s2312_s15, %s2832_s15   ;;  %s2275_s14 = sphi %s2310_s14, %s2831_s14   ;;  %s2271_s13 = sphi %s2308_s13, %s2830_s13   ;;  %s2267_s12 = sphi %s2306_s12, %s2829_s12  }
   0x4   : > { %p31_p0 = scmp.ge.s32.totalorder %s29_s17, 2  ;;  %p77_p1 = scmp.ne.s32.totalorder %s2271_s13, %s2267_s12 }
   0x5   : > { %p78_p2 = scmp.eq.s32.totalorder %s2283_s16, 0  ;;  %p109_p4 = scmp.eq.s32.totalorder %s1846_s18, 1 }
   0x6   : > { %s2834_s17 = smov (%p31_p0, %s29_s17), 0  ;;  %s70_s20 = sadd.s32 1, %s2271_s13 }
   0x7   : > { %p79_p3 = por %p78_p2, %p77_p1  ;;  %s66_s19 = ssub.s32 %s2279_s15, %s2834_s17 }
   0x8   : > { %p68_p5 = scmp.eq.s32.totalorder %s66_s19, 0  ;;  %p2341_p6 = por %p109_p4, %p77_p1 }
   0x9   : > { %p1850_p7 = scmp.ge.s32.totalorder %s2283_s16, 2 }
   0xa   : > { %s2346_s22 = scalar_select %p68_p5, %s2271_s13, %s70_s20  }
   0xb   : > { %174 = sbr.rel (%p1850_p7) target bundleno = 84 (0x54), region = 20 }
  0x10   : > { %177 = sbr.rel (!%p79_p3) target bundleno = 84 (0x54), region = 24  ;;  %s179_s23 = sand.u32 (%p79_p3), 1, %s2271_s13  }
  0x11   : > { %s2000_s24 = sshll.u32 (%p79_p3), %s2279_s15, 4  ;;  %s1851_s25 = sshll.u32 (%p79_p3), %s179_s23, 10 }
  0x12   : > { %s2354_s28 = scalar_lea.vmem (%p79_p3), %s2825_s1, %s2000_s24  ;;  %s2359_s29 = scalar_lea.vmem (%p79_p3), [#allocation3], %s1851_s25 }
  0x13   : > { %v200_v0 = vld [vmem:[%s2354_s28] sm:$0xff] (%p79_p3)  ;;  %v202_v1 = vld [vmem:[%s2354_s28 + $0x8] sm:$0xff] (%p79_p3) }
  0x14   : > { %v204_v2 = vld [vmem:[%s2354_s28 + $0x20] sm:$0xff] (%p79_p3)  ;;  %201 = vst [vmem:[%s2359_s29] sm:$0xff] (%p79_p3), %v200_v0  ;;  %203 = vst [vmem:[%s2359_s29 + $0x8] sm:$0xff] (%p79_p3), %v202_v1  ;;  %v206_v3 = vld [vmem:[%s2354_s28 + $0x28] sm:$0xff] (%p79_p3) }
  0x15   : > { %205 = vst [vmem:[%s2359_s29 + $0x10] sm:$0xff] %v204_v2  ;;  %v208_v4 = vld [vmem:[%s2354_s28 + $0x40] sm:$0xff]  ;;  %v210_v5 = vld [vmem:[%s2354_s28 + $0x48] sm:$0xff]  ;;  %207 = vst [vmem:[%s2359_s29 + $0x18] sm:$0xff] %v206_v3 }
  0x16   : > { %209 = vst [vmem:[%s2359_s29 + $0x20] sm:$0xff] %v208_v4  ;;  %211 = vst [vmem:[%s2359_s29 + $0x28] sm:$0xff] %v210_v5  ;;  %v212_v6 = vld [vmem:[%s2354_s28 + $0x60] sm:$0xff]  ;;  %v214_v7 = vld [vmem:[%s2354_s28 + $0x68] sm:$0xff] }
  0x17   : > { %v216_v8 = vld [vmem:[%s2354_s28 + $0x80] sm:$0xff]  ;;  %213 = vst [vmem:[%s2359_s29 + $0x30] sm:$0xff] %v212_v6  ;;  %215 = vst [vmem:[%s2359_s29 + $0x38] sm:$0xff] %v214_v7  ;;  %v218_v9 = vld [vmem:[%s2354_s28 + $0x88] sm:$0xff] }
  0x18   : > { %217 = vst [vmem:[%s2359_s29 + $0x40] sm:$0xff] %v216_v8  ;;  %v220_v10 = vld [vmem:[%s2354_s28 + $0xa0] sm:$0xff]  ;;  %v222_v11 = vld [vmem:[%s2354_s28 + $0xa8] sm:$0xff]  ;;  %219 = vst [vmem:[%s2359_s29 + $0x48] sm:$0xff] %v218_v9 }
  0x19   : > { %221 = vst [vmem:[%s2359_s29 + $0x50] sm:$0xff] %v220_v10  ;;  %223 = vst [vmem:[%s2359_s29 + $0x58] sm:$0xff] %v222_v11  ;;  %v224_v12 = vld [vmem:[%s2354_s28 + $0xc0] sm:$0xff]  ;;  %v226_v13 = vld [vmem:[%s2354_s28 + $0xc8] sm:$0xff] }
  0x1a   : > { %v228_v14 = vld [vmem:[%s2354_s28 + $0xe0] sm:$0xff]  ;;  %225 = vst [vmem:[%s2359_s29 + $0x60] sm:$0xff] %v224_v12  ;;  %227 = vst [vmem:[%s2359_s29 + $0x68] sm:$0xff] %v226_v13  ;;  %v230_v15 = vld [vmem:[%s2354_s28 + $0xe8] sm:$0xff] }
  0x1b   : > { %229 = vst [vmem:[%s2359_s29 + $0x70] sm:$0xff] %v228_v14  ;;  %v232_v16 = vld [vmem:[%s2354_s28 + $0x100] sm:$0xff]  ;;  %v234_v17 = vld [vmem:[%s2354_s28 + $0x108] sm:$0xff]  ;;  %231 = vst [vmem:[%s2359_s29 + $0x78] sm:$0xff] %v230_v15 }
  0x1c   : > { %233 = vst [vmem:[%s2359_s29 + $0x80] sm:$0xff] %v232_v16  ;;  %235 = vst [vmem:[%s2359_s29 + $0x88] sm:$0xff] %v234_v17  ;;  %v236_v18 = vld [vmem:[%s2354_s28 + $0x120] sm:$0xff]  ;;  %v238_v19 = vld [vmem:[%s2354_s28 + $0x128] sm:$0xff] }
  0x1d   : > { %v240_v20 = vld [vmem:[%s2354_s28 + $0x140] sm:$0xff]  ;;  %237 = vst [vmem:[%s2359_s29 + $0x90] sm:$0xff] %v236_v18  ;;  %239 = vst [vmem:[%s2359_s29 + $0x98] sm:$0xff] %v238_v19  ;;  %v242_v21 = vld [vmem:[%s2354_s28 + $0x148] sm:$0xff] }
  0x1e   : > { %241 = vst [vmem:[%s2359_s29 + $0xa0] sm:$0xff] %v240_v20  ;;  %v244_v22 = vld [vmem:[%s2354_s28 + $0x160] sm:$0xff]  ;;  %v246_v23 = vld [vmem:[%s2354_s28 + $0x168] sm:$0xff]  ;;  %243 = vst [vmem:[%s2359_s29 + $0xa8] sm:$0xff] %v242_v21 }
  0x1f   : > { %245 = vst [vmem:[%s2359_s29 + $0xb0] sm:$0xff] %v244_v22  ;;  %247 = vst [vmem:[%s2359_s29 + $0xb8] sm:$0xff] %v246_v23  ;;  %v248_v24 = vld [vmem:[%s2354_s28 + $0x180] sm:$0xff]  ;;  %v250_v25 = vld [vmem:[%s2354_s28 + $0x188] sm:$0xff] }
  0x20   : > { %v252_v26 = vld [vmem:[%s2354_s28 + $0x1a0] sm:$0xff]  ;;  %249 = vst [vmem:[%s2359_s29 + $0xc0] sm:$0xff] %v248_v24  ;;  %251 = vst [vmem:[%s2359_s29 + $0xc8] sm:$0xff] %v250_v25  ;;  %v254_v27 = vld [vmem:[%s2354_s28 + $0x1a8] sm:$0xff] }
  0x21   : > { %253 = vst [vmem:[%s2359_s29 + $0xd0] sm:$0xff] %v252_v26  ;;  %v256_v28 = vld [vmem:[%s2354_s28 + $0x1c0] sm:$0xff]  ;;  %v258_v29 = vld [vmem:[%s2354_s28 + $0x1c8] sm:$0xff]  ;;  %255 = vst [vmem:[%s2359_s29 + $0xd8] sm:$0xff] %v254_v27 }
  0x22   : > { %257 = vst [vmem:[%s2359_s29 + $0xe0] sm:$0xff] %v256_v28  ;;  %259 = vst [vmem:[%s2359_s29 + $0xe8] sm:$0xff] %v258_v29  ;;  %v260_v30 = vld [vmem:[%s2354_s28 + $0x1e0] sm:$0xff]  ;;  %v262_v31 = vld [vmem:[%s2354_s28 + $0x1e8] sm:$0xff] }
  0x23   : > { %v264_v32 = vld [vmem:[%s2354_s28 + $0x200] sm:$0xff]  ;;  %261 = vst [vmem:[%s2359_s29 + $0xf0] sm:$0xff] %v260_v30  ;;  %263 = vst [vmem:[%s2359_s29 + $0xf8] sm:$0xff] %v262_v31  ;;  %v266_v33 = vld [vmem:[%s2354_s28 + $0x208] sm:$0xff] }
  0x24   : > { %265 = vst [vmem:[%s2359_s29 + $0x100] sm:$0xff] %v264_v32  ;;  %v268_v34 = vld [vmem:[%s2354_s28 + $0x220] sm:$0xff]  ;;  %v270_v35 = vld [vmem:[%s2354_s28 + $0x228] sm:$0xff]  ;;  %267 = vst [vmem:[%s2359_s29 + $0x108] sm:$0xff] %v266_v33 }
  0x25   : > { %269 = vst [vmem:[%s2359_s29 + $0x110] sm:$0xff] %v268_v34  ;;  %271 = vst [vmem:[%s2359_s29 + $0x118] sm:$0xff] %v270_v35  ;;  %v272_v36 = vld [vmem:[%s2354_s28 + $0x240] sm:$0xff]  ;;  %v274_v37 = vld [vmem:[%s2354_s28 + $0x248] sm:$0xff] }
  0x26   : > { %v276_v38 = vld [vmem:[%s2354_s28 + $0x260] sm:$0xff]  ;;  %273 = vst [vmem:[%s2359_s29 + $0x120] sm:$0xff] %v272_v36  ;;  %275 = vst [vmem:[%s2359_s29 + $0x128] sm:$0xff] %v274_v37  ;;  %v278_v39 = vld [vmem:[%s2354_s28 + $0x268] sm:$0xff] }
  0x27   : > { %277 = vst [vmem:[%s2359_s29 + $0x130] sm:$0xff] %v276_v38  ;;  %v280_v40 = vld [vmem:[%s2354_s28 + $0x280] sm:$0xff]  ;;  %v282_v41 = vld [vmem:[%s2354_s28 + $0x288] sm:$0xff]  ;;  %279 = vst [vmem:[%s2359_s29 + $0x138] sm:$0xff] %v278_v39 }
  0x28   : > { %281 = vst [vmem:[%s2359_s29 + $0x140] sm:$0xff] %v280_v40  ;;  %283 = vst [vmem:[%s2359_s29 + $0x148] sm:$0xff] %v282_v41  ;;  %v284_v42 = vld [vmem:[%s2354_s28 + $0x2a0] sm:$0xff]  ;;  %v286_v43 = vld [vmem:[%s2354_s28 + $0x2a8] sm:$0xff] }
  0x29   : > { %v288_v44 = vld [vmem:[%s2354_s28 + $0x2c0] sm:$0xff]  ;;  %285 = vst [vmem:[%s2359_s29 + $0x150] sm:$0xff] %v284_v42  ;;  %287 = vst [vmem:[%s2359_s29 + $0x158] sm:$0xff] %v286_v43  ;;  %v290_v45 = vld [vmem:[%s2354_s28 + $0x2c8] sm:$0xff] }
  0x2a   : > { %289 = vst [vmem:[%s2359_s29 + $0x160] sm:$0xff] %v288_v44  ;;  %v292_v46 = vld [vmem:[%s2354_s28 + $0x2e0] sm:$0xff]  ;;  %v294_v47 = vld [vmem:[%s2354_s28 + $0x2e8] sm:$0xff]  ;;  %291 = vst [vmem:[%s2359_s29 + $0x168] sm:$0xff] %v290_v45 }
  0x2b   : > { %293 = vst [vmem:[%s2359_s29 + $0x170] sm:$0xff] %v292_v46  ;;  %295 = vst [vmem:[%s2359_s29 + $0x178] sm:$0xff] %v294_v47  ;;  %v296_v48 = vld [vmem:[%s2354_s28 + $0x300] sm:$0xff]  ;;  %v298_v49 = vld [vmem:[%s2354_s28 + $0x308] sm:$0xff] }
  0x2c   : > { %v300_v50 = vld [vmem:[%s2354_s28 + $0x320] sm:$0xff]  ;;  %297 = vst [vmem:[%s2359_s29 + $0x180] sm:$0xff] %v296_v48  ;;  %299 = vst [vmem:[%s2359_s29 + $0x188] sm:$0xff] %v298_v49  ;;  %v302_v51 = vld [vmem:[%s2354_s28 + $0x328] sm:$0xff] }
  0x2d   : > { %301 = vst [vmem:[%s2359_s29 + $0x190] sm:$0xff] %v300_v50  ;;  %v304_v52 = vld [vmem:[%s2354_s28 + $0x340] sm:$0xff]  ;;  %v306_v53 = vld [vmem:[%s2354_s28 + $0x348] sm:$0xff]  ;;  %303 = vst [vmem:[%s2359_s29 + $0x198] sm:$0xff] %v302_v51 }
  0x2e   : > { %305 = vst [vmem:[%s2359_s29 + $0x1a0] sm:$0xff] %v304_v52  ;;  %307 = vst [vmem:[%s2359_s29 + $0x1a8] sm:$0xff] %v306_v53  ;;  %v308_v54 = vld [vmem:[%s2354_s28 + $0x360] sm:$0xff]  ;;  %v310_v55 = vld [vmem:[%s2354_s28 + $0x368] sm:$0xff] }
  0x2f   : > { %v312_v56 = vld [vmem:[%s2354_s28 + $0x380] sm:$0xff]  ;;  %309 = vst [vmem:[%s2359_s29 + $0x1b0] sm:$0xff] %v308_v54  ;;  %311 = vst [vmem:[%s2359_s29 + $0x1b8] sm:$0xff] %v310_v55  ;;  %v314_v57 = vld [vmem:[%s2354_s28 + $0x388] sm:$0xff] }
  0x30   : > { %313 = vst [vmem:[%s2359_s29 + $0x1c0] sm:$0xff] %v312_v56  ;;  %v316_v58 = vld [vmem:[%s2354_s28 + $0x3a0] sm:$0xff]  ;;  %v318_v59 = vld [vmem:[%s2354_s28 + $0x3a8] sm:$0xff]  ;;  %315 = vst [vmem:[%s2359_s29 + $0x1c8] sm:$0xff] %v314_v57 }
  0x31   : > { %317 = vst [vmem:[%s2359_s29 + $0x1d0] sm:$0xff] %v316_v58  ;;  %319 = vst [vmem:[%s2359_s29 + $0x1d8] sm:$0xff] %v318_v59  ;;  %v320_v60 = vld [vmem:[%s2354_s28 + $0x3c0] sm:$0xff]  ;;  %v322_v61 = vld [vmem:[%s2354_s28 + $0x3c8] sm:$0xff] }
  0x32   : > { %v324_v62 = vld [vmem:[%s2354_s28 + $0x3e0] sm:$0xff]  ;;  %321 = vst [vmem:[%s2359_s29 + $0x1e0] sm:$0xff] %v320_v60  ;;  %323 = vst [vmem:[%s2359_s29 + $0x1e8] sm:$0xff] %v322_v61  ;;  %v326_v63 = vld [vmem:[%s2354_s28 + $0x3e8] sm:$0xff] }
  0x33   : > { %325 = vst [vmem:[%s2359_s29 + $0x1f0] sm:$0xff] %v324_v62  ;;  %v328_v0 = vld [vmem:[%s2354_s28 + $0x400] sm:$0xff]  ;;  %v330_v1 = vld [vmem:[%s2354_s28 + $0x408] sm:$0xff]  ;;  %327 = vst [vmem:[%s2359_s29 + $0x1f8] sm:$0xff] %v326_v63 }
  0x34   : > { %329 = vst [vmem:[%s2359_s29 + $0x200] sm:$0xff] %v328_v0  ;;  %331 = vst [vmem:[%s2359_s29 + $0x208] sm:$0xff] %v330_v1  ;;  %v332_v2 = vld [vmem:[%s2354_s28 + $0x420] sm:$0xff]  ;;  %v334_v3 = vld [vmem:[%s2354_s28 + $0x428] sm:$0xff] }
  0x35   : > { %v336_v4 = vld [vmem:[%s2354_s28 + $0x440] sm:$0xff]  ;;  %333 = vst [vmem:[%s2359_s29 + $0x210] sm:$0xff] %v332_v2  ;;  %335 = vst [vmem:[%s2359_s29 + $0x218] sm:$0xff] %v334_v3  ;;  %v338_v5 = vld [vmem:[%s2354_s28 + $0x448] sm:$0xff] }
  0x36   : > { %337 = vst [vmem:[%s2359_s29 + $0x220] sm:$0xff] %v336_v4  ;;  %v340_v6 = vld [vmem:[%s2354_s28 + $0x460] sm:$0xff]  ;;  %v342_v7 = vld [vmem:[%s2354_s28 + $0x468] sm:$0xff]  ;;  %339 = vst [vmem:[%s2359_s29 + $0x228] sm:$0xff] %v338_v5 }
  0x37   : > { %341 = vst [vmem:[%s2359_s29 + $0x230] sm:$0xff] %v340_v6  ;;  %343 = vst [vmem:[%s2359_s29 + $0x238] sm:$0xff] %v342_v7  ;;  %v344_v8 = vld [vmem:[%s2354_s28 + $0x480] sm:$0xff]  ;;  %v346_v9 = vld [vmem:[%s2354_s28 + $0x488] sm:$0xff] }
  0x38   : > { %v348_v10 = vld [vmem:[%s2354_s28 + $0x4a0] sm:$0xff]  ;;  %345 = vst [vmem:[%s2359_s29 + $0x240] sm:$0xff] %v344_v8  ;;  %347 = vst [vmem:[%s2359_s29 + $0x248] sm:$0xff] %v346_v9  ;;  %v350_v11 = vld [vmem:[%s2354_s28 + $0x4a8] sm:$0xff] }
  0x39   : > { %349 = vst [vmem:[%s2359_s29 + $0x250] sm:$0xff] %v348_v10  ;;  %v352_v12 = vld [vmem:[%s2354_s28 + $0x4c0] sm:$0xff]  ;;  %v354_v13 = vld [vmem:[%s2354_s28 + $0x4c8] sm:$0xff]  ;;  %351 = vst [vmem:[%s2359_s29 + $0x258] sm:$0xff] %v350_v11 }
  0x3a   : > { %353 = vst [vmem:[%s2359_s29 + $0x260] sm:$0xff] %v352_v12  ;;  %355 = vst [vmem:[%s2359_s29 + $0x268] sm:$0xff] %v354_v13  ;;  %v356_v14 = vld [vmem:[%s2354_s28 + $0x4e0] sm:$0xff]  ;;  %v358_v15 = vld [vmem:[%s2354_s28 + $0x4e8] sm:$0xff] }
  0x3b   : > { %v360_v16 = vld [vmem:[%s2354_s28 + $0x500] sm:$0xff]  ;;  %357 = vst [vmem:[%s2359_s29 + $0x270] sm:$0xff] %v356_v14  ;;  %359 = vst [vmem:[%s2359_s29 + $0x278] sm:$0xff] %v358_v15  ;;  %v362_v17 = vld [vmem:[%s2354_s28 + $0x508] sm:$0xff] }
  0x3c   : > { %361 = vst [vmem:[%s2359_s29 + $0x280] sm:$0xff] %v360_v16  ;;  %v364_v18 = vld [vmem:[%s2354_s28 + $0x520] sm:$0xff]  ;;  %v366_v19 = vld [vmem:[%s2354_s28 + $0x528] sm:$0xff]  ;;  %363 = vst [vmem:[%s2359_s29 + $0x288] sm:$0xff] %v362_v17 }
  0x3d   : > { %365 = vst [vmem:[%s2359_s29 + $0x290] sm:$0xff] %v364_v18  ;;  %367 = vst [vmem:[%s2359_s29 + $0x298] sm:$0xff] %v366_v19  ;;  %v368_v20 = vld [vmem:[%s2354_s28 + $0x540] sm:$0xff]  ;;  %v370_v21 = vld [vmem:[%s2354_s28 + $0x548] sm:$0xff] }
  0x3e   : > { %v372_v22 = vld [vmem:[%s2354_s28 + $0x560] sm:$0xff]  ;;  %369 = vst [vmem:[%s2359_s29 + $0x2a0] sm:$0xff] %v368_v20  ;;  %371 = vst [vmem:[%s2359_s29 + $0x2a8] sm:$0xff] %v370_v21  ;;  %v374_v23 = vld [vmem:[%s2354_s28 + $0x568] sm:$0xff] }
  0x3f   : > { %373 = vst [vmem:[%s2359_s29 + $0x2b0] sm:$0xff] %v372_v22  ;;  %v376_v24 = vld [vmem:[%s2354_s28 + $0x580] sm:$0xff]  ;;  %v378_v25 = vld [vmem:[%s2354_s28 + $0x588] sm:$0xff]  ;;  %375 = vst [vmem:[%s2359_s29 + $0x2b8] sm:$0xff] %v374_v23 }
  0x40   : > { %377 = vst [vmem:[%s2359_s29 + $0x2c0] sm:$0xff] %v376_v24  ;;  %379 = vst [vmem:[%s2359_s29 + $0x2c8] sm:$0xff] %v378_v25  ;;  %v380_v26 = vld [vmem:[%s2354_s28 + $0x5a0] sm:$0xff]  ;;  %v382_v27 = vld [vmem:[%s2354_s28 + $0x5a8] sm:$0xff] }
  0x41   : > { %v384_v28 = vld [vmem:[%s2354_s28 + $0x5c0] sm:$0xff]  ;;  %381 = vst [vmem:[%s2359_s29 + $0x2d0] sm:$0xff] %v380_v26  ;;  %383 = vst [vmem:[%s2359_s29 + $0x2d8] sm:$0xff] %v382_v27  ;;  %v386_v29 = vld [vmem:[%s2354_s28 + $0x5c8] sm:$0xff] }
  0x42   : > { %385 = vst [vmem:[%s2359_s29 + $0x2e0] sm:$0xff] %v384_v28  ;;  %v388_v30 = vld [vmem:[%s2354_s28 + $0x5e0] sm:$0xff]  ;;  %v390_v31 = vld [vmem:[%s2354_s28 + $0x5e8] sm:$0xff]  ;;  %387 = vst [vmem:[%s2359_s29 + $0x2e8] sm:$0xff] %v386_v29 }
  0x43   : > { %389 = vst [vmem:[%s2359_s29 + $0x2f0] sm:$0xff] %v388_v30  ;;  %391 = vst [vmem:[%s2359_s29 + $0x2f8] sm:$0xff] %v390_v31  ;;  %v392_v32 = vld [vmem:[%s2354_s28 + $0x600] sm:$0xff]  ;;  %v394_v33 = vld [vmem:[%s2354_s28 + $0x608] sm:$0xff] }
  0x44   : > { %v396_v34 = vld [vmem:[%s2354_s28 + $0x620] sm:$0xff]  ;;  %393 = vst [vmem:[%s2359_s29 + $0x300] sm:$0xff] %v392_v32  ;;  %395 = vst [vmem:[%s2359_s29 + $0x308] sm:$0xff] %v394_v33  ;;  %v398_v35 = vld [vmem:[%s2354_s28 + $0x628] sm:$0xff] }
  0x45   : > { %397 = vst [vmem:[%s2359_s29 + $0x310] sm:$0xff] %v396_v34  ;;  %v400_v36 = vld [vmem:[%s2354_s28 + $0x640] sm:$0xff]  ;;  %v402_v37 = vld [vmem:[%s2354_s28 + $0x648] sm:$0xff]  ;;  %399 = vst [vmem:[%s2359_s29 + $0x318] sm:$0xff] %v398_v35 }
  0x46   : > { %401 = vst [vmem:[%s2359_s29 + $0x320] sm:$0xff] %v400_v36  ;;  %403 = vst [vmem:[%s2359_s29 + $0x328] sm:$0xff] %v402_v37  ;;  %v404_v38 = vld [vmem:[%s2354_s28 + $0x660] sm:$0xff]  ;;  %v406_v39 = vld [vmem:[%s2354_s28 + $0x668] sm:$0xff] }
  0x47   : > { %v408_v40 = vld [vmem:[%s2354_s28 + $0x680] sm:$0xff]  ;;  %405 = vst [vmem:[%s2359_s29 + $0x330] sm:$0xff] %v404_v38  ;;  %407 = vst [vmem:[%s2359_s29 + $0x338] sm:$0xff] %v406_v39  ;;  %v410_v41 = vld [vmem:[%s2354_s28 + $0x688] sm:$0xff] }
  0x48   : > { %409 = vst [vmem:[%s2359_s29 + $0x340] sm:$0xff] %v408_v40  ;;  %v412_v42 = vld [vmem:[%s2354_s28 + $0x6a0] sm:$0xff]  ;;  %v414_v43 = vld [vmem:[%s2354_s28 + $0x6a8] sm:$0xff]  ;;  %411 = vst [vmem:[%s2359_s29 + $0x348] sm:$0xff] %v410_v41 }
  0x49   : > { %413 = vst [vmem:[%s2359_s29 + $0x350] sm:$0xff] %v412_v42  ;;  %415 = vst [vmem:[%s2359_s29 + $0x358] sm:$0xff] %v414_v43  ;;  %v416_v44 = vld [vmem:[%s2354_s28 + $0x6c0] sm:$0xff]  ;;  %v418_v45 = vld [vmem:[%s2354_s28 + $0x6c8] sm:$0xff] }
  0x4a   : > { %v420_v46 = vld [vmem:[%s2354_s28 + $0x6e0] sm:$0xff]  ;;  %417 = vst [vmem:[%s2359_s29 + $0x360] sm:$0xff] %v416_v44  ;;  %419 = vst [vmem:[%s2359_s29 + $0x368] sm:$0xff] %v418_v45  ;;  %v422_v47 = vld [vmem:[%s2354_s28 + $0x6e8] sm:$0xff] }
  0x4b   : > { %421 = vst [vmem:[%s2359_s29 + $0x370] sm:$0xff] %v420_v46  ;;  %v424_v48 = vld [vmem:[%s2354_s28 + $0x700] sm:$0xff]  ;;  %v426_v49 = vld [vmem:[%s2354_s28 + $0x708] sm:$0xff]  ;;  %423 = vst [vmem:[%s2359_s29 + $0x378] sm:$0xff] %v422_v47 }
  0x4c   : > { %425 = vst [vmem:[%s2359_s29 + $0x380] sm:$0xff] %v424_v48  ;;  %427 = vst [vmem:[%s2359_s29 + $0x388] sm:$0xff] %v426_v49  ;;  %v428_v50 = vld [vmem:[%s2354_s28 + $0x720] sm:$0xff]  ;;  %v430_v51 = vld [vmem:[%s2354_s28 + $0x728] sm:$0xff] }
  0x4d   : > { %v432_v52 = vld [vmem:[%s2354_s28 + $0x740] sm:$0xff]  ;;  %429 = vst [vmem:[%s2359_s29 + $0x390] sm:$0xff] %v428_v50  ;;  %431 = vst [vmem:[%s2359_s29 + $0x398] sm:$0xff] %v430_v51  ;;  %v434_v53 = vld [vmem:[%s2354_s28 + $0x748] sm:$0xff] }
  0x4e   : > { %433 = vst [vmem:[%s2359_s29 + $0x3a0] sm:$0xff] %v432_v52  ;;  %v436_v54 = vld [vmem:[%s2354_s28 + $0x760] sm:$0xff]  ;;  %v438_v55 = vld [vmem:[%s2354_s28 + $0x768] sm:$0xff]  ;;  %435 = vst [vmem:[%s2359_s29 + $0x3a8] sm:$0xff] %v434_v53 }
  0x4f   : > { %437 = vst [vmem:[%s2359_s29 + $0x3b0] sm:$0xff] %v436_v54  ;;  %439 = vst [vmem:[%s2359_s29 + $0x3b8] sm:$0xff] %v438_v55  ;;  %v440_v56 = vld [vmem:[%s2354_s28 + $0x780] sm:$0xff]  ;;  %v442_v57 = vld [vmem:[%s2354_s28 + $0x788] sm:$0xff] }
  0x50   : > { %v444_v58 = vld [vmem:[%s2354_s28 + $0x7a0] sm:$0xff]  ;;  %441 = vst [vmem:[%s2359_s29 + $0x3c0] sm:$0xff] %v440_v56  ;;  %443 = vst [vmem:[%s2359_s29 + $0x3c8] sm:$0xff] %v442_v57  ;;  %v446_v59 = vld [vmem:[%s2354_s28 + $0x7a8] sm:$0xff] }
  0x51   : > { %445 = vst [vmem:[%s2359_s29 + $0x3d0] sm:$0xff] %v444_v58  ;;  %v448_v60 = vld [vmem:[%s2354_s28 + $0x7c0] sm:$0xff]  ;;  %v450_v61 = vld [vmem:[%s2354_s28 + $0x7c8] sm:$0xff]  ;;  %447 = vst [vmem:[%s2359_s29 + $0x3d8] sm:$0xff] %v446_v59 }
  0x52   : > { %449 = vst [vmem:[%s2359_s29 + $0x3e0] sm:$0xff] %v448_v60  ;;  %451 = vst [vmem:[%s2359_s29 + $0x3e8] sm:$0xff] %v450_v61  ;;  %v452_v62 = vld [vmem:[%s2354_s28 + $0x7e0] sm:$0xff]  ;;  %v454_v63 = vld [vmem:[%s2354_s28 + $0x7e8] sm:$0xff] }
  0x53   : > { %453 = vst [vmem:[%s2359_s29 + $0x3f0] sm:$0xff] %v452_v62  ;;  %455 = vst [vmem:[%s2359_s29 + $0x3f8] sm:$0xff] %v454_v63 }
  0x54 PF: > { %p1854_p8 = scmp.ge.s32.totalorder %s2283_s16, 1  ;;  %p460_p9 = scmp.lt.s32.totalorder %s2283_s16, 3 }
  0x56   : > { %p461_p10 = pnand %p1854_p8, %p460_p9 }
  0x57   : > { %s467_s30 = sand.u32 (!%p461_p10), 1, %s2267_s12   ;;  %s1857_s12 = sshll.u32 (!%p461_p10), %s2275_s14, 2 }
  0x58   : > { %464 = sbr.rel (%p461_p10) target bundleno = 450 (0x1c2), region = 47  ;;  %s1855_s4 = sshll.u32 (!%p461_p10), %s467_s30, 10 }
  0x59   : > { %s2629_s9 = scalar_lea.vmem (!%p461_p10), [#allocation3], %s1855_s4  ;;  %s1856_s20 = sshll.u32 (!%p461_p10), %s467_s30, 5 }
  0x5a   : > { %s2779_s23 = scalar_lea.vmem (!%p461_p10), [#allocation4], %s1856_s20  ;;  %p527_p11 = scmp.lt.s32.totalorder (!%p461_p10), %s1857_s12, 7 }
  0x5d   : > { %v2622_v0 = vld [vmem:[%s2824_s0 + $0x4] ss:$16 sps:$4 sm:$0xff]   ;;  %v2627_v1 = vld [vmem:[%s2824_s0 + $0xc] ss:$16 sps:$4 sm:$0xff]   ;;  %v2051_v4 = vld [vmem:[%s2629_s9 + $0xe0] ss:$16 sps:$4 sm:$0xff]  }
  0x5e   : > { %v2047_v2 = vld [vmem:[%s2629_s9 + $0xe4] ss:$16 sps:$4 sm:$0xff]   ;;  %1378 = vmatprep.mubr.bf16.mxu0 %v2622_v0  ;;  %1421 = vmatprep.mubr.bf16.mxu1 %v2627_v1  ;;  %v2052_v5 = vld [vmem:[%s2629_s9 + $0x2e0] ss:$16 sps:$4 sm:$0xff]   ;;  %vm1637_vm0 = vcmask 1040384   ;;  %s2836_s12 = smov (!%p527_p11, %s1857_s12), 7 }
  0x5f   : > { %v2049_v3 = vld [vmem:[%s2629_s9 + $0x2e4] ss:$16 sps:$4 sm:$0xff]   ;;  %1346 = vmatprep.subr.bf16.mxu0 %v2047_v2  ;;  %v2057_v8 = vld [vmem:[%s2629_s9 + $0xc0] ss:$16 sps:$4 sm:$0xff]   ;;  %s1858_s24 = sshll.u32 %s2836_s12, 1  ;;  %s2005_s28 = sshll.u32 (%p2341_p6), %s2275_s14, 4 }
  0x60   : > { %1389 = vmatprep.subr.bf16.mxu1 %v2049_v3  ;;  %v2053_v6 = vld [vmem:[%s2629_s9 + $0xc4] ss:$16 sps:$4 sm:$0xff]   ;;  %1347 = vmatpush1.bf16.msra.mxu0 %v2051_v4  ;;  %v2058_v9 = vld [vmem:[%s2629_s9 + $0x2c0] ss:$16 sps:$4 sm:$0xff]   ;;  %v2151_v4 = vld [vmem:[%s2629_s9 + $0xec] ss:$16 sps:$4 sm:$0xff]   ;;  %s532_s27 = scalar_lea.vmem %s2827_s3, %s1858_s24  ;;  %s1686_s4 = scalar_lea.vmem (%p2341_p6), %s2826_s2, %s2005_s28 }
  0x61   : > { %1390 = vmatpush1.bf16.msra.mxu1 %v2052_v5  ;;  %v2055_v7 = vld [vmem:[%s2629_s9 + $0x2c4] ss:$16 sps:$4 sm:$0xff]   ;;  %1348 = vmatprep.subr.bf16.mxu0 %v2053_v6  ;;  %v2063_v12 = vld [vmem:[%s2629_s9 + $0xa0] ss:$16 sps:$4 sm:$0xff]   ;;  %v2154_v5 = vld [vmem:[%s2629_s9 + $0x2ec] ss:$16 sps:$4 sm:$0xff]  }
  0x62   : > { %1391 = vmatprep.subr.bf16.mxu1 %v2055_v7  ;;  %v2059_v10 = vld [vmem:[%s2629_s9 + $0xa4] ss:$16 sps:$4 sm:$0xff]   ;;  %v2064_v13 = vld [vmem:[%s2629_s9 + $0x2a0] ss:$16 sps:$4 sm:$0xff]   ;;  %v2707_v7 = vld [vmem:[%s2824_s0 + $0x8] ss:$16 sps:$4 sm:$0xff]  }
  0x63   : > { %v2061_v11 = vld [vmem:[%s2629_s9 + $0x2a4] ss:$16 sps:$4 sm:$0xff]   ;;  %v2069_v16 = vld [vmem:[%s2629_s9 + $0x80] ss:$16 sps:$4 sm:$0xff]  }
  0x64   : > { %1349 = vmatpush1.bf16.msra.mxu0 %v2057_v8  ;;  %v2065_v14 = vld [vmem:[%s2629_s9 + $0x84] ss:$16 sps:$4 sm:$0xff]   ;;  %v2070_v17 = vld [vmem:[%s2629_s9 + $0x280] ss:$16 sps:$4 sm:$0xff]   ;;  %v2149_v8 = vld [vmem:[%s2629_s9 + $0xe8] ss:$16 sps:$4 sm:$0xff]  }
  0x65   : > { %1392 = vmatpush1.bf16.msra.mxu1 %v2058_v9  ;;  %1350 = vmatprep.subr.bf16.mxu0 %v2059_v10  ;;  %v2067_v15 = vld [vmem:[%s2629_s9 + $0x284] ss:$16 sps:$4 sm:$0xff]   ;;  %v2075_v20 = vld [vmem:[%s2629_s9 + $0x60] ss:$16 sps:$4 sm:$0xff]   ;;  %v2152_v9 = vld [vmem:[%s2629_s9 + $0x2e8] ss:$16 sps:$4 sm:$0xff]  }
  0x66   : > { %1393 = vmatprep.subr.bf16.mxu1 %v2061_v11  ;;  %v2071_v18 = vld [vmem:[%s2629_s9 + $0x64] ss:$16 sps:$4 sm:$0xff]   ;;  %v2076_v21 = vld [vmem:[%s2629_s9 + $0x260] ss:$16 sps:$4 sm:$0xff]   ;;  %v2157_v10 = vld [vmem:[%s2629_s9 + $0xcc] ss:$16 sps:$4 sm:$0xff]  }
  0x67   : > { %v2073_v19 = vld [vmem:[%s2629_s9 + $0x264] ss:$16 sps:$4 sm:$0xff]   ;;  %v2081_v24 = vld [vmem:[%s2629_s9 + $0x40] ss:$16 sps:$4 sm:$0xff]   ;;  %v2160_v11 = vld [vmem:[%s2629_s9 + $0x2cc] ss:$16 sps:$4 sm:$0xff]  }
  0x68   : > { %1351 = vmatpush1.bf16.msra.mxu0 %v2063_v12  ;;  %v2077_v22 = vld [vmem:[%s2629_s9 + $0x44] ss:$16 sps:$4 sm:$0xff]   ;;  %v2082_v25 = vld [vmem:[%s2629_s9 + $0x240] ss:$16 sps:$4 sm:$0xff]   ;;  %v2155_v12 = vld [vmem:[%s2629_s9 + $0xc8] ss:$16 sps:$4 sm:$0xff]  }
  0x69   : > { %1394 = vmatpush1.bf16.msra.mxu1 %v2064_v13  ;;  %1352 = vmatprep.subr.bf16.mxu0 %v2065_v14  ;;  %v2079_v23 = vld [vmem:[%s2629_s9 + $0x244] ss:$16 sps:$4 sm:$0xff]   ;;  %v2087_v28 = vld [vmem:[%s2629_s9 + $0x20] ss:$16 sps:$4 sm:$0xff]   ;;  %v2158_v13 = vld [vmem:[%s2629_s9 + $0x2c8] ss:$16 sps:$4 sm:$0xff]  }
  0x6a   : > { %1395 = vmatprep.subr.bf16.mxu1 %v2067_v15  ;;  %v2083_v26 = vld [vmem:[%s2629_s9 + $0x24] ss:$16 sps:$4 sm:$0xff]   ;;  %v2088_v29 = vld [vmem:[%s2629_s9 + $0x220] ss:$16 sps:$4 sm:$0xff]   ;;  %v2163_v14 = vld [vmem:[%s2629_s9 + $0xac] ss:$16 sps:$4 sm:$0xff]  }
  0x6b   : > { %v2085_v27 = vld [vmem:[%s2629_s9 + $0x224] ss:$16 sps:$4 sm:$0xff]   ;;  %v2093_v32 = vld [vmem:[%s2629_s9] ss:$16 sps:$4 sm:$0xff]   ;;  %v2166_v15 = vld [vmem:[%s2629_s9 + $0x2ac] ss:$16 sps:$4 sm:$0xff]  }
  0x6c   : > { %1353 = vmatpush1.bf16.msra.mxu0 %v2069_v16  ;;  %v2089_v30 = vld [vmem:[%s2629_s9 + $0x4] ss:$16 sps:$4 sm:$0xff]   ;;  %v2094_v33 = vld [vmem:[%s2629_s9 + $0x200] ss:$16 sps:$4 sm:$0xff]   ;;  %v2161_v16 = vld [vmem:[%s2629_s9 + $0xa8] ss:$16 sps:$4 sm:$0xff]  }
  0x6d   : > { %1396 = vmatpush1.bf16.msra.mxu1 %v2070_v17  ;;  %1354 = vmatprep.subr.bf16.mxu0 %v2071_v18  ;;  %v2091_v31 = vld [vmem:[%s2629_s9 + $0x204] ss:$16 sps:$4 sm:$0xff]   ;;  %v2099_v36 = vld [vmem:[%s2629_s9 + $0x1e0] ss:$16 sps:$4 sm:$0xff]   ;;  %v2164_v17 = vld [vmem:[%s2629_s9 + $0x2a8] ss:$16 sps:$4 sm:$0xff]  }
  0x6e   : > { %1397 = vmatprep.subr.bf16.mxu1 %v2073_v19  ;;  %v2095_v34 = vld [vmem:[%s2629_s9 + $0x1e4] ss:$16 sps:$4 sm:$0xff]   ;;  %v2100_v37 = vld [vmem:[%s2629_s9 + $0x3e0] ss:$16 sps:$4 sm:$0xff]   ;;  %v2169_v18 = vld [vmem:[%s2629_s9 + $0x8c] ss:$16 sps:$4 sm:$0xff]  }
  0x6f   : > { %v2097_v35 = vld [vmem:[%s2629_s9 + $0x3e4] ss:$16 sps:$4 sm:$0xff]   ;;  %v2105_v40 = vld [vmem:[%s2629_s9 + $0x1c0] ss:$16 sps:$4 sm:$0xff]   ;;  %v2172_v19 = vld [vmem:[%s2629_s9 + $0x28c] ss:$16 sps:$4 sm:$0xff]  }
  0x70   : > { %1355 = vmatpush1.bf16.msra.mxu0 %v2075_v20  ;;  %v2101_v38 = vld [vmem:[%s2629_s9 + $0x1c4] ss:$16 sps:$4 sm:$0xff]   ;;  %v2106_v41 = vld [vmem:[%s2629_s9 + $0x3c0] ss:$16 sps:$4 sm:$0xff]   ;;  %v2167_v20 = vld [vmem:[%s2629_s9 + $0x88] ss:$16 sps:$4 sm:$0xff]  }
  0x71   : > { %1398 = vmatpush1.bf16.msra.mxu1 %v2076_v21  ;;  %1356 = vmatprep.subr.bf16.mxu0 %v2077_v22  ;;  %v2103_v39 = vld [vmem:[%s2629_s9 + $0x3c4] ss:$16 sps:$4 sm:$0xff]   ;;  %v2111_v44 = vld [vmem:[%s2629_s9 + $0x1a0] ss:$16 sps:$4 sm:$0xff]   ;;  %v2170_v21 = vld [vmem:[%s2629_s9 + $0x288] ss:$16 sps:$4 sm:$0xff]  }
  0x72   : > { %1399 = vmatprep.subr.bf16.mxu1 %v2079_v23  ;;  %v2107_v42 = vld [vmem:[%s2629_s9 + $0x1a4] ss:$16 sps:$4 sm:$0xff]   ;;  %v2112_v45 = vld [vmem:[%s2629_s9 + $0x3a0] ss:$16 sps:$4 sm:$0xff]   ;;  %v2173_v22 = vld [vmem:[%s2629_s9 + $0x68] ss:$16 sps:$4 sm:$0xff]  }
  0x73   : > { %v2109_v43 = vld [vmem:[%s2629_s9 + $0x3a4] ss:$16 sps:$4 sm:$0xff]   ;;  %v2117_v48 = vld [vmem:[%s2629_s9 + $0x180] ss:$16 sps:$4 sm:$0xff]   ;;  %v2176_v23 = vld [vmem:[%s2629_s9 + $0x268] ss:$16 sps:$4 sm:$0xff]  }
  0x74   : > { %1357 = vmatpush1.bf16.msra.mxu0 %v2081_v24  ;;  %v2113_v46 = vld [vmem:[%s2629_s9 + $0x184] ss:$16 sps:$4 sm:$0xff]   ;;  %v2118_v49 = vld [vmem:[%s2629_s9 + $0x380] ss:$16 sps:$4 sm:$0xff]   ;;  %v2181_v24 = vld [vmem:[%s2629_s9 + $0x4c] ss:$16 sps:$4 sm:$0xff]  }
  0x75   : > { %1400 = vmatpush1.bf16.msra.mxu1 %v2082_v25  ;;  %1358 = vmatprep.subr.bf16.mxu0 %v2083_v26  ;;  %v2115_v47 = vld [vmem:[%s2629_s9 + $0x384] ss:$16 sps:$4 sm:$0xff]   ;;  %v2123_v52 = vld [vmem:[%s2629_s9 + $0x160] ss:$16 sps:$4 sm:$0xff]   ;;  %v2184_v25 = vld [vmem:[%s2629_s9 + $0x24c] ss:$16 sps:$4 sm:$0xff]  }
  0x76   : > { %1401 = vmatprep.subr.bf16.mxu1 %v2085_v27  ;;  %v2119_v50 = vld [vmem:[%s2629_s9 + $0x164] ss:$16 sps:$4 sm:$0xff]   ;;  %v2124_v53 = vld [vmem:[%s2629_s9 + $0x360] ss:$16 sps:$4 sm:$0xff]   ;;  %v2179_v26 = vld [vmem:[%s2629_s9 + $0x48] ss:$16 sps:$4 sm:$0xff]  }
  0x77   : > { %v2121_v51 = vld [vmem:[%s2629_s9 + $0x364] ss:$16 sps:$4 sm:$0xff]   ;;  %v2129_v56 = vld [vmem:[%s2629_s9 + $0x140] ss:$16 sps:$4 sm:$0xff]   ;;  %v2182_v27 = vld [vmem:[%s2629_s9 + $0x248] ss:$16 sps:$4 sm:$0xff]  }
  0x78   : > { %1359 = vmatpush1.bf16.msra.mxu0 %v2087_v28  ;;  %v2125_v54 = vld [vmem:[%s2629_s9 + $0x144] ss:$16 sps:$4 sm:$0xff]   ;;  %v2130_v57 = vld [vmem:[%s2629_s9 + $0x340] ss:$16 sps:$4 sm:$0xff]   ;;  %v2187_v28 = vld [vmem:[%s2629_s9 + $0x2c] ss:$16 sps:$4 sm:$0xff]  }
  0x79   : > { %1402 = vmatpush1.bf16.msra.mxu1 %v2088_v29  ;;  %1360 = vmatprep.subr.bf16.mxu0 %v2089_v30  ;;  %v2127_v55 = vld [vmem:[%s2629_s9 + $0x344] ss:$16 sps:$4 sm:$0xff]   ;;  %v2135_v60 = vld [vmem:[%s2629_s9 + $0x120] ss:$16 sps:$4 sm:$0xff]   ;;  %v2190_v29 = vld [vmem:[%s2629_s9 + $0x22c] ss:$16 sps:$4 sm:$0xff]  }
  0x7a   : > { %1403 = vmatprep.subr.bf16.mxu1 %v2091_v31  ;;  %v2131_v58 = vld [vmem:[%s2629_s9 + $0x124] ss:$16 sps:$4 sm:$0xff]   ;;  %v2136_v61 = vld [vmem:[%s2629_s9 + $0x320] ss:$16 sps:$4 sm:$0xff]   ;;  %v2185_v30 = vld [vmem:[%s2629_s9 + $0x28] ss:$16 sps:$4 sm:$0xff]  }
  0x7b   : > { %v2133_v59 = vld [vmem:[%s2629_s9 + $0x324] ss:$16 sps:$4 sm:$0xff]   ;;  %v2141_v2 = vld [vmem:[%s2629_s9 + $0x100] ss:$16 sps:$4 sm:$0xff]   ;;  %v2188_v31 = vld [vmem:[%s2629_s9 + $0x228] ss:$16 sps:$4 sm:$0xff]  }
  0x7c   : > { %1361 = vmatpush1.bf16.msra.mxu0 %v2093_v32  ;;  %v2137_v62 = vld [vmem:[%s2629_s9 + $0x104] ss:$16 sps:$4 sm:$0xff]   ;;  %v2142_v3 = vld [vmem:[%s2629_s9 + $0x300] ss:$16 sps:$4 sm:$0xff]   ;;  %v2193_v32 = vld [vmem:[%s2629_s9 + $0xc] ss:$16 sps:$4 sm:$0xff]  }
  0x7d   : > { %1404 = vmatpush1.bf16.msra.mxu1 %v2094_v33  ;;  %1362 = vmatprep.subr.bf16.mxu0 %v2095_v34  ;;  %v2139_v63 = vld [vmem:[%s2629_s9 + $0x304] ss:$16 sps:$4 sm:$0xff]   ;;  %v2702_v6 = vld [vmem:[%s2824_s0] ss:$16 sps:$4 sm:$0xff]   ;;  %v2196_v33 = vld [vmem:[%s2629_s9 + $0x20c] ss:$16 sps:$4 sm:$0xff]  }
  0x7e   : > { %1405 = vmatprep.subr.bf16.mxu1 %v2097_v35  ;;  %v2191_v34 = vld [vmem:[%s2629_s9 + $0x8] ss:$16 sps:$4 sm:$0xff]  }
  0x7f   : > { %v2194_v35 = vld [vmem:[%s2629_s9 + $0x208] ss:$16 sps:$4 sm:$0xff]  }
  0x80   : > { %1363 = vmatpush2.bf16.msra.mxu0 %v2099_v36  ;;  %v2199_v36 = vld [vmem:[%s2629_s9 + $0x1ec] ss:$16 sps:$4 sm:$0xff]  }
  0x81   : > { %1406 = vmatpush2.bf16.msra.mxu1 %v2100_v37  ;;  %1364 = vmatprep.subr.bf16.mxu0 %v2101_v38  ;;  %v2202_v37 = vld [vmem:[%s2629_s9 + $0x3ec] ss:$16 sps:$4 sm:$0xff]   ;;  %v2197_v38 = vld [vmem:[%s2629_s9 + $0x1e8] ss:$16 sps:$4 sm:$0xff]  }
  0x82   : > { %1407 = vmatprep.subr.bf16.mxu1 %v2103_v39  ;;  %v2200_v39 = vld [vmem:[%s2629_s9 + $0x3e8] ss:$16 sps:$4 sm:$0xff]  }
  0x84   : > { %1365 = vmatpush2.bf16.msra.mxu0 %v2105_v40  ;;  %v2205_v40 = vld [vmem:[%s2629_s9 + $0x1cc] ss:$16 sps:$4 sm:$0xff]  }
  0x85   : > { %1408 = vmatpush2.bf16.msra.mxu1 %v2106_v41  ;;  %1366 = vmatprep.subr.bf16.mxu0 %v2107_v42  ;;  %v2208_v41 = vld [vmem:[%s2629_s9 + $0x3cc] ss:$16 sps:$4 sm:$0xff]   ;;  %v2203_v42 = vld [vmem:[%s2629_s9 + $0x1c8] ss:$16 sps:$4 sm:$0xff]  }
  0x86   : > { %1409 = vmatprep.subr.bf16.mxu1 %v2109_v43  ;;  %v2206_v43 = vld [vmem:[%s2629_s9 + $0x3c8] ss:$16 sps:$4 sm:$0xff]  }
  0x88   : > { %1367 = vmatpush2.bf16.msra.mxu0 %v2111_v44  ;;  %v2211_v44 = vld [vmem:[%s2629_s9 + $0x1ac] ss:$16 sps:$4 sm:$0xff]  }
  0x89   : > { %1410 = vmatpush2.bf16.msra.mxu1 %v2112_v45  ;;  %1368 = vmatprep.subr.bf16.mxu0 %v2113_v46  ;;  %v2214_v45 = vld [vmem:[%s2629_s9 + $0x3ac] ss:$16 sps:$4 sm:$0xff]   ;;  %v2209_v46 = vld [vmem:[%s2629_s9 + $0x1a8] ss:$16 sps:$4 sm:$0xff]  }
  0x8a   : > { %1411 = vmatprep.subr.bf16.mxu1 %v2115_v47  ;;  %v2212_v47 = vld [vmem:[%s2629_s9 + $0x3a8] ss:$16 sps:$4 sm:$0xff]  }
  0x8c   : > { %1369 = vmatpush2.bf16.msra.mxu0 %v2117_v48  ;;  %v2217_v48 = vld [vmem:[%s2629_s9 + $0x18c] ss:$16 sps:$4 sm:$0xff]  }
  0x8d   : > { %1412 = vmatpush2.bf16.msra.mxu1 %v2118_v49  ;;  %1370 = vmatprep.subr.bf16.mxu0 %v2119_v50  ;;  %v2220_v49 = vld [vmem:[%s2629_s9 + $0x38c] ss:$16 sps:$4 sm:$0xff]   ;;  %v2215_v50 = vld [vmem:[%s2629_s9 + $0x188] ss:$16 sps:$4 sm:$0xff]  }
  0x8e   : > { %1413 = vmatprep.subr.bf16.mxu1 %v2121_v51  ;;  %v2218_v51 = vld [vmem:[%s2629_s9 + $0x388] ss:$16 sps:$4 sm:$0xff]  }
  0x90   : > { %1371 = vmatpush2.bf16.msra.mxu0 %v2123_v52  ;;  %v2223_v52 = vld [vmem:[%s2629_s9 + $0x16c] ss:$16 sps:$4 sm:$0xff]  }
  0x91   : > { %1414 = vmatpush2.bf16.msra.mxu1 %v2124_v53  ;;  %1372 = vmatprep.subr.bf16.mxu0 %v2125_v54  ;;  %v2226_v53 = vld [vmem:[%s2629_s9 + $0x36c] ss:$16 sps:$4 sm:$0xff]   ;;  %v2221_v54 = vld [vmem:[%s2629_s9 + $0x168] ss:$16 sps:$4 sm:$0xff]  }
  0x92   : > { %1415 = vmatprep.subr.bf16.mxu1 %v2127_v55  ;;  %v2224_v55 = vld [vmem:[%s2629_s9 + $0x368] ss:$16 sps:$4 sm:$0xff]  }
  0x94   : > { %1373 = vmatpush2.bf16.msra.mxu0 %v2129_v56  ;;  %v2229_v56 = vld [vmem:[%s2629_s9 + $0x14c] ss:$16 sps:$4 sm:$0xff]  }
  0x95   : > { %1416 = vmatpush2.bf16.msra.mxu1 %v2130_v57  ;;  %1374 = vmatprep.subr.bf16.mxu0 %v2131_v58  ;;  %v2232_v57 = vld [vmem:[%s2629_s9 + $0x34c] ss:$16 sps:$4 sm:$0xff]   ;;  %v2227_v58 = vld [vmem:[%s2629_s9 + $0x148] ss:$16 sps:$4 sm:$0xff]  }
  0x96   : > { %1417 = vmatprep.subr.bf16.mxu1 %v2133_v59  ;;  %v2230_v59 = vld [vmem:[%s2629_s9 + $0x348] ss:$16 sps:$4 sm:$0xff]  }
  0x98   : > { %1375 = vmatpush2.bf16.msra.mxu0 %v2135_v60  ;;  %v2235_v60 = vld [vmem:[%s2629_s9 + $0x12c] ss:$16 sps:$4 sm:$0xff]  }
  0x99   : > { %1418 = vmatpush2.bf16.msra.mxu1 %v2136_v61  ;;  %1376 = vmatprep.subr.bf16.mxu0 %v2137_v62  ;;  %v2238_v61 = vld [vmem:[%s2629_s9 + $0x32c] ss:$16 sps:$4 sm:$0xff]   ;;  %v2233_v62 = vld [vmem:[%s2629_s9 + $0x128] ss:$16 sps:$4 sm:$0xff]  }
  0x9a   : > { %1419 = vmatprep.subr.bf16.mxu1 %v2139_v63  ;;  %v2236_v63 = vld [vmem:[%s2629_s9 + $0x328] ss:$16 sps:$4 sm:$0xff]  }
  0x9c   : > { %1377 = vmatpush2.bf16.msra.mxu0 %v2141_v2  ;;  %v2241_v2 = vld [vmem:[%s2629_s9 + $0x10c] ss:$16 sps:$4 sm:$0xff]  }
  0x9d   : > { %1420 = vmatpush2.bf16.msra.mxu1 %v2142_v3  ;;  %1432 = vmatprep.subr.bf16.mxu0 %v2151_v4  ;;  %v2244_v3 = vld [vmem:[%s2629_s9 + $0x30c] ss:$16 sps:$4 sm:$0xff]   ;;  %v2239_v4 = vld [vmem:[%s2629_s9 + $0x108] ss:$16 sps:$4 sm:$0xff]  }
  0x9e   : > { %1475 = vmatprep.subr.bf16.mxu1 %v2154_v5  ;;  %v2242_v5 = vld [vmem:[%s2629_s9 + $0x308] ss:$16 sps:$4 sm:$0xff]  }
  0x9f   : > { %1379 = vmatmul.mubr.bf16.vlgmr.msra.gmra.mxu0 %v2702_v6 }
  0xa0   : > { %1422 = vmatmul.mubr.bf16.vlgmr.msra.gmra.mxu1 %v2707_v7  ;;  %1433 = vmatpush1.bf16.msra.mxu0 %v2149_v8 }
  0xa1   : > { %1476 = vmatpush1.bf16.msra.mxu1 %v2152_v9  ;;  %1434 = vmatprep.subr.bf16.mxu0 %v2157_v10 }
  0xa2   : > { %1477 = vmatprep.subr.bf16.mxu1 %v2160_v11  ;;  %1464 = vmatprep.mubr.bf16.mxu0 %v2622_v0  ;;  %v2175_v0 = vld [vmem:[%s2629_s9 + $0x6c] ss:$16 sps:$4 sm:$0xff]  }
  0xa3   : > { %1507 = vmatprep.mubr.bf16.mxu1 %v2627_v1  ;;  %v2178_v1 = vld [vmem:[%s2629_s9 + $0x26c] ss:$16 sps:$4 sm:$0xff]  }
  0xa4   : > { %1435 = vmatpush1.bf16.msra.mxu0 %v2155_v12 }
  0xa5   : > { %1478 = vmatpush1.bf16.msra.mxu1 %v2158_v13  ;;  %1436 = vmatprep.subr.bf16.mxu0 %v2163_v14 }
  0xa6   : > { %1479 = vmatprep.subr.bf16.mxu1 %v2166_v15 }
  0xa8   : > { %1437 = vmatpush1.bf16.msra.mxu0 %v2161_v16 }
  0xa9   : > { %1480 = vmatpush1.bf16.msra.mxu1 %v2164_v17  ;;  %1438 = vmatprep.subr.bf16.mxu0 %v2169_v18 }
  0xaa   : > { %1481 = vmatprep.subr.bf16.mxu1 %v2172_v19 }
  0xac   : > { %1439 = vmatpush1.bf16.msra.mxu0 %v2167_v20 }
  0xad   : > { %1482 = vmatpush1.bf16.msra.mxu1 %v2170_v21  ;;  %1440 = vmatprep.subr.bf16.mxu0 %v2175_v0 }
  0xae   : > { %1483 = vmatprep.subr.bf16.mxu1 %v2178_v1 }
  0xb0   : > { %1441 = vmatpush1.bf16.msra.mxu0 %v2173_v22 }
  0xb1   : > { %1484 = vmatpush1.bf16.msra.mxu1 %v2176_v23  ;;  %1442 = vmatprep.subr.bf16.mxu0 %v2181_v24 }
  0xb2   : > { %1485 = vmatprep.subr.bf16.mxu1 %v2184_v25 }
  0xb4   : > { %1443 = vmatpush1.bf16.msra.mxu0 %v2179_v26 }
  0xb5   : > { %1486 = vmatpush1.bf16.msra.mxu1 %v2182_v27  ;;  %1444 = vmatprep.subr.bf16.mxu0 %v2187_v28 }
  0xb6   : > { %1487 = vmatprep.subr.bf16.mxu1 %v2190_v29 }
  0xb8   : > { %1445 = vmatpush1.bf16.msra.mxu0 %v2185_v30 }
  0xb9   : > { %1488 = vmatpush1.bf16.msra.mxu1 %v2188_v31  ;;  %1446 = vmatprep.subr.bf16.mxu0 %v2193_v32 }
  0xba   : > { %1489 = vmatprep.subr.bf16.mxu1 %v2196_v33 }
  0xbc   : > { %1447 = vmatpush1.bf16.msra.mxu0 %v2191_v34 }
  0xbd   : > { %1490 = vmatpush1.bf16.msra.mxu1 %v2194_v35  ;;  %1448 = vmatprep.subr.bf16.mxu0 %v2199_v36 }
  0xbe   : > { %1491 = vmatprep.subr.bf16.mxu1 %v2202_v37 }
  0xc0   : > { %1449 = vmatpush2.bf16.msra.mxu0 %v2197_v38 }
  0xc1   : > { %1492 = vmatpush2.bf16.msra.mxu1 %v2200_v39  ;;  %1450 = vmatprep.subr.bf16.mxu0 %v2205_v40 }
  0xc2   : > { %1493 = vmatprep.subr.bf16.mxu1 %v2208_v41 }
  0xc4   : > { %1451 = vmatpush2.bf16.msra.mxu0 %v2203_v42 }
  0xc5   : > { %1494 = vmatpush2.bf16.msra.mxu1 %v2206_v43  ;;  %1452 = vmatprep.subr.bf16.mxu0 %v2211_v44 }
  0xc6   : > { %1495 = vmatprep.subr.bf16.mxu1 %v2214_v45 }
  0xc8   : > { %1453 = vmatpush2.bf16.msra.mxu0 %v2209_v46 }
  0xc9   : > { %1496 = vmatpush2.bf16.msra.mxu1 %v2212_v47  ;;  %1454 = vmatprep.subr.bf16.mxu0 %v2217_v48 }
  0xca   : > { %1497 = vmatprep.subr.bf16.mxu1 %v2220_v49 }
  0xcc   : > { %1455 = vmatpush2.bf16.msra.mxu0 %v2215_v50 }
  0xcd   : > { %1498 = vmatpush2.bf16.msra.mxu1 %v2218_v51  ;;  %1456 = vmatprep.subr.bf16.mxu0 %v2223_v52 }
  0xce   : > { %1499 = vmatprep.subr.bf16.mxu1 %v2226_v53 }
  0xd0   : > { %1457 = vmatpush2.bf16.msra.mxu0 %v2221_v54 }
  0xd1   : > { %1500 = vmatpush2.bf16.msra.mxu1 %v2224_v55  ;;  %1458 = vmatprep.subr.bf16.mxu0 %v2229_v56 }
  0xd2   : > { %1501 = vmatprep.subr.bf16.mxu1 %v2232_v57 }
  0xd4   : > { %1459 = vmatpush2.bf16.msra.mxu0 %v2227_v58 }
  0xd5   : > { %1502 = vmatpush2.bf16.msra.mxu1 %v2230_v59  ;;  %1460 = vmatprep.subr.bf16.mxu0 %v2235_v60 }
  0xd6   : > { %1503 = vmatprep.subr.bf16.mxu1 %v2238_v61 }
  0xd8   : > { %1461 = vmatpush2.bf16.msra.mxu0 %v2233_v62 }
  0xd9   : > { %1504 = vmatpush2.bf16.msra.mxu1 %v2236_v63  ;;  %1462 = vmatprep.subr.bf16.mxu0 %v2241_v2 }
  0xda   : > { %1505 = vmatprep.subr.bf16.mxu1 %v2244_v3 }
  0xdc   : > { %1463 = vmatpush2.bf16.msra.mxu0 %v2239_v4 }
  0xdd   : > { %1506 = vmatpush2.bf16.msra.mxu1 %v2242_v5 }
  0xdf   : > { %1465 = vmatmul.mubr.bf16.vlgmr.msra.gmra.mxu0 %v2702_v6 }
  0xe0   : > { %1508 = vmatmul.mubr.bf16.vlgmr.msra.gmra.mxu1 %v2707_v7 }
 0x15f   : > { %v1380_v8 = vpop.f32.mrf.mxu0 }
 0x160   : > { %v1423_v9 = vpop.f32.mrf.mxu1 }
 0x161   : > { %v1424_v10 = vadd.f32 %v1423_v9, %v1380_v8  ;;  %v1382_v11 = vpop.f32.mrf.mxu0 }
 0x162   : > { %v1425_v12 = vpop.f32.mrf.mxu1 }
 0x163   : > { %v1426_v13 = vadd.f32 %v1425_v12, %v1382_v11  ;;  %v1384_v14 = vpop.f32.mrf.mxu0  ;;  %v1601_v20 = vmul.f32 %v1424_v10, %v1424_v10 }
 0x164   : > { %v1427_v15 = vpop.f32.mrf.mxu1 }
 0x165   : > { %v2001_v16 = vpack.c.bf16 %v1426_v13, %v1424_v10  ;;  %v1428_v17 = vadd.f32 %v1427_v15, %v1384_v14  ;;  %v1386_v18 = vpop.f32.mrf.mxu0  ;;  %v1602_v24 = vmul.f32 %v1426_v13, %v1426_v13 }
 0x166   : > { %v1429_v19 = vpop.f32.mrf.mxu1 }
 0x167   : > { %1569 = vst [vmem:[%s2779_s23] sm:$0xff] %v2001_v16  ;;  %v1573_v6 = vadd.f32 %v1428_v17, %v1424_v10  ;;  %v1605_v7 = vmul.f32 %v1428_v17, %v1428_v17  ;;  %v1430_v21 = vadd.f32 %v1429_v19, %v1386_v18 }
 0x169   : > { %v1574_v0 = vrot.slane %v1573_v6, 4  ;;  %v1609_v1 = vadd.f32 %v1605_v7, %v1601_v20  ;;  %v2003_v22 = vpack.c.bf16 %v1430_v21, %v1428_v17  ;;  %v1580_v23 = vadd.f32 %v1430_v21, %v1426_v13 }
 0x16a   : > { %v1606_v25 = vmul.f32 %v1430_v21, %v1430_v21 }
 0x16b   : > { %v1575_v26 = vadd.f32 %v1574_v0, %v1573_v6  ;;  %v1610_v27 = vrot.slane %v1609_v1, 4  ;;  %1571 = vst [vmem:[%s2779_s23 + $0x10] sm:$0xff] %v2003_v22  ;;  %v1581_v28 = vrot.slane %v1580_v23, 4 }
 0x16c   : > { %v1616_v29 = vadd.f32 %v1606_v25, %v1602_v24  ;;  %v1651_v25 = vlaneseq }
 0x16d   : > { %v1576_v30 = vrot.slane %v1575_v26, 2  ;;  %v1611_v31 = vadd.f32 %v1610_v27, %v1609_v1  ;;  %v1582_v32 = vadd.f32 %v1581_v28, %v1580_v23  ;;  %v2285_v23 = vmov 1983009808  }
 0x16e   : > { %v1617_v33 = vrot.slane %v1616_v29, 4  ;;  %v1649_v24 = vunpack.c.l.s4 %v2285_v23 }
 0x16f   : > { %v1577_v34 = vadd.f32 %v1576_v30, %v1575_v26  ;;  %v1612_v35 = vrot.slane %v1611_v31, 2  ;;  %v1583_v36 = vrot.slane %v1582_v32, 2 }
 0x170   : > { %v1618_v37 = vadd.f32 %v1617_v33, %v1616_v29  ;;  %v1650_v33 = vunpack.c.0.s8 %v1649_v24 }
 0x171   : > { %v1578_v38 = vrot.slane %v1577_v34, 1  ;;  %v1613_v39 = vadd.f32 %v1612_v35, %v1611_v31  ;;  %v1584_v40 = vadd.f32 %v1583_v36, %v1582_v32 }
 0x172   : > { %v1619_v41 = vrot.slane %v1618_v37, 2 }
 0x173   : > { %v1614_v42 = vrot.slane %v1613_v39, 1  ;;  %v1585_v43 = vrot.slane %v1584_v40, 1  ;;  %v1579_v45 = vadd.f32 %v1578_v38, %v1577_v34  ;;  %v1652_v34 = vshrl.u32 %v1651_v25, 7 }
 0x174   : > { %v1620_v44 = vadd.f32 %v1619_v41, %v1618_v37 }
 0x175   : > { %v1615_v46 = vadd.f32 %v1614_v42, %v1613_v39  ;;  %v1586_v49 = vadd.f32 %v1585_v43, %v1584_v40  ;;  %v1653_v40 = vsub.s32 %v1650_v33, %v1652_v34 }
 0x176   : > { %v1621_v47 = vrot.slane %v1620_v44, 1 }
 0x177   : > { %v2784_v48 = vsel %vm1637_vm0, %v1579_v45, %v1615_v46 }
 0x178   : > { %v1622_v50 = vadd.f32 %v1621_v47, %v1620_v44  ;;  %v1699_v47 = vld [vmem:[%s2779_s23] sm:$0xff] (%p2341_p6) }
 0x179   : > { %1700 = vst [vmem:[%s1686_s4] sm:$0xff] (%p2341_p6), %v1699_v47 }
 0x17a   : > { %v2787_v51 = vsel %vm1637_vm0, %v1586_v49, %v1622_v50  ;;  %v1703_v49 = vld [vmem:[%s2779_s23 + $0x10] sm:$0xff] (%p2341_p6) }
 0x17b   : > { %v1646_v52 = vcombine.low %v2784_v48, %v2787_v51  ;;  %1704 = vst [vmem:[%s1686_s4 + $0x20] sm:$0xff] (%p2341_p6), %v1703_v49 }
 0x17d   : > { %v1654_v44 = vrot.slane %v1646_v52, %v1653_v40 }
 0x19f   : > { %v1466_v53 = vpop.f32.mrf.mxu0 }
 0x1a0   : > { %v1509_v54 = vpop.f32.mrf.mxu1 }
 0x1a1   : > { %v1468_v55 = vpop.f32.mrf.mxu0  ;;  %v1510_v57 = vadd.f32 %v1509_v54, %v1466_v53 }
 0x1a2   : > { %v1511_v56 = vpop.f32.mrf.mxu1 }
 0x1a3   : > { %v1512_v58 = vadd.f32 %v1511_v56, %v1468_v55  ;;  %v1470_v59 = vpop.f32.mrf.mxu0  ;;  %v1603_v3 = vmul.f32 %v1510_v57, %v1510_v57 }
 0x1a4   : > { %v1513_v60 = vpop.f32.mrf.mxu1 }
 0x1a5   : > { %v2002_v61 = vpack.c.bf16 %v1512_v58, %v1510_v57  ;;  %v1514_v62 = vadd.f32 %v1513_v60, %v1470_v59  ;;  %v1472_v63 = vpop.f32.mrf.mxu0  ;;  %v1604_v13 = vmul.f32 %v1512_v58, %v1512_v58 }
 0x1a6   : > { %v1515_v2 = vpop.f32.mrf.mxu1 }
 0x1a7   : > { %1570 = vst [vmem:[%s2779_s23 + $0x8] sm:$0xff] %v2002_v61  ;;  %v1587_v4 = vadd.f32 %v1514_v62, %v1510_v57  ;;  %v1607_v5 = vmul.f32 %v1514_v62, %v1514_v62  ;;  %v1516_v8 = vadd.f32 %v1515_v2, %v1472_v63 }
 0x1a9   : > { %v1588_v9 = vrot.slane %v1587_v4, 4  ;;  %v1623_v10 = vadd.f32 %v1607_v5, %v1603_v3  ;;  %v2004_v11 = vpack.c.bf16 %v1516_v8, %v1514_v62  ;;  %v1594_v12 = vadd.f32 %v1516_v8, %v1512_v58 }
 0x1aa   : > { %v1608_v14 = vmul.f32 %v1516_v8, %v1516_v8 }
 0x1ab   : > { %v1589_v15 = vadd.f32 %v1588_v9, %v1587_v4  ;;  %v1624_v16 = vrot.slane %v1623_v10, 4  ;;  %1572 = vst [vmem:[%s2779_s23 + $0x18] sm:$0xff] %v2004_v11  ;;  %v1595_v17 = vrot.slane %v1594_v12, 4 }
 0x1ac   : > { %v1630_v18 = vadd.f32 %v1608_v14, %v1604_v13 }
 0x1ad   : > { %v1590_v19 = vrot.slane %v1589_v15, 2  ;;  %v1625_v20 = vadd.f32 %v1624_v16, %v1623_v10  ;;  %v1596_v6 = vadd.f32 %v1595_v17, %v1594_v12 }
 0x1ae   : > { %v1631_v7 = vrot.slane %v1630_v18, 4  ;;  %v1701_v48 = vld [vmem:[%s2779_s23 + $0x8] sm:$0xff] (%p2341_p6) }
 0x1af   : > { %v1626_v21 = vrot.slane %v1625_v20, 2  ;;  %v1597_v0 = vrot.slane %v1596_v6, 2  ;;  %v1591_v1 = vadd.f32 %v1590_v19, %v1589_v15  ;;  %1702 = vst [vmem:[%s1686_s4 + $0x8] sm:$0xff] (%p2341_p6), %v1701_v48 }
 0x1b0   : > { %v1632_v22 = vadd.f32 %v1631_v7, %v1630_v18 }
 0x1b1   : > { %v1627_v26 = vadd.f32 %v1626_v21, %v1625_v20  ;;  %v1598_v27 = vadd.f32 %v1597_v0, %v1596_v6  ;;  %v1592_v30 = vrot.slane %v1591_v1, 1 }
 0x1b2   : > { %v1633_v28 = vrot.slane %v1632_v22, 2  ;;  %v1705_v50 = vld [vmem:[%s2779_s23 + $0x18] sm:$0xff] (%p2341_p6) }
 0x1b3   : > { %v1628_v29 = vrot.slane %v1627_v26, 1  ;;  %v1599_v31 = vrot.slane %v1598_v27, 1  ;;  %v1593_v37 = vadd.f32 %v1592_v30, %v1591_v1  ;;  %1706 = vst [vmem:[%s1686_s4 + $0x28] sm:$0xff] (%p2341_p6), %v1705_v50 }
 0x1b4   : > { %v1634_v32 = vadd.f32 %v1633_v28, %v1632_v22 }
 0x1b5   : > { %v1629_v35 = vadd.f32 %v1628_v29, %v1627_v26  ;;  %v1600_v38 = vadd.f32 %v1599_v31, %v1598_v27 }
 0x1b6   : > { %v1635_v36 = vrot.slane %v1634_v32, 1 }
 0x1b7   : > { %v1640_v41 = vsel %vm1637_vm0, %v1593_v37, %v1629_v35 }
 0x1b8   : > { %v1636_v39 = vadd.f32 %v1635_v36, %v1634_v32 }
 0x1ba   : > { %v1641_v42 = vsel %vm1637_vm0, %v1600_v38, %v1636_v39 }
 0x1bb   : > { %v1647_v43 = vcombine.low %v1640_v41, %v1641_v42 }
 0x1bd   : > { %v1661_v45 = vrot.slane %v1647_v43, %v1653_v40  ;;  %1680 = sbr.rel (!%p2341_p6) target bundleno = 450 (0x1c2), region = 63 }
 0x1bf   : > { %v1662_v46 = vcombine.low %v1654_v44, %v1661_v45 }
 0x1c1   : > { %1664 = vst [vmem:[%s532_s27] sm:$0xff] %v1662_v46 }
 0x1c2 PF: > { %s14_s16 = sadd.s32 1, %s2283_s16   ;;  %s2829_s12 = smov %s2271_s13 }
 0x1c3   : > { %p11_p12 = scmp.ge.s32.totalorder %s14_s16, 4   ;;  %s2830_s13 = smov %s2346_s22 }
 0x1c4   : > { %s2831_s14 = smov %s2279_s15  ;;  %s2832_s15 = smov %s2834_s17 }
 0x1c5   :  { %13 = sbr.rel (!%p11_p12) target bundleno = 3 (0x3), region = 132 }

// kernel: viewpoint_forward.86
= control target key start
LH: loop header
LB: loop body
LE: loop exit
PB: predicated region body
PF: predicated region fallthrough
CT: control target
= control target key end

     0   :  { %v40_v0 = vlaneseq  ;;  %s320_s0 = inlined_call_operand.vmem [shape: bf16[16,1024], index: 0, kind: input, shape index: {}]   ;;  %s321_s1 = inlined_call_operand.vmem [shape: f32[1,1024], index: 1, kind: input, shape index: {}]   ;;  %s322_s2 = inlined_call_operand.vmem [shape: f32[1,1024], index: 2, kind: input, shape index: {}]   ;;  %s323_s3 = inlined_call_operand.vmem [shape: bf16[16,1024], index: 3, kind: output, shape index: {}]  }
   0x1   :  { %v14_v1 = vld [vmem:[%s320_s0] sm:$0xff]  ;;  %v15_v5 = vld [vmem:[%s320_s0 + $0x8] sm:$0xff]  ;;  %v16_v6 = vld [vmem:[%s320_s0 + $0x10] sm:$0xff] }
   0x2   :  { %v22_v2 = vunpack.c.l.bf16 %v14_v1  ;;  %v23_v3 = vunpack.c.h.bf16 %v14_v1  ;;  %v41_v4 = vshrl.u32 %v40_v0, 7  ;;  %v17_v7 = vld [vmem:[%s320_s0 + $0x18] sm:$0xff]  ;;  %v38_v8 = vld [vmem:[%s321_s1] sm:$0xff]  ;;  %v24_v10 = vunpack.c.l.bf16 %v15_v5  ;;  %v19_v55 = vld [vmem:[%s320_s0 + $0x28] sm:$0xff] }
   0x3   :  { %v96_v9 = vld [vmem:[%s322_s2] sm:$0xff]  ;;  %v25_v11 = vunpack.c.h.bf16 %v15_v5  ;;  %v26_v12 = vunpack.c.l.bf16 %v16_v6  ;;  %v27_v13 = vunpack.c.h.bf16 %v16_v6  ;;  %v28_v20 = vunpack.c.l.bf16 %v17_v7  ;;  %v20_v60 = vld [vmem:[%s320_s0 + $0x30] sm:$0xff] }
   0x4   :  { %v42_v14 = vsub.s32 0, %v41_v4  ;;  %v46_v15 = vsub.s32 1, %v41_v4  ;;  %v50_v16 = vsub.s32 2, %v41_v4  ;;  %v54_v17 = vsub.s32 3, %v41_v4  ;;  %v18_v54 = vld [vmem:[%s320_s0 + $0x20] sm:$0xff] }
   0x5   :  { %v58_v18 = vsub.s32 4, %v41_v4  ;;  %v62_v19 = vsub.s32 5, %v41_v4  ;;  %v29_v21 = vunpack.c.h.bf16 %v17_v7  ;;  %v66_v44 = vsub.s32 6, %v41_v4 }
   0x6   :  { %v43_v22 = vrot.slane %v38_v8, %v42_v14  ;;  %v47_v23 = vrot.slane %v38_v8, %v46_v15  ;;  %v101_v24 = vrot.slane %v96_v9, %v42_v14  ;;  %v105_v25 = vrot.slane %v96_v9, %v46_v15 }
   0x7   :  { %v51_v26 = vrot.slane %v38_v8, %v50_v16  ;;  %v55_v27 = vrot.slane %v38_v8, %v54_v17  ;;  %v109_v28 = vrot.slane %v96_v9, %v50_v16  ;;  %v113_v29 = vrot.slane %v96_v9, %v54_v17 }
   0x8   :  { %v80_v30 = vmul.f32 %v43_v22, %v22_v2  ;;  %v81_v31 = vmul.f32 %v47_v23, %v23_v3  ;;  %v59_v32 = vrot.slane %v38_v8, %v58_v18  ;;  %v63_v33 = vrot.slane %v38_v8, %v62_v19 }
   0x9   :  { %v82_v34 = vmul.f32 %v51_v26, %v24_v10  ;;  %v83_v35 = vmul.f32 %v55_v27, %v25_v11  ;;  %v117_v36 = vrot.slane %v96_v9, %v58_v18  ;;  %v121_v37 = vrot.slane %v96_v9, %v62_v19 }
   0xa   :  { %v138_v38 = vadd.f32 %v101_v24, %v80_v30  ;;  %v139_v39 = vadd.f32 %v105_v25, %v81_v31  ;;  %v84_v40 = vmul.f32 %v59_v32, %v26_v12  ;;  %v85_v41 = vmul.f32 %v63_v33, %v27_v13  ;;  %v21_v13 = vld [vmem:[%s320_s0 + $0x38] sm:$0xff] }
   0xb   :  { %v140_v42 = vadd.f32 %v109_v28, %v82_v34  ;;  %v141_v43 = vadd.f32 %v113_v29, %v83_v35  ;;  %v70_v45 = vsub.s32 7, %v41_v4  ;;  %v67_v52 = vrot.slane %v38_v8, %v66_v44 }
   0xc   :  { %v154_v46 = vmax.f32 %v138_v38, 0.0  ;;  %v155_v47 = vmax.f32 %v139_v39, 0.0  ;;  %v142_v48 = vadd.f32 %v117_v36, %v84_v40  ;;  %v143_v49 = vadd.f32 %v121_v37, %v85_v41 }
   0xd   :  { %v156_v50 = vmax.f32 %v140_v42, 0.0  ;;  %v157_v51 = vmax.f32 %v141_v43, 0.0  ;;  %v71_v53 = vrot.slane %v38_v8, %v70_v45  ;;  %v125_v59 = vrot.slane %v96_v9, %v66_v44 }
   0xe   :  { %v238_v56 = vpack.c.bf16 %v155_v47, %v154_v46  ;;  %v158_v57 = vmax.f32 %v142_v48, 0.0  ;;  %v159_v58 = vmax.f32 %v143_v49, 0.0  ;;  %v86_v62 = vmul.f32 %v67_v52, %v28_v20 }
   0xf   :  { %v239_v61 = vpack.c.bf16 %v157_v51, %v156_v50  ;;  %v87_v63 = vmul.f32 %v71_v53, %v29_v21  ;;  %v129_v0 = vrot.slane %v96_v9, %v70_v45  ;;  %v30_v2 = vunpack.c.l.bf16 %v18_v54 }
  0x10   :  { %218 = vst [vmem:[%s323_s3] sm:$0xff] %v238_v56  ;;  %v240_v1 = vpack.c.bf16 %v159_v58, %v158_v57  ;;  %v31_v3 = vunpack.c.h.bf16 %v18_v54  ;;  %v32_v4 = vunpack.c.l.bf16 %v19_v55  ;;  %v144_v5 = vadd.f32 %v125_v59, %v86_v62 }
  0x11   :  { %219 = vst [vmem:[%s323_s3 + $0x8] sm:$0xff] %v239_v61  ;;  %v145_v6 = vadd.f32 %v129_v0, %v87_v63  ;;  %v33_v7 = vunpack.c.h.bf16 %v19_v55  ;;  %v34_v8 = vunpack.c.l.bf16 %v20_v60  ;;  %v88_v9 = vmul.f32 %v43_v22, %v30_v2 }
  0x12   :  { %220 = vst [vmem:[%s323_s3 + $0x10] sm:$0xff] %v240_v1  ;;  %v89_v10 = vmul.f32 %v47_v23, %v31_v3  ;;  %v90_v11 = vmul.f32 %v51_v26, %v32_v4  ;;  %v35_v12 = vunpack.c.h.bf16 %v20_v60  ;;  %v160_v14 = vmax.f32 %v144_v5, 0.0 }
  0x13   :  { %v161_v15 = vmax.f32 %v145_v6, 0.0  ;;  %v91_v16 = vmul.f32 %v55_v27, %v33_v7  ;;  %v92_v17 = vmul.f32 %v59_v32, %v34_v8  ;;  %v146_v18 = vadd.f32 %v101_v24, %v88_v9 }
  0x14   :  { %v147_v19 = vadd.f32 %v105_v25, %v89_v10  ;;  %v148_v20 = vadd.f32 %v109_v28, %v90_v11  ;;  %v93_v21 = vmul.f32 %v63_v33, %v35_v12  ;;  %v36_v35 = vunpack.c.l.bf16 %v21_v13 }
  0x15   :  { %v241_v30 = vpack.c.bf16 %v161_v15, %v160_v14  ;;  %v149_v31 = vadd.f32 %v113_v29, %v91_v16  ;;  %v150_v34 = vadd.f32 %v117_v36, %v92_v17  ;;  %v162_v22 = vmax.f32 %v146_v18, 0.0 }
  0x16   :  { %v163_v23 = vmax.f32 %v147_v19, 0.0  ;;  %v164_v26 = vmax.f32 %v148_v20, 0.0  ;;  %v151_v38 = vadd.f32 %v121_v37, %v93_v21  ;;  %v37_v27 = vunpack.c.h.bf16 %v21_v13 }
  0x17   :  { %221 = vst [vmem:[%s323_s3 + $0x18] sm:$0xff] %v241_v30  ;;  %v165_v39 = vmax.f32 %v149_v31, 0.0  ;;  %v166_v40 = vmax.f32 %v150_v34, 0.0  ;;  %v94_v32 = vmul.f32 %v67_v52, %v36_v35 }
  0x18   :  { %v242_v24 = vpack.c.bf16 %v163_v23, %v162_v22  ;;  %v167_v25 = vmax.f32 %v151_v38, 0.0  ;;  %v95_v33 = vmul.f32 %v71_v53, %v37_v27 }
  0x19   :  { %v243_v28 = vpack.c.bf16 %v165_v39, %v164_v26  ;;  %v152_v41 = vadd.f32 %v125_v59, %v94_v32 }
  0x1a   :  { %222 = vst [vmem:[%s323_s3 + $0x20] sm:$0xff] %v242_v24  ;;  %v244_v29 = vpack.c.bf16 %v167_v25, %v166_v40  ;;  %v153_v36 = vadd.f32 %v129_v0, %v95_v33 }
  0x1b   :  { %223 = vst [vmem:[%s323_s3 + $0x28] sm:$0xff] %v243_v28  ;;  %v168_v37 = vmax.f32 %v152_v41, 0.0 }
  0x1c   :  { %224 = vst [vmem:[%s323_s3 + $0x30] sm:$0xff] %v244_v29  ;;  %v169_v42 = vmax.f32 %v153_v36, 0.0 }
  0x1e   :  { %v245_v43 = vpack.c.bf16 %v169_v42, %v168_v37 }
  0x20   :  { %225 = vst [vmem:[%s323_s3 + $0x38] sm:$0xff] %v245_v43 }

// kernel: viewpoint_forward.87
= control target key start
LH: loop header
LB: loop body
LE: loop exit
PB: predicated region body
PF: predicated region fallthrough
CT: control target
= control target key end

     0   :  { %s1922_s12 = smov 0   ;;  %s1924_s13 = smov 0   ;;  %s2160_s0 = inlined_call_operand.vmem [shape: bf16[16,1024], index: 0, kind: input, shape index: {}]   ;;  %s2161_s1 = inlined_call_operand.vmem [shape: bf16[1024,512], index: 1, kind: input, shape index: {}]   ;;  %s2162_s2 = inlined_call_operand.vmem [shape: f32[1,512], index: 2, kind: input, shape index: {}]   ;;  %s2163_s3 = inlined_call_operand.vmem [shape: f32[16,512], index: 3, kind: output, shape index: {}]  }
   0x1   :  { %s1926_s14 = smov 0   ;;  %s1928_s15 = smov 0  }
   0x2   :  { %s1930_s16 = smov 0  }
   0x3 LB: > { %s25_s17 = sadd.s32 1, %s1895_s15  ;;  %p48_p1 = scmp.ne.s32.totalorder %s1887_s13, %s1883_s12  ;;  %s1899_s16 = sphi %s1930_s16, %s13_s16   ;;  %s1895_s15 = sphi %s1928_s15, %s2167_s15   ;;  %s1891_s14 = sphi %s1926_s14, %s2166_s14   ;;  %s1887_s13 = sphi %s1924_s13, %s2165_s13   ;;  %s1883_s12 = sphi %s1922_s12, %s2164_s12  }
   0x4   : > { %p26_p0 = scmp.ge.s32.totalorder %s25_s17, 2  ;;  %p49_p2 = scmp.eq.s32.totalorder %s1899_s16, 0 }
   0x5   : > { %s41_s19 = sadd.s32 1, %s1887_s13  ;;  %p1473_p5 = scmp.ge.s32.totalorder %s1899_s16, 2 }
   0x6   : > { %s2169_s17 = smov (%p26_p0, %s25_s17), 0  ;;  %p50_p3 = por %p49_p2, %p48_p1 }
   0x7   : > { %s37_s18 = ssub.s32 %s1895_s15, %s2169_s17  ;;  %164 = sbr.rel (%p1473_p5) target bundleno = 18 (0x12), region = 20 }
   0x8   : > { %p39_p4 = scmp.eq.s32.totalorder %s37_s18, 0 }
   0xa   : > { %s1957_s20 = scalar_select %p39_p4, %s1887_s13, %s41_s19  }
   0xc   : > { %167 = sbr.rel (!%p50_p3) target bundleno = 18 (0x12), region = 24  ;;  %s169_s21 = sand.u32 (%p50_p3), 1, %s1887_s13  }
   0xd   : > { %s1620_s22 = sshll.u32 (%p50_p3), %s1895_s15, 4  ;;  %s1474_s23 = sshll.u32 (%p50_p3), %s169_s21, 5 }
   0xe   : > { %s177_s26 = scalar_lea.vmem (%p50_p3), %s2160_s0, %s1620_s22  ;;  %s171_s27 = scalar_lea.vmem (%p50_p3), [#allocation3], %s1474_s23 }
   0xf   : > { %v190_v0 = vld [vmem:[%s177_s26] sm:$0xff] (%p50_p3)  ;;  %v192_v1 = vld [vmem:[%s177_s26 + $0x8] sm:$0xff] (%p50_p3) }
  0x10   : > { %v194_v2 = vld [vmem:[%s177_s26 + $0x20] sm:$0xff] (%p50_p3)  ;;  %191 = vst [vmem:[%s171_s27] sm:$0xff] (%p50_p3), %v190_v0  ;;  %193 = vst [vmem:[%s171_s27 + $0x8] sm:$0xff] (%p50_p3), %v192_v1  ;;  %v196_v3 = vld [vmem:[%s177_s26 + $0x28] sm:$0xff] (%p50_p3) }
  0x11   : > { %195 = vst [vmem:[%s171_s27 + $0x10] sm:$0xff] %v194_v2  ;;  %197 = vst [vmem:[%s171_s27 + $0x18] sm:$0xff] %v196_v3 }
  0x12 PF: > { %p1477_p6 = scmp.ge.s32.totalorder %s1899_s16, 1  ;;  %p217_p7 = scmp.lt.s32.totalorder %s1899_s16, 3 }
  0x14   : > { %p218_p8 = pnand %p1477_p6, %p217_p7 }
  0x15   : > { %s224_s28 = sand.u32 (!%p218_p8), 1, %s1883_s12   ;;  %s1479_s29 = sshll.u32 (!%p218_p8), %s1891_s14, 6 }
  0x16   : > { %221 = sbr.rel (%p218_p8) target bundleno = 385 (0x181), region = 51  ;;  %s1478_s30 = sshll.u32 (!%p218_p8), %s224_s28, 5 }
  0x17   : > { %p270_p9 = scmp.lt.s32.totalorder (!%p218_p8), %s1479_s29, 127  ;;  %s1974_s8 = scalar_lea.vmem (!%p218_p8), [#allocation3], %s1478_s30 }
  0x18   : > { %p1482_p10 = scmp.ne.s32.totalorder (!%p218_p8), %s1891_s14, 0 }
  0x1b   : > { %s2171_s29 = smov (!%p270_p9, %s1479_s29), 127  ;;  %300 = sbr.rel (%p1482_p10) target bundleno = 37 (0x25), region = 59 }
  0x1c   : > { %s1621_s4 = sshll.u32 %s2171_s29, 4 }
  0x1d   : > { %s1972_s7 = scalar_lea.vmem %s2161_s1, %s1621_s4 }
  0x20   : > { %v1901_v4 = vmov 0.0  }
  0x21   : > { %301 = vst [vmem:[#allocation2 + $0x30] sm:$0xff] %v1901_v4  ;;  %302 = vst [vmem:[#allocation2] sm:$0xff] %v1901_v4 }
  0x22   : > { %303 = vst [vmem:[#allocation2 + $0x18] sm:$0xff] %v1901_v4  ;;  %304 = vst [vmem:[#allocation2 + $0x10] sm:$0xff] %v1901_v4 }
  0x23   : > { %305 = vst [vmem:[#allocation2 + $0x8] sm:$0xff] %v1901_v4  ;;  %306 = vst [vmem:[#allocation2 + $0x20] sm:$0xff] %v1901_v4 }
  0x24   : > { %307 = vst [vmem:[#allocation2 + $0x28] sm:$0xff] %v1901_v4  ;;  %308 = vst [vmem:[#allocation2 + $0x38] sm:$0xff] %v1901_v4 }
  0x25 PF: > { %v1663_v5 = vld [vmem:[%s1972_s7 + $0xe4] ss:$16 sps:$4 sm:$0xff]   ;;  %v1667_v7 = vld [vmem:[%s1972_s7 + $0xe0] ss:$16 sps:$4 sm:$0xff]   ;;  %v1764_v56 = vld [vmem:[%s1974_s8 + $0xc] ss:$16 sps:$4 sm:$0xff]  }
  0x26   : > { %v1665_v6 = vld [vmem:[%s1972_s7 + $0x2e4] ss:$16 sps:$4 sm:$0xff]   ;;  %1109 = vmatprep.subr.bf16.mxu0 %v1663_v5  ;;  %v1668_v8 = vld [vmem:[%s1972_s7 + $0x2e0] ss:$16 sps:$4 sm:$0xff]   ;;  %1184 = vmatprep.mubr.bf16.mxu1 %v1764_v56  ;;  %p1615_p11 = scmp.ne.s32.totalorder %s1891_s14, 1 }
  0x27   : > { %1152 = vmatprep.subr.bf16.mxu1 %v1665_v6  ;;  %v1669_v9 = vld [vmem:[%s1972_s7 + $0xc4] ss:$16 sps:$4 sm:$0xff]   ;;  %1110 = vmatpush1.bf16.msra.mxu0 %v1667_v7  ;;  %v1673_v11 = vld [vmem:[%s1972_s7 + $0xc0] ss:$16 sps:$4 sm:$0xff]   ;;  %v1767_v7 = vld [vmem:[%s1972_s7 + $0xec] ss:$16 sps:$4 sm:$0xff]  }
  0x28   : > { %1153 = vmatpush1.bf16.msra.mxu1 %v1668_v8  ;;  %v1671_v10 = vld [vmem:[%s1972_s7 + $0x2c4] ss:$16 sps:$4 sm:$0xff]   ;;  %1111 = vmatprep.subr.bf16.mxu0 %v1669_v9  ;;  %v1674_v12 = vld [vmem:[%s1972_s7 + $0x2c0] ss:$16 sps:$4 sm:$0xff]   ;;  %v1770_v8 = vld [vmem:[%s1972_s7 + $0x2ec] ss:$16 sps:$4 sm:$0xff]  }
  0x29   : > { %1154 = vmatprep.subr.bf16.mxu1 %v1671_v10  ;;  %v1675_v13 = vld [vmem:[%s1972_s7 + $0xa4] ss:$16 sps:$4 sm:$0xff]   ;;  %v1679_v15 = vld [vmem:[%s1972_s7 + $0xa0] ss:$16 sps:$4 sm:$0xff]   ;;  %v2049_v10 = vld [vmem:[%s1974_s8 + $0x8] ss:$16 sps:$4 sm:$0xff]  }
  0x2a   : > { %v1677_v14 = vld [vmem:[%s1972_s7 + $0x2a4] ss:$16 sps:$4 sm:$0xff]   ;;  %v1680_v16 = vld [vmem:[%s1972_s7 + $0x2a0] ss:$16 sps:$4 sm:$0xff]  }
  0x2b   : > { %1112 = vmatpush1.bf16.msra.mxu0 %v1673_v11  ;;  %v1681_v17 = vld [vmem:[%s1972_s7 + $0x84] ss:$16 sps:$4 sm:$0xff]   ;;  %v1685_v19 = vld [vmem:[%s1972_s7 + $0x80] ss:$16 sps:$4 sm:$0xff]   ;;  %v1765_v11 = vld [vmem:[%s1972_s7 + $0xe8] ss:$16 sps:$4 sm:$0xff]  }
  0x2c   : > { %1155 = vmatpush1.bf16.msra.mxu1 %v1674_v12  ;;  %1113 = vmatprep.subr.bf16.mxu0 %v1675_v13  ;;  %v1683_v18 = vld [vmem:[%s1972_s7 + $0x284] ss:$16 sps:$4 sm:$0xff]   ;;  %v1686_v20 = vld [vmem:[%s1972_s7 + $0x280] ss:$16 sps:$4 sm:$0xff]   ;;  %v1768_v12 = vld [vmem:[%s1972_s7 + $0x2e8] ss:$16 sps:$4 sm:$0xff]  }
  0x2d   : > { %1156 = vmatprep.subr.bf16.mxu1 %v1677_v14  ;;  %v1687_v21 = vld [vmem:[%s1972_s7 + $0x64] ss:$16 sps:$4 sm:$0xff]   ;;  %v1691_v23 = vld [vmem:[%s1972_s7 + $0x60] ss:$16 sps:$4 sm:$0xff]   ;;  %v1773_v13 = vld [vmem:[%s1972_s7 + $0xcc] ss:$16 sps:$4 sm:$0xff]  }
  0x2e   : > { %v1689_v22 = vld [vmem:[%s1972_s7 + $0x264] ss:$16 sps:$4 sm:$0xff]   ;;  %v1692_v24 = vld [vmem:[%s1972_s7 + $0x260] ss:$16 sps:$4 sm:$0xff]   ;;  %v1776_v14 = vld [vmem:[%s1972_s7 + $0x2cc] ss:$16 sps:$4 sm:$0xff]  }
  0x2f   : > { %1114 = vmatpush1.bf16.msra.mxu0 %v1679_v15  ;;  %v1693_v25 = vld [vmem:[%s1972_s7 + $0x44] ss:$16 sps:$4 sm:$0xff]   ;;  %v1697_v27 = vld [vmem:[%s1972_s7 + $0x40] ss:$16 sps:$4 sm:$0xff]   ;;  %v1771_v15 = vld [vmem:[%s1972_s7 + $0xc8] ss:$16 sps:$4 sm:$0xff]  }
  0x30   : > { %1157 = vmatpush1.bf16.msra.mxu1 %v1680_v16  ;;  %1115 = vmatprep.subr.bf16.mxu0 %v1681_v17  ;;  %v1695_v26 = vld [vmem:[%s1972_s7 + $0x244] ss:$16 sps:$4 sm:$0xff]   ;;  %v1698_v28 = vld [vmem:[%s1972_s7 + $0x240] ss:$16 sps:$4 sm:$0xff]   ;;  %v1774_v16 = vld [vmem:[%s1972_s7 + $0x2c8] ss:$16 sps:$4 sm:$0xff]  }
  0x31   : > { %1158 = vmatprep.subr.bf16.mxu1 %v1683_v18  ;;  %v1699_v29 = vld [vmem:[%s1972_s7 + $0x24] ss:$16 sps:$4 sm:$0xff]   ;;  %v1703_v31 = vld [vmem:[%s1972_s7 + $0x20] ss:$16 sps:$4 sm:$0xff]   ;;  %v1779_v17 = vld [vmem:[%s1972_s7 + $0xac] ss:$16 sps:$4 sm:$0xff]  }
  0x32   : > { %v1701_v30 = vld [vmem:[%s1972_s7 + $0x224] ss:$16 sps:$4 sm:$0xff]   ;;  %v1704_v32 = vld [vmem:[%s1972_s7 + $0x220] ss:$16 sps:$4 sm:$0xff]   ;;  %v1782_v18 = vld [vmem:[%s1972_s7 + $0x2ac] ss:$16 sps:$4 sm:$0xff]  }
  0x33   : > { %1116 = vmatpush1.bf16.msra.mxu0 %v1685_v19  ;;  %v1705_v33 = vld [vmem:[%s1972_s7 + $0x4] ss:$16 sps:$4 sm:$0xff]   ;;  %v1709_v35 = vld [vmem:[%s1972_s7] ss:$16 sps:$4 sm:$0xff]   ;;  %v1777_v19 = vld [vmem:[%s1972_s7 + $0xa8] ss:$16 sps:$4 sm:$0xff]  }
  0x34   : > { %1159 = vmatpush1.bf16.msra.mxu1 %v1686_v20  ;;  %1117 = vmatprep.subr.bf16.mxu0 %v1687_v21  ;;  %v1707_v34 = vld [vmem:[%s1972_s7 + $0x204] ss:$16 sps:$4 sm:$0xff]   ;;  %v1710_v36 = vld [vmem:[%s1972_s7 + $0x200] ss:$16 sps:$4 sm:$0xff]   ;;  %v1780_v20 = vld [vmem:[%s1972_s7 + $0x2a8] ss:$16 sps:$4 sm:$0xff]  }
  0x35   : > { %1160 = vmatprep.subr.bf16.mxu1 %v1689_v22  ;;  %v1711_v37 = vld [vmem:[%s1972_s7 + $0x1e4] ss:$16 sps:$4 sm:$0xff]   ;;  %v1715_v39 = vld [vmem:[%s1972_s7 + $0x1e0] ss:$16 sps:$4 sm:$0xff]   ;;  %v1785_v21 = vld [vmem:[%s1972_s7 + $0x8c] ss:$16 sps:$4 sm:$0xff]  }
  0x36   : > { %v1713_v38 = vld [vmem:[%s1972_s7 + $0x3e4] ss:$16 sps:$4 sm:$0xff]   ;;  %v1716_v40 = vld [vmem:[%s1972_s7 + $0x3e0] ss:$16 sps:$4 sm:$0xff]   ;;  %v1788_v22 = vld [vmem:[%s1972_s7 + $0x28c] ss:$16 sps:$4 sm:$0xff]  }
  0x37   : > { %1118 = vmatpush1.bf16.msra.mxu0 %v1691_v23  ;;  %v1717_v41 = vld [vmem:[%s1972_s7 + $0x1c4] ss:$16 sps:$4 sm:$0xff]   ;;  %v1721_v43 = vld [vmem:[%s1972_s7 + $0x1c0] ss:$16 sps:$4 sm:$0xff]   ;;  %v1783_v23 = vld [vmem:[%s1972_s7 + $0x88] ss:$16 sps:$4 sm:$0xff]  }
  0x38   : > { %1161 = vmatpush1.bf16.msra.mxu1 %v1692_v24  ;;  %1119 = vmatprep.subr.bf16.mxu0 %v1693_v25  ;;  %v1719_v42 = vld [vmem:[%s1972_s7 + $0x3c4] ss:$16 sps:$4 sm:$0xff]   ;;  %v1722_v44 = vld [vmem:[%s1972_s7 + $0x3c0] ss:$16 sps:$4 sm:$0xff]   ;;  %v1786_v24 = vld [vmem:[%s1972_s7 + $0x288] ss:$16 sps:$4 sm:$0xff]  }
  0x39   : > { %1162 = vmatprep.subr.bf16.mxu1 %v1695_v26  ;;  %v1723_v45 = vld [vmem:[%s1972_s7 + $0x1a4] ss:$16 sps:$4 sm:$0xff]   ;;  %v1727_v47 = vld [vmem:[%s1972_s7 + $0x1a0] ss:$16 sps:$4 sm:$0xff]   ;;  %v1791_v25 = vld [vmem:[%s1972_s7 + $0x6c] ss:$16 sps:$4 sm:$0xff]  }
  0x3a   : > { %v1725_v46 = vld [vmem:[%s1972_s7 + $0x3a4] ss:$16 sps:$4 sm:$0xff]   ;;  %v1728_v48 = vld [vmem:[%s1972_s7 + $0x3a0] ss:$16 sps:$4 sm:$0xff]   ;;  %v1794_v26 = vld [vmem:[%s1972_s7 + $0x26c] ss:$16 sps:$4 sm:$0xff]  }
  0x3b   : > { %1120 = vmatpush1.bf16.msra.mxu0 %v1697_v27  ;;  %v1729_v49 = vld [vmem:[%s1972_s7 + $0x184] ss:$16 sps:$4 sm:$0xff]   ;;  %v1733_v51 = vld [vmem:[%s1972_s7 + $0x180] ss:$16 sps:$4 sm:$0xff]   ;;  %v1789_v27 = vld [vmem:[%s1972_s7 + $0x68] ss:$16 sps:$4 sm:$0xff]  }
  0x3c   : > { %1163 = vmatpush1.bf16.msra.mxu1 %v1698_v28  ;;  %1121 = vmatprep.subr.bf16.mxu0 %v1699_v29  ;;  %v1731_v50 = vld [vmem:[%s1972_s7 + $0x384] ss:$16 sps:$4 sm:$0xff]   ;;  %v1734_v52 = vld [vmem:[%s1972_s7 + $0x380] ss:$16 sps:$4 sm:$0xff]   ;;  %v1792_v28 = vld [vmem:[%s1972_s7 + $0x268] ss:$16 sps:$4 sm:$0xff]  }
  0x3d   : > { %1164 = vmatprep.subr.bf16.mxu1 %v1701_v30  ;;  %v1735_v53 = vld [vmem:[%s1972_s7 + $0x164] ss:$16 sps:$4 sm:$0xff]   ;;  %v1739_v57 = vld [vmem:[%s1972_s7 + $0x160] ss:$16 sps:$4 sm:$0xff]   ;;  %v1797_v29 = vld [vmem:[%s1972_s7 + $0x4c] ss:$16 sps:$4 sm:$0xff]  }
  0x3e   : > { %v1761_v54 = vld [vmem:[%s1974_s8 + $0x4] ss:$16 sps:$4 sm:$0xff]   ;;  %v1740_v58 = vld [vmem:[%s1972_s7 + $0x360] ss:$16 sps:$4 sm:$0xff]   ;;  %v1800_v30 = vld [vmem:[%s1972_s7 + $0x24c] ss:$16 sps:$4 sm:$0xff]  }
  0x3f   : > { %1122 = vmatpush1.bf16.msra.mxu0 %v1703_v31  ;;  %v1737_v55 = vld [vmem:[%s1972_s7 + $0x364] ss:$16 sps:$4 sm:$0xff]   ;;  %1141 = vmatprep.mubr.bf16.mxu0 %v1761_v54  ;;  %v1745_v61 = vld [vmem:[%s1972_s7 + $0x140] ss:$16 sps:$4 sm:$0xff]   ;;  %v1795_v31 = vld [vmem:[%s1972_s7 + $0x48] ss:$16 sps:$4 sm:$0xff]  }
  0x40   : > { %1165 = vmatpush1.bf16.msra.mxu1 %v1704_v32  ;;  %1123 = vmatprep.subr.bf16.mxu0 %v1705_v33  ;;  %v1741_v59 = vld [vmem:[%s1972_s7 + $0x144] ss:$16 sps:$4 sm:$0xff]   ;;  %v1746_v62 = vld [vmem:[%s1972_s7 + $0x340] ss:$16 sps:$4 sm:$0xff]   ;;  %v1798_v32 = vld [vmem:[%s1972_s7 + $0x248] ss:$16 sps:$4 sm:$0xff]  }
  0x41   : > { %1166 = vmatprep.subr.bf16.mxu1 %v1707_v34  ;;  %v1743_v60 = vld [vmem:[%s1972_s7 + $0x344] ss:$16 sps:$4 sm:$0xff]   ;;  %v1751_v1 = vld [vmem:[%s1972_s7 + $0x120] ss:$16 sps:$4 sm:$0xff]   ;;  %v1803_v33 = vld [vmem:[%s1972_s7 + $0x2c] ss:$16 sps:$4 sm:$0xff]  }
  0x42   : > { %v1747_v63 = vld [vmem:[%s1972_s7 + $0x124] ss:$16 sps:$4 sm:$0xff]   ;;  %v1752_v2 = vld [vmem:[%s1972_s7 + $0x320] ss:$16 sps:$4 sm:$0xff]   ;;  %v1806_v34 = vld [vmem:[%s1972_s7 + $0x22c] ss:$16 sps:$4 sm:$0xff]  }
  0x43   : > { %1124 = vmatpush1.bf16.msra.mxu0 %v1709_v35  ;;  %v1749_v0 = vld [vmem:[%s1972_s7 + $0x324] ss:$16 sps:$4 sm:$0xff]   ;;  %v1757_v5 = vld [vmem:[%s1972_s7 + $0x100] ss:$16 sps:$4 sm:$0xff]   ;;  %v1801_v35 = vld [vmem:[%s1972_s7 + $0x28] ss:$16 sps:$4 sm:$0xff]  }
  0x44   : > { %1167 = vmatpush1.bf16.msra.mxu1 %v1710_v36  ;;  %1125 = vmatprep.subr.bf16.mxu0 %v1711_v37  ;;  %v1753_v3 = vld [vmem:[%s1972_s7 + $0x104] ss:$16 sps:$4 sm:$0xff]   ;;  %v1758_v6 = vld [vmem:[%s1972_s7 + $0x300] ss:$16 sps:$4 sm:$0xff]   ;;  %v1804_v36 = vld [vmem:[%s1972_s7 + $0x228] ss:$16 sps:$4 sm:$0xff]  }
  0x45   : > { %1168 = vmatprep.subr.bf16.mxu1 %v1713_v38  ;;  %v1755_v4 = vld [vmem:[%s1972_s7 + $0x304] ss:$16 sps:$4 sm:$0xff]   ;;  %v2046_v9 = vld [vmem:[%s1974_s8] ss:$16 sps:$4 sm:$0xff]   ;;  %v1809_v37 = vld [vmem:[%s1972_s7 + $0xc] ss:$16 sps:$4 sm:$0xff]  }
  0x46   : > { %v1812_v38 = vld [vmem:[%s1972_s7 + $0x20c] ss:$16 sps:$4 sm:$0xff]  }
  0x47   : > { %1126 = vmatpush2.bf16.msra.mxu0 %v1715_v39  ;;  %v1807_v39 = vld [vmem:[%s1972_s7 + $0x8] ss:$16 sps:$4 sm:$0xff]  }
  0x48   : > { %1169 = vmatpush2.bf16.msra.mxu1 %v1716_v40  ;;  %1127 = vmatprep.subr.bf16.mxu0 %v1717_v41  ;;  %v1810_v40 = vld [vmem:[%s1972_s7 + $0x208] ss:$16 sps:$4 sm:$0xff]   ;;  %v1815_v41 = vld [vmem:[%s1972_s7 + $0x1ec] ss:$16 sps:$4 sm:$0xff]  }
  0x49   : > { %1170 = vmatprep.subr.bf16.mxu1 %v1719_v42  ;;  %v1818_v42 = vld [vmem:[%s1972_s7 + $0x3ec] ss:$16 sps:$4 sm:$0xff]  }
  0x4b   : > { %1128 = vmatpush2.bf16.msra.mxu0 %v1721_v43  ;;  %v1813_v43 = vld [vmem:[%s1972_s7 + $0x1e8] ss:$16 sps:$4 sm:$0xff]  }
  0x4c   : > { %1171 = vmatpush2.bf16.msra.mxu1 %v1722_v44  ;;  %1129 = vmatprep.subr.bf16.mxu0 %v1723_v45  ;;  %v1816_v44 = vld [vmem:[%s1972_s7 + $0x3e8] ss:$16 sps:$4 sm:$0xff]   ;;  %v1821_v45 = vld [vmem:[%s1972_s7 + $0x1cc] ss:$16 sps:$4 sm:$0xff]  }
  0x4d   : > { %1172 = vmatprep.subr.bf16.mxu1 %v1725_v46  ;;  %v1824_v46 = vld [vmem:[%s1972_s7 + $0x3cc] ss:$16 sps:$4 sm:$0xff]  }
  0x4f   : > { %1130 = vmatpush2.bf16.msra.mxu0 %v1727_v47  ;;  %v1819_v47 = vld [vmem:[%s1972_s7 + $0x1c8] ss:$16 sps:$4 sm:$0xff]  }
  0x50   : > { %1173 = vmatpush2.bf16.msra.mxu1 %v1728_v48  ;;  %1131 = vmatprep.subr.bf16.mxu0 %v1729_v49  ;;  %v1822_v48 = vld [vmem:[%s1972_s7 + $0x3c8] ss:$16 sps:$4 sm:$0xff]   ;;  %v1827_v49 = vld [vmem:[%s1972_s7 + $0x1ac] ss:$16 sps:$4 sm:$0xff]  }
  0x51   : > { %1174 = vmatprep.subr.bf16.mxu1 %v1731_v50  ;;  %v1830_v50 = vld [vmem:[%s1972_s7 + $0x3ac] ss:$16 sps:$4 sm:$0xff]  }
  0x53   : > { %1132 = vmatpush2.bf16.msra.mxu0 %v1733_v51  ;;  %v1825_v51 = vld [vmem:[%s1972_s7 + $0x1a8] ss:$16 sps:$4 sm:$0xff]  }
  0x54   : > { %1175 = vmatpush2.bf16.msra.mxu1 %v1734_v52  ;;  %1133 = vmatprep.subr.bf16.mxu0 %v1735_v53  ;;  %v1828_v52 = vld [vmem:[%s1972_s7 + $0x3a8] ss:$16 sps:$4 sm:$0xff]   ;;  %v1833_v53 = vld [vmem:[%s1972_s7 + $0x18c] ss:$16 sps:$4 sm:$0xff]  }
  0x55   : > { %1176 = vmatprep.subr.bf16.mxu1 %v1737_v55  ;;  %v1831_v55 = vld [vmem:[%s1972_s7 + $0x188] ss:$16 sps:$4 sm:$0xff]  }
  0x57   : > { %1134 = vmatpush2.bf16.msra.mxu0 %v1739_v57  ;;  %v1839_v57 = vld [vmem:[%s1972_s7 + $0x16c] ss:$16 sps:$4 sm:$0xff]  }
  0x58   : > { %1177 = vmatpush2.bf16.msra.mxu1 %v1740_v58  ;;  %1135 = vmatprep.subr.bf16.mxu0 %v1741_v59  ;;  %v1842_v58 = vld [vmem:[%s1972_s7 + $0x36c] ss:$16 sps:$4 sm:$0xff]   ;;  %v1837_v59 = vld [vmem:[%s1972_s7 + $0x168] ss:$16 sps:$4 sm:$0xff]  }
  0x59   : > { %1178 = vmatprep.subr.bf16.mxu1 %v1743_v60  ;;  %v1840_v60 = vld [vmem:[%s1972_s7 + $0x368] ss:$16 sps:$4 sm:$0xff]  }
  0x5b   : > { %1136 = vmatpush2.bf16.msra.mxu0 %v1745_v61  ;;  %v1845_v61 = vld [vmem:[%s1972_s7 + $0x14c] ss:$16 sps:$4 sm:$0xff]  }
  0x5c   : > { %1179 = vmatpush2.bf16.msra.mxu1 %v1746_v62  ;;  %1137 = vmatprep.subr.bf16.mxu0 %v1747_v63  ;;  %v1848_v62 = vld [vmem:[%s1972_s7 + $0x34c] ss:$16 sps:$4 sm:$0xff]   ;;  %v1843_v63 = vld [vmem:[%s1972_s7 + $0x148] ss:$16 sps:$4 sm:$0xff]  }
  0x5d   : > { %1180 = vmatprep.subr.bf16.mxu1 %v1749_v0  ;;  %v1846_v0 = vld [vmem:[%s1972_s7 + $0x348] ss:$16 sps:$4 sm:$0xff]  }
  0x5f   : > { %1138 = vmatpush2.bf16.msra.mxu0 %v1751_v1  ;;  %v1851_v1 = vld [vmem:[%s1972_s7 + $0x12c] ss:$16 sps:$4 sm:$0xff]  }
  0x60   : > { %1181 = vmatpush2.bf16.msra.mxu1 %v1752_v2  ;;  %1139 = vmatprep.subr.bf16.mxu0 %v1753_v3  ;;  %v1854_v2 = vld [vmem:[%s1972_s7 + $0x32c] ss:$16 sps:$4 sm:$0xff]   ;;  %v1849_v3 = vld [vmem:[%s1972_s7 + $0x128] ss:$16 sps:$4 sm:$0xff]  }
  0x61   : > { %1182 = vmatprep.subr.bf16.mxu1 %v1755_v4  ;;  %v1852_v4 = vld [vmem:[%s1972_s7 + $0x328] ss:$16 sps:$4 sm:$0xff]  }
  0x63   : > { %1140 = vmatpush2.bf16.msra.mxu0 %v1757_v5  ;;  %v1857_v5 = vld [vmem:[%s1972_s7 + $0x10c] ss:$16 sps:$4 sm:$0xff]  }
  0x64   : > { %1183 = vmatpush2.bf16.msra.mxu1 %v1758_v6  ;;  %1195 = vmatprep.subr.bf16.mxu0 %v1767_v7  ;;  %v1860_v6 = vld [vmem:[%s1972_s7 + $0x30c] ss:$16 sps:$4 sm:$0xff]   ;;  %v1855_v7 = vld [vmem:[%s1972_s7 + $0x108] ss:$16 sps:$4 sm:$0xff]  }
  0x65   : > { %1238 = vmatprep.subr.bf16.mxu1 %v1770_v8  ;;  %v1858_v8 = vld [vmem:[%s1972_s7 + $0x308] ss:$16 sps:$4 sm:$0xff]  }
  0x66   : > { %1142 = vmatmul.mubr.bf16.vlgmr.msra.gmra.mxu0 %v2046_v9 }
  0x67   : > { %1185 = vmatmul.mubr.bf16.vlgmr.msra.gmra.mxu1 %v2049_v10  ;;  %1196 = vmatpush1.bf16.msra.mxu0 %v1765_v11 }
  0x68   : > { %1239 = vmatpush1.bf16.msra.mxu1 %v1768_v12  ;;  %1197 = vmatprep.subr.bf16.mxu0 %v1773_v13  ;;  %v309_v12 = vld [vmem:[#allocation2 + $0x30] sm:$0xff] }
  0x69   : > { %1240 = vmatprep.subr.bf16.mxu1 %v1776_v14  ;;  %1227 = vmatprep.mubr.bf16.mxu0 %v1761_v54  ;;  %v1836_v54 = vld [vmem:[%s1972_s7 + $0x38c] ss:$16 sps:$4 sm:$0xff]  }
  0x6a   : > { %1270 = vmatprep.mubr.bf16.mxu1 %v1764_v56  ;;  %v1834_v56 = vld [vmem:[%s1972_s7 + $0x388] ss:$16 sps:$4 sm:$0xff]  }
  0x6b   : > { %1198 = vmatpush1.bf16.msra.mxu0 %v1771_v15 }
  0x6c   : > { %1241 = vmatpush1.bf16.msra.mxu1 %v1774_v16  ;;  %1199 = vmatprep.subr.bf16.mxu0 %v1779_v17  ;;  %v310_v16 = vld [vmem:[#allocation2] sm:$0xff] }
  0x6d   : > { %1242 = vmatprep.subr.bf16.mxu1 %v1782_v18 }
  0x6f   : > { %1200 = vmatpush1.bf16.msra.mxu0 %v1777_v19 }
  0x70   : > { %1243 = vmatpush1.bf16.msra.mxu1 %v1780_v20  ;;  %1201 = vmatprep.subr.bf16.mxu0 %v1785_v21  ;;  %v313_v21 = vld [vmem:[#allocation2 + $0x8] sm:$0xff] }
  0x71   : > { %1244 = vmatprep.subr.bf16.mxu1 %v1788_v22 }
  0x73   : > { %1202 = vmatpush1.bf16.msra.mxu0 %v1783_v23 }
  0x74   : > { %1245 = vmatpush1.bf16.msra.mxu1 %v1786_v24  ;;  %1203 = vmatprep.subr.bf16.mxu0 %v1791_v25 }
  0x75   : > { %1246 = vmatprep.subr.bf16.mxu1 %v1794_v26  ;;  %v314_v26 = vld [vmem:[#allocation2 + $0x20] sm:$0xff] }
  0x77   : > { %1204 = vmatpush1.bf16.msra.mxu0 %v1789_v27 }
  0x78   : > { %1247 = vmatpush1.bf16.msra.mxu1 %v1792_v28  ;;  %1205 = vmatprep.subr.bf16.mxu0 %v1797_v29 }
  0x79   : > { %1248 = vmatprep.subr.bf16.mxu1 %v1800_v30  ;;  %v311_v30 = vld [vmem:[#allocation2 + $0x18] sm:$0xff] }
  0x7b   : > { %1206 = vmatpush1.bf16.msra.mxu0 %v1795_v31 }
  0x7c   : > { %1249 = vmatpush1.bf16.msra.mxu1 %v1798_v32  ;;  %1207 = vmatprep.subr.bf16.mxu0 %v1803_v33 }
  0x7d   : > { %1250 = vmatprep.subr.bf16.mxu1 %v1806_v34  ;;  %v312_v34 = vld [vmem:[#allocation2 + $0x10] sm:$0xff] }
  0x7f   : > { %1208 = vmatpush1.bf16.msra.mxu0 %v1801_v35 }
  0x80   : > { %1251 = vmatpush1.bf16.msra.mxu1 %v1804_v36  ;;  %1209 = vmatprep.subr.bf16.mxu0 %v1809_v37 }
  0x81   : > { %1252 = vmatprep.subr.bf16.mxu1 %v1812_v38 }
  0x83   : > { %1210 = vmatpush1.bf16.msra.mxu0 %v1807_v39  ;;  %v315_v39 = vld [vmem:[#allocation2 + $0x28] sm:$0xff] }
  0x84   : > { %1253 = vmatpush1.bf16.msra.mxu1 %v1810_v40  ;;  %1211 = vmatprep.subr.bf16.mxu0 %v1815_v41 }
  0x85   : > { %1254 = vmatprep.subr.bf16.mxu1 %v1818_v42 }
  0x87   : > { %1212 = vmatpush2.bf16.msra.mxu0 %v1813_v43 }
  0x88   : > { %1255 = vmatpush2.bf16.msra.mxu1 %v1816_v44  ;;  %1213 = vmatprep.subr.bf16.mxu0 %v1821_v45  ;;  %v316_v44 = vld [vmem:[#allocation2 + $0x38] sm:$0xff] }
  0x89   : > { %1256 = vmatprep.subr.bf16.mxu1 %v1824_v46 }
  0x8b   : > { %1214 = vmatpush2.bf16.msra.mxu0 %v1819_v47 }
  0x8c   : > { %1257 = vmatpush2.bf16.msra.mxu1 %v1822_v48  ;;  %1215 = vmatprep.subr.bf16.mxu0 %v1827_v49 }
  0x8d   : > { %1258 = vmatprep.subr.bf16.mxu1 %v1830_v50 }
  0x8f   : > { %1216 = vmatpush2.bf16.msra.mxu0 %v1825_v51 }
  0x90   : > { %1259 = vmatpush2.bf16.msra.mxu1 %v1828_v52  ;;  %1217 = vmatprep.subr.bf16.mxu0 %v1833_v53 }
  0x91   : > { %1260 = vmatprep.subr.bf16.mxu1 %v1836_v54 }
  0x93   : > { %1218 = vmatpush2.bf16.msra.mxu0 %v1831_v55 }
  0x94   : > { %1261 = vmatpush2.bf16.msra.mxu1 %v1834_v56  ;;  %1219 = vmatprep.subr.bf16.mxu0 %v1839_v57 }
  0x95   : > { %1262 = vmatprep.subr.bf16.mxu1 %v1842_v58 }
  0x97   : > { %1220 = vmatpush2.bf16.msra.mxu0 %v1837_v59 }
  0x98   : > { %1263 = vmatpush2.bf16.msra.mxu1 %v1840_v60  ;;  %1221 = vmatprep.subr.bf16.mxu0 %v1845_v61 }
  0x99   : > { %1264 = vmatprep.subr.bf16.mxu1 %v1848_v62 }
  0x9b   : > { %1222 = vmatpush2.bf16.msra.mxu0 %v1843_v63 }
  0x9c   : > { %1265 = vmatpush2.bf16.msra.mxu1 %v1846_v0  ;;  %1223 = vmatprep.subr.bf16.mxu0 %v1851_v1 }
  0x9d   : > { %1266 = vmatprep.subr.bf16.mxu1 %v1854_v2 }
  0x9f   : > { %1224 = vmatpush2.bf16.msra.mxu0 %v1849_v3 }
  0xa0   : > { %1267 = vmatpush2.bf16.msra.mxu1 %v1852_v4  ;;  %1225 = vmatprep.subr.bf16.mxu0 %v1857_v5 }
  0xa1   : > { %1268 = vmatprep.subr.bf16.mxu1 %v1860_v6 }
  0xa3   : > { %1226 = vmatpush2.bf16.msra.mxu0 %v1855_v7 }
  0xa4   : > { %1269 = vmatpush2.bf16.msra.mxu1 %v1858_v8 }
  0xa6   : > { %1228 = vmatmul.mubr.bf16.vlgmr.msra.gmra.mxu0 %v2046_v9 }
  0xa7   : > { %1271 = vmatmul.mubr.bf16.vlgmr.msra.gmra.mxu1 %v2049_v10 }
 0x126   : > { %v1143_v11 = vpop.f32.mrf.mxu0 }
 0x127   : > { %v1186_v13 = vpop.f32.mrf.mxu1 }
 0x128   : > { %v1187_v14 = vadd.f32 %v1186_v13, %v1143_v11  ;;  %v1145_v15 = vpop.f32.mrf.mxu0 }
 0x129   : > { %v1188_v17 = vpop.f32.mrf.mxu1 }
 0x12a   : > { %v1281_v18 = vadd.f32 %v1187_v14, %v309_v12  ;;  %v1189_v19 = vadd.f32 %v1188_v17, %v1145_v15  ;;  %v1147_v20 = vpop.f32.mrf.mxu0 }
 0x12b   : > { %v1190_v22 = vpop.f32.mrf.mxu1 }
 0x12c   : > { %1289 = vst [vmem:[#allocation2 + $0x30] sm:$0xff] %v1281_v18  ;;  %v1282_v23 = vadd.f32 %v1189_v19, %v310_v16  ;;  %v1191_v24 = vadd.f32 %v1190_v22, %v1147_v20  ;;  %v1149_v25 = vpop.f32.mrf.mxu0 }
 0x12d   : > { %v1192_v9 = vpop.f32.mrf.mxu1 }
 0x12e   : > { %1290 = vst [vmem:[#allocation2] sm:$0xff] %v1282_v23  ;;  %v1285_v10 = vadd.f32 %v1191_v24, %v313_v21  ;;  %v1193_v27 = vadd.f32 %v1192_v9, %v1149_v25 }
 0x130   : > { %1293 = vst [vmem:[#allocation2 + $0x8] sm:$0xff] %v1285_v10  ;;  %v1286_v28 = vadd.f32 %v1193_v27, %v314_v26 }
 0x132   : > { %1294 = vst [vmem:[#allocation2 + $0x20] sm:$0xff] %v1286_v28 }
 0x166   : > { %v1229_v29 = vpop.f32.mrf.mxu0 }
 0x167   : > { %v1272_v31 = vpop.f32.mrf.mxu1 }
 0x168   : > { %v1273_v32 = vadd.f32 %v1272_v31, %v1229_v29  ;;  %v1231_v33 = vpop.f32.mrf.mxu0 }
 0x169   : > { %v1274_v35 = vpop.f32.mrf.mxu1 }
 0x16a   : > { %v1283_v36 = vadd.f32 %v1273_v32, %v311_v30  ;;  %v1275_v37 = vadd.f32 %v1274_v35, %v1231_v33  ;;  %v1233_v38 = vpop.f32.mrf.mxu0 }
 0x16b   : > { %v1276_v40 = vpop.f32.mrf.mxu1 }
 0x16c   : > { %1291 = vst [vmem:[#allocation2 + $0x18] sm:$0xff] %v1283_v36  ;;  %v1284_v41 = vadd.f32 %v1275_v37, %v312_v34  ;;  %v1277_v42 = vadd.f32 %v1276_v40, %v1233_v38  ;;  %v1235_v43 = vpop.f32.mrf.mxu0 }
 0x16d   : > { %v1278_v45 = vpop.f32.mrf.mxu1 }
 0x16e   : > { %1292 = vst [vmem:[#allocation2 + $0x10] sm:$0xff] %v1284_v41  ;;  %v1287_v46 = vadd.f32 %v1277_v42, %v315_v39  ;;  %v1279_v47 = vadd.f32 %v1278_v45, %v1235_v43  ;;  %1300 = sbr.rel (%p1615_p11) target bundleno = 385 (0x181), region = 63 }
 0x170   : > { %1295 = vst [vmem:[#allocation2 + $0x28] sm:$0xff] %v1287_v46  ;;  %v1288_v48 = vadd.f32 %v1279_v47, %v316_v44 }
 0x172   : > { %1296 = vst [vmem:[#allocation2 + $0x38] sm:$0xff] %v1288_v48 }
 0x173   : > { %v1311_v49 = vlaneseq  ;;  %v1309_v51 = vld [vmem:[%s2162_s2] sm:$0xf]  ;;  %v1301_v52 = vld [vmem:[#allocation2 + $0x30] sm:$0xff]  ;;  %v1303_v58 = vld [vmem:[#allocation2 + $0x18] sm:$0xff] }
 0x174   : > { %v1302_v54 = vld [vmem:[#allocation2] sm:$0xff]  ;;  %v1305_v60 = vld [vmem:[#allocation2 + $0x8] sm:$0xff] }
 0x175   : > { %v1312_v50 = vshrl.u32 %v1311_v49, 7  ;;  %v1304_v59 = vld [vmem:[#allocation2 + $0x10] sm:$0xff]  ;;  %v1306_v1 = vld [vmem:[#allocation2 + $0x20] sm:$0xff] }
 0x177   : > { %v1313_v53 = vsub.s32 0, %v1312_v50  ;;  %v1317_v55 = vsub.s32 1, %v1312_v50  ;;  %v1321_v56 = vsub.s32 2, %v1312_v50  ;;  %v1325_v57 = vsub.s32 3, %v1312_v50  ;;  %v1307_v2 = vld [vmem:[#allocation2 + $0x28] sm:$0xff] }
 0x179   : > { %v1314_v61 = vrot.slane %v1309_v51, %v1313_v53  ;;  %v1318_v62 = vrot.slane %v1309_v51, %v1317_v55  ;;  %v1322_v63 = vrot.slane %v1309_v51, %v1321_v56  ;;  %v1326_v0 = vrot.slane %v1309_v51, %v1325_v57  ;;  %v1308_v3 = vld [vmem:[#allocation2 + $0x38] sm:$0xff] }
 0x17b   : > { %v1331_v4 = vadd.f32 %v1314_v61, %v1301_v52  ;;  %v1332_v5 = vadd.f32 %v1318_v62, %v1302_v54  ;;  %v1333_v6 = vadd.f32 %v1322_v63, %v1303_v58  ;;  %v1334_v7 = vadd.f32 %v1326_v0, %v1304_v59 }
 0x17c   : > { %v1335_v8 = vadd.f32 %v1314_v61, %v1305_v60  ;;  %v1336_v11 = vadd.f32 %v1318_v62, %v1306_v1  ;;  %v1337_v12 = vadd.f32 %v1322_v63, %v1307_v2  ;;  %v1338_v13 = vadd.f32 %v1326_v0, %v1308_v3 }
 0x17d   : > { %1339 = vst [vmem:[%s2163_s3] sm:$0xff] %v1331_v4  ;;  %1340 = vst [vmem:[%s2163_s3 + $0x8] sm:$0xff] %v1332_v5 }
 0x17e   : > { %1341 = vst [vmem:[%s2163_s3 + $0x10] sm:$0xff] %v1333_v6  ;;  %1342 = vst [vmem:[%s2163_s3 + $0x18] sm:$0xff] %v1334_v7 }
 0x17f   : > { %1343 = vst [vmem:[%s2163_s3 + $0x20] sm:$0xff] %v1335_v8  ;;  %1344 = vst [vmem:[%s2163_s3 + $0x28] sm:$0xff] %v1336_v11 }
 0x180   : > { %1345 = vst [vmem:[%s2163_s3 + $0x30] sm:$0xff] %v1337_v12  ;;  %1346 = vst [vmem:[%s2163_s3 + $0x38] sm:$0xff] %v1338_v13 }
 0x181 PF: > { %s13_s16 = sadd.s32 1, %s1899_s16   ;;  %s2164_s12 = smov %s1887_s13 }
 0x182   : > { %p10_p12 = scmp.ge.s32.totalorder %s13_s16, 4   ;;  %s2165_s13 = smov %s1957_s20 }
 0x183   : > { %s2166_s14 = smov %s1895_s15  ;;  %s2167_s15 = smov %s2169_s17 }
 0x184   :  { %12 = sbr.rel (!%p10_p12) target bundleno = 3 (0x3), region = 104 }

</bundles_post_ra>
